<compile_context>
chip_gen: v7x
topology: tpu7x:2x2x1
jax: 0.10.0
libtpu: 0.0.40
codegen_flags: <defaults>
</compile_context>

<pallas_src>
import math
from functools import partial

import jax
import jax.numpy as jnp
from jax import lax
from jax.experimental import pallas as pl
from jax.experimental.pallas import tpu as pltpu

SELU_ALPHA = 1.6732632423543772
SELU_SCALE = 1.0507009873554805

# MXU operand dtype (accumulation stays f32). Use jnp.float32 for exact
# reference numerics at ~2x the MXU cost.
MXU_DTYPE = jnp.bfloat16

_VMEM_LIMIT_CACHE = "unset"


def _vmem_limit_bytes():
    """Generation-aware scoped-VMEM limit (~3/4 of physical), None -> default."""
    global _VMEM_LIMIT_CACHE
    if _VMEM_LIMIT_CACHE == "unset":
        limit = None
        try:
            cap = getattr(pltpu.get_tpu_info(), "vmem_capacity_bytes", None)
            if cap:
                limit = (int(cap) * 3) // 4
                limit = max(32 * 1024 * 1024, min(limit, 112 * 1024 * 1024))
        except Exception:
            limit = None
        _VMEM_LIMIT_CACHE = limit
    return _VMEM_LIMIT_CACHE


def _compiler_params(dimension_semantics):
    return pltpu.CompilerParams(dimension_semantics=dimension_semantics,
                                vmem_limit_bytes=_vmem_limit_bytes())


def _selu(x):
    return SELU_SCALE * jnp.where(x > 0, x, SELU_ALPHA * (jnp.exp(x) - 1.0))


def _round_up(x, m):
    return (x + m - 1) // m * m


def _row_tiling(n, max_tile=512):
    """Return (tile, padded_n): tile multiple of 8, padded_n multiple of tile.

    Keeps the row tile large (256-512) so per-grid-step overhead amortizes,
    while capping row-padding waste at ~12.5%.
    """
    n8 = _round_up(n, 8)
    if n8 <= max_tile:
        return n8, n8
    for tile in (512, 384, 256, 128, 64):
        if tile <= max_tile and _round_up(n8, tile) - n8 <= n8 // 8:
            return tile, _round_up(n8, tile)
    return 8, n8


def _pad_to(a, shape):
    return jnp.pad(a, [(0, s - d) for d, s in zip(a.shape, shape)])


def _embed_gate_cols(w, H, Hp):
    """(..., 3H) -> (..., 3Hp): gate g columns placed at lane offset g*Hp."""
    out = jnp.zeros(w.shape[:-1] + (3 * Hp,), w.dtype)
    for g in range(3):
        out = out.at[..., g * Hp:g * Hp + H].set(w[..., g * H:(g + 1) * H])
    return out


def _embed_dir_rows(w, H, Hp):
    """(2H, C) -> (2Hp, C): forward rows at 0.., backward rows at Hp.."""
    out = jnp.zeros((2 * Hp, w.shape[1]), w.dtype)
    out = out.at[0:H].set(w[0:H])
    out = out.at[Hp:Hp + H].set(w[H:2 * H])
    return out


# ----------------------------- Pallas kernels -------------------------------

def linear_selu_kernel(x_ref, w_ref, b_ref, o_ref):
    # x: (tile, Dp), w: (Dp, Hp) [MXU dtype], b: (1, Hp)
    x = x_ref[...].astype(w_ref.dtype)
    y = jnp.dot(x, w_ref[...], preferred_element_type=jnp.float32)
    o_ref[...] = _selu(y + b_ref[...])


def linear_selu_stacked(x, w, b, tile):
    # x: (2, N, Dp); w: (2, Dp, Hp); b: (2, 1, Hp) -> (2, N, Hp); N % tile == 0
    E, N, Dp = x.shape
    Hp = w.shape[-1]
    return pl.pallas_call(
        linear_selu_kernel,
        out_shape=jax.ShapeDtypeStruct((E, N, Hp), jnp.float32),
        grid=(E, N // tile),
        in_specs=[pl.BlockSpec((None, tile, Dp), lambda e, i: (e, i, 0)),
                  pl.BlockSpec((None, Dp, Hp), lambda e, i: (e, 0, 0)),
                  pl.BlockSpec((None, 1, Hp), lambda e, i: (e, 0, 0))],
        out_specs=pl.BlockSpec((None, tile, Hp), lambda e, i: (e, i, 0)),
        compiler_params=_compiler_params(("parallel", "parallel")),
    )(x, w, b)


def gru_bidir_kernel(x_ref, wih_ref, whh_ref, bx_ref, bgh_ref, o_ref, gx_ref):
    # x: (T, Bp, Dp); wih: (Dp, 6Hp) [fwd gates | bwd gates], gate order r|z|n
    # whh: (2Hp, 6Hp) block-diag(W_hh_f, W_hh_b)
    # bx: (1, 6Hp) = b_ih + (b_hh_r, b_hh_z, 0) per dir (hoisted-matmul bias)
    # bgh: (1, 6Hp) = zeros except n-gate cols = b_hh_n per dir
    # o: (T, Bp, 2Hp) = [fwd | bwd]; gx scratch: (T, Bp, 6Hp)
    T, Bp, Dp = x_ref.shape
    Hp = whh_ref.shape[0] // 2
    G = 3 * Hp

    # Hoisted input->hidden matmul for both directions: one large MXU pass.
    x2d = x_ref[...].reshape(T * Bp, Dp).astype(wih_ref.dtype)
    gx_ref[...] = (jnp.dot(x2d, wih_ref[...],
                           preferred_element_type=jnp.float32)
                   + bx_ref[...]).reshape(T, Bp, 2 * G)

    bgh = bgh_ref[...]
    mxu_dtype = whh_ref.dtype
    h0 = jnp.zeros((Bp, 2 * Hp), jnp.float32)   # [h_f | h_b], carried in vregs

    def step(t, h):
        tb = T - 1 - t
        # one block-diagonal recurrent matmul covers both directions
        gh = jnp.dot(h.astype(mxu_dtype), whh_ref[...],
                     preferred_element_type=jnp.float32) + bgh
        gx_f = gx_ref[t, :, 0:G]
        gx_b = gx_ref[tb, :, G:2 * G]
        # ---- forward direction, timestep t ----
        r_f = jax.nn.sigmoid(gx_f[:, 0:Hp] + gh[:, 0:Hp])
        z_f = jax.nn.sigmoid(gx_f[:, Hp:2 * Hp] + gh[:, Hp:2 * Hp])
        n_f = jnp.tanh(gx_f[:, 2 * Hp:G] + r_f * gh[:, 2 * Hp:G])
        h_f = (1.0 - z_f) * n_f + z_f * h[:, 0:Hp]
        # ---- backward direction, timestep T-1-t ----
        r_b = jax.nn.sigmoid(gx_b[:, 0:Hp] + gh[:, G:G + Hp])
        z_b = jax.nn.sigmoid(gx_b[:, Hp:2 * Hp] + gh[:, G + Hp:G + 2 * Hp])
        n_b = jnp.tanh(gx_b[:, 2 * Hp:G] + r_b * gh[:, G + 2 * Hp:2 * G])
        h_b = (1.0 - z_b) * n_b + z_b * h[:, Hp:2 * Hp]
        o_ref[t, :, 0:Hp] = h_f
        o_ref[tb, :, Hp:2 * Hp] = h_b
        return jnp.concatenate([h_f, h_b], axis=-1)

    unroll = 4 if T % 4 == 0 else (2 if T % 2 == 0 else 1)
    lax.fori_loop(0, T, step, h0, unroll=unroll)


def gru_bidir_layer(x, wih, whh, bx, bgh):
    # x: (2, T, Bp, Dp) -> (2, T, Bp, 2Hp); both encoders on a parallel grid axis
    E, T, Bp, Dp = x.shape
    Hp = whh.shape[1] // 2
    G = 3 * Hp
    return pl.pallas_call(
        gru_bidir_kernel,
        out_shape=jax.ShapeDtypeStruct((E, T, Bp, 2 * Hp), jnp.float32),
        grid=(E,),
        in_specs=[pl.BlockSpec((None, T, Bp, Dp), lambda e: (e, 0, 0, 0)),
                  pl.BlockSpec((None, Dp, 2 * G), lambda e: (e, 0, 0)),
                  pl.BlockSpec((None, 2 * Hp, 2 * G), lambda e: (e, 0, 0)),
                  pl.BlockSpec((None, 1, 2 * G), lambda e: (e, 0, 0)),
                  pl.BlockSpec((None, 1, 2 * G), lambda e: (e, 0, 0))],
        out_specs=pl.BlockSpec((None, T, Bp, 2 * Hp), lambda e: (e, 0, 0, 0)),
        scratch_shapes=[pltpu.VMEM((T, Bp, 2 * G), jnp.float32)],
        compiler_params=_compiler_params(("parallel",)),
    )(x, wih, whh, bx, bgh)


def head_kernel(enc_ref, af_ref, at_ref, c_ref, w2_ref, b2_ref,
                logit_ref, score_ref):
    # enc: (2, tile, 2Hp) [freq, time]; classifiers + decision_net fused:
    #   h = SELU(of @ Af + ot @ At + c); logit = sum(h * w2) + b2; score = sigmoid
    of = enc_ref[0].astype(af_ref.dtype)
    ot = enc_ref[1].astype(at_ref.dtype)
    h = (jnp.dot(of, af_ref[...], preferred_element_type=jnp.float32)
         + jnp.dot(ot, at_ref[...], preferred_element_type=jnp.float32)
         + c_ref[...])
    h = _selu(h)
    # 128-lane padded hidden; final width-1 output via VPU mult + XLU reduce
    # instead of a lane-starved (tile, 10) x (10, 1) MXU pass.
    logit = jnp.sum(h * w2_ref[...], axis=-1, keepdims=True) + b2_ref[...]
    logit_ref[...] = logit
    score_ref[...] = jax.nn.sigmoid(logit)


def head(enc, af, at, c, w2, b2, tile):
    # enc: (2, N, 2Hp) -> logits (N, 1), scores (N, 1); N % tile == 0
    E, N, D2 = enc.shape
    HW = af.shape[-1]
    return pl.pallas_call(
        head_kernel,
        out_shape=(jax.ShapeDtypeStruct((N, 1), jnp.float32),
                   jax.ShapeDtypeStruct((N, 1), jnp.float32)),
        grid=(N // tile,),
        in_specs=[pl.BlockSpec((E, tile, D2), lambda i: (0, i, 0)),
                  pl.BlockSpec((D2, HW), lambda i: (0, 0)),
                  pl.BlockSpec((D2, HW), lambda i: (0, 0)),
                  pl.BlockSpec((1, HW), lambda i: (0, 0)),
                  pl.BlockSpec((1, HW), lambda i: (0, 0)),
                  pl.BlockSpec((1, 1), lambda i: (0, 0))],
        out_specs=(pl.BlockSpec((tile, 1), lambda i: (i, 0)),
                   pl.BlockSpec((tile, 1), lambda i: (i, 0))),
        compiler_params=_compiler_params(("parallel",)),
    )(enc, af, at, c, w2, b2)


# ------------------------------ plain-JAX glue -------------------------------

def time_to_timefreq(x, n_fft):
    """torch.stft-equivalent (hann window, hop=n_fft//4, center reflect pad,
    onesided, not normalized). Returns (B, n_frames, F, 2) real/imag."""
    hop = n_fft // 4
    pad = n_fft // 2
    B, L = x.shape
    win = 0.5 * (1.0 - jnp.cos(2.0 * jnp.pi * jnp.arange(n_fft) / n_fft))
    xp = jnp.pad(x, ((0, 0), (pad, pad)), mode="reflect")
    n_frames = 1 + L // hop
    idx = jnp.arange(n_frames)[:, None] * hop + jnp.arange(n_fft)[None, :]
    frames = xp[:, idx] * win[None, None, :]                  # (B, T, n_fft)
    F = n_fft // 2 + 1
    k = jnp.arange(F, dtype=jnp.float32)[:, None]
    n = jnp.arange(n_fft, dtype=jnp.float32)[None, :]
    ang = 2.0 * jnp.pi * k * n / n_fft
    real = jnp.einsum("btn,fn->btf", frames, jnp.cos(ang))
    imag = jnp.einsum("btn,fn->btf", frames, -jnp.sin(ang))
    return jnp.stack([real, imag], axis=-1)                   # (B, T, F, 2)


def init_params(key, patch_size, expansion_ratio, num_layers, n_fft):
    """Raw parameters in PyTorch-equivalent layout (weights pre-transposed)."""
    F = n_fft // 2 + 1
    d_freq = patch_size * 2 * F
    d_time = patch_size
    H = expansion_ratio * d_freq

    keys = iter(jax.random.split(key, 64))

    def xavier(k, fan_in, fan_out):
        bound = math.sqrt(6.0 / (fan_in + fan_out))
        return jax.random.uniform(k, (fan_in, fan_out), jnp.float32, -bound, bound)

    def uni(k, shape, bound):
        return jax.random.uniform(k, shape, jnp.float32, -bound, bound)

    raw = {
        "hidden_size": H,
        "proj_freq_w": xavier(next(keys), d_freq, H),
        "proj_freq_b": jnp.zeros((H,), jnp.float32),
        "proj_time_w": xavier(next(keys), d_time, H),
        "proj_time_b": jnp.zeros((H,), jnp.float32),
        "cls_freq_w": xavier(next(keys), 2 * H, 1),
        "cls_freq_b": jnp.zeros((1,), jnp.float32),
        "cls_time_w": xavier(next(keys), 2 * H, 1),
        "cls_time_b": jnp.zeros((1,), jnp.float32),
        # decision_net: PyTorch default Linear init ~ U(-1/sqrt(fan_in), ...)
        "dec_w1": uni(next(keys), (2, 10), 1.0 / math.sqrt(2.0)),
        "dec_b1": uni(next(keys), (10,), 1.0 / math.sqrt(2.0)),
        "dec_w2": uni(next(keys), (10, 1), 1.0 / math.sqrt(10.0)),
        "dec_b2": uni(next(keys), (1,), 1.0 / math.sqrt(10.0)),
    }

    k_gru = 1.0 / math.sqrt(H)

    def gru_stack():
        layers = []
        for layer in range(num_layers):
            d_in = H if layer == 0 else 2 * H
            layers.append({
                "wih": uni(next(keys), (2, d_in, 3 * H), k_gru),
                "whh": uni(next(keys), (2, H, 3 * H), k_gru),
                "bih": uni(next(keys), (2, 3 * H), k_gru),
                "bhh": uni(next(keys), (2, 3 * H), k_gru),
            })
        return layers

    raw["gru_freq"] = gru_stack()
    raw["gru_time"] = gru_stack()
    return raw


def prepare_params(raw, patch_size, n_fft):
    """Pad / reorder raw parameters into the lane-aligned kernel layout."""
    H = raw["hidden_size"]
    Hp = _round_up(H, 128)
    G = 3 * Hp
    F = n_fft // 2 + 1
    d_freq = patch_size * 2 * F
    d_time = patch_size
    Dp = _round_up(max(d_freq, d_time), 128)
    HEAD_W = 128

    # stacked projection (encoder 0 = freq, encoder 1 = time)
    proj_w = jnp.stack([_pad_to(raw["proj_freq_w"], (Dp, Hp)),
                        _pad_to(raw["proj_time_w"], (Dp, Hp))]).astype(MXU_DTYPE)
    proj_b = jnp.stack([_pad_to(raw["proj_freq_b"][None, :], (1, Hp)),
                        _pad_to(raw["proj_time_b"][None, :], (1, Hp))])

    def prep_one_encoder_layer(lp, layer_idx):
        wih_dirs, bx_dirs, bgh_dirs = [], [], []
        whh_bd = jnp.zeros((2 * Hp, 2 * G), jnp.float32)   # block-diagonal RHS
        for d in range(2):
            w = _embed_gate_cols(lp["wih"][d], H, Hp)            # (d_in, 3Hp)
            if layer_idx == 0:
                w = _pad_to(w, (Hp, G))
            else:
                w = _embed_dir_rows(w, H, Hp)                     # (2Hp, 3Hp)
            wih_dirs.append(w)
            whh_d = _pad_to(_embed_gate_cols(lp["whh"][d], H, Hp), (Hp, G))
            whh_bd = whh_bd.at[d * Hp:(d + 1) * Hp, d * G:(d + 1) * G].set(whh_d)
            bih = lp["bih"][d]
            bhh = lp["bhh"][d]
            # fold b_ih + the r/z part of b_hh into the hoisted-matmul bias
            b_rz = jnp.concatenate([bhh[:2 * H], jnp.zeros((H,), bhh.dtype)])
            bx_dirs.append(_embed_gate_cols((bih + b_rz)[None, :], H, Hp))
            # b_hh_n is added to gh BEFORE the r* product (PyTorch semantics)
            b_n = jnp.concatenate([jnp.zeros((2 * H,), bhh.dtype), bhh[2 * H:]])
            bgh_dirs.append(_embed_gate_cols(b_n[None, :], H, Hp))
        return (jnp.concatenate(wih_dirs, axis=1).astype(MXU_DTYPE),  # (Dp_l, 6Hp)
                whh_bd.astype(MXU_DTYPE),                             # (2Hp, 6Hp)
                jnp.concatenate(bx_dirs, axis=1),                     # (1, 6Hp)
                jnp.concatenate(bgh_dirs, axis=1))                    # (1, 6Hp)

    layers = []
    for l in range(len(raw["gru_freq"])):
        wf, whf, bxf, bgf = prep_one_encoder_layer(raw["gru_freq"][l], l)
        wt, wht, bxt, bgt = prep_one_encoder_layer(raw["gru_time"][l], l)
        layers.append({"wih": jnp.stack([wf, wt]),
                       "whh": jnp.stack([whf, wht]),
                       "bx": jnp.stack([bxf, bxt]),
                       "bgh": jnp.stack([bgf, bgt])})

    # fused classifiers + decision_net first layer (exact algebraic fusion),
    # padded to 128 lanes so the fused hidden is lane-dense.
    af = _embed_dir_rows(raw["cls_freq_w"], H, Hp) @ raw["dec_w1"][0:1, :]
    at = _embed_dir_rows(raw["cls_time_w"], H, Hp) @ raw["dec_w1"][1:2, :]
    c = (raw["cls_freq_b"][0] * raw["dec_w1"][0, :]
         + raw["cls_time_b"][0] * raw["dec_w1"][1, :]
         + raw["dec_b1"])[None, :]
    w2_row = raw["dec_w2"][:, 0][None, :]                     # (1, 10)

    return {"proj_w": proj_w, "proj_b": proj_b, "gru_layers": layers,
            "head_af": _pad_to(af, (2 * Hp, HEAD_W)).astype(MXU_DTYPE),
            "head_at": _pad_to(at, (2 * Hp, HEAD_W)).astype(MXU_DTYPE),
            "head_c": _pad_to(c, (1, HEAD_W)),
            "head_w2": _pad_to(w2_row, (1, HEAD_W)),
            "head_b2": raw["dec_b2"][None, :]}


def forward(params, x, patch_size, n_fft):
    B, L = x.shape
    T = L // patch_size                       # patches == GRU sequence length
    Hp = params["proj_w"].shape[-1]
    Dp = params["proj_w"].shape[1]
    Bp = _round_up(max(B, 8), 8)
    N = T * Bp

    # ---- patch construction (tiny, plain JAX; time-major + padded) ----------
    x_freq = time_to_timefreq(x, n_fft)[:, :L]                  # (B, L, F, 2)
    patch_freq = x_freq.reshape(B, T, -1)                       # (B, T, P*2F)
    patch_time = x.reshape(B, T, patch_size)                    # (B, T, P)

    def to_kernel_layout(p):
        p = jnp.transpose(p, (1, 0, 2))                          # (T, B, D)
        p = jnp.pad(p, ((0, 0), (0, Bp - B), (0, Dp - p.shape[-1])))
        return p.reshape(N, Dp)

    proj_in = jnp.stack([to_kernel_layout(patch_freq),
                         to_kernel_layout(patch_time)])          # (2, N, Dp)

    # row padding so the projection/head tiles stay large even for awkward N
    tile, n_pad = _row_tiling(N)
    if n_pad != N:
        proj_in = jnp.pad(proj_in, ((0, 0), (0, n_pad - N), (0, 0)))

    # ---- projections + SELU (Pallas, both encoders, tiled + parallel) -------
    proj = linear_selu_stacked(proj_in, params["proj_w"], params["proj_b"], tile)
    h = proj[:, :N].reshape(2, T, Bp, Hp)

    # ---- stacked bidirectional multi-layer GRU (Pallas) ---------------------
    for lp in params["gru_layers"]:
        h = gru_bidir_layer(h, lp["wih"], lp["whh"], lp["bx"], lp["bgh"])
    enc = h.reshape(2, N, 2 * Hp)
    if n_pad != N:
        enc = jnp.pad(enc, ((0, 0), (0, n_pad - N), (0, 0)))

    # ---- fused classifier + decision head + sigmoid (Pallas) ----------------
    logits, scores = head(enc, params["head_af"], params["head_at"],
                          params["head_c"], params["head_w2"],
                          params["head_b2"], tile)

    def unpack(y):
        y = y[:N].reshape(T, Bp, 1)[:, :B]                       # (T, B, 1)
        return jnp.transpose(y, (1, 0, 2))                       # (B, T, 1)

    return unpack(logits), unpack(scores)


if __name__ == "__main__":
    patch_size = 4
    expansion_ratio = 2
    num_layers = 2
    n_fft = 4
    batch = 2
    seq_length = 16

    key = jax.random.PRNGKey(0)
    pkey, xkey = jax.random.split(key)
    raw = init_params(pkey, patch_size, expansion_ratio, num_layers, n_fft)
    params = prepare_params(raw, patch_size, n_fft)
    x = jax.random.normal(xkey, (batch, seq_length), jnp.float32)

    fwd = jax.jit(partial(forward, patch_size=patch_size, n_fft=n_fft))
    classify_result, patch_anomaly_score = fwd(params, x)
    jax.block_until_ready((classify_result, patch_anomaly_score))

    Np = seq_length // patch_size
    assert classify_result.shape == (batch, Np, 1)
    assert patch_anomaly_score.shape == (batch, Np, 1)
    assert bool(jnp.all(jnp.isfinite(classify_result)))
    assert bool(jnp.all((patch_anomaly_score >= 0) & (patch_anomaly_score <= 1)))
    print("KERNEL_OK")
</pallas_src>

<mosaic_0001>
module attributes {stable_mosaic.version = 11 : i64} {
  func.func @linear_selu_kernel(%arg0: i32, %arg1: i32, %arg2: memref<1x32x128xf32, #tpu.memory_space<vmem>>, %arg3: memref<1x128x128xbf16, #tpu.memory_space<vmem>>, %arg4: memref<1x1x128xf32, #tpu.memory_space<vmem>>, %arg5: memref<1x32x128xf32, #tpu.memory_space<vmem>>) attributes {dimension_semantics = [#tpu.dimension_semantics<parallel>, #tpu.dimension_semantics<parallel>], iteration_bounds = array<i64: 2, 1>, scalar_prefetch = 0 : i64, scratch_operands = 0 : i64, tpu.core_type = #tpu.core_type<tc>, window_params = [{transform_indices = @transform_0, window_bounds = array<i64: 1, 32, 128>}, {transform_indices = @transform_1, window_bounds = array<i64: 1, 128, 128>}, {transform_indices = @transform_2, window_bounds = array<i64: 1, 1, 128>}, {transform_indices = @transform_3, window_bounds = array<i64: 1, 32, 128>}]} {
    %c0 = arith.constant 0 : index
    %c0_0 = arith.constant 0 : index
    %c0_1 = arith.constant 0 : index
    %0 = vector.load %arg2[%c0, %c0_0, %c0_1] : memref<1x32x128xf32, #tpu.memory_space<vmem>>, vector<1x32x128xf32>
    %1 = vector.shape_cast %0 : vector<1x32x128xf32> to vector<32x128xf32>
    %2 = arith.truncf %1 : vector<32x128xf32> to vector<32x128xbf16>
    %c0_2 = arith.constant 0 : index
    %c0_3 = arith.constant 0 : index
    %c0_4 = arith.constant 0 : index
    %3 = vector.load %arg3[%c0_2, %c0_3, %c0_4] : memref<1x128x128xbf16, #tpu.memory_space<vmem>>, vector<1x128x128xbf16>
    %4 = vector.shape_cast %3 : vector<1x128x128xbf16> to vector<128x128xbf16>
    %cst = arith.constant dense<0.000000e+00> : vector<32x128xf32>
    %5 = tpu.matmul %2, %4, %cst {dimension_numbers = #tpu.dot_dimension_numbers<[1], [0], [0], [1], [0, 0, 1, 1], [], []>} : vector<32x128xbf16>, vector<128x128xbf16>, vector<32x128xf32> -> vector<32x128xf32>
    %c0_5 = arith.constant 0 : index
    %c0_6 = arith.constant 0 : index
    %c0_7 = arith.constant 0 : index
    %6 = vector.load %arg4[%c0_5, %c0_6, %c0_7] : memref<1x1x128xf32, #tpu.memory_space<vmem>>, vector<1x1x128xf32>
    %7 = vector.shape_cast %6 : vector<1x1x128xf32> to vector<1x128xf32>
    %8 = vector.broadcast %7 : vector<1x128xf32> to vector<32x128xf32>
    %9 = arith.addf %5, %8 : vector<32x128xf32>
    %cst_8 = arith.constant 0.000000e+00 : f32
    %10 = vector.broadcast %cst_8 : f32 to vector<32x128xf32>
    %11 = arith.cmpf ogt, %9, %10 : vector<32x128xf32>
    %12 = math.exp %9 : vector<32x128xf32>
    %cst_9 = arith.constant 1.000000e+00 : f32
    %13 = vector.broadcast %cst_9 : f32 to vector<32x128xf32>
    %14 = arith.subf %12, %13 : vector<32x128xf32>
    %cst_10 = arith.constant 1.67326319 : f32
    %15 = vector.broadcast %cst_10 : f32 to vector<32x128xf32>
    %16 = arith.mulf %15, %14 : vector<32x128xf32>
    %17 = arith.select %11, %9, %16 : vector<32x128xi1>, vector<32x128xf32>
    %cst_11 = arith.constant 1.05070102 : f32
    %18 = vector.broadcast %cst_11 : f32 to vector<32x128xf32>
    %19 = arith.mulf %18, %17 : vector<32x128xf32>
    %c0_12 = arith.constant 0 : index
    %c0_13 = arith.constant 0 : index
    %c0_14 = arith.constant 0 : index
    %20 = vector.load %arg5[%c0_12, %c0_13, %c0_14] : memref<1x32x128xf32, #tpu.memory_space<vmem>>, vector<1x32x128xf32>
    %21 = vector.shape_cast %20 : vector<1x32x128xf32> to vector<32x128xf32>
    %22 = vector.shape_cast %19 : vector<32x128xf32> to vector<1x32x128xf32>
    tpu.vector_store %arg5[%c0_12, %c0_13, %c0_14], %22 {strides = array<i32>} : memref<1x32x128xf32, #tpu.memory_space<vmem>>, vector<1x32x128xf32>,
    return
  }
  func.func @transform_0(%arg0: i32, %arg1: i32) -> (i32, i32, i32) {
    %c0_i32 = arith.constant 0 : i32
    %c0_i32_0 = arith.constant 0 : i32
    return %arg0, %arg1, %c0_i32 : i32, i32, i32
  }
  func.func @transform_1(%arg0: i32, %arg1: i32) -> (i32, i32, i32) {
    %c0_i32 = arith.constant 0 : i32
    %c0_i32_0 = arith.constant 0 : i32
    %c0_i32_1 = arith.constant 0 : i32
    return %arg0, %c0_i32, %c0_i32_0 : i32, i32, i32
  }
  func.func @transform_2(%arg0: i32, %arg1: i32) -> (i32, i32, i32) {
    %c0_i32 = arith.constant 0 : i32
    %c0_i32_0 = arith.constant 0 : i32
    %c0_i32_1 = arith.constant 0 : i32
    return %arg0, %c0_i32, %c0_i32_0 : i32, i32, i32
  }
  func.func @transform_3(%arg0: i32, %arg1: i32) -> (i32, i32, i32) {
    %c0_i32 = arith.constant 0 : i32
    %c0_i32_0 = arith.constant 0 : i32
    return %arg0, %arg1, %c0_i32 : i32, i32, i32
  }
}

module attributes {stable_mosaic.version = 11 : i64} {
  func.func @gru_bidir_kernel(%arg0: i32, %arg1: memref<1x4x8x128xf32, #tpu.memory_space<vmem>>, %arg2: memref<1x128x768xbf16, #tpu.memory_space<vmem>>, %arg3: memref<1x256x768xbf16, #tpu.memory_space<vmem>>, %arg4: memref<1x1x768xf32, #tpu.memory_space<vmem>>, %arg5: memref<1x1x768xf32, #tpu.memory_space<vmem>>, %arg6: memref<1x4x8x256xf32, #tpu.memory_space<vmem>>, %arg7: memref<4x8x768xf32, #tpu.memory_space<vmem>>) attributes {dimension_semantics = [#tpu.dimension_semantics<parallel>], iteration_bounds = array<i64: 2>, scalar_prefetch = 0 : i64, scratch_operands = 1 : i64, tpu.core_type = #tpu.core_type<tc>, window_params = [{transform_indices = @transform_0, window_bounds = array<i64: 1, 4, 8, 128>}, {transform_indices = @transform_1, window_bounds = array<i64: 1, 128, 768>}, {transform_indices = @transform_2, window_bounds = array<i64: 1, 256, 768>}, {transform_indices = @transform_3, window_bounds = array<i64: 1, 1, 768>}, {transform_indices = @transform_4, window_bounds = array<i64: 1, 1, 768>}, {transform_indices = @transform_5, window_bounds = array<i64: 1, 4, 8, 256>}]} {
    %c0 = arith.constant 0 : index
    %c0_0 = arith.constant 0 : index
    %c0_1 = arith.constant 0 : index
    %c0_2 = arith.constant 0 : index
    %0 = vector.load %arg1[%c0, %c0_0, %c0_1, %c0_2] : memref<1x4x8x128xf32, #tpu.memory_space<vmem>>, vector<1x4x8x128xf32>
    %1 = vector.shape_cast %0 : vector<1x4x8x128xf32> to vector<4x8x128xf32>
    %2 = vector.shape_cast %1 : vector<4x8x128xf32> to vector<32x128xf32>
    %3 = arith.truncf %2 : vector<32x128xf32> to vector<32x128xbf16>
    %c0_3 = arith.constant 0 : index
    %c0_4 = arith.constant 0 : index
    %c0_5 = arith.constant 0 : index
    %4 = vector.load %arg2[%c0_3, %c0_4, %c0_5] : memref<1x128x768xbf16, #tpu.memory_space<vmem>>, vector<1x128x768xbf16>
    %5 = vector.shape_cast %4 : vector<1x128x768xbf16> to vector<128x768xbf16>
    %cst = arith.constant dense<0.000000e+00> : vector<32x768xf32>
    %6 = tpu.matmul %3, %5, %cst {dimension_numbers = #tpu.dot_dimension_numbers<[1], [0], [0], [1], [0, 0, 1, 1], [], []>} : vector<32x128xbf16>, vector<128x768xbf16>, vector<32x768xf32> -> vector<32x768xf32>
    %c0_6 = arith.constant 0 : index
    %c0_7 = arith.constant 0 : index
    %c0_8 = arith.constant 0 : index
    %7 = vector.load %arg4[%c0_6, %c0_7, %c0_8] : memref<1x1x768xf32, #tpu.memory_space<vmem>>, vector<1x1x768xf32>
    %8 = vector.shape_cast %7 : vector<1x1x768xf32> to vector<1x768xf32>
    %9 = vector.broadcast %8 : vector<1x768xf32> to vector<32x768xf32>
    %10 = arith.addf %6, %9 : vector<32x768xf32>
    %11 = vector.shape_cast %10 : vector<32x768xf32> to vector<4x8x768xf32>
    %c0_9 = arith.constant 0 : index
    %c0_10 = arith.constant 0 : index
    %c0_11 = arith.constant 0 : index
    %12 = vector.load %arg7[%c0_9, %c0_10, %c0_11] : memref<4x8x768xf32, #tpu.memory_space<vmem>>, vector<4x8x768xf32>
    tpu.vector_store %arg7[%c0_9, %c0_10, %c0_11], %11 {strides = array<i32>} : memref<4x8x768xf32, #tpu.memory_space<vmem>>, vector<4x8x768xf32>,
    %c0_12 = arith.constant 0 : index
    %c0_13 = arith.constant 0 : index
    %c0_14 = arith.constant 0 : index
    %13 = vector.load %arg5[%c0_12, %c0_13, %c0_14] : memref<1x1x768xf32, #tpu.memory_space<vmem>>, vector<1x1x768xf32>
    %14 = vector.shape_cast %13 : vector<1x1x768xf32> to vector<1x768xf32>
    %cst_15 = arith.constant 0.000000e+00 : f32
    %15 = vector.broadcast %cst_15 : f32 to vector<8x256xf32>
    %c0_i32 = arith.constant 0 : i32
    %c3_i32 = arith.constant 3 : i32
    %16 = arith.subi %c3_i32, %c0_i32 : i32
    %17 = arith.truncf %15 : vector<8x256xf32> to vector<8x256xbf16>
    %c0_16 = arith.constant 0 : index
    %c0_17 = arith.constant 0 : index
    %c0_18 = arith.constant 0 : index
    %18 = vector.load %arg3[%c0_16, %c0_17, %c0_18] : memref<1x256x768xbf16, #tpu.memory_space<vmem>>, vector<1x256x768xbf16>
    %19 = vector.shape_cast %18 : vector<1x256x768xbf16> to vector<256x768xbf16>
    %cst_19 = arith.constant dense<0.000000e+00> : vector<8x768xf32>
    %20 = tpu.matmul %17, %19, %cst_19 {dimension_numbers = #tpu.dot_dimension_numbers<[1], [0], [0], [1], [0, 0, 1, 1], [], []>} : vector<8x256xbf16>, vector<256x768xbf16>, vector<8x768xf32> -> vector<8x768xf32>
    %21 = vector.broadcast %14 : vector<1x768xf32> to vector<8x768xf32>
    %22 = arith.addf %20, %21 : vector<8x768xf32>
    %23 = arith.index_cast %c0_i32 : i32 to index
    %c0_20 = arith.constant 0 : index
    %c0_21 = arith.constant 0 : index
    %24 = vector.load %arg7[%23, %c0_20, %c0_21] : memref<4x8x768xf32, #tpu.memory_space<vmem>>, vector<1x8x384xf32>
    %25 = vector.shape_cast %24 : vector<1x8x384xf32> to vector<8x384xf32>
    %26 = arith.index_cast %16 : i32 to index
    %c0_22 = arith.constant 0 : index
    %c384 = arith.constant 384 : index
    %27 = vector.load %arg7[%26, %c0_22, %c384] : memref<4x8x768xf32, #tpu.memory_space<vmem>>, vector<1x8x384xf32>
    %28 = vector.shape_cast %27 : vector<1x8x384xf32> to vector<8x384xf32>
    %29 = vector.extract_strided_slice %25 {offsets = [0, 0], sizes = [8, 128], strides = [1, 1]} : vector<8x384xf32> to vector<8x128xf32>
    %30 = vector.extract_strided_slice %22 {offsets = [0, 0], sizes = [8, 128], strides = [1, 1]} : vector<8x768xf32> to vector<8x128xf32>
    %31 = arith.addf %29, %30 : vector<8x128xf32>
    %32 = arith.negf %31 : vector<8x128xf32>
    %33 = math.exp %32 : vector<8x128xf32>
    %cst_23 = arith.constant 1.000000e+00 : f32
    %34 = vector.broadcast %cst_23 : f32 to vector<8x128xf32>
    %35 = arith.addf %34, %33 : vector<8x128xf32>
    %36 = arith.divf %34, %35 : vector<8x128xf32>
    %37 = vector.extract_strided_slice %25 {offsets = [0, 128], sizes = [8, 128], strides = [1, 1]} : vector<8x384xf32> to vector<8x128xf32>
    %38 = vector.extract_strided_slice %22 {offsets = [0, 128], sizes = [8, 128], strides = [1, 1]} : vector<8x768xf32> to vector<8x128xf32>
    %39 = arith.addf %37, %38 : vector<8x128xf32>
    %40 = arith.negf %39 : vector<8x128xf32>
    %41 = math.exp %40 : vector<8x128xf32>
    %cst_24 = arith.constant 1.000000e+00 : f32
    %42 = vector.broadcast %cst_24 : f32 to vector<8x128xf32>
    %43 = arith.addf %42, %41 : vector<8x128xf32>
    %44 = arith.divf %42, %43 : vector<8x128xf32>
    %45 = vector.extract_strided_slice %25 {offsets = [0, 256], sizes = [8, 128], strides = [1, 1]} : vector<8x384xf32> to vector<8x128xf32>
    %46 = vector.extract_strided_slice %22 {offsets = [0, 256], sizes = [8, 128], strides = [1, 1]} : vector<8x768xf32> to vector<8x128xf32>
    %47 = arith.mulf %36, %46 : vector<8x128xf32>
    %48 = arith.addf %45, %47 : vector<8x128xf32>
    %49 = math.tanh %48 : vector<8x128xf32>
    %cst_25 = arith.constant 1.000000e+00 : f32
    %50 = vector.broadcast %cst_25 : f32 to vector<8x128xf32>
    %51 = arith.subf %50, %44 : vector<8x128xf32>
    %52 = arith.mulf %51, %49 : vector<8x128xf32>
    %53 = vector.extract_strided_slice %15 {offsets = [0, 0], sizes = [8, 128], strides = [1, 1]} : vector<8x256xf32> to vector<8x128xf32>
    %54 = arith.mulf %44, %53 : vector<8x128xf32>
    %55 = arith.addf %52, %54 : vector<8x128xf32>
    %56 = vector.extract_strided_slice %28 {offsets = [0, 0], sizes = [8, 128], strides = [1, 1]} : vector<8x384xf32> to vector<8x128xf32>
    %57 = vector.extract_strided_slice %22 {offsets = [0, 384], sizes = [8, 128], strides = [1, 1]} : vector<8x768xf32> to vector<8x128xf32>
    %58 = arith.addf %56, %57 : vector<8x128xf32>
    %59 = arith.negf %58 : vector<8x128xf32>
    %60 = math.exp %59 : vector<8x128xf32>
    %cst_26 = arith.constant 1.000000e+00 : f32
    %61 = vector.broadcast %cst_26 : f32 to vector<8x128xf32>
    %62 = arith.addf %61, %60 : vector<8x128xf32>
    %63 = arith.divf %61, %62 : vector<8x128xf32>
    %64 = vector.extract_strided_slice %28 {offsets = [0, 128], sizes = [8, 128], strides = [1, 1]} : vector<8x384xf32> to vector<8x128xf32>
    %65 = vector.extract_strided_slice %22 {offsets = [0, 512], sizes = [8, 128], strides = [1, 1]} : vector<8x768xf32> to vector<8x128xf32>
    %66 = arith.addf %64, %65 : vector<8x128xf32>
    %67 = arith.negf %66 : vector<8x128xf32>
    %68 = math.exp %67 : vector<8x128xf32>
    %cst_27 = arith.constant 1.000000e+00 : f32
    %69 = vector.broadcast %cst_27 : f32 to vector<8x128xf32>
    %70 = arith.addf %69, %68 : vector<8x128xf32>
    %71 = arith.divf %69, %70 : vector<8x128xf32>
    %72 = vector.extract_strided_slice %28 {offsets = [0, 256], sizes = [8, 128], strides = [1, 1]} : vector<8x384xf32> to vector<8x128xf32>
    %73 = vector.extract_strided_slice %22 {offsets = [0, 640], sizes = [8, 128], strides = [1, 1]} : vector<8x768xf32> to vector<8x128xf32>
    %74 = arith.mulf %63, %73 : vector<8x128xf32>
    %75 = arith.addf %72, %74 : vector<8x128xf32>
    %76 = math.tanh %75 : vector<8x128xf32>
    %cst_28 = arith.constant 1.000000e+00 : f32
    %77 = vector.broadcast %cst_28 : f32 to vector<8x128xf32>
    %78 = arith.subf %77, %71 : vector<8x128xf32>
    %79 = arith.mulf %78, %76 : vector<8x128xf32>
    %80 = vector.extract_strided_slice %15 {offsets = [0, 128], sizes = [8, 128], strides = [1, 1]} : vector<8x256xf32> to vector<8x128xf32>
    %81 = arith.mulf %71, %80 : vector<8x128xf32>
    %82 = arith.addf %79, %81 : vector<8x128xf32>
    %c0_29 = arith.constant 0 : index
    %83 = arith.index_cast %c0_i32 : i32 to index
    %c0_30 = arith.constant 0 : index
    %c0_31 = arith.constant 0 : index
    %84 = vector.load %arg6[%c0_29, %83, %c0_30, %c0_31] : memref<1x4x8x256xf32, #tpu.memory_space<vmem>>, vector<1x1x8x128xf32>
    %85 = vector.shape_cast %84 : vector<1x1x8x128xf32> to vector<8x128xf32>
    %86 = vector.shape_cast %55 : vector<8x128xf32> to vector<1x1x8x128xf32>
    tpu.vector_store %arg6[%c0_29, %83, %c0_30, %c0_31], %86 {strides = array<i32>} : memref<1x4x8x256xf32, #tpu.memory_space<vmem>>, vector<1x1x8x128xf32>,
    %c0_32 = arith.constant 0 : index
    %87 = arith.index_cast %16 : i32 to index
    %c0_33 = arith.constant 0 : index
    %c128 = arith.constant 128 : index
    %88 = vector.load %arg6[%c0_32, %87, %c0_33, %c128] : memref<1x4x8x256xf32, #tpu.memory_space<vmem>>, vector<1x1x8x128xf32>
    %89 = vector.shape_cast %88 : vector<1x1x8x128xf32> to vector<8x128xf32>
    %90 = vector.shape_cast %82 : vector<8x128xf32> to vector<1x1x8x128xf32>
    tpu.vector_store %arg6[%c0_32, %87, %c0_33, %c128], %90 {strides = array<i32>} : memref<1x4x8x256xf32, #tpu.memory_space<vmem>>, vector<1x1x8x128xf32>,
    %91 = tpu.concatenate %55, %82 in 1 : vector<8x128xf32>, vector<8x128xf32> -> vector<8x256xf32>
    %c1_i32 = arith.constant 1 : i32
    %c3_i32_34 = arith.constant 3 : i32
    %92 = arith.subi %c3_i32_34, %c1_i32 : i32
    %93 = arith.truncf %91 : vector<8x256xf32> to vector<8x256xbf16>
    %c0_35 = arith.constant 0 : index
    %c0_36 = arith.constant 0 : index
    %c0_37 = arith.constant 0 : index
    %94 = vector.load %arg3[%c0_35, %c0_36, %c0_37] : memref<1x256x768xbf16, #tpu.memory_space<vmem>>, vector<1x256x768xbf16>
    %95 = vector.shape_cast %94 : vector<1x256x768xbf16> to vector<256x768xbf16>
    %cst_38 = arith.constant dense<0.000000e+00> : vector<8x768xf32>
    %96 = tpu.matmul %93, %95, %cst_38 {dimension_numbers = #tpu.dot_dimension_numbers<[1], [0], [0], [1], [0, 0, 1, 1], [], []>} : vector<8x256xbf16>, vector<256x768xbf16>, vector<8x768xf32> -> vector<8x768xf32>
    %97 = vector.broadcast %14 : vector<1x768xf32> to vector<8x768xf32>
    %98 = arith.addf %96, %97 : vector<8x768xf32>
    %99 = arith.index_cast %c1_i32 : i32 to index
    %c0_39 = arith.constant 0 : index
    %c0_40 = arith.constant 0 : index
    %100 = vector.load %arg7[%99, %c0_39, %c0_40] : memref<4x8x768xf32, #tpu.memory_space<vmem>>, vector<1x8x384xf32>
    %101 = vector.shape_cast %100 : vector<1x8x384xf32> to vector<8x384xf32>
    %102 = arith.index_cast %92 : i32 to index
    %c0_41 = arith.constant 0 : index
    %c384_42 = arith.constant 384 : index
    %103 = vector.load %arg7[%102, %c0_41, %c384_42] : memref<4x8x768xf32, #tpu.memory_space<vmem>>, vector<1x8x384xf32>
    %104 = vector.shape_cast %103 : vector<1x8x384xf32> to vector<8x384xf32>
    %105 = vector.extract_strided_slice %101 {offsets = [0, 0], sizes = [8, 128], strides = [1, 1]} : vector<8x384xf32> to vector<8x128xf32>
    %106 = vector.extract_strided_slice %98 {offsets = [0, 0], sizes = [8, 128], strides = [1, 1]} : vector<8x768xf32> to vector<8x128xf32>
    %107 = arith.addf %105, %106 : vector<8x128xf32>
    %108 = arith.negf %107 : vector<8x128xf32>
    %109 = math.exp %108 : vector<8x128xf32>
    %cst_43 = arith.constant 1.000000e+00 : f32
    %110 = vector.broadcast %cst_43 : f32 to vector<8x128xf32>
    %111 = arith.addf %110, %109 : vector<8x128xf32>
    %112 = arith.divf %110, %111 : vector<8x128xf32>
    %113 = vector.extract_strided_slice %101 {offsets = [0, 128], sizes = [8, 128], strides = [1, 1]} : vector<8x384xf32> to vector<8x128xf32>
    %114 = vector.extract_strided_slice %98 {offsets = [0, 128], sizes = [8, 128], strides = [1, 1]} : vector<8x768xf32> to vector<8x128xf32>
    %115 = arith.addf %113, %114 : vector<8x128xf32>
    %116 = arith.negf %115 : vector<8x128xf32>
    %117 = math.exp %116 : vector<8x128xf32>
    %cst_44 = arith.constant 1.000000e+00 : f32
    %118 = vector.broadcast %cst_44 : f32 to vector<8x128xf32>
    %119 = arith.addf %118, %117 : vector<8x128xf32>
    %120 = arith.divf %118, %119 : vector<8x128xf32>
    %121 = vector.extract_strided_slice %101 {offsets = [0, 256], sizes = [8, 128], strides = [1, 1]} : vector<8x384xf32> to vector<8x128xf32>
    %122 = vector.extract_strided_slice %98 {offsets = [0, 256], sizes = [8, 128], strides = [1, 1]} : vector<8x768xf32> to vector<8x128xf32>
    %123 = arith.mulf %112, %122 : vector<8x128xf32>
    %124 = arith.addf %121, %123 : vector<8x128xf32>
    %125 = math.tanh %124 : vector<8x128xf32>
    %cst_45 = arith.constant 1.000000e+00 : f32
    %126 = vector.broadcast %cst_45 : f32 to vector<8x128xf32>
    %127 = arith.subf %126, %120 : vector<8x128xf32>
    %128 = arith.mulf %127, %125 : vector<8x128xf32>
    %129 = vector.extract_strided_slice %91 {offsets = [0, 0], sizes = [8, 128], strides = [1, 1]} : vector<8x256xf32> to vector<8x128xf32>
    %130 = arith.mulf %120, %129 : vector<8x128xf32>
    %131 = arith.addf %128, %130 : vector<8x128xf32>
    %132 = vector.extract_strided_slice %104 {offsets = [0, 0], sizes = [8, 128], strides = [1, 1]} : vector<8x384xf32> to vector<8x128xf32>
    %133 = vector.extract_strided_slice %98 {offsets = [0, 384], sizes = [8, 128], strides = [1, 1]} : vector<8x768xf32> to vector<8x128xf32>
    %134 = arith.addf %132, %133 : vector<8x128xf32>
    %135 = arith.negf %134 : vector<8x128xf32>
    %136 = math.exp %135 : vector<8x128xf32>
    %cst_46 = arith.constant 1.000000e+00 : f32
    %137 = vector.broadcast %cst_46 : f32 to vector<8x128xf32>
    %138 = arith.addf %137, %136 : vector<8x128xf32>
    %139 = arith.divf %137, %138 : vector<8x128xf32>
    %140 = vector.extract_strided_slice %104 {offsets = [0, 128], sizes = [8, 128], strides = [1, 1]} : vector<8x384xf32> to vector<8x128xf32>
    %141 = vector.extract_strided_slice %98 {offsets = [0, 512], sizes = [8, 128], strides = [1, 1]} : vector<8x768xf32> to vector<8x128xf32>
    %142 = arith.addf %140, %141 : vector<8x128xf32>
    %143 = arith.negf %142 : vector<8x128xf32>
    %144 = math.exp %143 : vector<8x128xf32>
    %cst_47 = arith.constant 1.000000e+00 : f32
    %145 = vector.broadcast %cst_47 : f32 to vector<8x128xf32>
    %146 = arith.addf %145, %144 : vector<8x128xf32>
    %147 = arith.divf %145, %146 : vector<8x128xf32>
    %148 = vector.extract_strided_slice %104 {offsets = [0, 256], sizes = [8, 128], strides = [1, 1]} : vector<8x384xf32> to vector<8x128xf32>
    %149 = vector.extract_strided_slice %98 {offsets = [0, 640], sizes = [8, 128], strides = [1, 1]} : vector<8x768xf32> to vector<8x128xf32>
    %150 = arith.mulf %139, %149 : vector<8x128xf32>
    %151 = arith.addf %148, %150 : vector<8x128xf32>
    %152 = math.tanh %151 : vector<8x128xf32>
    %cst_48 = arith.constant 1.000000e+00 : f32
    %153 = vector.broadcast %cst_48 : f32 to vector<8x128xf32>
    %154 = arith.subf %153, %147 : vector<8x128xf32>
    %155 = arith.mulf %154, %152 : vector<8x128xf32>
    %156 = vector.extract_strided_slice %91 {offsets = [0, 128], sizes = [8, 128], strides = [1, 1]} : vector<8x256xf32> to vector<8x128xf32>
    %157 = arith.mulf %147, %156 : vector<8x128xf32>
    %158 = arith.addf %155, %157 : vector<8x128xf32>
    %c0_49 = arith.constant 0 : index
    %159 = arith.index_cast %c1_i32 : i32 to index
    %c0_50 = arith.constant 0 : index
    %c0_51 = arith.constant 0 : index
    %160 = vector.load %arg6[%c0_49, %159, %c0_50, %c0_51] : memref<1x4x8x256xf32, #tpu.memory_space<vmem>>, vector<1x1x8x128xf32>
    %161 = vector.shape_cast %160 : vector<1x1x8x128xf32> to vector<8x128xf32>
    %162 = vector.shape_cast %131 : vector<8x128xf32> to vector<1x1x8x128xf32>
    tpu.vector_store %arg6[%c0_49, %159, %c0_50, %c0_51], %162 {strides = array<i32>} : memref<1x4x8x256xf32, #tpu.memory_space<vmem>>, vector<1x1x8x128xf32>,
    %c0_52 = arith.constant 0 : index
    %163 = arith.index_cast %92 : i32 to index
    %c0_53 = arith.constant 0 : index
    %c128_54 = arith.constant 128 : index
    %164 = vector.load %arg6[%c0_52, %163, %c0_53, %c128_54] : memref<1x4x8x256xf32, #tpu.memory_space<vmem>>, vector<1x1x8x128xf32>
    %165 = vector.shape_cast %164 : vector<1x1x8x128xf32> to vector<8x128xf32>
    %166 = vector.shape_cast %158 : vector<8x128xf32> to vector<1x1x8x128xf32>
    tpu.vector_store %arg6[%c0_52, %163, %c0_53, %c128_54], %166 {strides = array<i32>} : memref<1x4x8x256xf32, #tpu.memory_space<vmem>>, vector<1x1x8x128xf32>,
    %167 = tpu.concatenate %131, %158 in 1 : vector<8x128xf32>, vector<8x128xf32> -> vector<8x256xf32>
    %c2_i32 = arith.constant 2 : i32
    %c3_i32_55 = arith.constant 3 : i32
    %168 = arith.subi %c3_i32_55, %c2_i32 : i32
    %169 = arith.truncf %167 : vector<8x256xf32> to vector<8x256xbf16>
    %c0_56 = arith.constant 0 : index
    %c0_57 = arith.constant 0 : index
    %c0_58 = arith.constant 0 : index
    %170 = vector.load %arg3[%c0_56, %c0_57, %c0_58] : memref<1x256x768xbf16, #tpu.memory_space<vmem>>, vector<1x256x768xbf16>
    %171 = vector.shape_cast %170 : vector<1x256x768xbf16> to vector<256x768xbf16>
    %cst_59 = arith.constant dense<0.000000e+00> : vector<8x768xf32>
    %172 = tpu.matmul %169, %171, %cst_59 {dimension_numbers = #tpu.dot_dimension_numbers<[1], [0], [0], [1], [0, 0, 1, 1], [], []>} : vector<8x256xbf16>, vector<256x768xbf16>, vector<8x768xf32> -> vector<8x768xf32>
    %173 = vector.broadcast %14 : vector<1x768xf32> to vector<8x768xf32>
    %174 = arith.addf %172, %173 : vector<8x768xf32>
    %175 = arith.index_cast %c2_i32 : i32 to index
    %c0_60 = arith.constant 0 : index
    %c0_61 = arith.constant 0 : index
    %176 = vector.load %arg7[%175, %c0_60, %c0_61] : memref<4x8x768xf32, #tpu.memory_space<vmem>>, vector<1x8x384xf32>
    %177 = vector.shape_cast %176 : vector<1x8x384xf32> to vector<8x384xf32>
    %178 = arith.index_cast %168 : i32 to index
    %c0_62 = arith.constant 0 : index
    %c384_63 = arith.constant 384 : index
    %179 = vector.load %arg7[%178, %c0_62, %c384_63] : memref<4x8x768xf32, #tpu.memory_space<vmem>>, vector<1x8x384xf32>
    %180 = vector.shape_cast %179 : vector<1x8x384xf32> to vector<8x384xf32>
    %181 = vector.extract_strided_slice %177 {offsets = [0, 0], sizes = [8, 128], strides = [1, 1]} : vector<8x384xf32> to vector<8x128xf32>
    %182 = vector.extract_strided_slice %174 {offsets = [0, 0], sizes = [8, 128], strides = [1, 1]} : vector<8x768xf32> to vector<8x128xf32>
    %183 = arith.addf %181, %182 : vector<8x128xf32>
    %184 = arith.negf %183 : vector<8x128xf32>
    %185 = math.exp %184 : vector<8x128xf32>
    %cst_64 = arith.constant 1.000000e+00 : f32
    %186 = vector.broadcast %cst_64 : f32 to vector<8x128xf32>
    %187 = arith.addf %186, %185 : vector<8x128xf32>
    %188 = arith.divf %186, %187 : vector<8x128xf32>
    %189 = vector.extract_strided_slice %177 {offsets = [0, 128], sizes = [8, 128], strides = [1, 1]} : vector<8x384xf32> to vector<8x128xf32>
    %190 = vector.extract_strided_slice %174 {offsets = [0, 128], sizes = [8, 128], strides = [1, 1]} : vector<8x768xf32> to vector<8x128xf32>
    %191 = arith.addf %189, %190 : vector<8x128xf32>
    %192 = arith.negf %191 : vector<8x128xf32>
    %193 = math.exp %192 : vector<8x128xf32>
    %cst_65 = arith.constant 1.000000e+00 : f32
    %194 = vector.broadcast %cst_65 : f32 to vector<8x128xf32>
    %195 = arith.addf %194, %193 : vector<8x128xf32>
    %196 = arith.divf %194, %195 : vector<8x128xf32>
    %197 = vector.extract_strided_slice %177 {offsets = [0, 256], sizes = [8, 128], strides = [1, 1]} : vector<8x384xf32> to vector<8x128xf32>
    %198 = vector.extract_strided_slice %174 {offsets = [0, 256], sizes = [8, 128], strides = [1, 1]} : vector<8x768xf32> to vector<8x128xf32>
    %199 = arith.mulf %188, %198 : vector<8x128xf32>
    %200 = arith.addf %197, %199 : vector<8x128xf32>
    %201 = math.tanh %200 : vector<8x128xf32>
    %cst_66 = arith.constant 1.000000e+00 : f32
    %202 = vector.broadcast %cst_66 : f32 to vector<8x128xf32>
    %203 = arith.subf %202, %196 : vector<8x128xf32>
    %204 = arith.mulf %203, %201 : vector<8x128xf32>
    %205 = vector.extract_strided_slice %167 {offsets = [0, 0], sizes = [8, 128], strides = [1, 1]} : vector<8x256xf32> to vector<8x128xf32>
    %206 = arith.mulf %196, %205 : vector<8x128xf32>
    %207 = arith.addf %204, %206 : vector<8x128xf32>
    %208 = vector.extract_strided_slice %180 {offsets = [0, 0], sizes = [8, 128], strides = [1, 1]} : vector<8x384xf32> to vector<8x128xf32>
    %209 = vector.extract_strided_slice %174 {offsets = [0, 384], sizes = [8, 128], strides = [1, 1]} : vector<8x768xf32> to vector<8x128xf32>
    %210 = arith.addf %208, %209 : vector<8x128xf32>
    %211 = arith.negf %210 : vector<8x128xf32>
    %212 = math.exp %211 : vector<8x128xf32>
    %cst_67 = arith.constant 1.000000e+00 : f32
    %213 = vector.broadcast %cst_67 : f32 to vector<8x128xf32>
    %214 = arith.addf %213, %212 : vector<8x128xf32>
    %215 = arith.divf %213, %214 : vector<8x128xf32>
    %216 = vector.extract_strided_slice %180 {offsets = [0, 128], sizes = [8, 128], strides = [1, 1]} : vector<8x384xf32> to vector<8x128xf32>
    %217 = vector.extract_strided_slice %174 {offsets = [0, 512], sizes = [8, 128], strides = [1, 1]} : vector<8x768xf32> to vector<8x128xf32>
    %218 = arith.addf %216, %217 : vector<8x128xf32>
    %219 = arith.negf %218 : vector<8x128xf32>
    %220 = math.exp %219 : vector<8x128xf32>
    %cst_68 = arith.constant 1.000000e+00 : f32
    %221 = vector.broadcast %cst_68 : f32 to vector<8x128xf32>
    %222 = arith.addf %221, %220 : vector<8x128xf32>
    %223 = arith.divf %221, %222 : vector<8x128xf32>
    %224 = vector.extract_strided_slice %180 {offsets = [0, 256], sizes = [8, 128], strides = [1, 1]} : vector<8x384xf32> to vector<8x128xf32>
    %225 = vector.extract_strided_slice %174 {offsets = [0, 640], sizes = [8, 128], strides = [1, 1]} : vector<8x768xf32> to vector<8x128xf32>
    %226 = arith.mulf %215, %225 : vector<8x128xf32>
    %227 = arith.addf %224, %226 : vector<8x128xf32>
    %228 = math.tanh %227 : vector<8x128xf32>
    %cst_69 = arith.constant 1.000000e+00 : f32
    %229 = vector.broadcast %cst_69 : f32 to vector<8x128xf32>
    %230 = arith.subf %229, %223 : vector<8x128xf32>
    %231 = arith.mulf %230, %228 : vector<8x128xf32>
    %232 = vector.extract_strided_slice %167 {offsets = [0, 128], sizes = [8, 128], strides = [1, 1]} : vector<8x256xf32> to vector<8x128xf32>
    %233 = arith.mulf %223, %232 : vector<8x128xf32>
    %234 = arith.addf %231, %233 : vector<8x128xf32>
    %c0_70 = arith.constant 0 : index
    %235 = arith.index_cast %c2_i32 : i32 to index
    %c0_71 = arith.constant 0 : index
    %c0_72 = arith.constant 0 : index
    %236 = vector.load %arg6[%c0_70, %235, %c0_71, %c0_72] : memref<1x4x8x256xf32, #tpu.memory_space<vmem>>, vector<1x1x8x128xf32>
    %237 = vector.shape_cast %236 : vector<1x1x8x128xf32> to vector<8x128xf32>
    %238 = vector.shape_cast %207 : vector<8x128xf32> to vector<1x1x8x128xf32>
    tpu.vector_store %arg6[%c0_70, %235, %c0_71, %c0_72], %238 {strides = array<i32>} : memref<1x4x8x256xf32, #tpu.memory_space<vmem>>, vector<1x1x8x128xf32>,
    %c0_73 = arith.constant 0 : index
    %239 = arith.index_cast %168 : i32 to index
    %c0_74 = arith.constant 0 : index
    %c128_75 = arith.constant 128 : index
    %240 = vector.load %arg6[%c0_73, %239, %c0_74, %c128_75] : memref<1x4x8x256xf32, #tpu.memory_space<vmem>>, vector<1x1x8x128xf32>
    %241 = vector.shape_cast %240 : vector<1x1x8x128xf32> to vector<8x128xf32>
    %242 = vector.shape_cast %234 : vector<8x128xf32> to vector<1x1x8x128xf32>
    tpu.vector_store %arg6[%c0_73, %239, %c0_74, %c128_75], %242 {strides = array<i32>} : memref<1x4x8x256xf32, #tpu.memory_space<vmem>>, vector<1x1x8x128xf32>,
    %243 = tpu.concatenate %207, %234 in 1 : vector<8x128xf32>, vector<8x128xf32> -> vector<8x256xf32>
    %c3_i32_76 = arith.constant 3 : i32
    %c3_i32_77 = arith.constant 3 : i32
    %244 = arith.subi %c3_i32_77, %c3_i32_76 : i32
    %245 = arith.truncf %243 : vector<8x256xf32> to vector<8x256xbf16>
    %c0_78 = arith.constant 0 : index
    %c0_79 = arith.constant 0 : index
    %c0_80 = arith.constant 0 : index
    %246 = vector.load %arg3[%c0_78, %c0_79, %c0_80] : memref<1x256x768xbf16, #tpu.memory_space<vmem>>, vector<1x256x768xbf16>
    %247 = vector.shape_cast %246 : vector<1x256x768xbf16> to vector<256x768xbf16>
    %cst_81 = arith.constant dense<0.000000e+00> : vector<8x768xf32>
    %248 = tpu.matmul %245, %247, %cst_81 {dimension_numbers = #tpu.dot_dimension_numbers<[1], [0], [0], [1], [0, 0, 1, 1], [], []>} : vector<8x256xbf16>, vector<256x768xbf16>, vector<8x768xf32> -> vector<8x768xf32>
    %249 = vector.broadcast %14 : vector<1x768xf32> to vector<8x768xf32>
    %250 = arith.addf %248, %249 : vector<8x768xf32>
    %251 = arith.index_cast %c3_i32_76 : i32 to index
    %c0_82 = arith.constant 0 : index
    %c0_83 = arith.constant 0 : index
    %252 = vector.load %arg7[%251, %c0_82, %c0_83] : memref<4x8x768xf32, #tpu.memory_space<vmem>>, vector<1x8x384xf32>
    %253 = vector.shape_cast %252 : vector<1x8x384xf32> to vector<8x384xf32>
    %254 = arith.index_cast %244 : i32 to index
    %c0_84 = arith.constant 0 : index
    %c384_85 = arith.constant 384 : index
    %255 = vector.load %arg7[%254, %c0_84, %c384_85] : memref<4x8x768xf32, #tpu.memory_space<vmem>>, vector<1x8x384xf32>
    %256 = vector.shape_cast %255 : vector<1x8x384xf32> to vector<8x384xf32>
    %257 = vector.extract_strided_slice %253 {offsets = [0, 0], sizes = [8, 128], strides = [1, 1]} : vector<8x384xf32> to vector<8x128xf32>
    %258 = vector.extract_strided_slice %250 {offsets = [0, 0], sizes = [8, 128], strides = [1, 1]} : vector<8x768xf32> to vector<8x128xf32>
    %259 = arith.addf %257, %258 : vector<8x128xf32>
    %260 = arith.negf %259 : vector<8x128xf32>
    %261 = math.exp %260 : vector<8x128xf32>
    %cst_86 = arith.constant 1.000000e+00 : f32
    %262 = vector.broadcast %cst_86 : f32 to vector<8x128xf32>
    %263 = arith.addf %262, %261 : vector<8x128xf32>
    %264 = arith.divf %262, %263 : vector<8x128xf32>
    %265 = vector.extract_strided_slice %253 {offsets = [0, 128], sizes = [8, 128], strides = [1, 1]} : vector<8x384xf32> to vector<8x128xf32>
    %266 = vector.extract_strided_slice %250 {offsets = [0, 128], sizes = [8, 128], strides = [1, 1]} : vector<8x768xf32> to vector<8x128xf32>
    %267 = arith.addf %265, %266 : vector<8x128xf32>
    %268 = arith.negf %267 : vector<8x128xf32>
    %269 = math.exp %268 : vector<8x128xf32>
    %cst_87 = arith.constant 1.000000e+00 : f32
    %270 = vector.broadcast %cst_87 : f32 to vector<8x128xf32>
    %271 = arith.addf %270, %269 : vector<8x128xf32>
    %272 = arith.divf %270, %271 : vector<8x128xf32>
    %273 = vector.extract_strided_slice %253 {offsets = [0, 256], sizes = [8, 128], strides = [1, 1]} : vector<8x384xf32> to vector<8x128xf32>
    %274 = vector.extract_strided_slice %250 {offsets = [0, 256], sizes = [8, 128], strides = [1, 1]} : vector<8x768xf32> to vector<8x128xf32>
    %275 = arith.mulf %264, %274 : vector<8x128xf32>
    %276 = arith.addf %273, %275 : vector<8x128xf32>
    %277 = math.tanh %276 : vector<8x128xf32>
    %cst_88 = arith.constant 1.000000e+00 : f32
    %278 = vector.broadcast %cst_88 : f32 to vector<8x128xf32>
    %279 = arith.subf %278, %272 : vector<8x128xf32>
    %280 = arith.mulf %279, %277 : vector<8x128xf32>
    %281 = vector.extract_strided_slice %243 {offsets = [0, 0], sizes = [8, 128], strides = [1, 1]} : vector<8x256xf32> to vector<8x128xf32>
    %282 = arith.mulf %272, %281 : vector<8x128xf32>
    %283 = arith.addf %280, %282 : vector<8x128xf32>
    %284 = vector.extract_strided_slice %256 {offsets = [0, 0], sizes = [8, 128], strides = [1, 1]} : vector<8x384xf32> to vector<8x128xf32>
    %285 = vector.extract_strided_slice %250 {offsets = [0, 384], sizes = [8, 128], strides = [1, 1]} : vector<8x768xf32> to vector<8x128xf32>
    %286 = arith.addf %284, %285 : vector<8x128xf32>
    %287 = arith.negf %286 : vector<8x128xf32>
    %288 = math.exp %287 : vector<8x128xf32>
    %cst_89 = arith.constant 1.000000e+00 : f32
    %289 = vector.broadcast %cst_89 : f32 to vector<8x128xf32>
    %290 = arith.addf %289, %288 : vector<8x128xf32>
    %291 = arith.divf %289, %290 : vector<8x128xf32>
    %292 = vector.extract_strided_slice %256 {offsets = [0, 128], sizes = [8, 128], strides = [1, 1]} : vector<8x384xf32> to vector<8x128xf32>
    %293 = vector.extract_strided_slice %250 {offsets = [0, 512], sizes = [8, 128], strides = [1, 1]} : vector<8x768xf32> to vector<8x128xf32>
    %294 = arith.addf %292, %293 : vector<8x128xf32>
    %295 = arith.negf %294 : vector<8x128xf32>
    %296 = math.exp %295 : vector<8x128xf32>
    %cst_90 = arith.constant 1.000000e+00 : f32
    %297 = vector.broadcast %cst_90 : f32 to vector<8x128xf32>
    %298 = arith.addf %297, %296 : vector<8x128xf32>
    %299 = arith.divf %297, %298 : vector<8x128xf32>
    %300 = vector.extract_strided_slice %256 {offsets = [0, 256], sizes = [8, 128], strides = [1, 1]} : vector<8x384xf32> to vector<8x128xf32>
    %301 = vector.extract_strided_slice %250 {offsets = [0, 640], sizes = [8, 128], strides = [1, 1]} : vector<8x768xf32> to vector<8x128xf32>
    %302 = arith.mulf %291, %301 : vector<8x128xf32>
    %303 = arith.addf %300, %302 : vector<8x128xf32>
    %304 = math.tanh %303 : vector<8x128xf32>
    %cst_91 = arith.constant 1.000000e+00 : f32
    %305 = vector.broadcast %cst_91 : f32 to vector<8x128xf32>
    %306 = arith.subf %305, %299 : vector<8x128xf32>
    %307 = arith.mulf %306, %304 : vector<8x128xf32>
    %308 = vector.extract_strided_slice %243 {offsets = [0, 128], sizes = [8, 128], strides = [1, 1]} : vector<8x256xf32> to vector<8x128xf32>
    %309 = arith.mulf %299, %308 : vector<8x128xf32>
    %310 = arith.addf %307, %309 : vector<8x128xf32>
    %c0_92 = arith.constant 0 : index
    %311 = arith.index_cast %c3_i32_76 : i32 to index
    %c0_93 = arith.constant 0 : index
    %c0_94 = arith.constant 0 : index
    %312 = vector.load %arg6[%c0_92, %311, %c0_93, %c0_94] : memref<1x4x8x256xf32, #tpu.memory_space<vmem>>, vector<1x1x8x128xf32>
    %313 = vector.shape_cast %312 : vector<1x1x8x128xf32> to vector<8x128xf32>
    %314 = vector.shape_cast %283 : vector<8x128xf32> to vector<1x1x8x128xf32>
    tpu.vector_store %arg6[%c0_92, %311, %c0_93, %c0_94], %314 {strides = array<i32>} : memref<1x4x8x256xf32, #tpu.memory_space<vmem>>, vector<1x1x8x128xf32>,
    %c0_95 = arith.constant 0 : index
    %315 = arith.index_cast %244 : i32 to index
    %c0_96 = arith.constant 0 : index
    %c128_97 = arith.constant 128 : index
    %316 = vector.load %arg6[%c0_95, %315, %c0_96, %c128_97] : memref<1x4x8x256xf32, #tpu.memory_space<vmem>>, vector<1x1x8x128xf32>
    %317 = vector.shape_cast %316 : vector<1x1x8x128xf32> to vector<8x128xf32>
    %318 = vector.shape_cast %310 : vector<8x128xf32> to vector<1x1x8x128xf32>
    tpu.vector_store %arg6[%c0_95, %315, %c0_96, %c128_97], %318 {strides = array<i32>} : memref<1x4x8x256xf32, #tpu.memory_space<vmem>>, vector<1x1x8x128xf32>,
    %319 = tpu.concatenate %283, %310 in 1 : vector<8x128xf32>, vector<8x128xf32> -> vector<8x256xf32>
    %c4_i32 = arith.constant 4 : i32
    return
  }
  func.func @transform_0(%arg0: i32) -> (i32, i32, i32, i32) {
    %c0_i32 = arith.constant 0 : i32
    %c0_i32_0 = arith.constant 0 : i32
    %c0_i32_1 = arith.constant 0 : i32
    %c0_i32_2 = arith.constant 0 : i32
    return %arg0, %c0_i32, %c0_i32_0, %c0_i32_1 : i32, i32, i32, i32
  }
  func.func @transform_1(%arg0: i32) -> (i32, i32, i32) {
    %c0_i32 = arith.constant 0 : i32
    %c0_i32_0 = arith.constant 0 : i32
    %c0_i32_1 = arith.constant 0 : i32
    return %arg0, %c0_i32, %c0_i32_0 : i32, i32, i32
  }
  func.func @transform_2(%arg0: i32) -> (i32, i32, i32) {
    %c0_i32 = arith.constant 0 : i32
    %c0_i32_0 = arith.constant 0 : i32
    %c0_i32_1 = arith.constant 0 : i32
    return %arg0, %c0_i32, %c0_i32_0 : i32, i32, i32
  }
  func.func @transform_3(%arg0: i32) -> (i32, i32, i32) {
    %c0_i32 = arith.constant 0 : i32
    %c0_i32_0 = arith.constant 0 : i32
    %c0_i32_1 = arith.constant 0 : i32
    return %arg0, %c0_i32, %c0_i32_0 : i32, i32, i32
  }
  func.func @transform_4(%arg0: i32) -> (i32, i32, i32) {
    %c0_i32 = arith.constant 0 : i32
    %c0_i32_0 = arith.constant 0 : i32
    %c0_i32_1 = arith.constant 0 : i32
    return %arg0, %c0_i32, %c0_i32_0 : i32, i32, i32
  }
  func.func @transform_5(%arg0: i32) -> (i32, i32, i32, i32) {
    %c0_i32 = arith.constant 0 : i32
    %c0_i32_0 = arith.constant 0 : i32
    %c0_i32_1 = arith.constant 0 : i32
    %c0_i32_2 = arith.constant 0 : i32
    return %arg0, %c0_i32, %c0_i32_0, %c0_i32_1 : i32, i32, i32, i32
  }
}

module attributes {stable_mosaic.version = 11 : i64} {
  func.func @gru_bidir_kernel(%arg0: i32, %arg1: memref<1x4x8x256xf32, #tpu.memory_space<vmem>>, %arg2: memref<1x256x768xbf16, #tpu.memory_space<vmem>>, %arg3: memref<1x256x768xbf16, #tpu.memory_space<vmem>>, %arg4: memref<1x1x768xf32, #tpu.memory_space<vmem>>, %arg5: memref<1x1x768xf32, #tpu.memory_space<vmem>>, %arg6: memref<1x4x8x256xf32, #tpu.memory_space<vmem>>, %arg7: memref<4x8x768xf32, #tpu.memory_space<vmem>>) attributes {dimension_semantics = [#tpu.dimension_semantics<parallel>], iteration_bounds = array<i64: 2>, scalar_prefetch = 0 : i64, scratch_operands = 1 : i64, tpu.core_type = #tpu.core_type<tc>, window_params = [{transform_indices = @transform_0, window_bounds = array<i64: 1, 4, 8, 256>}, {transform_indices = @transform_1, window_bounds = array<i64: 1, 256, 768>}, {transform_indices = @transform_2, window_bounds = array<i64: 1, 256, 768>}, {transform_indices = @transform_3, window_bounds = array<i64: 1, 1, 768>}, {transform_indices = @transform_4, window_bounds = array<i64: 1, 1, 768>}, {transform_indices = @transform_5, window_bounds = array<i64: 1, 4, 8, 256>}]} {
    %c0 = arith.constant 0 : index
    %c0_0 = arith.constant 0 : index
    %c0_1 = arith.constant 0 : index
    %c0_2 = arith.constant 0 : index
    %0 = vector.load %arg1[%c0, %c0_0, %c0_1, %c0_2] : memref<1x4x8x256xf32, #tpu.memory_space<vmem>>, vector<1x4x8x256xf32>
    %1 = vector.shape_cast %0 : vector<1x4x8x256xf32> to vector<4x8x256xf32>
    %2 = vector.shape_cast %1 : vector<4x8x256xf32> to vector<32x256xf32>
    %3 = arith.truncf %2 : vector<32x256xf32> to vector<32x256xbf16>
    %c0_3 = arith.constant 0 : index
    %c0_4 = arith.constant 0 : index
    %c0_5 = arith.constant 0 : index
    %4 = vector.load %arg2[%c0_3, %c0_4, %c0_5] : memref<1x256x768xbf16, #tpu.memory_space<vmem>>, vector<1x256x768xbf16>
    %5 = vector.shape_cast %4 : vector<1x256x768xbf16> to vector<256x768xbf16>
    %cst = arith.constant dense<0.000000e+00> : vector<32x768xf32>
    %6 = tpu.matmul %3, %5, %cst {dimension_numbers = #tpu.dot_dimension_numbers<[1], [0], [0], [1], [0, 0, 1, 1], [], []>} : vector<32x256xbf16>, vector<256x768xbf16>, vector<32x768xf32> -> vector<32x768xf32>
    %c0_6 = arith.constant 0 : index
    %c0_7 = arith.constant 0 : index
    %c0_8 = arith.constant 0 : index
    %7 = vector.load %arg4[%c0_6, %c0_7, %c0_8] : memref<1x1x768xf32, #tpu.memory_space<vmem>>, vector<1x1x768xf32>
    %8 = vector.shape_cast %7 : vector<1x1x768xf32> to vector<1x768xf32>
    %9 = vector.broadcast %8 : vector<1x768xf32> to vector<32x768xf32>
    %10 = arith.addf %6, %9 : vector<32x768xf32>
    %11 = vector.shape_cast %10 : vector<32x768xf32> to vector<4x8x768xf32>
    %c0_9 = arith.constant 0 : index
    %c0_10 = arith.constant 0 : index
    %c0_11 = arith.constant 0 : index
    %12 = vector.load %arg7[%c0_9, %c0_10, %c0_11] : memref<4x8x768xf32, #tpu.memory_space<vmem>>, vector<4x8x768xf32>
    tpu.vector_store %arg7[%c0_9, %c0_10, %c0_11], %11 {strides = array<i32>} : memref<4x8x768xf32, #tpu.memory_space<vmem>>, vector<4x8x768xf32>,
    %c0_12 = arith.constant 0 : index
    %c0_13 = arith.constant 0 : index
    %c0_14 = arith.constant 0 : index
    %13 = vector.load %arg5[%c0_12, %c0_13, %c0_14] : memref<1x1x768xf32, #tpu.memory_space<vmem>>, vector<1x1x768xf32>
    %14 = vector.shape_cast %13 : vector<1x1x768xf32> to vector<1x768xf32>
    %cst_15 = arith.constant 0.000000e+00 : f32
    %15 = vector.broadcast %cst_15 : f32 to vector<8x256xf32>
    %c0_i32 = arith.constant 0 : i32
    %c3_i32 = arith.constant 3 : i32
    %16 = arith.subi %c3_i32, %c0_i32 : i32
    %17 = arith.truncf %15 : vector<8x256xf32> to vector<8x256xbf16>
    %c0_16 = arith.constant 0 : index
    %c0_17 = arith.constant 0 : index
    %c0_18 = arith.constant 0 : index
    %18 = vector.load %arg3[%c0_16, %c0_17, %c0_18] : memref<1x256x768xbf16, #tpu.memory_space<vmem>>, vector<1x256x768xbf16>
    %19 = vector.shape_cast %18 : vector<1x256x768xbf16> to vector<256x768xbf16>
    %cst_19 = arith.constant dense<0.000000e+00> : vector<8x768xf32>
    %20 = tpu.matmul %17, %19, %cst_19 {dimension_numbers = #tpu.dot_dimension_numbers<[1], [0], [0], [1], [0, 0, 1, 1], [], []>} : vector<8x256xbf16>, vector<256x768xbf16>, vector<8x768xf32> -> vector<8x768xf32>
    %21 = vector.broadcast %14 : vector<1x768xf32> to vector<8x768xf32>
    %22 = arith.addf %20, %21 : vector<8x768xf32>
    %23 = arith.index_cast %c0_i32 : i32 to index
    %c0_20 = arith.constant 0 : index
    %c0_21 = arith.constant 0 : index
    %24 = vector.load %arg7[%23, %c0_20, %c0_21] : memref<4x8x768xf32, #tpu.memory_space<vmem>>, vector<1x8x384xf32>
    %25 = vector.shape_cast %24 : vector<1x8x384xf32> to vector<8x384xf32>
    %26 = arith.index_cast %16 : i32 to index
    %c0_22 = arith.constant 0 : index
    %c384 = arith.constant 384 : index
    %27 = vector.load %arg7[%26, %c0_22, %c384] : memref<4x8x768xf32, #tpu.memory_space<vmem>>, vector<1x8x384xf32>
    %28 = vector.shape_cast %27 : vector<1x8x384xf32> to vector<8x384xf32>
    %29 = vector.extract_strided_slice %25 {offsets = [0, 0], sizes = [8, 128], strides = [1, 1]} : vector<8x384xf32> to vector<8x128xf32>
    %30 = vector.extract_strided_slice %22 {offsets = [0, 0], sizes = [8, 128], strides = [1, 1]} : vector<8x768xf32> to vector<8x128xf32>
    %31 = arith.addf %29, %30 : vector<8x128xf32>
    %32 = arith.negf %31 : vector<8x128xf32>
    %33 = math.exp %32 : vector<8x128xf32>
    %cst_23 = arith.constant 1.000000e+00 : f32
    %34 = vector.broadcast %cst_23 : f32 to vector<8x128xf32>
    %35 = arith.addf %34, %33 : vector<8x128xf32>
    %36 = arith.divf %34, %35 : vector<8x128xf32>
    %37 = vector.extract_strided_slice %25 {offsets = [0, 128], sizes = [8, 128], strides = [1, 1]} : vector<8x384xf32> to vector<8x128xf32>
    %38 = vector.extract_strided_slice %22 {offsets = [0, 128], sizes = [8, 128], strides = [1, 1]} : vector<8x768xf32> to vector<8x128xf32>
    %39 = arith.addf %37, %38 : vector<8x128xf32>
    %40 = arith.negf %39 : vector<8x128xf32>
    %41 = math.exp %40 : vector<8x128xf32>
    %cst_24 = arith.constant 1.000000e+00 : f32
    %42 = vector.broadcast %cst_24 : f32 to vector<8x128xf32>
    %43 = arith.addf %42, %41 : vector<8x128xf32>
    %44 = arith.divf %42, %43 : vector<8x128xf32>
    %45 = vector.extract_strided_slice %25 {offsets = [0, 256], sizes = [8, 128], strides = [1, 1]} : vector<8x384xf32> to vector<8x128xf32>
    %46 = vector.extract_strided_slice %22 {offsets = [0, 256], sizes = [8, 128], strides = [1, 1]} : vector<8x768xf32> to vector<8x128xf32>
    %47 = arith.mulf %36, %46 : vector<8x128xf32>
    %48 = arith.addf %45, %47 : vector<8x128xf32>
    %49 = math.tanh %48 : vector<8x128xf32>
    %cst_25 = arith.constant 1.000000e+00 : f32
    %50 = vector.broadcast %cst_25 : f32 to vector<8x128xf32>
    %51 = arith.subf %50, %44 : vector<8x128xf32>
    %52 = arith.mulf %51, %49 : vector<8x128xf32>
    %53 = vector.extract_strided_slice %15 {offsets = [0, 0], sizes = [8, 128], strides = [1, 1]} : vector<8x256xf32> to vector<8x128xf32>
    %54 = arith.mulf %44, %53 : vector<8x128xf32>
    %55 = arith.addf %52, %54 : vector<8x128xf32>
    %56 = vector.extract_strided_slice %28 {offsets = [0, 0], sizes = [8, 128], strides = [1, 1]} : vector<8x384xf32> to vector<8x128xf32>
    %57 = vector.extract_strided_slice %22 {offsets = [0, 384], sizes = [8, 128], strides = [1, 1]} : vector<8x768xf32> to vector<8x128xf32>
    %58 = arith.addf %56, %57 : vector<8x128xf32>
    %59 = arith.negf %58 : vector<8x128xf32>
    %60 = math.exp %59 : vector<8x128xf32>
    %cst_26 = arith.constant 1.000000e+00 : f32
    %61 = vector.broadcast %cst_26 : f32 to vector<8x128xf32>
    %62 = arith.addf %61, %60 : vector<8x128xf32>
    %63 = arith.divf %61, %62 : vector<8x128xf32>
    %64 = vector.extract_strided_slice %28 {offsets = [0, 128], sizes = [8, 128], strides = [1, 1]} : vector<8x384xf32> to vector<8x128xf32>
    %65 = vector.extract_strided_slice %22 {offsets = [0, 512], sizes = [8, 128], strides = [1, 1]} : vector<8x768xf32> to vector<8x128xf32>
    %66 = arith.addf %64, %65 : vector<8x128xf32>
    %67 = arith.negf %66 : vector<8x128xf32>
    %68 = math.exp %67 : vector<8x128xf32>
    %cst_27 = arith.constant 1.000000e+00 : f32
    %69 = vector.broadcast %cst_27 : f32 to vector<8x128xf32>
    %70 = arith.addf %69, %68 : vector<8x128xf32>
    %71 = arith.divf %69, %70 : vector<8x128xf32>
    %72 = vector.extract_strided_slice %28 {offsets = [0, 256], sizes = [8, 128], strides = [1, 1]} : vector<8x384xf32> to vector<8x128xf32>
    %73 = vector.extract_strided_slice %22 {offsets = [0, 640], sizes = [8, 128], strides = [1, 1]} : vector<8x768xf32> to vector<8x128xf32>
    %74 = arith.mulf %63, %73 : vector<8x128xf32>
    %75 = arith.addf %72, %74 : vector<8x128xf32>
    %76 = math.tanh %75 : vector<8x128xf32>
    %cst_28 = arith.constant 1.000000e+00 : f32
    %77 = vector.broadcast %cst_28 : f32 to vector<8x128xf32>
    %78 = arith.subf %77, %71 : vector<8x128xf32>
    %79 = arith.mulf %78, %76 : vector<8x128xf32>
    %80 = vector.extract_strided_slice %15 {offsets = [0, 128], sizes = [8, 128], strides = [1, 1]} : vector<8x256xf32> to vector<8x128xf32>
    %81 = arith.mulf %71, %80 : vector<8x128xf32>
    %82 = arith.addf %79, %81 : vector<8x128xf32>
    %c0_29 = arith.constant 0 : index
    %83 = arith.index_cast %c0_i32 : i32 to index
    %c0_30 = arith.constant 0 : index
    %c0_31 = arith.constant 0 : index
    %84 = vector.load %arg6[%c0_29, %83, %c0_30, %c0_31] : memref<1x4x8x256xf32, #tpu.memory_space<vmem>>, vector<1x1x8x128xf32>
    %85 = vector.shape_cast %84 : vector<1x1x8x128xf32> to vector<8x128xf32>
    %86 = vector.shape_cast %55 : vector<8x128xf32> to vector<1x1x8x128xf32>
    tpu.vector_store %arg6[%c0_29, %83, %c0_30, %c0_31], %86 {strides = array<i32>} : memref<1x4x8x256xf32, #tpu.memory_space<vmem>>, vector<1x1x8x128xf32>,
    %c0_32 = arith.constant 0 : index
    %87 = arith.index_cast %16 : i32 to index
    %c0_33 = arith.constant 0 : index
    %c128 = arith.constant 128 : index
    %88 = vector.load %arg6[%c0_32, %87, %c0_33, %c128] : memref<1x4x8x256xf32, #tpu.memory_space<vmem>>, vector<1x1x8x128xf32>
    %89 = vector.shape_cast %88 : vector<1x1x8x128xf32> to vector<8x128xf32>
    %90 = vector.shape_cast %82 : vector<8x128xf32> to vector<1x1x8x128xf32>
    tpu.vector_store %arg6[%c0_32, %87, %c0_33, %c128], %90 {strides = array<i32>} : memref<1x4x8x256xf32, #tpu.memory_space<vmem>>, vector<1x1x8x128xf32>,
    %91 = tpu.concatenate %55, %82 in 1 : vector<8x128xf32>, vector<8x128xf32> -> vector<8x256xf32>
    %c1_i32 = arith.constant 1 : i32
    %c3_i32_34 = arith.constant 3 : i32
    %92 = arith.subi %c3_i32_34, %c1_i32 : i32
    %93 = arith.truncf %91 : vector<8x256xf32> to vector<8x256xbf16>
    %c0_35 = arith.constant 0 : index
    %c0_36 = arith.constant 0 : index
    %c0_37 = arith.constant 0 : index
    %94 = vector.load %arg3[%c0_35, %c0_36, %c0_37] : memref<1x256x768xbf16, #tpu.memory_space<vmem>>, vector<1x256x768xbf16>
    %95 = vector.shape_cast %94 : vector<1x256x768xbf16> to vector<256x768xbf16>
    %cst_38 = arith.constant dense<0.000000e+00> : vector<8x768xf32>
    %96 = tpu.matmul %93, %95, %cst_38 {dimension_numbers = #tpu.dot_dimension_numbers<[1], [0], [0], [1], [0, 0, 1, 1], [], []>} : vector<8x256xbf16>, vector<256x768xbf16>, vector<8x768xf32> -> vector<8x768xf32>
    %97 = vector.broadcast %14 : vector<1x768xf32> to vector<8x768xf32>
    %98 = arith.addf %96, %97 : vector<8x768xf32>
    %99 = arith.index_cast %c1_i32 : i32 to index
    %c0_39 = arith.constant 0 : index
    %c0_40 = arith.constant 0 : index
    %100 = vector.load %arg7[%99, %c0_39, %c0_40] : memref<4x8x768xf32, #tpu.memory_space<vmem>>, vector<1x8x384xf32>
    %101 = vector.shape_cast %100 : vector<1x8x384xf32> to vector<8x384xf32>
    %102 = arith.index_cast %92 : i32 to index
    %c0_41 = arith.constant 0 : index
    %c384_42 = arith.constant 384 : index
    %103 = vector.load %arg7[%102, %c0_41, %c384_42] : memref<4x8x768xf32, #tpu.memory_space<vmem>>, vector<1x8x384xf32>
    %104 = vector.shape_cast %103 : vector<1x8x384xf32> to vector<8x384xf32>
    %105 = vector.extract_strided_slice %101 {offsets = [0, 0], sizes = [8, 128], strides = [1, 1]} : vector<8x384xf32> to vector<8x128xf32>
    %106 = vector.extract_strided_slice %98 {offsets = [0, 0], sizes = [8, 128], strides = [1, 1]} : vector<8x768xf32> to vector<8x128xf32>
    %107 = arith.addf %105, %106 : vector<8x128xf32>
    %108 = arith.negf %107 : vector<8x128xf32>
    %109 = math.exp %108 : vector<8x128xf32>
    %cst_43 = arith.constant 1.000000e+00 : f32
    %110 = vector.broadcast %cst_43 : f32 to vector<8x128xf32>
    %111 = arith.addf %110, %109 : vector<8x128xf32>
    %112 = arith.divf %110, %111 : vector<8x128xf32>
    %113 = vector.extract_strided_slice %101 {offsets = [0, 128], sizes = [8, 128], strides = [1, 1]} : vector<8x384xf32> to vector<8x128xf32>
    %114 = vector.extract_strided_slice %98 {offsets = [0, 128], sizes = [8, 128], strides = [1, 1]} : vector<8x768xf32> to vector<8x128xf32>
    %115 = arith.addf %113, %114 : vector<8x128xf32>
    %116 = arith.negf %115 : vector<8x128xf32>
    %117 = math.exp %116 : vector<8x128xf32>
    %cst_44 = arith.constant 1.000000e+00 : f32
    %118 = vector.broadcast %cst_44 : f32 to vector<8x128xf32>
    %119 = arith.addf %118, %117 : vector<8x128xf32>
    %120 = arith.divf %118, %119 : vector<8x128xf32>
    %121 = vector.extract_strided_slice %101 {offsets = [0, 256], sizes = [8, 128], strides = [1, 1]} : vector<8x384xf32> to vector<8x128xf32>
    %122 = vector.extract_strided_slice %98 {offsets = [0, 256], sizes = [8, 128], strides = [1, 1]} : vector<8x768xf32> to vector<8x128xf32>
    %123 = arith.mulf %112, %122 : vector<8x128xf32>
    %124 = arith.addf %121, %123 : vector<8x128xf32>
    %125 = math.tanh %124 : vector<8x128xf32>
    %cst_45 = arith.constant 1.000000e+00 : f32
    %126 = vector.broadcast %cst_45 : f32 to vector<8x128xf32>
    %127 = arith.subf %126, %120 : vector<8x128xf32>
    %128 = arith.mulf %127, %125 : vector<8x128xf32>
    %129 = vector.extract_strided_slice %91 {offsets = [0, 0], sizes = [8, 128], strides = [1, 1]} : vector<8x256xf32> to vector<8x128xf32>
    %130 = arith.mulf %120, %129 : vector<8x128xf32>
    %131 = arith.addf %128, %130 : vector<8x128xf32>
    %132 = vector.extract_strided_slice %104 {offsets = [0, 0], sizes = [8, 128], strides = [1, 1]} : vector<8x384xf32> to vector<8x128xf32>
    %133 = vector.extract_strided_slice %98 {offsets = [0, 384], sizes = [8, 128], strides = [1, 1]} : vector<8x768xf32> to vector<8x128xf32>
    %134 = arith.addf %132, %133 : vector<8x128xf32>
    %135 = arith.negf %134 : vector<8x128xf32>
    %136 = math.exp %135 : vector<8x128xf32>
    %cst_46 = arith.constant 1.000000e+00 : f32
    %137 = vector.broadcast %cst_46 : f32 to vector<8x128xf32>
    %138 = arith.addf %137, %136 : vector<8x128xf32>
    %139 = arith.divf %137, %138 : vector<8x128xf32>
    %140 = vector.extract_strided_slice %104 {offsets = [0, 128], sizes = [8, 128], strides = [1, 1]} : vector<8x384xf32> to vector<8x128xf32>
    %141 = vector.extract_strided_slice %98 {offsets = [0, 512], sizes = [8, 128], strides = [1, 1]} : vector<8x768xf32> to vector<8x128xf32>
    %142 = arith.addf %140, %141 : vector<8x128xf32>
    %143 = arith.negf %142 : vector<8x128xf32>
    %144 = math.exp %143 : vector<8x128xf32>
    %cst_47 = arith.constant 1.000000e+00 : f32
    %145 = vector.broadcast %cst_47 : f32 to vector<8x128xf32>
    %146 = arith.addf %145, %144 : vector<8x128xf32>
    %147 = arith.divf %145, %146 : vector<8x128xf32>
    %148 = vector.extract_strided_slice %104 {offsets = [0, 256], sizes = [8, 128], strides = [1, 1]} : vector<8x384xf32> to vector<8x128xf32>
    %149 = vector.extract_strided_slice %98 {offsets = [0, 640], sizes = [8, 128], strides = [1, 1]} : vector<8x768xf32> to vector<8x128xf32>
    %150 = arith.mulf %139, %149 : vector<8x128xf32>
    %151 = arith.addf %148, %150 : vector<8x128xf32>
    %152 = math.tanh %151 : vector<8x128xf32>
    %cst_48 = arith.constant 1.000000e+00 : f32
    %153 = vector.broadcast %cst_48 : f32 to vector<8x128xf32>
    %154 = arith.subf %153, %147 : vector<8x128xf32>
    %155 = arith.mulf %154, %152 : vector<8x128xf32>
    %156 = vector.extract_strided_slice %91 {offsets = [0, 128], sizes = [8, 128], strides = [1, 1]} : vector<8x256xf32> to vector<8x128xf32>
    %157 = arith.mulf %147, %156 : vector<8x128xf32>
    %158 = arith.addf %155, %157 : vector<8x128xf32>
    %c0_49 = arith.constant 0 : index
    %159 = arith.index_cast %c1_i32 : i32 to index
    %c0_50 = arith.constant 0 : index
    %c0_51 = arith.constant 0 : index
    %160 = vector.load %arg6[%c0_49, %159, %c0_50, %c0_51] : memref<1x4x8x256xf32, #tpu.memory_space<vmem>>, vector<1x1x8x128xf32>
    %161 = vector.shape_cast %160 : vector<1x1x8x128xf32> to vector<8x128xf32>
    %162 = vector.shape_cast %131 : vector<8x128xf32> to vector<1x1x8x128xf32>
    tpu.vector_store %arg6[%c0_49, %159, %c0_50, %c0_51], %162 {strides = array<i32>} : memref<1x4x8x256xf32, #tpu.memory_space<vmem>>, vector<1x1x8x128xf32>,
    %c0_52 = arith.constant 0 : index
    %163 = arith.index_cast %92 : i32 to index
    %c0_53 = arith.constant 0 : index
    %c128_54 = arith.constant 128 : index
    %164 = vector.load %arg6[%c0_52, %163, %c0_53, %c128_54] : memref<1x4x8x256xf32, #tpu.memory_space<vmem>>, vector<1x1x8x128xf32>
    %165 = vector.shape_cast %164 : vector<1x1x8x128xf32> to vector<8x128xf32>
    %166 = vector.shape_cast %158 : vector<8x128xf32> to vector<1x1x8x128xf32>
    tpu.vector_store %arg6[%c0_52, %163, %c0_53, %c128_54], %166 {strides = array<i32>} : memref<1x4x8x256xf32, #tpu.memory_space<vmem>>, vector<1x1x8x128xf32>,
    %167 = tpu.concatenate %131, %158 in 1 : vector<8x128xf32>, vector<8x128xf32> -> vector<8x256xf32>
    %c2_i32 = arith.constant 2 : i32
    %c3_i32_55 = arith.constant 3 : i32
    %168 = arith.subi %c3_i32_55, %c2_i32 : i32
    %169 = arith.truncf %167 : vector<8x256xf32> to vector<8x256xbf16>
    %c0_56 = arith.constant 0 : index
    %c0_57 = arith.constant 0 : index
    %c0_58 = arith.constant 0 : index
    %170 = vector.load %arg3[%c0_56, %c0_57, %c0_58] : memref<1x256x768xbf16, #tpu.memory_space<vmem>>, vector<1x256x768xbf16>
    %171 = vector.shape_cast %170 : vector<1x256x768xbf16> to vector<256x768xbf16>
    %cst_59 = arith.constant dense<0.000000e+00> : vector<8x768xf32>
    %172 = tpu.matmul %169, %171, %cst_59 {dimension_numbers = #tpu.dot_dimension_numbers<[1], [0], [0], [1], [0, 0, 1, 1], [], []>} : vector<8x256xbf16>, vector<256x768xbf16>, vector<8x768xf32> -> vector<8x768xf32>
    %173 = vector.broadcast %14 : vector<1x768xf32> to vector<8x768xf32>
    %174 = arith.addf %172, %173 : vector<8x768xf32>
    %175 = arith.index_cast %c2_i32 : i32 to index
    %c0_60 = arith.constant 0 : index
    %c0_61 = arith.constant 0 : index
    %176 = vector.load %arg7[%175, %c0_60, %c0_61] : memref<4x8x768xf32, #tpu.memory_space<vmem>>, vector<1x8x384xf32>
    %177 = vector.shape_cast %176 : vector<1x8x384xf32> to vector<8x384xf32>
    %178 = arith.index_cast %168 : i32 to index
    %c0_62 = arith.constant 0 : index
    %c384_63 = arith.constant 384 : index
    %179 = vector.load %arg7[%178, %c0_62, %c384_63] : memref<4x8x768xf32, #tpu.memory_space<vmem>>, vector<1x8x384xf32>
    %180 = vector.shape_cast %179 : vector<1x8x384xf32> to vector<8x384xf32>
    %181 = vector.extract_strided_slice %177 {offsets = [0, 0], sizes = [8, 128], strides = [1, 1]} : vector<8x384xf32> to vector<8x128xf32>
    %182 = vector.extract_strided_slice %174 {offsets = [0, 0], sizes = [8, 128], strides = [1, 1]} : vector<8x768xf32> to vector<8x128xf32>
    %183 = arith.addf %181, %182 : vector<8x128xf32>
    %184 = arith.negf %183 : vector<8x128xf32>
    %185 = math.exp %184 : vector<8x128xf32>
    %cst_64 = arith.constant 1.000000e+00 : f32
    %186 = vector.broadcast %cst_64 : f32 to vector<8x128xf32>
    %187 = arith.addf %186, %185 : vector<8x128xf32>
    %188 = arith.divf %186, %187 : vector<8x128xf32>
    %189 = vector.extract_strided_slice %177 {offsets = [0, 128], sizes = [8, 128], strides = [1, 1]} : vector<8x384xf32> to vector<8x128xf32>
    %190 = vector.extract_strided_slice %174 {offsets = [0, 128], sizes = [8, 128], strides = [1, 1]} : vector<8x768xf32> to vector<8x128xf32>
    %191 = arith.addf %189, %190 : vector<8x128xf32>
    %192 = arith.negf %191 : vector<8x128xf32>
    %193 = math.exp %192 : vector<8x128xf32>
    %cst_65 = arith.constant 1.000000e+00 : f32
    %194 = vector.broadcast %cst_65 : f32 to vector<8x128xf32>
    %195 = arith.addf %194, %193 : vector<8x128xf32>
    %196 = arith.divf %194, %195 : vector<8x128xf32>
    %197 = vector.extract_strided_slice %177 {offsets = [0, 256], sizes = [8, 128], strides = [1, 1]} : vector<8x384xf32> to vector<8x128xf32>
    %198 = vector.extract_strided_slice %174 {offsets = [0, 256], sizes = [8, 128], strides = [1, 1]} : vector<8x768xf32> to vector<8x128xf32>
    %199 = arith.mulf %188, %198 : vector<8x128xf32>
    %200 = arith.addf %197, %199 : vector<8x128xf32>
    %201 = math.tanh %200 : vector<8x128xf32>
    %cst_66 = arith.constant 1.000000e+00 : f32
    %202 = vector.broadcast %cst_66 : f32 to vector<8x128xf32>
    %203 = arith.subf %202, %196 : vector<8x128xf32>
    %204 = arith.mulf %203, %201 : vector<8x128xf32>
    %205 = vector.extract_strided_slice %167 {offsets = [0, 0], sizes = [8, 128], strides = [1, 1]} : vector<8x256xf32> to vector<8x128xf32>
    %206 = arith.mulf %196, %205 : vector<8x128xf32>
    %207 = arith.addf %204, %206 : vector<8x128xf32>
    %208 = vector.extract_strided_slice %180 {offsets = [0, 0], sizes = [8, 128], strides = [1, 1]} : vector<8x384xf32> to vector<8x128xf32>
    %209 = vector.extract_strided_slice %174 {offsets = [0, 384], sizes = [8, 128], strides = [1, 1]} : vector<8x768xf32> to vector<8x128xf32>
    %210 = arith.addf %208, %209 : vector<8x128xf32>
    %211 = arith.negf %210 : vector<8x128xf32>
    %212 = math.exp %211 : vector<8x128xf32>
    %cst_67 = arith.constant 1.000000e+00 : f32
    %213 = vector.broadcast %cst_67 : f32 to vector<8x128xf32>
    %214 = arith.addf %213, %212 : vector<8x128xf32>
    %215 = arith.divf %213, %214 : vector<8x128xf32>
    %216 = vector.extract_strided_slice %180 {offsets = [0, 128], sizes = [8, 128], strides = [1, 1]} : vector<8x384xf32> to vector<8x128xf32>
    %217 = vector.extract_strided_slice %174 {offsets = [0, 512], sizes = [8, 128], strides = [1, 1]} : vector<8x768xf32> to vector<8x128xf32>
    %218 = arith.addf %216, %217 : vector<8x128xf32>
    %219 = arith.negf %218 : vector<8x128xf32>
    %220 = math.exp %219 : vector<8x128xf32>
    %cst_68 = arith.constant 1.000000e+00 : f32
    %221 = vector.broadcast %cst_68 : f32 to vector<8x128xf32>
    %222 = arith.addf %221, %220 : vector<8x128xf32>
    %223 = arith.divf %221, %222 : vector<8x128xf32>
    %224 = vector.extract_strided_slice %180 {offsets = [0, 256], sizes = [8, 128], strides = [1, 1]} : vector<8x384xf32> to vector<8x128xf32>
    %225 = vector.extract_strided_slice %174 {offsets = [0, 640], sizes = [8, 128], strides = [1, 1]} : vector<8x768xf32> to vector<8x128xf32>
    %226 = arith.mulf %215, %225 : vector<8x128xf32>
    %227 = arith.addf %224, %226 : vector<8x128xf32>
    %228 = math.tanh %227 : vector<8x128xf32>
    %cst_69 = arith.constant 1.000000e+00 : f32
    %229 = vector.broadcast %cst_69 : f32 to vector<8x128xf32>
    %230 = arith.subf %229, %223 : vector<8x128xf32>
    %231 = arith.mulf %230, %228 : vector<8x128xf32>
    %232 = vector.extract_strided_slice %167 {offsets = [0, 128], sizes = [8, 128], strides = [1, 1]} : vector<8x256xf32> to vector<8x128xf32>
    %233 = arith.mulf %223, %232 : vector<8x128xf32>
    %234 = arith.addf %231, %233 : vector<8x128xf32>
    %c0_70 = arith.constant 0 : index
    %235 = arith.index_cast %c2_i32 : i32 to index
    %c0_71 = arith.constant 0 : index
    %c0_72 = arith.constant 0 : index
    %236 = vector.load %arg6[%c0_70, %235, %c0_71, %c0_72] : memref<1x4x8x256xf32, #tpu.memory_space<vmem>>, vector<1x1x8x128xf32>
    %237 = vector.shape_cast %236 : vector<1x1x8x128xf32> to vector<8x128xf32>
    %238 = vector.shape_cast %207 : vector<8x128xf32> to vector<1x1x8x128xf32>
    tpu.vector_store %arg6[%c0_70, %235, %c0_71, %c0_72], %238 {strides = array<i32>} : memref<1x4x8x256xf32, #tpu.memory_space<vmem>>, vector<1x1x8x128xf32>,
    %c0_73 = arith.constant 0 : index
    %239 = arith.index_cast %168 : i32 to index
    %c0_74 = arith.constant 0 : index
    %c128_75 = arith.constant 128 : index
    %240 = vector.load %arg6[%c0_73, %239, %c0_74, %c128_75] : memref<1x4x8x256xf32, #tpu.memory_space<vmem>>, vector<1x1x8x128xf32>
    %241 = vector.shape_cast %240 : vector<1x1x8x128xf32> to vector<8x128xf32>
    %242 = vector.shape_cast %234 : vector<8x128xf32> to vector<1x1x8x128xf32>
    tpu.vector_store %arg6[%c0_73, %239, %c0_74, %c128_75], %242 {strides = array<i32>} : memref<1x4x8x256xf32, #tpu.memory_space<vmem>>, vector<1x1x8x128xf32>,
    %243 = tpu.concatenate %207, %234 in 1 : vector<8x128xf32>, vector<8x128xf32> -> vector<8x256xf32>
    %c3_i32_76 = arith.constant 3 : i32
    %c3_i32_77 = arith.constant 3 : i32
    %244 = arith.subi %c3_i32_77, %c3_i32_76 : i32
    %245 = arith.truncf %243 : vector<8x256xf32> to vector<8x256xbf16>
    %c0_78 = arith.constant 0 : index
    %c0_79 = arith.constant 0 : index
    %c0_80 = arith.constant 0 : index
    %246 = vector.load %arg3[%c0_78, %c0_79, %c0_80] : memref<1x256x768xbf16, #tpu.memory_space<vmem>>, vector<1x256x768xbf16>
    %247 = vector.shape_cast %246 : vector<1x256x768xbf16> to vector<256x768xbf16>
    %cst_81 = arith.constant dense<0.000000e+00> : vector<8x768xf32>
    %248 = tpu.matmul %245, %247, %cst_81 {dimension_numbers = #tpu.dot_dimension_numbers<[1], [0], [0], [1], [0, 0, 1, 1], [], []>} : vector<8x256xbf16>, vector<256x768xbf16>, vector<8x768xf32> -> vector<8x768xf32>
    %249 = vector.broadcast %14 : vector<1x768xf32> to vector<8x768xf32>
    %250 = arith.addf %248, %249 : vector<8x768xf32>
    %251 = arith.index_cast %c3_i32_76 : i32 to index
    %c0_82 = arith.constant 0 : index
    %c0_83 = arith.constant 0 : index
    %252 = vector.load %arg7[%251, %c0_82, %c0_83] : memref<4x8x768xf32, #tpu.memory_space<vmem>>, vector<1x8x384xf32>
    %253 = vector.shape_cast %252 : vector<1x8x384xf32> to vector<8x384xf32>
    %254 = arith.index_cast %244 : i32 to index
    %c0_84 = arith.constant 0 : index
    %c384_85 = arith.constant 384 : index
    %255 = vector.load %arg7[%254, %c0_84, %c384_85] : memref<4x8x768xf32, #tpu.memory_space<vmem>>, vector<1x8x384xf32>
    %256 = vector.shape_cast %255 : vector<1x8x384xf32> to vector<8x384xf32>
    %257 = vector.extract_strided_slice %253 {offsets = [0, 0], sizes = [8, 128], strides = [1, 1]} : vector<8x384xf32> to vector<8x128xf32>
    %258 = vector.extract_strided_slice %250 {offsets = [0, 0], sizes = [8, 128], strides = [1, 1]} : vector<8x768xf32> to vector<8x128xf32>
    %259 = arith.addf %257, %258 : vector<8x128xf32>
    %260 = arith.negf %259 : vector<8x128xf32>
    %261 = math.exp %260 : vector<8x128xf32>
    %cst_86 = arith.constant 1.000000e+00 : f32
    %262 = vector.broadcast %cst_86 : f32 to vector<8x128xf32>
    %263 = arith.addf %262, %261 : vector<8x128xf32>
    %264 = arith.divf %262, %263 : vector<8x128xf32>
    %265 = vector.extract_strided_slice %253 {offsets = [0, 128], sizes = [8, 128], strides = [1, 1]} : vector<8x384xf32> to vector<8x128xf32>
    %266 = vector.extract_strided_slice %250 {offsets = [0, 128], sizes = [8, 128], strides = [1, 1]} : vector<8x768xf32> to vector<8x128xf32>
    %267 = arith.addf %265, %266 : vector<8x128xf32>
    %268 = arith.negf %267 : vector<8x128xf32>
    %269 = math.exp %268 : vector<8x128xf32>
    %cst_87 = arith.constant 1.000000e+00 : f32
    %270 = vector.broadcast %cst_87 : f32 to vector<8x128xf32>
    %271 = arith.addf %270, %269 : vector<8x128xf32>
    %272 = arith.divf %270, %271 : vector<8x128xf32>
    %273 = vector.extract_strided_slice %253 {offsets = [0, 256], sizes = [8, 128], strides = [1, 1]} : vector<8x384xf32> to vector<8x128xf32>
    %274 = vector.extract_strided_slice %250 {offsets = [0, 256], sizes = [8, 128], strides = [1, 1]} : vector<8x768xf32> to vector<8x128xf32>
    %275 = arith.mulf %264, %274 : vector<8x128xf32>
    %276 = arith.addf %273, %275 : vector<8x128xf32>
    %277 = math.tanh %276 : vector<8x128xf32>
    %cst_88 = arith.constant 1.000000e+00 : f32
    %278 = vector.broadcast %cst_88 : f32 to vector<8x128xf32>
    %279 = arith.subf %278, %272 : vector<8x128xf32>
    %280 = arith.mulf %279, %277 : vector<8x128xf32>
    %281 = vector.extract_strided_slice %243 {offsets = [0, 0], sizes = [8, 128], strides = [1, 1]} : vector<8x256xf32> to vector<8x128xf32>
    %282 = arith.mulf %272, %281 : vector<8x128xf32>
    %283 = arith.addf %280, %282 : vector<8x128xf32>
    %284 = vector.extract_strided_slice %256 {offsets = [0, 0], sizes = [8, 128], strides = [1, 1]} : vector<8x384xf32> to vector<8x128xf32>
    %285 = vector.extract_strided_slice %250 {offsets = [0, 384], sizes = [8, 128], strides = [1, 1]} : vector<8x768xf32> to vector<8x128xf32>
    %286 = arith.addf %284, %285 : vector<8x128xf32>
    %287 = arith.negf %286 : vector<8x128xf32>
    %288 = math.exp %287 : vector<8x128xf32>
    %cst_89 = arith.constant 1.000000e+00 : f32
    %289 = vector.broadcast %cst_89 : f32 to vector<8x128xf32>
    %290 = arith.addf %289, %288 : vector<8x128xf32>
    %291 = arith.divf %289, %290 : vector<8x128xf32>
    %292 = vector.extract_strided_slice %256 {offsets = [0, 128], sizes = [8, 128], strides = [1, 1]} : vector<8x384xf32> to vector<8x128xf32>
    %293 = vector.extract_strided_slice %250 {offsets = [0, 512], sizes = [8, 128], strides = [1, 1]} : vector<8x768xf32> to vector<8x128xf32>
    %294 = arith.addf %292, %293 : vector<8x128xf32>
    %295 = arith.negf %294 : vector<8x128xf32>
    %296 = math.exp %295 : vector<8x128xf32>
    %cst_90 = arith.constant 1.000000e+00 : f32
    %297 = vector.broadcast %cst_90 : f32 to vector<8x128xf32>
    %298 = arith.addf %297, %296 : vector<8x128xf32>
    %299 = arith.divf %297, %298 : vector<8x128xf32>
    %300 = vector.extract_strided_slice %256 {offsets = [0, 256], sizes = [8, 128], strides = [1, 1]} : vector<8x384xf32> to vector<8x128xf32>
    %301 = vector.extract_strided_slice %250 {offsets = [0, 640], sizes = [8, 128], strides = [1, 1]} : vector<8x768xf32> to vector<8x128xf32>
    %302 = arith.mulf %291, %301 : vector<8x128xf32>
    %303 = arith.addf %300, %302 : vector<8x128xf32>
    %304 = math.tanh %303 : vector<8x128xf32>
    %cst_91 = arith.constant 1.000000e+00 : f32
    %305 = vector.broadcast %cst_91 : f32 to vector<8x128xf32>
    %306 = arith.subf %305, %299 : vector<8x128xf32>
    %307 = arith.mulf %306, %304 : vector<8x128xf32>
    %308 = vector.extract_strided_slice %243 {offsets = [0, 128], sizes = [8, 128], strides = [1, 1]} : vector<8x256xf32> to vector<8x128xf32>
    %309 = arith.mulf %299, %308 : vector<8x128xf32>
    %310 = arith.addf %307, %309 : vector<8x128xf32>
    %c0_92 = arith.constant 0 : index
    %311 = arith.index_cast %c3_i32_76 : i32 to index
    %c0_93 = arith.constant 0 : index
    %c0_94 = arith.constant 0 : index
    %312 = vector.load %arg6[%c0_92, %311, %c0_93, %c0_94] : memref<1x4x8x256xf32, #tpu.memory_space<vmem>>, vector<1x1x8x128xf32>
    %313 = vector.shape_cast %312 : vector<1x1x8x128xf32> to vector<8x128xf32>
    %314 = vector.shape_cast %283 : vector<8x128xf32> to vector<1x1x8x128xf32>
    tpu.vector_store %arg6[%c0_92, %311, %c0_93, %c0_94], %314 {strides = array<i32>} : memref<1x4x8x256xf32, #tpu.memory_space<vmem>>, vector<1x1x8x128xf32>,
    %c0_95 = arith.constant 0 : index
    %315 = arith.index_cast %244 : i32 to index
    %c0_96 = arith.constant 0 : index
    %c128_97 = arith.constant 128 : index
    %316 = vector.load %arg6[%c0_95, %315, %c0_96, %c128_97] : memref<1x4x8x256xf32, #tpu.memory_space<vmem>>, vector<1x1x8x128xf32>
    %317 = vector.shape_cast %316 : vector<1x1x8x128xf32> to vector<8x128xf32>
    %318 = vector.shape_cast %310 : vector<8x128xf32> to vector<1x1x8x128xf32>
    tpu.vector_store %arg6[%c0_95, %315, %c0_96, %c128_97], %318 {strides = array<i32>} : memref<1x4x8x256xf32, #tpu.memory_space<vmem>>, vector<1x1x8x128xf32>,
    %319 = tpu.concatenate %283, %310 in 1 : vector<8x128xf32>, vector<8x128xf32> -> vector<8x256xf32>
    %c4_i32 = arith.constant 4 : i32
    return
  }
  func.func @transform_0(%arg0: i32) -> (i32, i32, i32, i32) {
    %c0_i32 = arith.constant 0 : i32
    %c0_i32_0 = arith.constant 0 : i32
    %c0_i32_1 = arith.constant 0 : i32
    %c0_i32_2 = arith.constant 0 : i32
    return %arg0, %c0_i32, %c0_i32_0, %c0_i32_1 : i32, i32, i32, i32
  }
  func.func @transform_1(%arg0: i32) -> (i32, i32, i32) {
    %c0_i32 = arith.constant 0 : i32
    %c0_i32_0 = arith.constant 0 : i32
    %c0_i32_1 = arith.constant 0 : i32
    return %arg0, %c0_i32, %c0_i32_0 : i32, i32, i32
  }
  func.func @transform_2(%arg0: i32) -> (i32, i32, i32) {
    %c0_i32 = arith.constant 0 : i32
    %c0_i32_0 = arith.constant 0 : i32
    %c0_i32_1 = arith.constant 0 : i32
    return %arg0, %c0_i32, %c0_i32_0 : i32, i32, i32
  }
  func.func @transform_3(%arg0: i32) -> (i32, i32, i32) {
    %c0_i32 = arith.constant 0 : i32
    %c0_i32_0 = arith.constant 0 : i32
    %c0_i32_1 = arith.constant 0 : i32
    return %arg0, %c0_i32, %c0_i32_0 : i32, i32, i32
  }
  func.func @transform_4(%arg0: i32) -> (i32, i32, i32) {
    %c0_i32 = arith.constant 0 : i32
    %c0_i32_0 = arith.constant 0 : i32
    %c0_i32_1 = arith.constant 0 : i32
    return %arg0, %c0_i32, %c0_i32_0 : i32, i32, i32
  }
  func.func @transform_5(%arg0: i32) -> (i32, i32, i32, i32) {
    %c0_i32 = arith.constant 0 : i32
    %c0_i32_0 = arith.constant 0 : i32
    %c0_i32_1 = arith.constant 0 : i32
    %c0_i32_2 = arith.constant 0 : i32
    return %arg0, %c0_i32, %c0_i32_0, %c0_i32_1 : i32, i32, i32, i32
  }
}

module attributes {stable_mosaic.version = 11 : i64} {
  func.func @head_kernel(%arg0: i32, %arg1: memref<2x32x256xf32, #tpu.memory_space<vmem>>, %arg2: memref<256x128xbf16, #tpu.memory_space<vmem>>, %arg3: memref<256x128xbf16, #tpu.memory_space<vmem>>, %arg4: memref<1x128xf32, #tpu.memory_space<vmem>>, %arg5: memref<1x128xf32, #tpu.memory_space<vmem>>, %arg6: memref<1x1xf32, #tpu.memory_space<vmem>>, %arg7: memref<32x1xf32, #tpu.memory_space<vmem>>, %arg8: memref<32x1xf32, #tpu.memory_space<vmem>>) attributes {dimension_semantics = [#tpu.dimension_semantics<parallel>], iteration_bounds = array<i64: 1>, scalar_prefetch = 0 : i64, scratch_operands = 0 : i64, tpu.core_type = #tpu.core_type<tc>, window_params = [{transform_indices = @transform_0, window_bounds = array<i64: 2, 32, 256>}, {pipeline_mode = #tpu.pipeline_mode<synchronous>, transform_indices = @transform_1, window_bounds = array<i64: 256, 128>}, {pipeline_mode = #tpu.pipeline_mode<synchronous>, transform_indices = @transform_2, window_bounds = array<i64: 256, 128>}, {pipeline_mode = #tpu.pipeline_mode<synchronous>, transform_indices = @transform_3, window_bounds = array<i64: 1, 128>}, {pipeline_mode = #tpu.pipeline_mode<synchronous>, transform_indices = @transform_4, window_bounds = array<i64: 1, 128>}, {pipeline_mode = #tpu.pipeline_mode<synchronous>, transform_indices = @transform_5, window_bounds = array<i64: 1, 1>}, {transform_indices = @transform_6, window_bounds = array<i64: 32, 1>}, {transform_indices = @transform_7, window_bounds = array<i64: 32, 1>}]} {
    %c0 = arith.constant 0 : index
    %c0_0 = arith.constant 0 : index
    %c0_1 = arith.constant 0 : index
    %0 = vector.load %arg1[%c0, %c0_0, %c0_1] : memref<2x32x256xf32, #tpu.memory_space<vmem>>, vector<1x32x256xf32>
    %1 = vector.shape_cast %0 : vector<1x32x256xf32> to vector<32x256xf32>
    %2 = arith.truncf %1 : vector<32x256xf32> to vector<32x256xbf16>
    %c1 = arith.constant 1 : index
    %c0_2 = arith.constant 0 : index
    %c0_3 = arith.constant 0 : index
    %3 = vector.load %arg1[%c1, %c0_2, %c0_3] : memref<2x32x256xf32, #tpu.memory_space<vmem>>, vector<1x32x256xf32>
    %4 = vector.shape_cast %3 : vector<1x32x256xf32> to vector<32x256xf32>
    %5 = arith.truncf %4 : vector<32x256xf32> to vector<32x256xbf16>
    %c0_4 = arith.constant 0 : index
    %c0_5 = arith.constant 0 : index
    %6 = vector.load %arg2[%c0_4, %c0_5] : memref<256x128xbf16, #tpu.memory_space<vmem>>, vector<256x128xbf16>
    %cst = arith.constant dense<0.000000e+00> : vector<32x128xf32>
    %7 = tpu.matmul %2, %6, %cst {dimension_numbers = #tpu.dot_dimension_numbers<[1], [0], [0], [1], [0, 0, 1, 1], [], []>} : vector<32x256xbf16>, vector<256x128xbf16>, vector<32x128xf32> -> vector<32x128xf32>
    %c0_6 = arith.constant 0 : index
    %c0_7 = arith.constant 0 : index
    %8 = vector.load %arg3[%c0_6, %c0_7] : memref<256x128xbf16, #tpu.memory_space<vmem>>, vector<256x128xbf16>
    %cst_8 = arith.constant dense<0.000000e+00> : vector<32x128xf32>
    %9 = tpu.matmul %5, %8, %cst_8 {dimension_numbers = #tpu.dot_dimension_numbers<[1], [0], [0], [1], [0, 0, 1, 1], [], []>} : vector<32x256xbf16>, vector<256x128xbf16>, vector<32x128xf32> -> vector<32x128xf32>
    %10 = arith.addf %7, %9 : vector<32x128xf32>
    %c0_9 = arith.constant 0 : index
    %c0_10 = arith.constant 0 : index
    %11 = vector.load %arg4[%c0_9, %c0_10] : memref<1x128xf32, #tpu.memory_space<vmem>>, vector<1x128xf32>
    %12 = vector.broadcast %11 : vector<1x128xf32> to vector<32x128xf32>
    %13 = arith.addf %10, %12 : vector<32x128xf32>
    %cst_11 = arith.constant 0.000000e+00 : f32
    %14 = vector.broadcast %cst_11 : f32 to vector<32x128xf32>
    %15 = arith.cmpf ogt, %13, %14 : vector<32x128xf32>
    %16 = math.exp %13 : vector<32x128xf32>
    %cst_12 = arith.constant 1.000000e+00 : f32
    %17 = vector.broadcast %cst_12 : f32 to vector<32x128xf32>
    %18 = arith.subf %16, %17 : vector<32x128xf32>
    %cst_13 = arith.constant 1.67326319 : f32
    %19 = vector.broadcast %cst_13 : f32 to vector<32x128xf32>
    %20 = arith.mulf %19, %18 : vector<32x128xf32>
    %21 = arith.select %15, %13, %20 : vector<32x128xi1>, vector<32x128xf32>
    %cst_14 = arith.constant 1.05070102 : f32
    %22 = vector.broadcast %cst_14 : f32 to vector<32x128xf32>
    %23 = arith.mulf %22, %21 : vector<32x128xf32>
    %c0_15 = arith.constant 0 : index
    %c0_16 = arith.constant 0 : index
    %24 = vector.load %arg5[%c0_15, %c0_16] : memref<1x128xf32, #tpu.memory_space<vmem>>, vector<1x128xf32>
    %25 = vector.broadcast %24 : vector<1x128xf32> to vector<32x128xf32>
    %26 = arith.mulf %23, %25 : vector<32x128xf32>
    %cst_17 = arith.constant dense<0.000000e+00> : vector<32xf32>
    %27 = vector.multi_reduction <add>, %26, %cst_17 [1] : vector<32x128xf32> to vector<32xf32>
    %28 = vector.shape_cast %27 : vector<32xf32> to vector<32x1xf32>
    %c0_18 = arith.constant 0 : index
    %c0_19 = arith.constant 0 : index
    %29 = vector.load %arg6[%c0_18, %c0_19] : memref<1x1xf32, #tpu.memory_space<vmem>>, vector<1x1xf32>
    %30 = vector.broadcast %29 : vector<1x1xf32> to vector<32x1xf32>
    %31 = arith.addf %28, %30 : vector<32x1xf32>
    %c0_20 = arith.constant 0 : index
    %c0_21 = arith.constant 0 : index
    %32 = vector.load %arg7[%c0_20, %c0_21] : memref<32x1xf32, #tpu.memory_space<vmem>>, vector<32x1xf32>
    tpu.vector_store %arg7[%c0_20, %c0_21], %31 {strides = array<i32>} : memref<32x1xf32, #tpu.memory_space<vmem>>, vector<32x1xf32>,
    %33 = arith.negf %31 : vector<32x1xf32>
    %34 = math.exp %33 : vector<32x1xf32>
    %cst_22 = arith.constant 1.000000e+00 : f32
    %35 = vector.broadcast %cst_22 : f32 to vector<32x1xf32>
    %36 = arith.addf %35, %34 : vector<32x1xf32>
    %37 = arith.divf %35, %36 : vector<32x1xf32>
    %c0_23 = arith.constant 0 : index
    %c0_24 = arith.constant 0 : index
    %38 = vector.load %arg8[%c0_23, %c0_24] : memref<32x1xf32, #tpu.memory_space<vmem>>, vector<32x1xf32>
    tpu.vector_store %arg8[%c0_23, %c0_24], %37 {strides = array<i32>} : memref<32x1xf32, #tpu.memory_space<vmem>>, vector<32x1xf32>,
    return
  }
  func.func @transform_0(%arg0: i32) -> (i32, i32, i32) {
    %c0_i32 = arith.constant 0 : i32
    %c0_i32_0 = arith.constant 0 : i32
    %c0_i32_1 = arith.constant 0 : i32
    return %c0_i32, %arg0, %c0_i32_0 : i32, i32, i32
  }
  func.func @transform_1(%arg0: i32) -> (i32, i32) {
    %c0_i32 = arith.constant 0 : i32
    %c0_i32_0 = arith.constant 0 : i32
    %c0_i32_1 = arith.constant 0 : i32
    return %c0_i32, %c0_i32_0 : i32, i32
  }
  func.func @transform_2(%arg0: i32) -> (i32, i32) {
    %c0_i32 = arith.constant 0 : i32
    %c0_i32_0 = arith.constant 0 : i32
    %c0_i32_1 = arith.constant 0 : i32
    return %c0_i32, %c0_i32_0 : i32, i32
  }
  func.func @transform_3(%arg0: i32) -> (i32, i32) {
    %c0_i32 = arith.constant 0 : i32
    %c0_i32_0 = arith.constant 0 : i32
    %c0_i32_1 = arith.constant 0 : i32
    return %c0_i32, %c0_i32_0 : i32, i32
  }
  func.func @transform_4(%arg0: i32) -> (i32, i32) {
    %c0_i32 = arith.constant 0 : i32
    %c0_i32_0 = arith.constant 0 : i32
    %c0_i32_1 = arith.constant 0 : i32
    return %c0_i32, %c0_i32_0 : i32, i32
  }
  func.func @transform_5(%arg0: i32) -> (i32, i32) {
    %c0_i32 = arith.constant 0 : i32
    %c0_i32_0 = arith.constant 0 : i32
    %c0_i32_1 = arith.constant 0 : i32
    return %c0_i32, %c0_i32_0 : i32, i32
  }
  func.func @transform_6(%arg0: i32) -> (i32, i32) {
    %c0_i32 = arith.constant 0 : i32
    %c0_i32_0 = arith.constant 0 : i32
    return %arg0, %c0_i32 : i32, i32
  }
  func.func @transform_7(%arg0: i32) -> (i32, i32) {
    %c0_i32 = arith.constant 0 : i32
    %c0_i32_0 = arith.constant 0 : i32
    return %arg0, %c0_i32 : i32, i32
  }
}

</mosaic_0001>

<bundles_post_ra>
// kernel: forward.4
= control target key start
LH: loop header
LB: loop body
LE: loop exit
PB: predicated region body
PF: predicated region fallthrough
CT: control target
= control target key end

     0   :  { %s654_s12 = smov 0   ;;  %s656_s13 = smov 0   ;;  %s702_s0 = inlined_call_operand.vmem [shape: f32[2,32,128], index: 0, kind: input, shape index: {}]   ;;  %s703_s1 = inlined_call_operand.vmem [shape: bf16[2,128,128], index: 1, kind: input, shape index: {}]   ;;  %s704_s2 = inlined_call_operand.vmem [shape: f32[2,1,128], index: 2, kind: input, shape index: {}]   ;;  %s705_s3 = inlined_call_operand.vmem [shape: f32[2,32,128], index: 3, kind: output, shape index: {}]  }
   0x1   :  { %s658_s14 = smov 0  }
   0x2 LB: > { %s25_s15 = sadd.s32 1, %s628_s13  ;;  %p515_p0 = scmp.ge.s32.totalorder %s632_s14, 1  ;;  %s632_s14 = sphi %s658_s14, %s13_s14   ;;  %s628_s13 = sphi %s656_s13, %s707_s13   ;;  %s624_s12 = sphi %s654_s12, %s706_s12  }
   0x3   : > { %p27_p1 = scmp.ge.s32.totalorder %s25_s15, 2  ;;  %p176_p2 = scmp.lt.s32.totalorder %s632_s14, 3 }
   0x5   : > { %s709_s15 = smov (%p27_p1, %s25_s15), 0  ;;  %p177_p3 = pnand %p515_p0, %p176_p2 }
   0x6   : > { %p217_p4 = scmp.lt.s32.totalorder (!%p177_p3), %s624_s12, 1 }
   0x7   : > { %180 = sbr.rel (%p177_p3) target bundleno = 288 (0x120), region = 32 }
   0xe   : > { %s711_s12 = smov (!%p217_p4, %s624_s12), 1 }
   0xf   : > { %s538_s16 = sshll.u32 %s711_s12, 6  ;;  %s537_s20 = sshll.u32 %s711_s12, 5 }
  0x10   : > { %s230_s19 = scalar_lea.vmem %s703_s1, %s538_s16  ;;  %s224_s23 = scalar_lea.vmem %s702_s0, %s537_s20 }
  0x11   : > { %v594_v0 = vld [vmem:[%s230_s19] sm:$0xff]   ;;  %v595_v1 = vld [vmem:[%s230_s19 + $0x8] sm:$0xff]   ;;  %v596_v2 = vld [vmem:[%s230_s19 + $0x10] sm:$0xff]   ;;  %s233_s26 = scalar_lea.vmem %s704_s2, %s711_s12  ;;  %s242_s29 = scalar_lea.vmem %s705_s3, %s537_s20 }
  0x12   : > { %550 = vmatprep.subr.bf16.mxu0 %v594_v0  ;;  %v597_v3 = vld [vmem:[%s230_s19 + $0x18] sm:$0xff]   ;;  %v245_v4 = vld [vmem:[%s224_s23] sm:$0xff]  ;;  %v246_v5 = vld [vmem:[%s224_s23 + $0x8] sm:$0xff] }
  0x13   : > { %551 = vmatpush3.bf16.msra.mxu0 %v594_v0  ;;  %v249_v6 = vpack.c.bf16 %v246_v5, %v245_v4  ;;  %v598_v7 = vld [vmem:[%s230_s19 + $0x20] sm:$0xff]   ;;  %v599_v8 = vld [vmem:[%s230_s19 + $0x28] sm:$0xff]   ;;  %v600_v9 = vld [vmem:[%s230_s19 + $0x30] sm:$0xff]  }
  0x14   : > { %552 = vmatprep.subr.bf16.mxu0 %v595_v1  ;;  %v601_v10 = vld [vmem:[%s230_s19 + $0x38] sm:$0xff]   ;;  %v247_v11 = vld [vmem:[%s224_s23 + $0x10] sm:$0xff]  ;;  %v522_v14 = vld [vmem:[%s233_s26] ss:$0 sm:$0xff] }
  0x15   : > { %566 = vmatprep.mubr.bf16.mxu0 %v249_v6  ;;  %v248_v12 = vld [vmem:[%s224_s23 + $0x18] sm:$0xff] }
  0x16   : > { %v250_v13 = vpack.c.bf16 %v248_v12, %v247_v11 }
  0x17   : > { %553 = vmatpush3.bf16.msra.mxu0 %v595_v1 }
  0x18   : > { %554 = vmatprep.subr.bf16.mxu0 %v596_v2 }
  0x1b   : > { %555 = vmatpush3.bf16.msra.mxu0 %v596_v2 }
  0x1c   : > { %556 = vmatprep.subr.bf16.mxu0 %v597_v3 }
  0x1f   : > { %557 = vmatpush3.bf16.msra.mxu0 %v597_v3 }
  0x20   : > { %558 = vmatprep.subr.bf16.mxu0 %v598_v7 }
  0x23   : > { %559 = vmatpush3.bf16.msra.mxu0 %v598_v7 }
  0x24   : > { %560 = vmatprep.subr.bf16.mxu0 %v599_v8 }
  0x27   : > { %561 = vmatpush3.bf16.msra.mxu0 %v599_v8 }
  0x28   : > { %562 = vmatprep.subr.bf16.mxu0 %v600_v9 }
  0x2b   : > { %563 = vmatpush3.bf16.msra.mxu0 %v600_v9 }
  0x2c   : > { %564 = vmatprep.subr.bf16.mxu0 %v601_v10 }
  0x2f   : > { %565 = vmatpush3.bf16.msra.mxu0 %v601_v10 }
  0x32   : > { %567 = vmatmul.mubr.bf16.vlgmr.msra.gmra.mrb[0].mxu0 %v250_v13 }
 0x105   : > { %v568_v15 = vpop.f32.mrb[0].mxu0 }
 0x106   : > { %v365_v16 = vadd.f32 %v568_v15, %v522_v14  ;;  %v356_v17 = vpop.f32.mrb[1].mxu0 }
 0x107   : > { %v357_v18 = vadd.f32 %v522_v14, %v356_v17  ;;  %v569_v19 = vpop.f32.mrb[2].mxu0 }
 0x108   : > { %v379_v20 = vmul.f32 1.442695, %v365_v16  ;;  %v368_v21 = vadd.f32 %v569_v19, %v522_v14  ;;  %v359_v22 = vpop.f32.mrb[3].mxu0  ;;  %vm373_vm0 = vcmp.gt.f32.partialorder %v365_v16, 0.0 }
 0x109   : > { %v375_v23 = vmul.f32 1.442695, %v357_v18  ;;  %v360_v24 = vadd.f32 %v522_v14, %v359_v22  ;;  %vm371_vm1 = vcmp.gt.f32.partialorder %v357_v18, 0.0 }
 0x10a   : > { %602 = vpow2.f32 %v379_v20  ;;  %v381_v25 = vmul.f32 1.442695, %v368_v21  ;;  %vm374_vm2 = vcmp.gt.f32.partialorder %v368_v21, 0.0 }
 0x10b   : > { %604 = vpow2.f32 %v375_v23  ;;  %v377_v26 = vmul.f32 1.442695, %v360_v24  ;;  %vm372_vm3 = vcmp.gt.f32.partialorder %v360_v24, 0.0 }
 0x10c   : > { %606 = vpow2.f32 %v381_v25 }
 0x10d   : > { %608 = vpow2.f32 %v377_v26 }
 0x114   : > { %v603_v27 = vpop.eup %602 }
 0x115   : > { %v605_v28 = vpop.eup %604  ;;  %v533_v29 = vadd.f32 -1.0, %v603_v27 }
 0x116   : > { %v607_v30 = vpop.eup %606  ;;  %v531_v31 = vadd.f32 -1.0, %v605_v28 }
 0x117   : > { %v609_v32 = vpop.eup %608  ;;  %v389_v33 = vmul.f32 1.6732632, %v533_v29  ;;  %v534_v34 = vadd.f32 -1.0, %v607_v30 }
 0x118   : > { %v387_v35 = vmul.f32 1.6732632, %v531_v31  ;;  %v532_v36 = vadd.f32 -1.0, %v609_v32 }
 0x119   : > { %v393_v37 = vsel %vm373_vm0, %v365_v16, %v389_v33  ;;  %v390_v38 = vmul.f32 1.6732632, %v534_v34 }
 0x11a   : > { %v397_v39 = vmul.f32 1.050701, %v393_v37  ;;  %v391_v40 = vsel %vm371_vm1, %v357_v18, %v387_v35  ;;  %v388_v41 = vmul.f32 1.6732632, %v532_v36 }
 0x11b   : > { %v395_v42 = vmul.f32 1.050701, %v391_v40  ;;  %v394_v43 = vsel %vm374_vm2, %v368_v21, %v390_v38 }
 0x11c   : > { %401 = vst [vmem:[%s242_s29 + $0x10] sm:$0xff] %v397_v39  ;;  %v398_v44 = vmul.f32 1.050701, %v394_v43  ;;  %v392_v45 = vsel %vm372_vm3, %v360_v24, %v388_v41 }
 0x11d   : > { %399 = vst [vmem:[%s242_s29] sm:$0xff] %v395_v42  ;;  %v396_v46 = vmul.f32 1.050701, %v392_v45 }
 0x11e   : > { %402 = vst [vmem:[%s242_s29 + $0x18] sm:$0xff] %v398_v44 }
 0x11f   : > { %400 = vst [vmem:[%s242_s29 + $0x8] sm:$0xff] %v396_v46 }
 0x120 PF: > { %s13_s14 = sadd.s32 1, %s632_s14   ;;  %s706_s12 = smov %s628_s13 }
 0x121   : > { %p10_p5 = scmp.ge.s32.totalorder %s13_s14, 4   ;;  %s707_s13 = smov %s709_s15 }
 0x123   :  { %12 = sbr.rel (!%p10_p5) target bundleno = 2 (0x2), region = 68 }

// kernel: forward.7
= control target key start
LH: loop header
LB: loop body
LE: loop exit
PB: predicated region body
PF: predicated region fallthrough
CT: control target
= control target key end

     0   :  { %vm476_vm4 = vcmask 7168   ;;  %s905_s2 = inlined_call_operand.vmem [shape: bf16[256,128], index: 2, kind: input, shape index: {}]   ;;  %s906_s1 = inlined_call_operand.vmem [shape: bf16[256,128], index: 1, kind: input, shape index: {}]   ;;  %s907_s0 = inlined_call_operand.vmem [shape: f32[2,32,256], index: 0, kind: input, shape index: {}]   ;;  %s908_s5 = inlined_call_operand.<no memory space> [shape: f32[1,1], index: 5, kind: input, shape index: {}]   ;;  %s909_s3 = inlined_call_operand.vmem [shape: f32[1,128], index: 3, kind: input, shape index: {}]   ;;  %s910_s4 = inlined_call_operand.vmem [shape: f32[1,128], index: 4, kind: input, shape index: {}]   ;;  %s911_s6 = inlined_call_operand.vmem [shape: f32[32,1], index: 6, kind: output, shape index: {0}]   ;;  %s912_s7 = inlined_call_operand.vmem [shape: f32[32,1], index: 7, kind: output, shape index: {1}]  }
   0x1   :  { %v624_v0 = vld [vmem:[%s905_s2 + $0x40] sm:$0xff]   ;;  %v628_v4 = vld [vmem:[%s905_s2 + $0x48] sm:$0xff]   ;;  %v632_v8 = vld [vmem:[%s905_s2 + $0x50] sm:$0xff]   ;;  %v13_v56 = vstv %s908_s5 }
   0x2   :  { %v625_v1 = vld [vmem:[%s906_s1 + $0x40] sm:$0xff]   ;;  %568 = vmatprep.subr.bf16.mxu0 %v624_v0  ;;  %v629_v5 = vld [vmem:[%s906_s1 + $0x48] sm:$0xff]   ;;  %v633_v9 = vld [vmem:[%s906_s1 + $0x50] sm:$0xff]   ;;  %14 = vst [vmem:[#allocation2] sm:$0x1] %v13_v56 }
   0x3   :  { %v626_v2 = vld [vmem:[%s905_s2] sm:$0xff]   ;;  %596 = vmatprep.subr.bf16.mxu1 %v625_v1  ;;  %v630_v6 = vld [vmem:[%s905_s2 + $0x8] sm:$0xff]   ;;  %v634_v10 = vld [vmem:[%s905_s2 + $0x10] sm:$0xff]  }
   0x4   :  { %v627_v3 = vld [vmem:[%s906_s1] sm:$0xff]   ;;  %569 = vmatpush3.bf16.msra.mxu0 %v626_v2  ;;  %v631_v7 = vld [vmem:[%s906_s1 + $0x8] sm:$0xff]   ;;  %v635_v11 = vld [vmem:[%s906_s1 + $0x10] sm:$0xff]  }
   0x5   :  { %597 = vmatpush3.bf16.msra.mxu1 %v627_v3  ;;  %570 = vmatprep.subr.bf16.mxu0 %v628_v4  ;;  %v636_v12 = vld [vmem:[%s905_s2 + $0x58] sm:$0xff]   ;;  %v640_v16 = vld [vmem:[%s905_s2 + $0x60] sm:$0xff]   ;;  %v644_v20 = vld [vmem:[%s905_s2 + $0x68] sm:$0xff]  }
   0x6   :  { %598 = vmatprep.subr.bf16.mxu1 %v629_v5  ;;  %v637_v13 = vld [vmem:[%s906_s1 + $0x58] sm:$0xff]   ;;  %v641_v17 = vld [vmem:[%s906_s1 + $0x60] sm:$0xff]   ;;  %v645_v21 = vld [vmem:[%s906_s1 + $0x68] sm:$0xff]  }
   0x7   :  { %v638_v14 = vld [vmem:[%s905_s2 + $0x18] sm:$0xff]   ;;  %v642_v18 = vld [vmem:[%s905_s2 + $0x20] sm:$0xff]   ;;  %v646_v22 = vld [vmem:[%s905_s2 + $0x28] sm:$0xff]  }
   0x8   :  { %571 = vmatpush3.bf16.msra.mxu0 %v630_v6  ;;  %v639_v15 = vld [vmem:[%s906_s1 + $0x18] sm:$0xff]   ;;  %v643_v19 = vld [vmem:[%s906_s1 + $0x20] sm:$0xff]   ;;  %v647_v23 = vld [vmem:[%s906_s1 + $0x28] sm:$0xff]  }
   0x9   :  { %599 = vmatpush3.bf16.msra.mxu1 %v631_v7  ;;  %572 = vmatprep.subr.bf16.mxu0 %v632_v8  ;;  %v648_v24 = vld [vmem:[%s905_s2 + $0x70] sm:$0xff]   ;;  %v652_v28 = vld [vmem:[%s905_s2 + $0x78] sm:$0xff]   ;;  %v518_v32 = vld [vmem:[%s907_s0 + $0x48] sm:$0xff] }
   0xa   :  { %600 = vmatprep.subr.bf16.mxu1 %v633_v9  ;;  %v649_v25 = vld [vmem:[%s906_s1 + $0x70] sm:$0xff]   ;;  %v653_v29 = vld [vmem:[%s906_s1 + $0x78] sm:$0xff]   ;;  %v29_v34 = vld [vmem:[%s907_s0 + $0x8] sm:$0xff] }
   0xb   :  { %v650_v26 = vld [vmem:[%s905_s2 + $0x30] sm:$0xff]   ;;  %v654_v30 = vld [vmem:[%s905_s2 + $0x38] sm:$0xff]   ;;  %v517_v37 = vld [vmem:[%s907_s0 + $0x40] sm:$0xff] }
   0xc   :  { %573 = vmatpush3.bf16.msra.mxu0 %v634_v10  ;;  %v651_v27 = vld [vmem:[%s906_s1 + $0x30] sm:$0xff]   ;;  %v655_v31 = vld [vmem:[%s906_s1 + $0x38] sm:$0xff]   ;;  %v28_v41 = vld [vmem:[%s907_s0] sm:$0xff] }
   0xd   :  { %601 = vmatpush3.bf16.msra.mxu1 %v635_v11  ;;  %574 = vmatprep.subr.bf16.mxu0 %v636_v12  ;;  %v520_v33 = vld [vmem:[%s907_s0 + $0x58] sm:$0xff]  ;;  %v519_v38 = vld [vmem:[%s907_s0 + $0x50] sm:$0xff]  ;;  %v522_v43 = vld [vmem:[%s907_s0 + $0x68] sm:$0xff] }
   0xe   :  { %602 = vmatprep.subr.bf16.mxu1 %v637_v13  ;;  %v50_v35 = vpack.c.bf16 %v520_v33, %v518_v32  ;;  %v31_v36 = vld [vmem:[%s907_s0 + $0x18] sm:$0xff]  ;;  %v49_v40 = vpack.c.bf16 %v519_v38, %v517_v37  ;;  %v30_v42 = vld [vmem:[%s907_s0 + $0x10] sm:$0xff]  ;;  %v33_v46 = vld [vmem:[%s907_s0 + $0x28] sm:$0xff] }
   0xf   :  { %v37_v39 = vpack.c.bf16 %v31_v36, %v29_v34  ;;  %v36_v44 = vpack.c.bf16 %v30_v42, %v28_v41  ;;  %v524_v45 = vld [vmem:[%s907_s0 + $0x78] sm:$0xff]  ;;  %v521_v50 = vld [vmem:[%s907_s0 + $0x60] sm:$0xff]  ;;  %v523_v51 = vld [vmem:[%s907_s0 + $0x70] sm:$0xff] }
  0x10   :  { %575 = vmatpush3.bf16.msra.mxu0 %v638_v14  ;;  %245 = vmatprep.mubr.bf16.mxu0 %v50_v35  ;;  %v35_v47 = vld [vmem:[%s907_s0 + $0x38] sm:$0xff]  ;;  %v52_v48 = vpack.c.bf16 %v524_v45, %v522_v43  ;;  %v32_v52 = vld [vmem:[%s907_s0 + $0x20] sm:$0xff]  ;;  %v34_v53 = vld [vmem:[%s907_s0 + $0x30] sm:$0xff]  ;;  %v51_v54 = vpack.c.bf16 %v523_v51, %v521_v50 }
  0x11   :  { %603 = vmatpush3.bf16.msra.mxu1 %v639_v15  ;;  %576 = vmatprep.subr.bf16.mxu0 %v640_v16  ;;  %v39_v49 = vpack.c.bf16 %v35_v47, %v33_v46  ;;  %v38_v55 = vpack.c.bf16 %v34_v53, %v32_v52  ;;  %v557_v2 = vld [vmem:[%s909_s3] ss:$0 sm:$0xff] }
  0x12   :  { %604 = vmatprep.subr.bf16.mxu1 %v641_v17  ;;  %390 = vmatprep.mubr.bf16.mxu1 %v37_v39  ;;  %v562_v36 = vld [vmem:[%s910_s4] ss:$0 sm:$0xff] }
  0x14   :  { %577 = vmatpush3.bf16.msra.mxu0 %v642_v18 }
  0x15   :  { %605 = vmatpush3.bf16.msra.mxu1 %v643_v19  ;;  %578 = vmatprep.subr.bf16.mxu0 %v644_v20 }
  0x16   :  { %606 = vmatprep.subr.bf16.mxu1 %v645_v21 }
  0x18   :  { %579 = vmatpush3.bf16.msra.mxu0 %v646_v22 }
  0x19   :  { %607 = vmatpush3.bf16.msra.mxu1 %v647_v23  ;;  %580 = vmatprep.subr.bf16.mxu0 %v648_v24 }
  0x1a   :  { %608 = vmatprep.subr.bf16.mxu1 %v649_v25 }
  0x1c   :  { %581 = vmatpush3.bf16.msra.mxu0 %v650_v26 }
  0x1d   :  { %609 = vmatpush3.bf16.msra.mxu1 %v651_v27  ;;  %582 = vmatprep.subr.bf16.mxu0 %v652_v28 }
  0x1e   :  { %610 = vmatprep.subr.bf16.mxu1 %v653_v29 }
  0x20   :  { %583 = vmatpush3.bf16.msra.mxu0 %v654_v30 }
  0x21   :  { %611 = vmatpush3.bf16.msra.mxu1 %v655_v31 }
  0x23   :  { %246 = vmatmul.mubr.bf16.vlgmr.msra.gmra.mrb[0].mxu0 %v49_v40 }
  0x24   :  { %391 = vmatmul.mubr.bf16.vlgmr.msra.gmra.mrb[0].mxu1 %v36_v44  ;;  %253 = vmatprep.mubr.bf16.mxu0 %v52_v48 }
  0x25   :  { %398 = vmatprep.mubr.bf16.mxu1 %v39_v49 }
  0x2b   :  { %254 = vmatmul.mubr.bf16.gmra.mrb[4].mxu0 %v51_v54 }
  0x2c   :  { %399 = vmatmul.mubr.bf16.gmra.mrb[4].mxu1 %v38_v55  ;;  %v563_v55 = vld [vmem:[#allocation2] ss:$0 sm:$0xff] }
  0xf6   :  { %v584_v57 = vpop.f32.mrb[0].mxu0 }
  0xf7   :  { %v612_v58 = vpop.f32.mrb[0].mxu1  ;;  %v585_v59 = vpop.f32.mrb[1].mxu0 }
  0xf8   :  { %v586_v60 = vadd.f32 %v585_v59, %v584_v57  ;;  %v613_v61 = vpop.f32.mrb[1].mxu1  ;;  %v587_v62 = vpop.f32.mrb[2].mxu0 }
  0xf9   :  { %v614_v63 = vadd.f32 %v613_v61, %v612_v58  ;;  %v615_v0 = vpop.f32.mrb[2].mxu1  ;;  %v588_v1 = vpop.f32.mrb[3].mxu0 }
  0xfa   :  { %v589_v3 = vadd.f32 %v588_v1, %v587_v62  ;;  %v616_v4 = vpop.f32.mrb[3].mxu1 }
  0xfb   :  { %v393_v5 = vadd.f32 %v614_v63, %v586_v60  ;;  %v617_v6 = vadd.f32 %v616_v4, %v615_v0 }
  0xfd   :  { %v414_v7 = vadd.f32 %v557_v2, %v393_v5  ;;  %v396_v8 = vadd.f32 %v617_v6, %v589_v3 }
  0xfe   :  { %v590_v9 = vpop.f32.mrb[4].mxu0 }
  0xff   :  { %v422_v10 = vmul.f32 1.442695, %v414_v7  ;;  %v415_v11 = vadd.f32 %v557_v2, %v396_v8  ;;  %v618_v12 = vpop.f32.mrb[4].mxu1  ;;  %v591_v13 = vpop.f32.mrb[5].mxu0  ;;  %vm418_vm0 = vcmp.gt.f32.partialorder %v414_v7, 0.0 }
 0x100   :  { %v592_v14 = vadd.f32 %v591_v13, %v590_v9  ;;  %v619_v15 = vpop.f32.mrb[5].mxu1  ;;  %v593_v16 = vpop.f32.mrb[6].mxu0 }
 0x101   :  { %656 = vpow2.f32 %v422_v10  ;;  %v424_v17 = vmul.f32 1.442695, %v415_v11  ;;  %v620_v18 = vadd.f32 %v619_v15, %v618_v12  ;;  %v621_v19 = vpop.f32.mrb[6].mxu1  ;;  %v594_v20 = vpop.f32.mrb[7].mxu0  ;;  %vm419_vm1 = vcmp.gt.f32.partialorder %v415_v11, 0.0 }
 0x102   :  { %v595_v21 = vadd.f32 %v594_v20, %v593_v16  ;;  %v622_v22 = vpop.f32.mrb[7].mxu1 }
 0x103   :  { %658 = vpow2.f32 %v424_v17  ;;  %v401_v23 = vadd.f32 %v620_v18, %v592_v14  ;;  %v623_v24 = vadd.f32 %v622_v22, %v621_v19 }
 0x105   :  { %v416_v25 = vadd.f32 %v557_v2, %v401_v23  ;;  %v404_v26 = vadd.f32 %v623_v24, %v595_v21 }
 0x107   :  { %v426_v27 = vmul.f32 1.442695, %v416_v25  ;;  %v417_v28 = vadd.f32 %v557_v2, %v404_v26  ;;  %vm420_vm2 = vcmp.gt.f32.partialorder %v416_v25, 0.0 }
 0x109   :  { %660 = vpow2.f32 %v426_v27  ;;  %v428_v29 = vmul.f32 1.442695, %v417_v28  ;;  %vm421_vm3 = vcmp.gt.f32.partialorder %v417_v28, 0.0 }
 0x10b   :  { %v657_v30 = vpop.eup %656  ;;  %662 = vpow2.f32 %v428_v29 }
 0x10c   :  { %v558_v31 = vadd.f32 -1.0, %v657_v30 }
 0x10d   :  { %v659_v32 = vpop.eup %658 }
 0x10e   :  { %v434_v33 = vmul.f32 1.6732632, %v558_v31  ;;  %v559_v34 = vadd.f32 -1.0, %v659_v32 }
 0x110   :  { %v438_v35 = vsel %vm418_vm0, %v414_v7, %v434_v33  ;;  %v435_v37 = vmul.f32 1.6732632, %v559_v34 }
 0x111   :  { %v442_v38 = vmul.f32 1.050701, %v438_v35 }
 0x112   :  { %v439_v39 = vsel %vm419_vm1, %v415_v11, %v435_v37 }
 0x113   :  { %v661_v40 = vpop.eup %660  ;;  %v453_v41 = vmul.f32 %v562_v36, %v442_v38  ;;  %v443_v42 = vmul.f32 1.050701, %v439_v39 }
 0x114   :  { %v560_v43 = vadd.f32 -1.0, %v661_v40 }
 0x115   :  { %v663_v44 = vpop.eup %662  ;;  %457 = vadd.xlane.f32.xlu0 %v453_v41  ;;  %v454_v47 = vmul.f32 %v562_v36, %v443_v42 }
 0x116   :  { %v436_v45 = vmul.f32 1.6732632, %v560_v43  ;;  %v561_v46 = vadd.f32 -1.0, %v663_v44 }
 0x118   :  { %v440_v48 = vsel %vm420_vm2, %v416_v25, %v436_v45  ;;  %v437_v49 = vmul.f32 1.6732632, %v561_v46 }
 0x119   :  { %459 = vadd.xlane.f32.xlu0 %v454_v47  ;;  %v444_v50 = vmul.f32 1.050701, %v440_v48 }
 0x11a   :  { %v441_v51 = vsel %vm421_vm3, %v417_v28, %v437_v49 }
 0x11b   :  { %v455_v52 = vmul.f32 %v562_v36, %v444_v50  ;;  %v445_v53 = vmul.f32 1.050701, %v441_v51 }
 0x11d   :  { %461 = vadd.xlane.f32.xlu1 %v455_v52  ;;  %v456_v54 = vmul.f32 %v562_v36, %v445_v53 }
 0x121   :  { %463 = vadd.xlane.f32.xlu1 %v456_v54 }
 0x1a2   :  { %v458_v56 = vpop.xlane.xlu0 %457 }
 0x1a3   :  { %v472_v57 = vadd.f32 %v563_v55, %v458_v56 }
 0x1a5   :  { %477 = vst.msk [vmem:[%s911_s6] sm:$0xff] %vm476_vm4, %v472_v57  ;;  %v564_v58 = vmul.f32 -1.442695, %v472_v57 }
 0x1a6   :  { %v460_v59 = vpop.xlane.xlu0 %459 }
 0x1a7   :  { %664 = vpow2.f32 %v564_v58  ;;  %v473_v60 = vadd.f32 %v563_v55, %v460_v59 }
 0x1a9   :  { %478 = vst.msk [vmem:[%s911_s6 + $0x8] sm:$0xff] %vm476_vm4, %v473_v60  ;;  %v565_v61 = vmul.f32 -1.442695, %v473_v60 }
 0x1aa   :  { %v462_v62 = vpop.xlane.xlu1 %461 }
 0x1ab   :  { %666 = vpow2.f32 %v565_v61  ;;  %v474_v63 = vadd.f32 %v563_v55, %v462_v62 }
 0x1ad   :  { %479 = vst.msk [vmem:[%s911_s6 + $0x10] sm:$0xff] %vm476_vm4, %v474_v63  ;;  %v566_v0 = vmul.f32 -1.442695, %v474_v63 }
 0x1ae   :  { %v464_v1 = vpop.xlane.xlu1 %463 }
 0x1af   :  { %668 = vpow2.f32 %v566_v0  ;;  %v475_v2 = vadd.f32 %v563_v55, %v464_v1 }
 0x1b1   :  { %v665_v3 = vpop.eup %664  ;;  %480 = vst.msk [vmem:[%s911_s6 + $0x18] sm:$0xff] %vm476_vm4, %v475_v2  ;;  %v567_v4 = vmul.f32 -1.442695, %v475_v2 }
 0x1b2   :  { %v493_v5 = vadd.f32 1.0, %v665_v3 }
 0x1b3   :  { %670 = vpow2.f32 %v567_v4 }
 0x1b4   :  { %672 = vrcp.f32 %v493_v5 }
 0x1b5   :  { %v667_v6 = vpop.eup %666 }
 0x1b6   :  { %v494_v7 = vadd.f32 1.0, %v667_v6 }
 0x1b8   :  { %674 = vrcp.f32 %v494_v7 }
 0x1b9   :  { %v669_v8 = vpop.eup %668 }
 0x1ba   :  { %v495_v9 = vadd.f32 1.0, %v669_v8 }
 0x1bc   :  { %676 = vrcp.f32 %v495_v9 }
 0x1bd   :  { %v671_v10 = vpop.eup %670 }
 0x1be   :  { %v673_v11 = vpop.eup %672  ;;  %v496_v12 = vadd.f32 1.0, %v671_v10 }
 0x1bf   :  { %505 = vst.msk [vmem:[%s912_s7] sm:$0xff] %vm476_vm4, %v673_v11 }
 0x1c0   :  { %678 = vrcp.f32 %v496_v12 }
 0x1c2   :  { %v675_v13 = vpop.eup %674 }
 0x1c3   :  { %506 = vst.msk [vmem:[%s912_s7 + $0x8] sm:$0xff] %vm476_vm4, %v675_v13 }
 0x1c6   :  { %v677_v14 = vpop.eup %676 }
 0x1c7   :  { %507 = vst.msk [vmem:[%s912_s7 + $0x10] sm:$0xff] %vm476_vm4, %v677_v14 }
 0x1ca   :  { %v679_v15 = vpop.eup %678 }
 0x1cb   :  { %508 = vst.msk [vmem:[%s912_s7 + $0x18] sm:$0xff] %vm476_vm4, %v679_v15 }

// kernel: forward.6
= control target key start
LH: loop header
LB: loop body
LE: loop exit
PB: predicated region body
PF: predicated region fallthrough
CT: control target
= control target key end

     0   :  { %10 = vsyncpa [#allocation4], 0  ;;  %s6862_s0 = inlined_call_operand.vmem [shape: f32[2,4,8,256], index: 0, kind: input, shape index: {}]   ;;  %s6863_s1 = inlined_call_operand.vmem [shape: bf16[2,256,768], index: 1, kind: input, shape index: {}]   ;;  %s6864_s2 = inlined_call_operand.hbm [shape: bf16[2,256,768], index: 2, kind: input, shape index: {}]   ;;  %s6865_s3 = inlined_call_operand.vmem [shape: f32[2,1,768], index: 3, kind: input, shape index: {}]   ;;  %s6866_s4 = inlined_call_operand.vmem [shape: f32[2,1,768], index: 4, kind: input, shape index: {}]   ;;  %s6867_s5 = inlined_call_operand.vmem [shape: f32[2,4,8,256], index: 5, kind: output, shape index: {}]  }
   0x1   :  { %12 = vsyncpa [#allocation4 + $0x1], 0  ;;  %s5480_s18 = smov 0   ;;  %s5482_s19 = smov 0  }
   0x2   :  { %s5484_s20 = smov 0   ;;  %s5486_s21 = smov 0  }
   0x3 LB: > { %s5499_s22 = sadd.s32 4294967295, %s5444_s21   ;;  %s5502_s23 = sadd.s32 1, %s5444_s21   ;;  %s5444_s21 = sphi %s5486_s21, %s7009_s21   ;;  %s5440_s20 = sphi %s5484_s20, %s7008_s20   ;;  %s5436_s19 = sphi %s5482_s19, %s7007_s19   ;;  %s5432_s18 = sphi %s5480_s18, %s7006_s18  }
   0x4   : > { %s74_s24 = ssub.s32 %s5444_s21, %s5502_s23  ;;  %s77_s25 = sadd.s32 1, %s5440_s20 }
   0x5   : > { %p75_p0 = scmp.eq.s32.totalorder %s74_s24, 0  ;;  %p84_p1 = scmp.ne.s32.totalorder %s5440_s20, %s5436_s19 }
   0x6   : > { %p85_p2 = scmp.eq.s32.totalorder %s5444_s21, 0  ;;  %p90_p3 = scmp.ne.s32.totalorder %s5436_s19, %s5432_s18 }
   0x7   : > { %s5512_s26 = scalar_select %p75_p0, %s5440_s20, %s77_s25  }
   0x8   : > { %p86_p4 = por %p85_p2, %p84_p1  ;;  %p91_p5 = scmp.eq.s32.totalorder %s5499_s22, 0 }
   0x9   : > { %p4805_p6 = scmp.lt.s32.totalorder %s5444_s21, 2  ;;  %s208_s28 = sand.u32 1, %s5440_s20  }
   0xa   : > { %p5516_p7 = por %p91_p5, %p90_p3  ;;  %s4794_s29 = smul.u32 768, %s208_s28 }
   0xb   : > { %s4795_s30 = smul.u32 12288, %s5444_s21  ;;  %p5522_p8 = pnand %p4805_p6, %p86_p4 }
   0xc   : > { %s212_s10 = scalar_lea.vmem [#allocation3], %s4794_s29  ;;  %s5534_s12 = scalar_lea.sflag [#allocation4], %s208_s28 }
   0xd   : > { %s5529_s9 = scalar_lea.hbm %s6864_s2, %s4795_s30  ;;  %s219_s11 = sshll.u32 %s212_s10, 4  ;;  %s5531_s11 = int_to_ptr.vmem [resolvable:$true] %s219_s11 }
   0xe   : > { %s5380_s13 = scalar_lea.hbm %s5529_s9, 12288  ;;  %p5382_p11 = pneg %p5522_p8 }
   0xf   : > { %p5381_p10 = scmp.ne.s32.totalorder %s5529_s9, %s5380_s13  ;;  %s5385_s16 = scalar_lea.hbm %s6864_s2, 24576 }
  0x10   : > { %p5386_p0 = scmp.lt.u32.totalorder %s5529_s9, %s6864_s2  ;;  %p5387_p1 = scmp.lt.u32.totalorder %s5385_s16, %s5380_s13 }
  0x11   : > { %p5383_p12 = pnand %p5382_p11, %p5381_p10  ;;  %p5389_p3 = scmp.lt.u32.totalorder %s5380_s13, %s5529_s9 }
  0x12   : > { %p5388_p2 = por %p5387_p1, %p5386_p0 }
  0x13   : > { %p5384_p13 = pneg %p5383_p12 }
  0x14   : > { %p5390_p4 = por %p5389_p3, %p5388_p2 }
  0x16   : > { %p5391_p5 = pnand %p5390_p4, %p5384_p13 }
  0x18   : > { %5394 = shalt.err (!%p5391_p5)
}
  0x19   : > { %s5395_s24 = scalar_lea.vmem %s5531_s11, 12288  ;;  %s5446_s25 = smov [#allocation3]  }
  0x1a   : > { %p5396_p6 = scmp.ne.s32.totalorder %s5531_s11, %s5395_s24  ;;  %s5400_s28 = sshll.u32 %s5446_s25, 4  ;;  %s5401_s28 = int_to_ptr.vmem [resolvable:$false] %s5400_s28 }
  0x1b   : > { %s5402_s29 = scalar_lea.vmem %s5401_s28, 24576  ;;  %p5403_p9 = scmp.lt.s32.totalorder %s5531_s11, %s5401_s28 }
  0x1c   : > { %p5398_p10 = pnand %p5396_p6, %p5382_p11  ;;  %p5404_p0 = scmp.lt.s32.totalorder %s5402_s29, %s5395_s24 }
  0x1e   : > { %p5399_p12 = pneg %p5398_p10  ;;  %p5405_p1 = por %p5404_p0, %p5403_p9 }
  0x20   : > { %p5406_p2 = pnand %p5405_p1, %p5399_p12 }
  0x22   : > { %5409 = shalt.err (!%p5406_p2)
}
  0x23   : > { %s5447_s30 = smov 384   ;;  %s5448_s7 = smov 24  }
  0x24   : > { %4804 = dma.hbm_to_vmem [thread:$0]  (!%p5522_p8), %s5529_s9, 12288, %s5531_s11, %s5534_s12, %s5447_s30, %s5447_s30, %s5448_s7  }
  0x25   : > { %p241_p11 = scmp.lt.s32.totalorder %s5444_s21, 3  ;;  %p6909_p13 = scmp.ge.s32.totalorder %s5444_s21, 1 }
  0x27   : > { %p242_p3 = pnand %p6909_p13, %p241_p11 }
  0x29   : > { %245 = sbr.rel (%p242_p3) target bundleno = 1460 (0x5b4), region = 40 }
  0x30   : > { %s247_s8 = sand.u32 1, %s5436_s19  }
  0x31   : > { %s4796_s10 = smul.u32 768, %s247_s8  ;;  %s248_s13 = scalar_lea.sflag [#allocation4], %s247_s8 }
  0x33   : > { %s5566_s14 = scalar_lea.vmem [#allocation3], %s4796_s10 }
  0x34   : > { %5427 = dma.done.wait (%p5516_p7), %s248_s13, 12288  }
  0x35   : > { %5429 = vsyncadd (%p5516_p7), %s248_s13, 4294955008  ;;  %p296_p9 = scmp.lt.s32.totalorder %s5499_s22, 1 }
  0x37   : > { %s7011_s22 = smov (!%p296_p9, %s5499_s22), 1 }
  0x38   : > { %s4797_s21 = smul.u32 768, %s7011_s22  ;;  %s4792_s27 = sshll.u32 %s7011_s22, 6 }
  0x39   : > { %s5632_s16 = scalar_lea.vmem %s6862_s0, %s4792_s27  ;;  %s4798_s17 = smul.u32 6, %s7011_s22 }
  0x3a   : > { %s5580_s11 = scalar_lea.vmem %s6863_s1, %s4797_s21  ;;  %v321_v46 = vld [vmem:[%s5632_s16 + $0x8] sm:$0xff]  ;;  %v323_v49 = vld [vmem:[%s5632_s16 + $0x18] sm:$0xff]  ;;  %s6292_s10 = scalar_lea.vmem %s6867_s5, %s4792_s27 }
  0x3b   : > { %v4841_v0 = vld [vmem:[%s5580_s11 + $0x4] ss:$24 sps:$4 sm:$0xff]   ;;  %v4845_v2 = vld [vmem:[%s5580_s11] ss:$24 sps:$4 sm:$0xff]   ;;  %v4847_v4 = vld [vmem:[%s5580_s11 + $0x34] ss:$24 sps:$4 sm:$0xff]   ;;  %v5641_v51 = vpack.c.bf16 %v323_v49, %v321_v46  ;;  %s309_s25 = scalar_lea.vmem %s6865_s3, %s4798_s17  ;;  %s313_s30 = scalar_lea.vmem %s6866_s4, %s4798_s17 }
  0x3c   : > { %v4843_v1 = vld [vmem:[%s5580_s11 + $0xc] ss:$24 sps:$4 sm:$0xff]   ;;  %940 = vmatprep.subr.bf16.mxu0 %v4841_v0  ;;  %v4846_v3 = vld [vmem:[%s5580_s11 + $0x8] ss:$24 sps:$4 sm:$0xff]   ;;  %v4849_v5 = vld [vmem:[%s5580_s11 + $0x3c] ss:$24 sps:$4 sm:$0xff]  }
  0x3d   : > { %993 = vmatprep.subr.bf16.mxu1 %v4843_v1  ;;  %941 = vmatpush1.bf16.msra.mxu0 %v4845_v2  ;;  %v4851_v6 = vld [vmem:[%s5580_s11 + $0x30] ss:$24 sps:$4 sm:$0xff]   ;;  %v4853_v8 = vld [vmem:[%s5580_s11 + $0x64] ss:$24 sps:$4 sm:$0xff]   ;;  %v4857_v10 = vld [vmem:[%s5580_s11 + $0x60] ss:$24 sps:$4 sm:$0xff]  }
  0x3e   : > { %994 = vmatpush1.bf16.msra.mxu1 %v4846_v3  ;;  %942 = vmatprep.subr.bf16.mxu0 %v4847_v4  ;;  %v4852_v7 = vld [vmem:[%s5580_s11 + $0x38] ss:$24 sps:$4 sm:$0xff]   ;;  %v4855_v9 = vld [vmem:[%s5580_s11 + $0x6c] ss:$24 sps:$4 sm:$0xff]   ;;  %v4858_v11 = vld [vmem:[%s5580_s11 + $0x68] ss:$24 sps:$4 sm:$0xff]  }
  0x3f   : > { %995 = vmatprep.subr.bf16.mxu1 %v4849_v5  ;;  %v4859_v12 = vld [vmem:[%s5580_s11 + $0x94] ss:$24 sps:$4 sm:$0xff]   ;;  %v4863_v14 = vld [vmem:[%s5580_s11 + $0x90] ss:$24 sps:$4 sm:$0xff]   ;;  %v4865_v16 = vld [vmem:[%s5580_s11 + $0xc4] ss:$24 sps:$4 sm:$0xff]   ;;  %972 = vmatprep.mubr.bf16.mxu0 %v5641_v51 }
  0x40   : > { %v4861_v13 = vld [vmem:[%s5580_s11 + $0x9c] ss:$24 sps:$4 sm:$0xff]   ;;  %v4864_v15 = vld [vmem:[%s5580_s11 + $0x98] ss:$24 sps:$4 sm:$0xff]   ;;  %v4867_v17 = vld [vmem:[%s5580_s11 + $0xcc] ss:$24 sps:$4 sm:$0xff]   ;;  %1025 = vmatprep.mubr.bf16.mxu1 %v5641_v51 }
  0x41   : > { %943 = vmatpush1.bf16.msra.mxu0 %v4851_v6  ;;  %v4869_v18 = vld [vmem:[%s5580_s11 + $0xc0] ss:$24 sps:$4 sm:$0xff]   ;;  %v4871_v20 = vld [vmem:[%s5580_s11 + $0xf4] ss:$24 sps:$4 sm:$0xff]   ;;  %v4875_v22 = vld [vmem:[%s5580_s11 + $0xf0] ss:$24 sps:$4 sm:$0xff]  }
  0x42   : > { %996 = vmatpush1.bf16.msra.mxu1 %v4852_v7  ;;  %944 = vmatprep.subr.bf16.mxu0 %v4853_v8  ;;  %v4870_v19 = vld [vmem:[%s5580_s11 + $0xc8] ss:$24 sps:$4 sm:$0xff]   ;;  %v4873_v21 = vld [vmem:[%s5580_s11 + $0xfc] ss:$24 sps:$4 sm:$0xff]   ;;  %v4876_v23 = vld [vmem:[%s5580_s11 + $0xf8] ss:$24 sps:$4 sm:$0xff]  }
  0x43   : > { %997 = vmatprep.subr.bf16.mxu1 %v4855_v9  ;;  %v4877_v24 = vld [vmem:[%s5580_s11 + $0x124] ss:$24 sps:$4 sm:$0xff]   ;;  %v4881_v26 = vld [vmem:[%s5580_s11 + $0x120] ss:$24 sps:$4 sm:$0xff]   ;;  %v4883_v28 = vld [vmem:[%s5580_s11 + $0x154] ss:$24 sps:$4 sm:$0xff]  }
  0x44   : > { %v4879_v25 = vld [vmem:[%s5580_s11 + $0x12c] ss:$24 sps:$4 sm:$0xff]   ;;  %v4882_v27 = vld [vmem:[%s5580_s11 + $0x128] ss:$24 sps:$4 sm:$0xff]   ;;  %v4885_v29 = vld [vmem:[%s5580_s11 + $0x15c] ss:$24 sps:$4 sm:$0xff]  }
  0x45   : > { %945 = vmatpush1.bf16.msra.mxu0 %v4857_v10  ;;  %v4887_v30 = vld [vmem:[%s5580_s11 + $0x150] ss:$24 sps:$4 sm:$0xff]   ;;  %v4889_v32 = vld [vmem:[%s5580_s11 + $0x184] ss:$24 sps:$4 sm:$0xff]   ;;  %v4893_v34 = vld [vmem:[%s5580_s11 + $0x180] ss:$24 sps:$4 sm:$0xff]  }
  0x46   : > { %998 = vmatpush1.bf16.msra.mxu1 %v4858_v11  ;;  %946 = vmatprep.subr.bf16.mxu0 %v4859_v12  ;;  %v4888_v31 = vld [vmem:[%s5580_s11 + $0x158] ss:$24 sps:$4 sm:$0xff]   ;;  %v4891_v33 = vld [vmem:[%s5580_s11 + $0x18c] ss:$24 sps:$4 sm:$0xff]   ;;  %v4894_v35 = vld [vmem:[%s5580_s11 + $0x188] ss:$24 sps:$4 sm:$0xff]  }
  0x47   : > { %999 = vmatprep.subr.bf16.mxu1 %v4861_v13  ;;  %v4895_v36 = vld [vmem:[%s5580_s11 + $0x1b4] ss:$24 sps:$4 sm:$0xff]   ;;  %v4899_v38 = vld [vmem:[%s5580_s11 + $0x1b0] ss:$24 sps:$4 sm:$0xff]   ;;  %v4901_v40 = vld [vmem:[%s5580_s11 + $0x1e4] ss:$24 sps:$4 sm:$0xff]  }
  0x48   : > { %v4897_v37 = vld [vmem:[%s5580_s11 + $0x1bc] ss:$24 sps:$4 sm:$0xff]   ;;  %v4900_v39 = vld [vmem:[%s5580_s11 + $0x1b8] ss:$24 sps:$4 sm:$0xff]   ;;  %v4903_v41 = vld [vmem:[%s5580_s11 + $0x1ec] ss:$24 sps:$4 sm:$0xff]  }
  0x49   : > { %947 = vmatpush1.bf16.msra.mxu0 %v4863_v14  ;;  %v4905_v42 = vld [vmem:[%s5580_s11 + $0x1e0] ss:$24 sps:$4 sm:$0xff]   ;;  %v4907_v44 = vld [vmem:[%s5580_s11 + $0x214] ss:$24 sps:$4 sm:$0xff]   ;;  %v4911_v47 = vld [vmem:[%s5580_s11 + $0x210] ss:$24 sps:$4 sm:$0xff]  }
  0x4a   : > { %1000 = vmatpush1.bf16.msra.mxu1 %v4864_v15  ;;  %948 = vmatprep.subr.bf16.mxu0 %v4865_v16  ;;  %v4906_v43 = vld [vmem:[%s5580_s11 + $0x1e8] ss:$24 sps:$4 sm:$0xff]   ;;  %v4909_v45 = vld [vmem:[%s5580_s11 + $0x21c] ss:$24 sps:$4 sm:$0xff]   ;;  %v4912_v48 = vld [vmem:[%s5580_s11 + $0x218] ss:$24 sps:$4 sm:$0xff]  }
  0x4b   : > { %1001 = vmatprep.subr.bf16.mxu1 %v4867_v17  ;;  %v4913_v50 = vld [vmem:[%s5580_s11 + $0x244] ss:$24 sps:$4 sm:$0xff]   ;;  %v4917_v53 = vld [vmem:[%s5580_s11 + $0x240] ss:$24 sps:$4 sm:$0xff]   ;;  %v4919_v55 = vld [vmem:[%s5580_s11 + $0x274] ss:$24 sps:$4 sm:$0xff]  }
  0x4c   : > { %v4915_v52 = vld [vmem:[%s5580_s11 + $0x24c] ss:$24 sps:$4 sm:$0xff]   ;;  %v4918_v54 = vld [vmem:[%s5580_s11 + $0x248] ss:$24 sps:$4 sm:$0xff]   ;;  %v4921_v56 = vld [vmem:[%s5580_s11 + $0x27c] ss:$24 sps:$4 sm:$0xff]  }
  0x4d   : > { %949 = vmatpush1.bf16.msra.mxu0 %v4869_v18  ;;  %v4923_v57 = vld [vmem:[%s5580_s11 + $0x270] ss:$24 sps:$4 sm:$0xff]   ;;  %v4925_v59 = vld [vmem:[%s5580_s11 + $0x2a4] ss:$24 sps:$4 sm:$0xff]   ;;  %v4929_v61 = vld [vmem:[%s5580_s11 + $0x2a0] ss:$24 sps:$4 sm:$0xff]  }
  0x4e   : > { %1002 = vmatpush1.bf16.msra.mxu1 %v4870_v19  ;;  %950 = vmatprep.subr.bf16.mxu0 %v4871_v20  ;;  %v4924_v58 = vld [vmem:[%s5580_s11 + $0x278] ss:$24 sps:$4 sm:$0xff]   ;;  %v4927_v60 = vld [vmem:[%s5580_s11 + $0x2ac] ss:$24 sps:$4 sm:$0xff]   ;;  %v4930_v62 = vld [vmem:[%s5580_s11 + $0x2a8] ss:$24 sps:$4 sm:$0xff]  }
  0x4f   : > { %1003 = vmatprep.subr.bf16.mxu1 %v4873_v21  ;;  %v4931_v63 = vld [vmem:[%s5580_s11 + $0x2d4] ss:$24 sps:$4 sm:$0xff]   ;;  %v4935_v1 = vld [vmem:[%s5580_s11 + $0x2d0] ss:$24 sps:$4 sm:$0xff]   ;;  %v320_v3 = vld [vmem:[%s5632_s16] sm:$0xff] }
  0x50   : > { %v4933_v0 = vld [vmem:[%s5580_s11 + $0x2dc] ss:$24 sps:$4 sm:$0xff]   ;;  %v4936_v2 = vld [vmem:[%s5580_s11 + $0x2d8] ss:$24 sps:$4 sm:$0xff]  }
  0x51   : > { %951 = vmatpush1.bf16.msra.mxu0 %v4875_v22  ;;  %v322_v4 = vld [vmem:[%s5632_s16 + $0x10] sm:$0xff]  ;;  %v5664_v6 = vld [vmem:[%s5566_s14 + $0x4] ss:$24 sps:$4 sm:$0xff]   ;;  %v5670_v9 = vld [vmem:[%s5566_s14] ss:$24 sps:$4 sm:$0xff]  }
  0x52   : > { %1004 = vmatpush1.bf16.msra.mxu1 %v4876_v23  ;;  %952 = vmatprep.subr.bf16.mxu0 %v4877_v24  ;;  %v4939_v5 = vld [vmem:[%s5580_s11 + $0x14] ss:$24 sps:$4 sm:$0xff]   ;;  %v5666_v7 = vpack.c.bf16 %v322_v4, %v320_v3  ;;  %v4937_v8 = vld [vmem:[%s5580_s11 + $0x10] ss:$24 sps:$4 sm:$0xff]   ;;  %v4945_v10 = vld [vmem:[%s5580_s11 + $0x44] ss:$24 sps:$4 sm:$0xff]  }
  0x53   : > { %1005 = vmatprep.subr.bf16.mxu1 %v4879_v25  ;;  %v5675_v11 = vld [vmem:[%s5566_s14 + $0x34] ss:$24 sps:$4 sm:$0xff]   ;;  %v4943_v12 = vld [vmem:[%s5580_s11 + $0x40] ss:$24 sps:$4 sm:$0xff]   ;;  %v5681_v13 = vld [vmem:[%s5566_s14 + $0x30] ss:$24 sps:$4 sm:$0xff]  }
  0x54   : > { %v4951_v14 = vld [vmem:[%s5580_s11 + $0x74] ss:$24 sps:$4 sm:$0xff]   ;;  %v5687_v15 = vld [vmem:[%s5566_s14 + $0x64] ss:$24 sps:$4 sm:$0xff]   ;;  %v4949_v16 = vld [vmem:[%s5580_s11 + $0x70] ss:$24 sps:$4 sm:$0xff]  }
  0x55   : > { %953 = vmatpush1.bf16.msra.mxu0 %v4881_v26  ;;  %v5691_v17 = vld [vmem:[%s5566_s14 + $0x60] ss:$24 sps:$4 sm:$0xff]   ;;  %v4957_v18 = vld [vmem:[%s5580_s11 + $0xa4] ss:$24 sps:$4 sm:$0xff]   ;;  %v5697_v19 = vld [vmem:[%s5566_s14 + $0x94] ss:$24 sps:$4 sm:$0xff]  }
  0x56   : > { %1006 = vmatpush1.bf16.msra.mxu1 %v4882_v27  ;;  %954 = vmatprep.subr.bf16.mxu0 %v4883_v28  ;;  %v4955_v20 = vld [vmem:[%s5580_s11 + $0xa0] ss:$24 sps:$4 sm:$0xff]   ;;  %v5701_v21 = vld [vmem:[%s5566_s14 + $0x90] ss:$24 sps:$4 sm:$0xff]   ;;  %v4963_v22 = vld [vmem:[%s5580_s11 + $0xd4] ss:$24 sps:$4 sm:$0xff]  }
  0x57   : > { %1007 = vmatprep.subr.bf16.mxu1 %v4885_v29  ;;  %v5707_v23 = vld [vmem:[%s5566_s14 + $0xc4] ss:$24 sps:$4 sm:$0xff]   ;;  %v4961_v24 = vld [vmem:[%s5580_s11 + $0xd0] ss:$24 sps:$4 sm:$0xff]   ;;  %v5711_v25 = vld [vmem:[%s5566_s14 + $0xc0] ss:$24 sps:$4 sm:$0xff]  }
  0x58   : > { %v4969_v26 = vld [vmem:[%s5580_s11 + $0x104] ss:$24 sps:$4 sm:$0xff]   ;;  %v5717_v27 = vld [vmem:[%s5566_s14 + $0xf4] ss:$24 sps:$4 sm:$0xff]   ;;  %v5015_v3 = vld [vmem:[%s5580_s11 + $0x280] ss:$24 sps:$4 sm:$0xff]  }
  0x59   : > { %955 = vmatpush1.bf16.msra.mxu0 %v4887_v30  ;;  %v325_v28 = vld [vmem:[%s5632_s16 + $0x28] sm:$0xff]  ;;  %v327_v29 = vld [vmem:[%s5632_s16 + $0x38] sm:$0xff] }
  0x5a   : > { %1008 = vmatpush1.bf16.msra.mxu1 %v4888_v31  ;;  %956 = vmatprep.subr.bf16.mxu0 %v4889_v32  ;;  %v5721_v30 = vpack.c.bf16 %v327_v29, %v325_v28  ;;  %v324_v31 = vld [vmem:[%s5632_s16 + $0x20] sm:$0xff]  ;;  %v326_v32 = vld [vmem:[%s5632_s16 + $0x30] sm:$0xff] }
  0x5b   : > { %1009 = vmatprep.subr.bf16.mxu1 %v4891_v33  ;;  %v4967_v33 = vld [vmem:[%s5580_s11 + $0x100] ss:$24 sps:$4 sm:$0xff]   ;;  %v4990_v46 = vld [vmem:[%s5566_s14 + $0x184] ss:$24 sps:$4 sm:$0xff]   ;;  %v5018_v4 = vld [vmem:[%s5566_s14 + $0x270] ss:$24 sps:$4 sm:$0xff]  }
  0x5c   : > { %v4993_v49 = vld [vmem:[%s5580_s11 + $0x1c4] ss:$24 sps:$4 sm:$0xff]   ;;  %v5801_v28 = vld [vmem:[%s5566_s14 + $0x10] ss:$24 sps:$4 sm:$0xff]  }
  0x5d   : > { %957 = vmatpush1.bf16.msra.mxu0 %v4893_v34  ;;  %v5727_v34 = vld [vmem:[%s5566_s14 + $0xf0] ss:$24 sps:$4 sm:$0xff]   ;;  %v5805_v29 = vld [vmem:[%s5566_s14 + $0x3c] ss:$24 sps:$4 sm:$0xff]  }
  0x5e   : > { %1010 = vmatpush1.bf16.msra.mxu1 %v4894_v35  ;;  %958 = vmatprep.subr.bf16.mxu0 %v4895_v36  ;;  %v5729_v35 = vpack.c.bf16 %v326_v32, %v324_v31  ;;  %v4975_v36 = vld [vmem:[%s5580_s11 + $0x134] ss:$24 sps:$4 sm:$0xff]   ;;  %v5044_v31 = vld [vmem:[%s5566_s14 + $0x44] ss:$24 sps:$4 sm:$0xff]   ;;  %v5811_v32 = vld [vmem:[%s5566_s14 + $0x38] ss:$24 sps:$4 sm:$0xff]  }
  0x5f   : > { %1011 = vmatprep.subr.bf16.mxu1 %v4897_v37  ;;  %v4978_v37 = vld [vmem:[%s5566_s14 + $0x124] ss:$24 sps:$4 sm:$0xff]  }
  0x61   : > { %959 = vmatpush1.bf16.msra.mxu0 %v4899_v38  ;;  %v4973_v38 = vld [vmem:[%s5580_s11 + $0x130] ss:$24 sps:$4 sm:$0xff]  }
  0x62   : > { %1012 = vmatpush1.bf16.msra.mxu1 %v4900_v39  ;;  %960 = vmatprep.subr.bf16.mxu0 %v4901_v40  ;;  %v4976_v39 = vld [vmem:[%s5566_s14 + $0x120] ss:$24 sps:$4 sm:$0xff]   ;;  %v4981_v40 = vld [vmem:[%s5580_s11 + $0x164] ss:$24 sps:$4 sm:$0xff]  }
  0x63   : > { %1013 = vmatprep.subr.bf16.mxu1 %v4903_v41  ;;  %v4984_v41 = vld [vmem:[%s5566_s14 + $0x154] ss:$24 sps:$4 sm:$0xff]  }
  0x65   : > { %961 = vmatpush1.bf16.msra.mxu0 %v4905_v42  ;;  %v6868_v42 = vmov 0  }
  0x66   : > { %1014 = vmatpush1.bf16.msra.mxu1 %v4906_v43  ;;  %962 = vmatprep.subr.bf16.mxu0 %v4907_v44  ;;  %v4979_v43 = vld [vmem:[%s5580_s11 + $0x160] ss:$24 sps:$4 sm:$0xff]   ;;  %v4982_v44 = vld [vmem:[%s5566_s14 + $0x150] ss:$24 sps:$4 sm:$0xff]  }
  0x67   : > { %1015 = vmatprep.subr.bf16.mxu1 %v4909_v45  ;;  %v4987_v45 = vld [vmem:[%s5580_s11 + $0x194] ss:$24 sps:$4 sm:$0xff]  }
  0x69   : > { %963 = vmatpush1.bf16.msra.mxu0 %v4911_v47  ;;  %v4985_v47 = vld [vmem:[%s5580_s11 + $0x190] ss:$24 sps:$4 sm:$0xff]  }
  0x6a   : > { %1016 = vmatpush1.bf16.msra.mxu1 %v4912_v48  ;;  %964 = vmatprep.subr.bf16.mxu0 %v4913_v50  ;;  %v4988_v48 = vld [vmem:[%s5566_s14 + $0x180] ss:$24 sps:$4 sm:$0xff]   ;;  %v4996_v50 = vld [vmem:[%s5566_s14 + $0x1b4] ss:$24 sps:$4 sm:$0xff]  }
  0x6b   : > { %1017 = vmatprep.subr.bf16.mxu1 %v4915_v52  ;;  %v4994_v52 = vld [vmem:[%s5566_s14 + $0x1b0] ss:$24 sps:$4 sm:$0xff]  }
  0x6d   : > { %965 = vmatpush1.bf16.msra.mxu0 %v4917_v53  ;;  %v4999_v53 = vld [vmem:[%s5580_s11 + $0x1f4] ss:$24 sps:$4 sm:$0xff]  }
  0x6e   : > { %1018 = vmatpush1.bf16.msra.mxu1 %v4918_v54  ;;  %966 = vmatprep.subr.bf16.mxu0 %v4919_v55  ;;  %v5002_v54 = vld [vmem:[%s5566_s14 + $0x1e4] ss:$24 sps:$4 sm:$0xff]   ;;  %v4997_v55 = vld [vmem:[%s5580_s11 + $0x1f0] ss:$24 sps:$4 sm:$0xff]  }
  0x6f   : > { %1019 = vmatprep.subr.bf16.mxu1 %v4921_v56  ;;  %v5000_v56 = vld [vmem:[%s5566_s14 + $0x1e0] ss:$24 sps:$4 sm:$0xff]  }
  0x71   : > { %967 = vmatpush1.bf16.msra.mxu0 %v4923_v57  ;;  %v5005_v57 = vld [vmem:[%s5580_s11 + $0x224] ss:$24 sps:$4 sm:$0xff]  }
  0x72   : > { %1020 = vmatpush1.bf16.msra.mxu1 %v4924_v58  ;;  %968 = vmatprep.subr.bf16.mxu0 %v4925_v59  ;;  %v5008_v58 = vld [vmem:[%s5566_s14 + $0x214] ss:$24 sps:$4 sm:$0xff]   ;;  %v5003_v59 = vld [vmem:[%s5580_s11 + $0x220] ss:$24 sps:$4 sm:$0xff]  }
  0x73   : > { %1021 = vmatprep.subr.bf16.mxu1 %v4927_v60  ;;  %v5006_v60 = vld [vmem:[%s5566_s14 + $0x210] ss:$24 sps:$4 sm:$0xff]  }
  0x75   : > { %969 = vmatpush1.bf16.msra.mxu0 %v4929_v61  ;;  %v5011_v61 = vld [vmem:[%s5580_s11 + $0x254] ss:$24 sps:$4 sm:$0xff]  }
  0x76   : > { %1022 = vmatpush1.bf16.msra.mxu1 %v4930_v62  ;;  %970 = vmatprep.subr.bf16.mxu0 %v4931_v63  ;;  %v5014_v62 = vld [vmem:[%s5566_s14 + $0x244] ss:$24 sps:$4 sm:$0xff]   ;;  %v5009_v63 = vld [vmem:[%s5580_s11 + $0x250] ss:$24 sps:$4 sm:$0xff]  }
  0x77   : > { %1023 = vmatprep.subr.bf16.mxu1 %v4933_v0  ;;  %v5012_v0 = vld [vmem:[%s5566_s14 + $0x240] ss:$24 sps:$4 sm:$0xff]  }
  0x79   : > { %971 = vmatpush1.bf16.msra.mxu0 %v4935_v1  ;;  %v5017_v1 = vld [vmem:[%s5580_s11 + $0x284] ss:$24 sps:$4 sm:$0xff]  }
  0x7a   : > { %1024 = vmatpush1.bf16.msra.mxu1 %v4936_v2  ;;  %1046 = vmatprep.subr.bf16.mxu0 %v4939_v5  ;;  %v5020_v2 = vld [vmem:[%s5566_s14 + $0x274] ss:$24 sps:$4 sm:$0xff]  }
  0x7b   : > { %1731 = vmatprep.subr.bf16.mxu1 %v5664_v6  ;;  %v5023_v5 = vld [vmem:[%s5580_s11 + $0x2b4] ss:$24 sps:$4 sm:$0xff]  }
  0x7c   : > { %973 = vmatmul.mubr.bf16.vlgmr.msra.gmra.mrb[0].mxu0 %v5666_v7 }
  0x7d   : > { %1026 = vmatmul.mubr.bf16.vlgmr.msra.gmra.mrb[0].mxu1 %v5666_v7  ;;  %1047 = vmatpush1.bf16.msra.mxu0 %v4937_v8  ;;  %v5774_v8 = vld [vmem:[%s5566_s14 + $0x2a4] ss:$24 sps:$4 sm:$0xff]  }
  0x7e   : > { %1732 = vmatpush1.bf16.msra.mxu1 %v5670_v9  ;;  %1048 = vmatprep.subr.bf16.mxu0 %v4945_v10  ;;  %v5021_v10 = vld [vmem:[%s5580_s11 + $0x2b0] ss:$24 sps:$4 sm:$0xff]  }
  0x7f   : > { %1733 = vmatprep.subr.bf16.mxu1 %v5675_v11  ;;  %982 = vmatprep.mubr.bf16.mxu0 %v5721_v30 }
  0x80   : > { %1035 = vmatprep.mubr.bf16.mxu1 %v5721_v30 }
  0x81   : > { %1049 = vmatpush1.bf16.msra.mxu0 %v4943_v12  ;;  %v5778_v12 = vld [vmem:[%s5566_s14 + $0x2a0] ss:$24 sps:$4 sm:$0xff]  }
  0x82   : > { %1734 = vmatpush1.bf16.msra.mxu1 %v5681_v13  ;;  %1050 = vmatprep.subr.bf16.mxu0 %v4951_v14  ;;  %v5029_v14 = vld [vmem:[%s5580_s11 + $0x2e4] ss:$24 sps:$4 sm:$0xff]  }
  0x83   : > { %1735 = vmatprep.subr.bf16.mxu1 %v5687_v15 }
  0x84   : > { %983 = vmatmul.mubr.bf16.gmra.mrb[4].mxu0 %v5729_v35 }
  0x85   : > { %1051 = vmatpush1.bf16.msra.mxu0 %v4949_v16  ;;  %1036 = vmatmul.mubr.bf16.gmra.mrb[4].mxu1 %v5729_v35  ;;  %v5783_v16 = vld [vmem:[%s5566_s14 + $0x2d4] ss:$24 sps:$4 sm:$0xff]  }
  0x86   : > { %1736 = vmatpush1.bf16.msra.mxu1 %v5691_v17  ;;  %1052 = vmatprep.subr.bf16.mxu0 %v4957_v18  ;;  %v5027_v18 = vld [vmem:[%s5580_s11 + $0x2e0] ss:$24 sps:$4 sm:$0xff]  }
  0x87   : > { %1737 = vmatprep.subr.bf16.mxu1 %v5697_v19  ;;  %1078 = vmatprep.mubr.bf16.mxu0 %v5641_v51  ;;  %v4991_v51 = vld [vmem:[%s5580_s11 + $0x1c0] ss:$24 sps:$4 sm:$0xff]  }
  0x88   : > { %1763 = vmatprep.mubr.bf16.mxu1 %v6868_v42 }
  0x89   : > { %1053 = vmatpush1.bf16.msra.mxu0 %v4955_v20  ;;  %v5787_v20 = vld [vmem:[%s5566_s14 + $0x2d0] ss:$24 sps:$4 sm:$0xff]  }
  0x8a   : > { %1738 = vmatpush1.bf16.msra.mxu1 %v5701_v21  ;;  %1054 = vmatprep.subr.bf16.mxu0 %v4963_v22  ;;  %v5791_v22 = vld [vmem:[%s5566_s14 + $0xc] ss:$24 sps:$4 sm:$0xff]  }
  0x8b   : > { %1739 = vmatprep.subr.bf16.mxu1 %v5707_v23 }
  0x8d   : > { %1055 = vmatpush1.bf16.msra.mxu0 %v4961_v24  ;;  %v5795_v24 = vld [vmem:[%s5566_s14 + $0x14] ss:$24 sps:$4 sm:$0xff]  }
  0x8e   : > { %1740 = vmatpush1.bf16.msra.mxu1 %v5711_v25  ;;  %1056 = vmatprep.subr.bf16.mxu0 %v4969_v26  ;;  %v5798_v26 = vld [vmem:[%s5566_s14 + $0x8] ss:$24 sps:$4 sm:$0xff]  }
  0x8f   : > { %1741 = vmatprep.subr.bf16.mxu1 %v5717_v27 }
  0x91   : > { %1057 = vmatpush1.bf16.msra.mxu0 %v4967_v33  ;;  %v5042_v33 = vld [vmem:[%s5566_s14 + $0x40] ss:$24 sps:$4 sm:$0xff]  }
  0x92   : > { %1742 = vmatpush1.bf16.msra.mxu1 %v5727_v34  ;;  %1058 = vmatprep.subr.bf16.mxu0 %v4975_v36  ;;  %v5817_v36 = vld [vmem:[%s5566_s14 + $0x6c] ss:$24 sps:$4 sm:$0xff]  }
  0x93   : > { %1743 = vmatprep.subr.bf16.mxu1 %v4978_v37  ;;  %v5820_v37 = vld [vmem:[%s5566_s14 + $0x74] ss:$24 sps:$4 sm:$0xff]  }
  0x95   : > { %1059 = vmatpush1.bf16.msra.mxu0 %v4973_v38  ;;  %v5826_v38 = vld [vmem:[%s5566_s14 + $0x68] ss:$24 sps:$4 sm:$0xff]  }
  0x96   : > { %1744 = vmatpush1.bf16.msra.mxu1 %v4976_v39  ;;  %1060 = vmatprep.subr.bf16.mxu0 %v4981_v40  ;;  %v5834_v39 = vld [vmem:[%s5566_s14 + $0x9c] ss:$24 sps:$4 sm:$0xff]  }
  0x97   : > { %1745 = vmatprep.subr.bf16.mxu1 %v4984_v41  ;;  %v5837_v40 = vld [vmem:[%s5566_s14 + $0xa4] ss:$24 sps:$4 sm:$0xff]   ;;  %v5843_v41 = vld [vmem:[%s5566_s14 + $0x98] ss:$24 sps:$4 sm:$0xff]  }
  0x99   : > { %1061 = vmatpush1.bf16.msra.mxu0 %v4979_v43  ;;  %v5849_v43 = vld [vmem:[%s5566_s14 + $0xcc] ss:$24 sps:$4 sm:$0xff]  }
  0x9a   : > { %1746 = vmatpush1.bf16.msra.mxu1 %v4982_v44  ;;  %1062 = vmatprep.subr.bf16.mxu0 %v4987_v45  ;;  %v5852_v44 = vld [vmem:[%s5566_s14 + $0xd4] ss:$24 sps:$4 sm:$0xff]   ;;  %v5860_v45 = vld [vmem:[%s5566_s14 + $0xc8] ss:$24 sps:$4 sm:$0xff]  }
  0x9b   : > { %1747 = vmatprep.subr.bf16.mxu1 %v4990_v46  ;;  %v5863_v46 = vld [vmem:[%s5566_s14 + $0xd0] ss:$24 sps:$4 sm:$0xff]  }
  0x9d   : > { %1063 = vmatpush1.bf16.msra.mxu0 %v4985_v47  ;;  %v5867_v47 = vld [vmem:[%s5566_s14 + $0xfc] ss:$24 sps:$4 sm:$0xff]  }
  0x9e   : > { %1748 = vmatpush1.bf16.msra.mxu1 %v4988_v48  ;;  %1064 = vmatprep.subr.bf16.mxu0 %v4993_v49  ;;  %v5877_v48 = vld [vmem:[%s5566_s14 + $0xf8] ss:$24 sps:$4 sm:$0xff]  }
  0x9f   : > { %1749 = vmatprep.subr.bf16.mxu1 %v4996_v50  ;;  %v5880_v49 = vld [vmem:[%s5566_s14 + $0x100] ss:$24 sps:$4 sm:$0xff]   ;;  %v5883_v50 = vld [vmem:[%s5566_s14 + $0x12c] ss:$24 sps:$4 sm:$0xff]  }
  0xa1   : > { %1065 = vmatpush1.bf16.msra.mxu0 %v4991_v51  ;;  %v5886_v51 = vld [vmem:[%s5566_s14 + $0x134] ss:$24 sps:$4 sm:$0xff]  }
  0xa2   : > { %1750 = vmatpush1.bf16.msra.mxu1 %v4994_v52  ;;  %1066 = vmatprep.subr.bf16.mxu0 %v4999_v53  ;;  %v5893_v52 = vld [vmem:[%s5566_s14 + $0x128] ss:$24 sps:$4 sm:$0xff]  }
  0xa3   : > { %1751 = vmatprep.subr.bf16.mxu1 %v5002_v54  ;;  %v5896_v53 = vld [vmem:[%s5566_s14 + $0x130] ss:$24 sps:$4 sm:$0xff]   ;;  %v5899_v54 = vld [vmem:[%s5566_s14 + $0x15c] ss:$24 sps:$4 sm:$0xff]  }
  0xa4   : > { %6910 = vst [vmem:[#allocation6_spill] sm:$0xff] %v5896_v53 }
  0xa5   : > { %1067 = vmatpush1.bf16.msra.mxu0 %v4997_v55  ;;  %v5902_v55 = vld [vmem:[%s5566_s14 + $0x164] ss:$24 sps:$4 sm:$0xff]  }
  0xa6   : > { %1752 = vmatpush1.bf16.msra.mxu1 %v5000_v56  ;;  %1068 = vmatprep.subr.bf16.mxu0 %v5005_v57  ;;  %6911 = vst [vmem:[#allocation7_spill] sm:$0xff] %v5902_v55  ;;  %v5909_v56 = vld [vmem:[%s5566_s14 + $0x158] ss:$24 sps:$4 sm:$0xff]  }
  0xa7   : > { %1753 = vmatprep.subr.bf16.mxu1 %v5008_v58  ;;  %v5912_v57 = vld [vmem:[%s5566_s14 + $0x160] ss:$24 sps:$4 sm:$0xff]   ;;  %v5915_v58 = vld [vmem:[%s5566_s14 + $0x18c] ss:$24 sps:$4 sm:$0xff]  }
  0xa8   : > { %6912 = vst [vmem:[#allocation8_spill] sm:$0xff] %v5912_v57 }
  0xa9   : > { %1069 = vmatpush1.bf16.msra.mxu0 %v5003_v59  ;;  %v5918_v59 = vld [vmem:[%s5566_s14 + $0x194] ss:$24 sps:$4 sm:$0xff]  }
  0xaa   : > { %1754 = vmatpush1.bf16.msra.mxu1 %v5006_v60  ;;  %1070 = vmatprep.subr.bf16.mxu0 %v5011_v61  ;;  %6913 = vst [vmem:[#allocation9_spill] sm:$0xff] %v5918_v59  ;;  %v5925_v60 = vld [vmem:[%s5566_s14 + $0x188] ss:$24 sps:$4 sm:$0xff]  }
  0xab   : > { %1755 = vmatprep.subr.bf16.mxu1 %v5014_v62  ;;  %v5928_v61 = vld [vmem:[%s5566_s14 + $0x190] ss:$24 sps:$4 sm:$0xff]   ;;  %v5931_v62 = vld [vmem:[%s5566_s14 + $0x1bc] ss:$24 sps:$4 sm:$0xff]  }
  0xac   : > { %6914 = vst [vmem:[#allocation10_spill] sm:$0xff] %v5928_v61 }
  0xad   : > { %1071 = vmatpush1.bf16.msra.mxu0 %v5009_v63  ;;  %v5934_v63 = vld [vmem:[%s5566_s14 + $0x1c4] ss:$24 sps:$4 sm:$0xff]  }
  0xae   : > { %1756 = vmatpush1.bf16.msra.mxu1 %v5012_v0  ;;  %1072 = vmatprep.subr.bf16.mxu0 %v5017_v1  ;;  %6915 = vst [vmem:[#allocation11_spill] sm:$0xff] %v5934_v63  ;;  %v5941_v0 = vld [vmem:[%s5566_s14 + $0x1b8] ss:$24 sps:$4 sm:$0xff]  }
  0xaf   : > { %1757 = vmatprep.subr.bf16.mxu1 %v5020_v2  ;;  %v5944_v1 = vld [vmem:[%s5566_s14 + $0x1c0] ss:$24 sps:$4 sm:$0xff]   ;;  %v5947_v2 = vld [vmem:[%s5566_s14 + $0x1ec] ss:$24 sps:$4 sm:$0xff]  }
  0xb0   : > { %6916 = vst [vmem:[#allocation12_spill] sm:$0xff] %v5944_v1 }
  0xb1   : > { %1073 = vmatpush1.bf16.msra.mxu0 %v5015_v3  ;;  %v5950_v3 = vld [vmem:[%s5566_s14 + $0x1f4] ss:$24 sps:$4 sm:$0xff]  }
  0xb2   : > { %1758 = vmatpush1.bf16.msra.mxu1 %v5018_v4  ;;  %1074 = vmatprep.subr.bf16.mxu0 %v5023_v5  ;;  %6917 = vst [vmem:[#allocation13_spill] sm:$0xff] %v5950_v3  ;;  %v5957_v4 = vld [vmem:[%s5566_s14 + $0x1e8] ss:$24 sps:$4 sm:$0xff]  }
  0xb3   : > { %1759 = vmatprep.subr.bf16.mxu1 %v5774_v8  ;;  %v5960_v5 = vld [vmem:[%s5566_s14 + $0x1f0] ss:$24 sps:$4 sm:$0xff]  }
  0xb4   : > { %6918 = vst [vmem:[#allocation14_spill] sm:$0xff] %v5960_v5 }
  0xb5   : > { %1075 = vmatpush1.bf16.msra.mxu0 %v5021_v10  ;;  %v5967_v10 = vld [vmem:[%s5566_s14 + $0x21c] ss:$24 sps:$4 sm:$0xff]  }
  0xb6   : > { %1760 = vmatpush1.bf16.msra.mxu1 %v5778_v12  ;;  %1076 = vmatprep.subr.bf16.mxu0 %v5029_v14  ;;  %v5970_v14 = vld [vmem:[%s5566_s14 + $0x224] ss:$24 sps:$4 sm:$0xff]  }
  0xb7   : > { %1761 = vmatprep.subr.bf16.mxu1 %v5783_v16  ;;  %6919 = vst [vmem:[#allocation15_spill] sm:$0xff] %v5970_v14 }
  0xb9   : > { %1077 = vmatpush1.bf16.msra.mxu0 %v5027_v18  ;;  %v5975_v18 = vld [vmem:[%s5566_s14 + $0x218] ss:$24 sps:$4 sm:$0xff]  }
  0xba   : > { %1762 = vmatpush1.bf16.msra.mxu1 %v5787_v20  ;;  %1772 = vmatprep.subr.bf16.mxu0 %v5791_v22 }
  0xbb   : > { %1813 = vmatprep.subr.bf16.mxu1 %v5795_v24 }
  0xbc   : > { %1079 = vmatmul.mubr.bf16.vlgmr.msra.gmra.mrb[8].mxu0 %v5666_v7  ;;  %v5829_v7 = vld [vmem:[%s5566_s14 + $0x70] ss:$24 sps:$4 sm:$0xff]  }
  0xbd   : > { %1764 = vmatmul.mubr.bf16.vlgmr.msra.gmra.mrb[8].mxu1 %v6868_v42  ;;  %1773 = vmatpush1.bf16.msra.mxu0 %v5798_v26 }
  0xbe   : > { %1814 = vmatpush1.bf16.msra.mxu1 %v5801_v28  ;;  %1774 = vmatprep.subr.bf16.mxu0 %v5805_v29 }
  0xbf   : > { %1815 = vmatprep.subr.bf16.mxu1 %v5044_v31  ;;  %1088 = vmatprep.mubr.bf16.mxu0 %v5721_v30  ;;  %v5846_v30 = vld [vmem:[%s5566_s14 + $0xa0] ss:$24 sps:$4 sm:$0xff]  }
  0xc0   : > { %1845 = vmatprep.mubr.bf16.mxu1 %v6868_v42  ;;  %v5978_v31 = vld [vmem:[%s5566_s14 + $0x220] ss:$24 sps:$4 sm:$0xff]  }
  0xc1   : > { %1775 = vmatpush1.bf16.msra.mxu0 %v5811_v32  ;;  %6920 = vst [vmem:[#allocation16_spill] sm:$0xff] %v5978_v31 }
  0xc2   : > { %1816 = vmatpush1.bf16.msra.mxu1 %v5042_v33  ;;  %1776 = vmatprep.subr.bf16.mxu0 %v5817_v36  ;;  %v5983_v33 = vld [vmem:[%s5566_s14 + $0x24c] ss:$24 sps:$4 sm:$0xff]  }
  0xc3   : > { %1817 = vmatprep.subr.bf16.mxu1 %v5820_v37 }
  0xc4   : > { %1089 = vmatmul.mubr.bf16.gmra.mrb[12].mxu0 %v5729_v35  ;;  %v5870_v35 = vld [vmem:[%s5566_s14 + $0x104] ss:$24 sps:$4 sm:$0xff]  }
  0xc5   : > { %1777 = vmatpush1.bf16.msra.mxu0 %v5826_v38  ;;  %1804 = vmatprep.mubr.bf16.mxu0 %v6868_v42  ;;  %v5986_v42 = vld [vmem:[%s5566_s14 + $0x254] ss:$24 sps:$4 sm:$0xff]  }
  0xc6   : > { %1818 = vmatpush1.bf16.msra.mxu1 %v5829_v7  ;;  %1778 = vmatprep.subr.bf16.mxu0 %v5834_v39  ;;  %6921 = vst [vmem:[#allocation17_spill] sm:$0xff] %v5986_v42 }
  0xc7   : > { %1819 = vmatprep.subr.bf16.mxu1 %v5837_v40 }
  0xc9   : > { %1779 = vmatpush1.bf16.msra.mxu0 %v5843_v41 }
  0xca   : > { %1820 = vmatpush1.bf16.msra.mxu1 %v5846_v30  ;;  %1780 = vmatprep.subr.bf16.mxu0 %v5849_v43 }
  0xcb   : > { %1821 = vmatprep.subr.bf16.mxu1 %v5852_v44 }
  0xcd   : > { %1781 = vmatpush1.bf16.msra.mxu0 %v5860_v45 }
  0xce   : > { %1822 = vmatpush1.bf16.msra.mxu1 %v5863_v46  ;;  %1782 = vmatprep.subr.bf16.mxu0 %v5867_v47 }
  0xcf   : > { %1823 = vmatprep.subr.bf16.mxu1 %v5870_v35 }
  0xd1   : > { %1783 = vmatpush1.bf16.msra.mxu0 %v5877_v48 }
  0xd2   : > { %1824 = vmatpush1.bf16.msra.mxu1 %v5880_v49  ;;  %1784 = vmatprep.subr.bf16.mxu0 %v5883_v50 }
  0xd3   : > { %1825 = vmatprep.subr.bf16.mxu1 %v5886_v51 }
  0xd5   : > { %1785 = vmatpush1.bf16.msra.mxu0 %v5893_v52 }
  0xd6   : > { %1826 = vmatpush1.bf16.msra.mxu1 %v5896_v53  ;;  %1786 = vmatprep.subr.bf16.mxu0 %v5899_v54  ;;  %v5123_v53 = vld [vmem:[%s5566_s14 + $0x2d8] ss:$24 sps:$4 sm:$0xff]  }
  0xd7   : > { %1827 = vmatprep.subr.bf16.mxu1 %v5902_v55  ;;  %v6024_v55 = vld [vmem:[%s5566_s14 + $0x2e4] ss:$24 sps:$4 sm:$0xff]  }
  0xd9   : > { %1787 = vmatpush1.bf16.msra.mxu0 %v5909_v56 }
  0xda   : > { %1828 = vmatpush1.bf16.msra.mxu1 %v5912_v57  ;;  %1788 = vmatprep.subr.bf16.mxu0 %v5915_v58  ;;  %v6019_v57 = vld [vmem:[%s5566_s14 + $0x2b0] ss:$24 sps:$4 sm:$0xff]  }
  0xdb   : > { %1829 = vmatprep.subr.bf16.mxu1 %v5918_v59  ;;  %v5117_v59 = vld [vmem:[%s5566_s14 + $0x2a8] ss:$24 sps:$4 sm:$0xff]  }
  0xdd   : > { %1789 = vmatpush1.bf16.msra.mxu0 %v5925_v60 }
  0xde   : > { %1830 = vmatpush1.bf16.msra.mxu1 %v5928_v61  ;;  %1790 = vmatprep.subr.bf16.mxu0 %v5931_v62  ;;  %v6014_v61 = vld [vmem:[%s5566_s14 + $0x2b4] ss:$24 sps:$4 sm:$0xff]  }
  0xdf   : > { %1831 = vmatprep.subr.bf16.mxu1 %v5934_v63  ;;  %v6008_v63 = vld [vmem:[%s5566_s14 + $0x280] ss:$24 sps:$4 sm:$0xff]   ;;  %6924 = vst [vmem:[#allocation20_spill] sm:$0xff] %v6014_v61 }
  0xe1   : > { %1791 = vmatpush1.bf16.msra.mxu0 %v5941_v0 }
  0xe2   : > { %1832 = vmatpush1.bf16.msra.mxu1 %v5944_v1  ;;  %1792 = vmatprep.subr.bf16.mxu0 %v5947_v2  ;;  %v6002_v1 = vld [vmem:[%s5566_s14 + $0x284] ss:$24 sps:$4 sm:$0xff]  }
  0xe3   : > { %1833 = vmatprep.subr.bf16.mxu1 %v5950_v3  ;;  %v5994_v3 = vld [vmem:[%s5566_s14 + $0x250] ss:$24 sps:$4 sm:$0xff]   ;;  %6923 = vst [vmem:[#allocation19_spill] sm:$0xff] %v6002_v1 }
  0xe4   : > { %6922 = vst [vmem:[#allocation18_spill] sm:$0xff] %v5994_v3 }
  0xe5   : > { %1793 = vmatpush1.bf16.msra.mxu0 %v5957_v4 }
  0xe6   : > { %1834 = vmatpush1.bf16.msra.mxu1 %v5960_v5  ;;  %1794 = vmatprep.subr.bf16.mxu0 %v5967_v10  ;;  %v5991_v5 = vld [vmem:[%s5566_s14 + $0x248] ss:$24 sps:$4 sm:$0xff]  }
  0xe7   : > { %1835 = vmatprep.subr.bf16.mxu1 %v5970_v14  ;;  %v5999_v14 = vld [vmem:[%s5566_s14 + $0x27c] ss:$24 sps:$4 sm:$0xff]  }
  0xe9   : > { %1795 = vmatpush1.bf16.msra.mxu0 %v5975_v18 }
  0xea   : > { %1836 = vmatpush1.bf16.msra.mxu1 %v5978_v31  ;;  %1796 = vmatprep.subr.bf16.mxu0 %v5983_v33  ;;  %v5111_v31 = vld [vmem:[%s5566_s14 + $0x278] ss:$24 sps:$4 sm:$0xff]  }
  0xeb   : > { %1837 = vmatprep.subr.bf16.mxu1 %v5986_v42  ;;  %v5119_v42 = vld [vmem:[%s5566_s14 + $0x2ac] ss:$24 sps:$4 sm:$0xff]  }
  0xed   : > { %1797 = vmatpush1.bf16.msra.mxu0 %v5991_v5 }
  0xee   : > { %1838 = vmatpush1.bf16.msra.mxu1 %v5994_v3  ;;  %1798 = vmatprep.subr.bf16.mxu0 %v5999_v14  ;;  %v5125_v3 = vld [vmem:[%s5566_s14 + $0x2dc] ss:$24 sps:$4 sm:$0xff]  }
  0xef   : > { %1839 = vmatprep.subr.bf16.mxu1 %v6002_v1  ;;  %v6029_v1 = vld [vmem:[%s5566_s14 + $0x2e0] ss:$24 sps:$4 sm:$0xff]  }
  0xf1   : > { %1799 = vmatpush1.bf16.msra.mxu0 %v5111_v31 }
  0xf2   : > { %1840 = vmatpush1.bf16.msra.mxu1 %v6008_v63  ;;  %1800 = vmatprep.subr.bf16.mxu0 %v5119_v42 }
  0xf3   : > { %1841 = vmatprep.subr.bf16.mxu1 %v6014_v61  ;;  %v6925_v61 = vmov 0  }
  0xf5   : > { %1801 = vmatpush1.bf16.msra.mxu0 %v5117_v59 }
  0xf6   : > { %1842 = vmatpush1.bf16.msra.mxu1 %v6019_v57  ;;  %1802 = vmatprep.subr.bf16.mxu0 %v5125_v3 }
  0xf7   : > { %1843 = vmatprep.subr.bf16.mxu1 %v6024_v55 }
  0xf9   : > { %1803 = vmatpush1.bf16.msra.mxu0 %v5123_v53 }
  0xfa   : > { %1844 = vmatpush1.bf16.msra.mxu1 %v6029_v1  ;;  %2484 = vmatprep.subr.bf16.mxu0 %v5664_v6  ;;  %v430_v6 = vlaneseq }
  0xfb   : > { %2525 = vmatprep.subr.bf16.mxu1 %v5791_v22 }
  0xfc   : > { %1805 = vmatmul.mubr.bf16.vlgmr.msra.gmra.mrb[16].mxu0 %v6925_v61 }
  0xfd   : > { %1846 = vmatmul.mubr.bf16.vlgmr.msra.gmra.mrb[12].mxu1 %v6925_v61  ;;  %2485 = vmatpush1.bf16.msra.mxu0 %v5670_v9  ;;  %v6075_v9 = vshrl.u32 %v430_v6, 7  ;;  %v6177_v6 = vld [vmem:[%s5566_s14 + $0x1b4] ss:$24 sps:$4 sm:$0xff]  }
  0xfe   : > { %2526 = vmatpush1.bf16.msra.mxu1 %v5798_v26  ;;  %2486 = vmatprep.subr.bf16.mxu0 %v5675_v11 }
  0xff   : > { %2527 = vmatprep.subr.bf16.mxu1 %v5805_v29  ;;  %v6885_v11 = vsub.s32 3, %v6075_v9 }
 0x101   : > { %2487 = vmatpush1.bf16.msra.mxu0 %v5681_v13  ;;  %v432_v13 = vsub.s32 0, %v6075_v9 }
 0x102   : > { %2528 = vmatpush1.bf16.msra.mxu1 %v5811_v32  ;;  %2488 = vmatprep.subr.bf16.mxu0 %v5687_v15  ;;  %v6886_v15 = vsub.s32 2, %v6075_v9 }
 0x103   : > { %2529 = vmatprep.subr.bf16.mxu1 %v5817_v36 }
 0x105   : > { %2489 = vmatpush1.bf16.msra.mxu0 %v5691_v17  ;;  %v6085_v17 = vld [vmem:[%s309_s25] sm:$0x3f] }
 0x106   : > { %2530 = vmatpush1.bf16.msra.mxu1 %v5826_v38  ;;  %2490 = vmatprep.subr.bf16.mxu0 %v5697_v19  ;;  %v436_v19 = vsub.s32 1, %v6075_v9 }
 0x107   : > { %2531 = vmatprep.subr.bf16.mxu1 %v5834_v39 }
 0x108   : > { %v6112_v26 = vrot.slane %v6085_v17, %v436_v19 }
 0x109   : > { %2491 = vmatpush1.bf16.msra.mxu0 %v5701_v21  ;;  %v6091_v21 = vrot.slane %v6085_v17, %v6885_v11 }
 0x10a   : > { %2532 = vmatpush1.bf16.msra.mxu1 %v5843_v41  ;;  %2492 = vmatprep.subr.bf16.mxu0 %v5707_v23  ;;  %v6096_v23 = vrot.slane %v6085_v17, %v432_v13 }
 0x10b   : > { %2533 = vmatprep.subr.bf16.mxu1 %v5849_v43 }
 0x10d   : > { %2493 = vmatpush1.bf16.msra.mxu0 %v5711_v25  ;;  %v6101_v25 = vrot.slane %v6085_v17, %v6886_v15 }
 0x10e   : > { %2534 = vmatpush1.bf16.msra.mxu1 %v5860_v45  ;;  %2494 = vmatprep.subr.bf16.mxu0 %v5717_v27 }
 0x10f   : > { %2535 = vmatprep.subr.bf16.mxu1 %v5867_v47 }
 0x111   : > { %2495 = vmatpush1.bf16.msra.mxu0 %v5727_v34 }
 0x112   : > { %2536 = vmatpush1.bf16.msra.mxu1 %v5877_v48  ;;  %v6130_v48 = vld [vmem:[%s5566_s14 + $0x124] ss:$24 sps:$4 sm:$0xff]  }
 0x113   : > { %2537 = vmatprep.subr.bf16.mxu1 %v5883_v50  ;;  %v6133_v50 = vld [vmem:[%s5566_s14 + $0x120] ss:$24 sps:$4 sm:$0xff]   ;;  %2496 = vmatprep.subr.bf16.mxu0 %v6130_v48 }
 0x115   : > { %2497 = vmatpush1.bf16.msra.mxu0 %v6133_v50 }
 0x116   : > { %2538 = vmatpush1.bf16.msra.mxu1 %v5893_v52  ;;  %v6138_v52 = vld [vmem:[%s5566_s14 + $0x154] ss:$24 sps:$4 sm:$0xff]  }
 0x117   : > { %2539 = vmatprep.subr.bf16.mxu1 %v5899_v54  ;;  %2498 = vmatprep.subr.bf16.mxu0 %v6138_v52 }
 0x11a   : > { %2540 = vmatpush1.bf16.msra.mxu1 %v5909_v56 }
 0x11b   : > { %2541 = vmatprep.subr.bf16.mxu1 %v5915_v58  ;;  %v6146_v58 = vld [vmem:[%s5566_s14 + $0x184] ss:$24 sps:$4 sm:$0xff]  }
 0x11e   : > { %2542 = vmatpush1.bf16.msra.mxu1 %v5925_v60 }
 0x11f   : > { %2543 = vmatprep.subr.bf16.mxu1 %v5931_v62 }
 0x122   : > { %2544 = vmatpush1.bf16.msra.mxu1 %v5941_v0  ;;  %v6155_v0 = vld [vmem:[%s5566_s14 + $0x180] ss:$24 sps:$4 sm:$0xff]  }
 0x123   : > { %2545 = vmatprep.subr.bf16.mxu1 %v5947_v2 }
 0x126   : > { %2546 = vmatpush1.bf16.msra.mxu1 %v5957_v4 }
 0x127   : > { %2547 = vmatprep.subr.bf16.mxu1 %v5967_v10 }
 0x12a   : > { %2548 = vmatpush1.bf16.msra.mxu1 %v5975_v18 }
 0x12b   : > { %2549 = vmatprep.subr.bf16.mxu1 %v5983_v33 }
 0x12e   : > { %2550 = vmatpush1.bf16.msra.mxu1 %v5991_v5 }
 0x12f   : > { %2551 = vmatprep.subr.bf16.mxu1 %v5999_v14 }
 0x132   : > { %2552 = vmatpush1.bf16.msra.mxu1 %v5111_v31 }
 0x133   : > { %2553 = vmatprep.subr.bf16.mxu1 %v5119_v42 }
 0x136   : > { %2554 = vmatpush1.bf16.msra.mxu1 %v5117_v59 }
 0x137   : > { %2555 = vmatprep.subr.bf16.mxu1 %v5125_v3 }
 0x13a   : > { %2556 = vmatpush1.bf16.msra.mxu1 %v5123_v53  ;;  %v6141_v53 = vld [vmem:[%s5566_s14 + $0x150] ss:$24 sps:$4 sm:$0xff]  }
 0x13b   : > { %2499 = vmatpush1.bf16.msra.mxu0 %v6141_v53 }
 0x13c   : > { %2500 = vmatprep.subr.bf16.mxu0 %v6146_v58 }
 0x13f   : > { %2501 = vmatpush1.bf16.msra.mxu0 %v6155_v0 }
 0x140   : > { %2502 = vmatprep.subr.bf16.mxu0 %v6177_v6 }
 0x14f   : > { %v6103_v27 = vpop.f32.mrb[0].mxu0 }
 0x150   : > { %v6105_v34 = vpop.f32.mrb[0].mxu1  ;;  %v6107_v42 = vpop.f32.mrb[1].mxu0  ;;  %v975_v15 = vadd.f32 %v6103_v27, %v6096_v23 }
 0x151   : > { %v1029_v22 = vpop.f32.mrb[1].mxu1  ;;  %v978_v29 = vpop.f32.mrb[2].mxu0 }
 0x152   : > { %v6115_v32 = vadd.f32 %v1029_v22, %v6091_v21  ;;  %v1031_v36 = vpop.f32.mrb[2].mxu1  ;;  %v6118_v38 = vadd.f32 %v978_v29, %v6096_v23  ;;  %v980_v39 = vpop.f32.mrb[3].mxu0  ;;  %v6180_v22 = vld [vmem:[%s5566_s14 + $0x1b0] ss:$24 sps:$4 sm:$0xff]   ;;  %v6185_v29 = vld [vmem:[%s5566_s14 + $0x1e4] ss:$24 sps:$4 sm:$0xff]  }
 0x153   : > { %v6121_v41 = vadd.f32 %v1031_v36, %v6101_v25  ;;  %v1033_v43 = vpop.f32.mrb[3].mxu1  ;;  %v6124_v45 = vadd.f32 %v980_v39, %v6112_v26  ;;  %2503 = vmatpush1.bf16.msra.mxu0 %v6180_v22  ;;  %v6188_v36 = vld [vmem:[%s5566_s14 + $0x1e0] ss:$24 sps:$4 sm:$0xff]   ;;  %v6193_v39 = vld [vmem:[%s5566_s14 + $0x214] ss:$24 sps:$4 sm:$0xff]  }
 0x154   : > { %6926 = vst [vmem:[#allocation21_spill] sm:$0xff] %v6115_v32  ;;  %v6127_v47 = vadd.f32 %v1033_v43, %v6091_v21  ;;  %2504 = vmatprep.subr.bf16.mxu0 %v6185_v29  ;;  %v6196_v43 = vld [vmem:[%s5566_s14 + $0x210] ss:$24 sps:$4 sm:$0xff]  }
 0x155   : > { %6927 = vst [vmem:[#allocation22_spill] sm:$0xff] %v6121_v41 }
 0x156   : > { %6928 = vst [vmem:[#allocation23_spill] sm:$0xff] %v6127_v47 }
 0x157   : > { %v984_v54 = vpop.f32.mrb[4].mxu0  ;;  %2505 = vmatpush1.bf16.msra.mxu0 %v6188_v36 }
 0x158   : > { %v1037_v56 = vpop.f32.mrb[4].mxu1  ;;  %v6149_v59 = vadd.f32 %v984_v54, %v6096_v23  ;;  %v986_v60 = vpop.f32.mrb[5].mxu0  ;;  %2506 = vmatprep.subr.bf16.mxu0 %v6193_v39  ;;  %v6201_v54 = vld [vmem:[%s5566_s14 + $0x244] ss:$24 sps:$4 sm:$0xff]  }
 0x159   : > { %v6152_v61 = vadd.f32 %v1037_v56, %v6101_v25  ;;  %v1039_v62 = vpop.f32.mrb[5].mxu1  ;;  %v6158_v2 = vadd.f32 %v986_v60, %v6112_v26  ;;  %v988_v3 = vpop.f32.mrb[6].mxu0  ;;  %v6204_v56 = vld [vmem:[%s5566_s14 + $0x240] ss:$24 sps:$4 sm:$0xff]   ;;  %v6207_v60 = vld [vmem:[%s5566_s14 + $0x274] ss:$24 sps:$4 sm:$0xff]  }
 0x15a   : > { %6929 = vst [vmem:[#allocation24_spill] sm:$0xff] %v6149_v59  ;;  %v6161_v4 = vadd.f32 %v1039_v62, %v6091_v21  ;;  %v1041_v5 = vpop.f32.mrb[6].mxu1  ;;  %v6165_v10 = vadd.f32 %v988_v3, %v6096_v23  ;;  %v990_v14 = vpop.f32.mrb[7].mxu0  ;;  %v6212_v62 = vld [vmem:[%s5566_s14 + $0x270] ss:$24 sps:$4 sm:$0xff]   ;;  %v448_v3 = vsub.s32 4, %v6075_v9 }
 0x15b   : > { %6930 = vst [vmem:[#allocation25_spill] sm:$0xff] %v6152_v61  ;;  %6931 = vst [vmem:[#allocation26_spill] sm:$0xff] %v6158_v2  ;;  %v6168_v18 = vadd.f32 %v1041_v5, %v6101_v25  ;;  %v6170_v31 = vpop.f32.mrb[7].mxu1  ;;  %v6174_v33 = vadd.f32 %v990_v14, %v6112_v26  ;;  %2507 = vmatpush1.bf16.msra.mxu0 %v6196_v43  ;;  %v6227_v5 = vld [vmem:[%s313_s30] sm:$0x3f]  ;;  %v6887_v14 = vsub.s32 5, %v6075_v9 }
 0x15c   : > { %6932 = vst [vmem:[#allocation27_spill] sm:$0xff] %v6161_v4  ;;  %6933 = vst [vmem:[#allocation28_spill] sm:$0xff] %v6165_v10  ;;  %2508 = vmatprep.subr.bf16.mxu0 %v6201_v54 }
 0x15d   : > { %6934 = vst [vmem:[#allocation29_spill] sm:$0xff] %v6168_v18  ;;  %6935 = vst [vmem:[#allocation30_spill] sm:$0xff] %v6174_v33 }
 0x15f   : > { %2509 = vmatpush1.bf16.msra.mxu0 %v6204_v56 }
 0x160   : > { %2510 = vmatprep.subr.bf16.mxu0 %v6207_v60 }
 0x163   : > { %2511 = vmatpush1.bf16.msra.mxu0 %v6212_v62 }
 0x164   : > { %2512 = vmatprep.subr.bf16.mxu0 %v5774_v8  ;;  %v449_v8 = vrot.slane %v6085_v17, %v448_v3 }
 0x167   : > { %2513 = vmatpush1.bf16.msra.mxu0 %v5778_v12  ;;  %v6234_v12 = vrot.slane %v6227_v5, %v432_v13 }
 0x168   : > { %2514 = vmatprep.subr.bf16.mxu0 %v5783_v16  ;;  %v6239_v16 = vrot.slane %v6085_v17, %v6887_v14  ;;  %v977_v17 = vadd.f32 %v6107_v42, %v6112_v26 }
 0x169   : > { %6936 = vst [vmem:[#allocation31_spill] sm:$0xff] %v6234_v12 }
 0x16b   : > { %2515 = vmatpush1.bf16.msra.mxu0 %v5787_v20  ;;  %v6244_v20 = vrot.slane %v6227_v5, %v436_v19 }
 0x16c   : > { %2566 = vmatprep.subr.bf16.mxu0 %v5795_v24 }
 0x16d   : > { %6937 = vst [vmem:[#allocation32_spill] sm:$0xff] %v6244_v20 }
 0x18f   : > { %v1080_v24 = vpop.f32.mrb[8].mxu0 }
 0x190   : > { %v1765_v11 = vpop.f32.mrb[8].mxu1  ;;  %v6248_v18 = vadd.f32 %v1080_v24, %v449_v8  ;;  %v1082_v32 = vpop.f32.mrb[9].mxu0 }
 0x191   : > { %v1766_v13 = vadd.f32 %v1765_v11, %v6234_v12  ;;  %v1767_v33 = vpop.f32.mrb[9].mxu1  ;;  %v6254_v14 = vadd.f32 %v1082_v32, %v6239_v16  ;;  %v1084_v10 = vpop.f32.mrb[10].mxu0 }
 0x192   : > { %6938 = vst [vmem:[#allocation33_spill] sm:$0xff] %v6248_v18  ;;  %v1768_v19 = vadd.f32 %v1767_v33, %v6244_v20  ;;  %v1769_v61 = vpop.f32.mrb[10].mxu1  ;;  %v6257_v2 = vadd.f32 %v1084_v10, %v449_v8  ;;  %v1086_v23 = vpop.f32.mrb[11].mxu0 }
 0x193   : > { %6939 = vst [vmem:[#allocation34_spill] sm:$0xff] %v6254_v14  ;;  %v1861_v47 = vadd.f32 %v1766_v13, %v975_v15  ;;  %v1770_v27 = vpop.f32.mrb[11].mxu1  ;;  %v6260_v11 = vadd.f32 %v1086_v23, %v6239_v16  ;;  %v6947_v23 = vsub.s32 3, %v6075_v9 }
 0x194   : > { %6940 = vst [vmem:[#allocation35_spill] sm:$0xff] %v6257_v2  ;;  %v1868_v24 = vadd.f32 %v1768_v19, %v977_v17  ;;  %v6944_v17 = vsub.s32 2, %v6075_v9 }
 0x195   : > { %6941 = vst [vmem:[#allocation36_spill] sm:$0xff] %v6260_v11  ;;  %v4480_v14 = vmul.f32 -1.442695, %v1861_v47  ;;  %v6278_v27 = vrot.slane %v6227_v5, %v6947_v23 }
 0x196   : > { %v4481_v15 = vmul.f32 -1.442695, %v1868_v24  ;;  %v6270_v19 = vrot.slane %v6227_v5, %v6944_v17 }
 0x197   : > { %v1090_v18 = vpop.f32.mrb[12].mxu0  ;;  %5300 = vpow2.f32 %v4480_v14 }
 0x198   : > { %v6262_v59 = vadd.f32 %v1090_v18, %v449_v8  ;;  %v1092_v42 = vpop.f32.mrb[13].mxu0  ;;  %5302 = vpow2.f32 %v4481_v15  ;;  %6945 = vst [vmem:[#allocation39_spill] sm:$0xff] %v6270_v19  ;;  %v6273_v18 = vrot.slane %v6227_v5, %v448_v3  ;;  %v1044_v3 = vadd.f32 %v6170_v31, %v6091_v21 }
 0x199   : > { %v6265_v26 = vadd.f32 %v1092_v42, %v6239_v16  ;;  %v1094_v32 = vpop.f32.mrb[14].mxu0 }
 0x19a   : > { %6942 = vst [vmem:[#allocation37_spill] sm:$0xff] %v6262_v59  ;;  %v1096_v33 = vpop.f32.mrb[15].mxu0  ;;  %6946 = vst [vmem:[#allocation40_spill] sm:$0xff] %v6273_v18  ;;  %v1095_v42 = vadd.f32 %v1094_v32, %v449_v8 }
 0x19b   : > { %6943 = vst [vmem:[#allocation38_spill] sm:$0xff] %v6265_v26 }
 0x1a1   : > { %v5301_v61 = vpop.eup %5300 }
 0x1a2   : > { %v1865_v10 = vadd.f32 1.0, %v5301_v61  ;;  %v5303_v13 = vpop.eup %5302 }
 0x1a3   : > { %v1872_v47 = vadd.f32 1.0, %v5303_v13  ;;  %v1028_v13 = vadd.f32 %v6105_v34, %v6101_v25 }
 0x1a4   : > { %5304 = vrcp.f32 %v1865_v10 }
 0x1a5   : > { %5306 = vrcp.f32 %v1872_v47 }
 0x1ae   : > { %v5305_v17 = vpop.eup %5304 }
 0x1af   : > { %v5307_v21 = vpop.eup %5306 }
 0x1b0   : > { %v1878_v31 = vsub.f32 1.0, %v5307_v21 }
 0x1cf   : > { %v1806_v14 = vpop.f32.mrb[16].mxu0 }
 0x1d0   : > { %v1847_v24 = vpop.f32.mrb[12].mxu1  ;;  %v1807_v15 = vadd.f32 %v1806_v14, %v6270_v19  ;;  %v1808_v10 = vpop.f32.mrb[17].mxu0 }
 0x1d1   : > { %v1848_v61 = vadd.f32 %v1847_v24, %v6273_v18  ;;  %v1849_v11 = vpop.f32.mrb[13].mxu1  ;;  %v1809_v2 = vadd.f32 %v1808_v10, %v6278_v27  ;;  %v1810_v26 = vpop.f32.mrb[18].mxu0  ;;  %v1880_v10 = vmul.f32 0.0, %v5307_v21  ;;  %v6962_v21 = vld [vmem:[#allocation19_spill] sm:$0xff] }
 0x1d2   : > { %v1851_v59 = vpop.f32.mrb[14].mxu1  ;;  %v1875_v23 = vmul.f32 %v5305_v17, %v1807_v15  ;;  %v1811_v32 = vpop.f32.mrb[19].mxu0  ;;  %v1097_v15 = vadd.f32 %v1096_v33, %v6239_v16  ;;  %v6318_v33 = vld [vmem:[%s5566_s14 + $0x40] ss:$24 sps:$4 sm:$0xff]  }
 0x1d3   : > { %v1889_v8 = vadd.f32 %v1848_v61, %v1095_v42  ;;  %v1852_v14 = vpop.f32.mrb[15].mxu1  ;;  %v1882_v24 = vadd.f32 %v1809_v2, %v1044_v3  ;;  %v6948_v2 = vsub.s32 5, %v6075_v9  ;;  %v6950_v32 = vld [vmem:[#allocation7_spill] sm:$0xff] }
 0x1d4   : > { %v1876_v18 = vadd.f32 %v1875_v23, %v1028_v13  ;;  %v6960_v14 = vld [vmem:[#allocation17_spill] sm:$0xff] }
 0x1d5   : > { %v4482_v41 = vmul.f32 -1.442695, %v1882_v24  ;;  %v4483_v19 = vmul.f32 -1.442695, %v1889_v8  ;;  %v6961_v24 = vld [vmem:[#allocation18_spill] sm:$0xff] }
 0x1d6   : > { %5308 = vtanh.f32 %v1876_v18 }
 0x1d7   : > { %5310 = vpow2.f32 %v4482_v41 }
 0x1d8   : > { %5312 = vpow2.f32 %v4483_v19  ;;  %v6301_v19 = vrot.slane %v6227_v5, %v6948_v2  ;;  %v6384_v2 = vld [vmem:[%s5566_s14 + $0x6c] ss:$24 sps:$4 sm:$0xff]  }
 0x1da   : > { %v1850_v47 = vadd.f32 %v1849_v11, %v6301_v19  ;;  %v6314_v11 = vld [vmem:[%s5566_s14 + $0x44] ss:$24 sps:$4 sm:$0xff]  }
 0x1e0   : > { %v5309_v26 = vpop.eup %5308 }
 0x1e1   : > { %v1879_v59 = vmul.f32 %v5309_v26, %v1878_v31  ;;  %v5311_v4 = vpop.eup %5310  ;;  %v6963_v31 = vld [vmem:[#allocation20_spill] sm:$0xff]  ;;  %v6351_v26 = vld [vmem:[%s5566_s14] ss:$24 sps:$4 sm:$0xff]  }
 0x1e2   : > { %v1886_v25 = vadd.f32 1.0, %v5311_v4  ;;  %v5313_v41 = vpop.eup %5312 }
 0x1e3   : > { %v6294_v34 = vadd.f32 %v1880_v10, %v1879_v59  ;;  %v1893_v18 = vadd.f32 1.0, %v5313_v41  ;;  %v6354_v59 = vld [vmem:[%s5566_s14 + $0x4] ss:$24 sps:$4 sm:$0xff]   ;;  %v6357_v10 = vld [vmem:[%s5566_s14 + $0x8] ss:$24 sps:$4 sm:$0xff]  }
 0x1e4   : > { %5314 = vrcp.f32 %v1886_v25  ;;  %v6363_v25 = vld [vmem:[%s5566_s14 + $0x34] ss:$24 sps:$4 sm:$0xff]   ;;  %3239 = vmatprep.subr.bf16.mxu1 %v6354_v59  ;;  %v6380_v41 = vld [vmem:[%s5566_s14 + $0x64] ss:$24 sps:$4 sm:$0xff]  }
 0x1e5   : > { %1903 = vst [vmem:[%s6292_s10] sm:$0xff] %v6294_v34  ;;  %5316 = vrcp.f32 %v1893_v18  ;;  %v1906_v16 = vpack.c.bf16 %v6294_v34, %v6294_v34  ;;  %v6388_v18 = vld [vmem:[%s5566_s14 + $0x60] ss:$24 sps:$4 sm:$0xff]  }
 0x1ee   : > { %v5315_v42 = vpop.eup %5314 }
 0x1ef   : > { %v1896_v4 = vmul.f32 %v5315_v42, %v1850_v47  ;;  %v5317_v17 = vpop.eup %5316  ;;  %v6393_v47 = vld [vmem:[%s5566_s14 + $0x68] ss:$24 sps:$4 sm:$0xff]   ;;  %v6396_v42 = vld [vmem:[%s5566_s14 + $0x94] ss:$24 sps:$4 sm:$0xff]  }
 0x1f0   : > { %v1899_v3 = vsub.f32 1.0, %v5317_v17  ;;  %v1901_v23 = vmul.f32 0.0, %v5317_v17  ;;  %v6412_v17 = vld [vmem:[%s5566_s14 + $0xc4] ss:$24 sps:$4 sm:$0xff]  }
 0x1f1   : > { %v1897_v61 = vadd.f32 %v1896_v4, %v1097_v15  ;;  %v6400_v15 = vld [vmem:[%s5566_s14 + $0x9c] ss:$24 sps:$4 sm:$0xff]   ;;  %v6404_v4 = vld [vmem:[%s5566_s14 + $0x90] ss:$24 sps:$4 sm:$0xff]  }
 0x1f3   : > { %5318 = vtanh.f32 %v1897_v61  ;;  %v6409_v61 = vld [vmem:[%s5566_s14 + $0x98] ss:$24 sps:$4 sm:$0xff]  }
 0x1fd   : > { %v5319_v13 = vpop.eup %5318 }
 0x1fe   : > { %v1900_v9 = vmul.f32 %v5319_v13, %v1899_v3  ;;  %v6416_v3 = vld [vmem:[%s5566_s14 + $0xcc] ss:$24 sps:$4 sm:$0xff]   ;;  %v6420_v13 = vld [vmem:[%s5566_s14 + $0xc0] ss:$24 sps:$4 sm:$0xff]  }
 0x200   : > { %v6305_v8 = vadd.f32 %v1901_v23, %v1900_v9  ;;  %v6425_v9 = vld [vmem:[%s5566_s14 + $0xc8] ss:$24 sps:$4 sm:$0xff]   ;;  %v6428_v23 = vld [vmem:[%s5566_s14 + $0xf4] ss:$24 sps:$4 sm:$0xff]  }
 0x202   : > { %4484 = vst [vmem:[%s6292_s10 + $0x38] sm:$0xff] %v6305_v8  ;;  %v1907_v5 = vpack.c.bf16 %v6305_v8, %v6305_v8 }
 0x204   : > { %2516 = vmatprep.mubr.bf16.mxu0 %v1907_v5  ;;  %2557 = vmatprep.mubr.bf16.mxu1 %v1907_v5 }
 0x205   : > { %2517 = vmatmul.mubr.bf16.vlgmr.msra.gmra.mrb[20].mxu0 %v1906_v16  ;;  %2558 = vmatmul.mubr.bf16.vlgmr.msra.gmra.mrb[16].mxu1 %v1906_v16 }
 0x206   : > { %2567 = vmatpush1.bf16.msra.mxu0 %v5801_v28  ;;  %2598 = vmatprep.mubr.bf16.mxu0 %v1907_v5  ;;  %v6949_v28 = vld [vmem:[#allocation6_spill] sm:$0xff]  ;;  %v6432_v5 = vld [vmem:[%s5566_s14 + $0xfc] ss:$24 sps:$4 sm:$0xff]  }
 0x207   : > { %2568 = vmatprep.subr.bf16.mxu0 %v6314_v11  ;;  %3240 = vmatpush1.bf16.msra.mxu1 %v6351_v26 }
 0x208   : > { %3241 = vmatprep.subr.bf16.mxu1 %v6363_v25 }
 0x20a   : > { %2569 = vmatpush1.bf16.msra.mxu0 %v6318_v33 }
 0x20b   : > { %2570 = vmatprep.subr.bf16.mxu0 %v5820_v37  ;;  %v6951_v37 = vld [vmem:[#allocation8_spill] sm:$0xff] }
 0x20e   : > { %2571 = vmatpush1.bf16.msra.mxu0 %v5829_v7  ;;  %v6952_v7 = vld [vmem:[#allocation9_spill] sm:$0xff] }
 0x20f   : > { %2572 = vmatprep.subr.bf16.mxu0 %v5837_v40  ;;  %v6953_v40 = vld [vmem:[#allocation10_spill] sm:$0xff] }
 0x212   : > { %2573 = vmatpush1.bf16.msra.mxu0 %v5846_v30  ;;  %v6954_v30 = vld [vmem:[#allocation11_spill] sm:$0xff] }
 0x213   : > { %2574 = vmatprep.subr.bf16.mxu0 %v5852_v44  ;;  %v6955_v44 = vld [vmem:[#allocation12_spill] sm:$0xff] }
 0x216   : > { %2575 = vmatpush1.bf16.msra.mxu0 %v5863_v46  ;;  %v6956_v46 = vld [vmem:[#allocation13_spill] sm:$0xff] }
 0x217   : > { %2576 = vmatprep.subr.bf16.mxu0 %v5870_v35  ;;  %v6957_v35 = vld [vmem:[#allocation14_spill] sm:$0xff] }
 0x21a   : > { %2577 = vmatpush1.bf16.msra.mxu0 %v5880_v49  ;;  %v6958_v49 = vld [vmem:[#allocation15_spill] sm:$0xff] }
 0x21b   : > { %2578 = vmatprep.subr.bf16.mxu0 %v5886_v51  ;;  %v6959_v51 = vld [vmem:[#allocation16_spill] sm:$0xff] }
 0x21e   : > { %2579 = vmatpush1.bf16.msra.mxu0 %v6949_v28  ;;  %v6441_v28 = vld [vmem:[%s5566_s14 + $0xf8] ss:$24 sps:$4 sm:$0xff]  }
 0x21f   : > { %2580 = vmatprep.subr.bf16.mxu0 %v6950_v32  ;;  %v6449_v32 = vld [vmem:[%s5566_s14 + $0x12c] ss:$24 sps:$4 sm:$0xff]  }
 0x222   : > { %2581 = vmatpush1.bf16.msra.mxu0 %v6951_v37  ;;  %v6452_v37 = vld [vmem:[%s5566_s14 + $0x128] ss:$24 sps:$4 sm:$0xff]  }
 0x223   : > { %2582 = vmatprep.subr.bf16.mxu0 %v6952_v7  ;;  %v6459_v7 = vld [vmem:[%s5566_s14 + $0x15c] ss:$24 sps:$4 sm:$0xff]  }
 0x226   : > { %2583 = vmatpush1.bf16.msra.mxu0 %v6953_v40  ;;  %v6462_v40 = vld [vmem:[%s5566_s14 + $0x158] ss:$24 sps:$4 sm:$0xff]  }
 0x227   : > { %2584 = vmatprep.subr.bf16.mxu0 %v6954_v30  ;;  %v6532_v30 = vld [vmem:[%s5566_s14 + $0x2ac] ss:$24 sps:$4 sm:$0xff]  }
 0x228   : > { %6968 = vst [vmem:[#allocation10_spill] sm:$0xff] %v6532_v30 }
 0x22a   : > { %2585 = vmatpush1.bf16.msra.mxu0 %v6955_v44  ;;  %v6536_v44 = vld [vmem:[%s5566_s14 + $0x2d4] ss:$24 sps:$4 sm:$0xff]  }
 0x22b   : > { %2586 = vmatprep.subr.bf16.mxu0 %v6956_v46  ;;  %6969 = vst [vmem:[#allocation11_spill] sm:$0xff] %v6536_v44  ;;  %v6548_v46 = vld [vmem:[%s5566_s14 + $0x2dc] ss:$24 sps:$4 sm:$0xff]  }
 0x22c   : > { %6972 = vst [vmem:[#allocation14_spill] sm:$0xff] %v6548_v46 }
 0x22e   : > { %2587 = vmatpush1.bf16.msra.mxu0 %v6957_v35  ;;  %v6553_v35 = vld [vmem:[%s5566_s14 + $0x2d8] ss:$24 sps:$4 sm:$0xff]  }
 0x22f   : > { %2588 = vmatprep.subr.bf16.mxu0 %v6958_v49  ;;  %6973 = vst [vmem:[#allocation15_spill] sm:$0xff] %v6553_v35  ;;  %v6559_v49 = vld [vmem:[%s5566_s14 + $0x14] ss:$24 sps:$4 sm:$0xff]  }
 0x230   : > { %6974 = vst [vmem:[#allocation16_spill] sm:$0xff] %v6559_v49 }
 0x232   : > { %2589 = vmatpush1.bf16.msra.mxu0 %v6959_v51 }
 0x233   : > { %2590 = vmatprep.subr.bf16.mxu0 %v6960_v14 }
 0x236   : > { %2591 = vmatpush1.bf16.msra.mxu0 %v6961_v24 }
 0x237   : > { %2592 = vmatprep.subr.bf16.mxu0 %v6962_v21 }
 0x23a   : > { %2593 = vmatpush1.bf16.msra.mxu0 %v6008_v63  ;;  %v6360_v63 = vld [vmem:[%s5566_s14 + $0xc] ss:$24 sps:$4 sm:$0xff]  }
 0x23b   : > { %2594 = vmatprep.subr.bf16.mxu0 %v6963_v31 }
 0x23e   : > { %2595 = vmatpush1.bf16.msra.mxu0 %v6019_v57  ;;  %v6372_v57 = vld [vmem:[%s5566_s14 + $0x30] ss:$24 sps:$4 sm:$0xff]  }
 0x23f   : > { %2596 = vmatprep.subr.bf16.mxu0 %v6024_v55  ;;  %v6367_v55 = vld [vmem:[%s5566_s14 + $0x3c] ss:$24 sps:$4 sm:$0xff]   ;;  %3242 = vmatpush1.bf16.msra.mxu1 %v6372_v57 }
 0x240   : > { %3243 = vmatprep.subr.bf16.mxu1 %v6380_v41 }
 0x242   : > { %2597 = vmatpush1.bf16.msra.mxu0 %v6029_v1  ;;  %v6377_v1 = vld [vmem:[%s5566_s14 + $0x38] ss:$24 sps:$4 sm:$0xff]  }
 0x243   : > { %3280 = vmatprep.subr.bf16.mxu0 %v6360_v63  ;;  %3244 = vmatpush1.bf16.msra.mxu1 %v6388_v18 }
 0x244   : > { %3245 = vmatprep.subr.bf16.mxu1 %v6396_v42 }
 0x245   : > { %2599 = vmatmul.mubr.bf16.vlgmr.msra.gmra.mrb[24].mxu0 %v1906_v16  ;;  %v6436_v16 = vld [vmem:[%s5566_s14 + $0xf0] ss:$24 sps:$4 sm:$0xff]  }
 0x246   : > { %3281 = vmatpush1.bf16.msra.mxu0 %v6357_v10 }
 0x247   : > { %3282 = vmatprep.subr.bf16.mxu0 %v6367_v55  ;;  %3246 = vmatpush1.bf16.msra.mxu1 %v6404_v4 }
 0x248   : > { %3247 = vmatprep.subr.bf16.mxu1 %v6412_v17 }
 0x24a   : > { %3283 = vmatpush1.bf16.msra.mxu0 %v6377_v1 }
 0x24b   : > { %3284 = vmatprep.subr.bf16.mxu0 %v6384_v2  ;;  %3248 = vmatpush1.bf16.msra.mxu1 %v6420_v13 }
 0x24c   : > { %3249 = vmatprep.subr.bf16.mxu1 %v6428_v23 }
 0x24e   : > { %3285 = vmatpush1.bf16.msra.mxu0 %v6393_v47 }
 0x24f   : > { %3286 = vmatprep.subr.bf16.mxu0 %v6400_v15  ;;  %3250 = vmatpush1.bf16.msra.mxu1 %v6436_v16 }
 0x250   : > { %3251 = vmatprep.subr.bf16.mxu1 %v6130_v48  ;;  %v6469_v48 = vld [vmem:[%s5566_s14 + $0x18c] ss:$24 sps:$4 sm:$0xff]  }
 0x252   : > { %3287 = vmatpush1.bf16.msra.mxu0 %v6409_v61 }
 0x253   : > { %3288 = vmatprep.subr.bf16.mxu0 %v6416_v3  ;;  %3252 = vmatpush1.bf16.msra.mxu1 %v6133_v50  ;;  %v6472_v50 = vld [vmem:[%s5566_s14 + $0x188] ss:$24 sps:$4 sm:$0xff]  }
 0x254   : > { %3253 = vmatprep.subr.bf16.mxu1 %v6138_v52  ;;  %v6479_v52 = vld [vmem:[%s5566_s14 + $0x1bc] ss:$24 sps:$4 sm:$0xff]  }
 0x256   : > { %3289 = vmatpush1.bf16.msra.mxu0 %v6425_v9 }
 0x257   : > { %3290 = vmatprep.subr.bf16.mxu0 %v6432_v5  ;;  %3254 = vmatpush1.bf16.msra.mxu1 %v6141_v53  ;;  %v6482_v53 = vld [vmem:[%s5566_s14 + $0x1b8] ss:$24 sps:$4 sm:$0xff]  }
 0x258   : > { %3255 = vmatprep.subr.bf16.mxu1 %v6146_v58  ;;  %v6489_v58 = vld [vmem:[%s5566_s14 + $0x1ec] ss:$24 sps:$4 sm:$0xff]  }
 0x25a   : > { %3291 = vmatpush1.bf16.msra.mxu0 %v6441_v28 }
 0x25b   : > { %3292 = vmatprep.subr.bf16.mxu0 %v6449_v32  ;;  %3256 = vmatpush1.bf16.msra.mxu1 %v6155_v0  ;;  %v6492_v0 = vld [vmem:[%s5566_s14 + $0x1e8] ss:$24 sps:$4 sm:$0xff]  }
 0x25c   : > { %3257 = vmatprep.subr.bf16.mxu1 %v6177_v6  ;;  %v6499_v6 = vld [vmem:[%s5566_s14 + $0x21c] ss:$24 sps:$4 sm:$0xff]  }
 0x25e   : > { %3293 = vmatpush1.bf16.msra.mxu0 %v6452_v37 }
 0x25f   : > { %3294 = vmatprep.subr.bf16.mxu0 %v6459_v7  ;;  %3258 = vmatpush1.bf16.msra.mxu1 %v6180_v22  ;;  %v6502_v22 = vld [vmem:[%s5566_s14 + $0x218] ss:$24 sps:$4 sm:$0xff]  }
 0x260   : > { %3259 = vmatprep.subr.bf16.mxu1 %v6185_v29  ;;  %v6507_v29 = vld [vmem:[%s5566_s14 + $0x24c] ss:$24 sps:$4 sm:$0xff]  }
 0x262   : > { %3295 = vmatpush1.bf16.msra.mxu0 %v6462_v40 }
 0x263   : > { %3296 = vmatprep.subr.bf16.mxu0 %v6469_v48  ;;  %3260 = vmatpush1.bf16.msra.mxu1 %v6188_v36  ;;  %v6511_v36 = vld [vmem:[%s5566_s14 + $0x248] ss:$24 sps:$4 sm:$0xff]  }
 0x264   : > { %3261 = vmatprep.subr.bf16.mxu1 %v6193_v39  ;;  %v6516_v39 = vld [vmem:[%s5566_s14 + $0x27c] ss:$24 sps:$4 sm:$0xff]  }
 0x265   : > { %6964 = vst [vmem:[#allocation6_spill] sm:$0xff] %v6516_v39 }
 0x266   : > { %3297 = vmatpush1.bf16.msra.mxu0 %v6472_v50 }
 0x267   : > { %3298 = vmatprep.subr.bf16.mxu0 %v6479_v52  ;;  %3262 = vmatpush1.bf16.msra.mxu1 %v6196_v43  ;;  %v6520_v43 = vld [vmem:[%s5566_s14 + $0x2a4] ss:$24 sps:$4 sm:$0xff]  }
 0x268   : > { %3263 = vmatprep.subr.bf16.mxu1 %v6201_v54  ;;  %6965 = vst [vmem:[#allocation7_spill] sm:$0xff] %v6520_v43  ;;  %v6524_v54 = vld [vmem:[%s5566_s14 + $0x278] ss:$24 sps:$4 sm:$0xff]  }
 0x269   : > { %6966 = vst [vmem:[#allocation8_spill] sm:$0xff] %v6524_v54 }
 0x26a   : > { %3299 = vmatpush1.bf16.msra.mxu0 %v6482_v53 }
 0x26b   : > { %3300 = vmatprep.subr.bf16.mxu0 %v6489_v58  ;;  %3264 = vmatpush1.bf16.msra.mxu1 %v6204_v56  ;;  %v6529_v56 = vld [vmem:[%s5566_s14 + $0x2a0] ss:$24 sps:$4 sm:$0xff]  }
 0x26c   : > { %3265 = vmatprep.subr.bf16.mxu1 %v6207_v60  ;;  %6967 = vst [vmem:[#allocation9_spill] sm:$0xff] %v6529_v56  ;;  %v6540_v60 = vld [vmem:[%s5566_s14 + $0x2a8] ss:$24 sps:$4 sm:$0xff]  }
 0x26d   : > { %6970 = vst [vmem:[#allocation12_spill] sm:$0xff] %v6540_v60 }
 0x26e   : > { %3301 = vmatpush1.bf16.msra.mxu0 %v6492_v0 }
 0x26f   : > { %3302 = vmatprep.subr.bf16.mxu0 %v6499_v6  ;;  %3266 = vmatpush1.bf16.msra.mxu1 %v6212_v62  ;;  %v6545_v62 = vld [vmem:[%s5566_s14 + $0x2d0] ss:$24 sps:$4 sm:$0xff]  }
 0x270   : > { %3267 = vmatprep.subr.bf16.mxu1 %v6520_v43  ;;  %6971 = vst [vmem:[#allocation13_spill] sm:$0xff] %v6545_v62 }
 0x272   : > { %3303 = vmatpush1.bf16.msra.mxu0 %v6502_v22 }
 0x273   : > { %3304 = vmatprep.subr.bf16.mxu0 %v6507_v29  ;;  %3268 = vmatpush1.bf16.msra.mxu1 %v6529_v56 }
 0x274   : > { %3269 = vmatprep.subr.bf16.mxu1 %v6536_v44 }
 0x276   : > { %3305 = vmatpush1.bf16.msra.mxu0 %v6511_v36 }
 0x277   : > { %3306 = vmatprep.subr.bf16.mxu0 %v6516_v39  ;;  %3270 = vmatpush1.bf16.msra.mxu1 %v6545_v62 }
 0x278   : > { %3321 = vmatprep.subr.bf16.mxu1 %v6559_v49 }
 0x27a   : > { %3307 = vmatpush1.bf16.msra.mxu0 %v6524_v54 }
 0x27b   : > { %3308 = vmatprep.subr.bf16.mxu0 %v6532_v30  ;;  %v6975_v30 = vld [vmem:[#allocation27_spill] sm:$0xff] }
 0x27e   : > { %3309 = vmatpush1.bf16.msra.mxu0 %v6540_v60 }
 0x27f   : > { %3310 = vmatprep.subr.bf16.mxu0 %v6548_v46 }
 0x282   : > { %3311 = vmatpush1.bf16.msra.mxu0 %v6553_v35 }
 0x283   : > { %3990 = vmatprep.subr.bf16.mxu0 %v6354_v59 }
 0x2d8   : > { %v2518_v51 = vpop.f32.mrb[20].mxu0  ;;  %v2559_v14 = vpop.f32.mrb[16].mxu1 }
 0x2d9   : > { %v2519_v24 = vadd.f32 %v2518_v51, %v6234_v12  ;;  %v2520_v21 = vpop.f32.mrb[21].mxu0  ;;  %v2561_v31 = vpop.f32.mrb[17].mxu1 }
 0x2da   : > { %v2521_v44 = vadd.f32 %v2520_v21, %v6244_v20  ;;  %v2562_v62 = vadd.f32 %v2561_v31, %v6278_v27  ;;  %v2522_v56 = vpop.f32.mrb[22].mxu0  ;;  %v2563_v43 = vpop.f32.mrb[18].mxu1  ;;  %v6976_v31 = vld [vmem:[#allocation39_spill] sm:$0xff] }
 0x2db   : > { %v2615_v35 = vadd.f32 %v2519_v24, %v6118_v38  ;;  %v2523_v46 = vpop.f32.mrb[23].mxu0  ;;  %v2564_v60 = vpop.f32.mrb[19].mxu1  ;;  %v2560_v43 = vadd.f32 %v2559_v14, %v6976_v31 }
 0x2dc   : > { %v2622_v59 = vadd.f32 %v2521_v44, %v6124_v45  ;;  %v2636_v49 = vadd.f32 %v2562_v62, %v6975_v30  ;;  %v6977_v60 = vld [vmem:[#allocation22_spill] sm:$0xff] }
 0x2dd   : > { %v4581_v54 = vmul.f32 -1.442695, %v2615_v35 }
 0x2de   : > { %v4582_v39 = vmul.f32 -1.442695, %v2622_v59  ;;  %v4583_v45 = vmul.f32 -1.442695, %v2636_v49 }
 0x2df   : > { %5320 = vpow2.f32 %v4581_v54 }
 0x2e0   : > { %5322 = vpow2.f32 %v4582_v39 }
 0x2e9   : > { %v5321_v51 = vpop.eup %5320 }
 0x2ea   : > { %v2619_v12 = vadd.f32 1.0, %v5321_v51  ;;  %v5323_v21 = vpop.eup %5322 }
 0x2eb   : > { %v2626_v20 = vadd.f32 1.0, %v5323_v21 }
 0x2ec   : > { %5324 = vrcp.f32 %v2619_v12 }
 0x2ed   : > { %5326 = vrcp.f32 %v2626_v20  ;;  %v6978_v20 = vld [vmem:[#allocation40_spill] sm:$0xff] }
 0x2f6   : > { %v5325_v56 = vpop.eup %5324 }
 0x2f7   : > { %v2629_v38 = vmul.f32 %v5325_v56, %v2560_v43  ;;  %v5327_v30 = vpop.eup %5326  ;;  %v6979_v56 = vld [vmem:[#allocation37_spill] sm:$0xff] }
 0x2f8   : > { %v2632_v54 = vsub.f32 1.0, %v5327_v30  ;;  %v2634_v62 = vmul.f32 %v5327_v30, %v6294_v34 }
 0x2f9   : > { %v2630_v46 = vadd.f32 %v2629_v38, %v6977_v60 }
 0x2fb   : > { %5328 = vtanh.f32 %v2630_v46 }
 0x2fc   : > { %5330 = vpow2.f32 %v4583_v45  ;;  %v6980_v45 = vld [vmem:[#allocation38_spill] sm:$0xff] }
 0x305   : > { %v5329_v44 = vpop.eup %5328 }
 0x306   : > { %v2633_v39 = vmul.f32 %v5329_v44, %v2632_v54  ;;  %v5331_v35 = vpop.eup %5330 }
 0x307   : > { %v2640_v14 = vadd.f32 1.0, %v5331_v35 }
 0x308   : > { %v6572_v12 = vadd.f32 %v2634_v62, %v2633_v39 }
 0x309   : > { %5332 = vrcp.f32 %v2640_v14 }
 0x30a   : > { %4585 = vst [vmem:[%s6292_s10 + $0x10] sm:$0xff] %v6572_v12 }
 0x313   : > { %v5333_v43 = vpop.eup %5332 }
 0x318   : > { %v2600_v24 = vpop.f32.mrb[24].mxu0 }
 0x319   : > { %v2601_v59 = vadd.f32 %v2600_v24, %v6978_v20  ;;  %v2602_v51 = vpop.f32.mrb[25].mxu0 }
 0x31a   : > { %v2603_v49 = vadd.f32 %v2602_v51, %v6301_v19  ;;  %v2604_v21 = vpop.f32.mrb[26].mxu0 }
 0x31b   : > { %v2643_v38 = vadd.f32 %v2601_v59, %v6979_v56  ;;  %v2605_v60 = vpop.f32.mrb[27].mxu0  ;;  %v6592_v21 = vpack.c.bf16 %v6572_v12, %v6572_v12  ;;  %v6609_v56 = vld [vmem:[%s5566_s14 + $0xa4] ss:$24 sps:$4 sm:$0xff]  }
 0x31c   : > { %v2650_v34 = vmul.f32 %v5333_v43, %v2603_v49  ;;  %v6588_v49 = vld [vmem:[%s5566_s14 + $0x10] ss:$24 sps:$4 sm:$0xff]  }
 0x31d   : > { %v4584_v46 = vmul.f32 -1.442695, %v2643_v38  ;;  %v6605_v43 = vld [vmem:[%s5566_s14 + $0x70] ss:$24 sps:$4 sm:$0xff]   ;;  %v6674_v38 = vld [vmem:[%s5566_s14 + $0x1f4] ss:$24 sps:$4 sm:$0xff]  }
 0x31e   : > { %v2651_v30 = vadd.f32 %v2650_v34, %v6980_v45  ;;  %v6678_v60 = vld [vmem:[%s5566_s14 + $0x1f0] ss:$24 sps:$4 sm:$0xff]   ;;  %v6682_v34 = vld [vmem:[%s5566_s14 + $0x224] ss:$24 sps:$4 sm:$0xff]   ;;  %v6690_v45 = vld [vmem:[%s5566_s14 + $0x254] ss:$24 sps:$4 sm:$0xff]  }
 0x31f   : > { %5334 = vpow2.f32 %v4584_v46  ;;  %v6686_v46 = vld [vmem:[%s5566_s14 + $0x220] ss:$24 sps:$4 sm:$0xff]  }
 0x329   : > { %v5335_v54 = vpop.eup %5334 }
 0x32a   : > { %v2647_v44 = vadd.f32 1.0, %v5335_v54  ;;  %v6698_v54 = vld [vmem:[%s5566_s14 + $0x284] ss:$24 sps:$4 sm:$0xff]  }
 0x32c   : > { %5336 = vrcp.f32 %v2647_v44  ;;  %v6702_v44 = vld [vmem:[%s5566_s14 + $0x280] ss:$24 sps:$4 sm:$0xff]  }
 0x32d   : > { %5338 = vtanh.f32 %v2651_v30  ;;  %v6694_v30 = vld [vmem:[%s5566_s14 + $0x250] ss:$24 sps:$4 sm:$0xff]  }
 0x336   : > { %v5337_v39 = vpop.eup %5336 }
 0x337   : > { %v2653_v62 = vsub.f32 1.0, %v5337_v39  ;;  %v5339_v35 = vpop.eup %5338  ;;  %v2655_v24 = vmul.f32 %v5337_v39, %v6305_v8  ;;  %v6599_v8 = vld [vmem:[%s5566_s14 + $0x74] ss:$24 sps:$4 sm:$0xff]  }
 0x338   : > { %v6706_v39 = vld [vmem:[%s5566_s14 + $0x2b4] ss:$24 sps:$4 sm:$0xff]  }
 0x339   : > { %v2654_v14 = vmul.f32 %v5339_v35, %v2653_v62  ;;  %v6710_v62 = vld [vmem:[%s5566_s14 + $0x2b0] ss:$24 sps:$4 sm:$0xff]   ;;  %v6714_v35 = vld [vmem:[%s5566_s14 + $0x2e4] ss:$24 sps:$4 sm:$0xff]  }
 0x33b   : > { %v6581_v59 = vadd.f32 %v2655_v24, %v2654_v14  ;;  %v6718_v14 = vld [vmem:[%s5566_s14 + $0x2e0] ss:$24 sps:$4 sm:$0xff]   ;;  %v6991_v24 = vld [vmem:[#allocation16_spill] sm:$0xff] }
 0x33d   : > { %4586 = vst [vmem:[%s6292_s10 + $0x28] sm:$0xff] %v6581_v59  ;;  %v2662_v51 = vpack.c.bf16 %v6581_v59, %v6581_v59 }
 0x33f   : > { %3271 = vmatprep.mubr.bf16.mxu1 %v2662_v51  ;;  %3312 = vmatprep.mubr.bf16.mxu0 %v2662_v51 }
 0x340   : > { %3272 = vmatmul.mubr.bf16.vlgmr.msra.gmra.mrb[20].mxu1 %v6592_v21  ;;  %3313 = vmatmul.mubr.bf16.vlgmr.msra.gmra.mrb[28].mxu0 %v6592_v21 }
 0x341   : > { %3322 = vmatpush1.bf16.msra.mxu1 %v6588_v49  ;;  %3353 = vmatprep.mubr.bf16.mxu1 %v2662_v51 }
 0x342   : > { %3323 = vmatprep.subr.bf16.mxu1 %v6314_v11  ;;  %3991 = vmatpush1.bf16.msra.mxu0 %v6351_v26  ;;  %v6615_v11 = vld [vmem:[%s5566_s14 + $0xa0] ss:$24 sps:$4 sm:$0xff]   ;;  %v6619_v26 = vld [vmem:[%s5566_s14 + $0xd4] ss:$24 sps:$4 sm:$0xff]  }
 0x343   : > { %3992 = vmatprep.subr.bf16.mxu0 %v6363_v25  ;;  %v6629_v25 = vld [vmem:[%s5566_s14 + $0x104] ss:$24 sps:$4 sm:$0xff]  }
 0x345   : > { %3324 = vmatpush1.bf16.msra.mxu1 %v6318_v33  ;;  %v6625_v33 = vld [vmem:[%s5566_s14 + $0xd0] ss:$24 sps:$4 sm:$0xff]  }
 0x346   : > { %3325 = vmatprep.subr.bf16.mxu1 %v6599_v8  ;;  %3993 = vmatpush1.bf16.msra.mxu0 %v6372_v57  ;;  %v6635_v57 = vld [vmem:[%s5566_s14 + $0x100] ss:$24 sps:$4 sm:$0xff]  }
 0x347   : > { %3994 = vmatprep.subr.bf16.mxu0 %v6380_v41  ;;  %v6639_v41 = vld [vmem:[%s5566_s14 + $0x134] ss:$24 sps:$4 sm:$0xff]  }
 0x349   : > { %3326 = vmatpush1.bf16.msra.mxu1 %v6605_v43 }
 0x34a   : > { %3327 = vmatprep.subr.bf16.mxu1 %v6609_v56  ;;  %3995 = vmatpush1.bf16.msra.mxu0 %v6388_v18  ;;  %v6645_v18 = vld [vmem:[%s5566_s14 + $0x130] ss:$24 sps:$4 sm:$0xff]  }
 0x34b   : > { %3996 = vmatprep.subr.bf16.mxu0 %v6396_v42  ;;  %v6649_v42 = vld [vmem:[%s5566_s14 + $0x164] ss:$24 sps:$4 sm:$0xff]  }
 0x34d   : > { %3328 = vmatpush1.bf16.msra.mxu1 %v6615_v11 }
 0x34e   : > { %3329 = vmatprep.subr.bf16.mxu1 %v6619_v26  ;;  %3997 = vmatpush1.bf16.msra.mxu0 %v6404_v4  ;;  %v6654_v4 = vld [vmem:[%s5566_s14 + $0x160] ss:$24 sps:$4 sm:$0xff]  }
 0x34f   : > { %3998 = vmatprep.subr.bf16.mxu0 %v6412_v17  ;;  %v6658_v17 = vld [vmem:[%s5566_s14 + $0x194] ss:$24 sps:$4 sm:$0xff]  }
 0x351   : > { %3330 = vmatpush1.bf16.msra.mxu1 %v6625_v33 }
 0x352   : > { %3331 = vmatprep.subr.bf16.mxu1 %v6629_v25  ;;  %3999 = vmatpush1.bf16.msra.mxu0 %v6420_v13  ;;  %v6662_v13 = vld [vmem:[%s5566_s14 + $0x190] ss:$24 sps:$4 sm:$0xff]  }
 0x353   : > { %4000 = vmatprep.subr.bf16.mxu0 %v6428_v23  ;;  %v6666_v23 = vld [vmem:[%s5566_s14 + $0x1c4] ss:$24 sps:$4 sm:$0xff]  }
 0x355   : > { %3332 = vmatpush1.bf16.msra.mxu1 %v6635_v57 }
 0x356   : > { %3333 = vmatprep.subr.bf16.mxu1 %v6639_v41  ;;  %4001 = vmatpush1.bf16.msra.mxu0 %v6436_v16  ;;  %v6670_v16 = vld [vmem:[%s5566_s14 + $0x1c0] ss:$24 sps:$4 sm:$0xff]  }
 0x359   : > { %3334 = vmatpush1.bf16.msra.mxu1 %v6645_v18 }
 0x35a   : > { %3335 = vmatprep.subr.bf16.mxu1 %v6649_v42 }
 0x35d   : > { %3336 = vmatpush1.bf16.msra.mxu1 %v6654_v4 }
 0x35e   : > { %3337 = vmatprep.subr.bf16.mxu1 %v6658_v17 }
 0x361   : > { %3338 = vmatpush1.bf16.msra.mxu1 %v6662_v13 }
 0x362   : > { %3339 = vmatprep.subr.bf16.mxu1 %v6666_v23 }
 0x365   : > { %3340 = vmatpush1.bf16.msra.mxu1 %v6670_v16 }
 0x366   : > { %3341 = vmatprep.subr.bf16.mxu1 %v6674_v38 }
 0x369   : > { %3342 = vmatpush1.bf16.msra.mxu1 %v6678_v60 }
 0x36a   : > { %3343 = vmatprep.subr.bf16.mxu1 %v6682_v34 }
 0x36d   : > { %3344 = vmatpush1.bf16.msra.mxu1 %v6686_v46 }
 0x36e   : > { %3345 = vmatprep.subr.bf16.mxu1 %v6690_v45 }
 0x371   : > { %3346 = vmatpush1.bf16.msra.mxu1 %v6694_v30 }
 0x372   : > { %3347 = vmatprep.subr.bf16.mxu1 %v6698_v54 }
 0x375   : > { %3348 = vmatpush1.bf16.msra.mxu1 %v6702_v44 }
 0x376   : > { %3349 = vmatprep.subr.bf16.mxu1 %v6706_v39 }
 0x379   : > { %3350 = vmatpush1.bf16.msra.mxu1 %v6710_v62 }
 0x37a   : > { %3351 = vmatprep.subr.bf16.mxu1 %v6714_v35 }
 0x37d   : > { %3352 = vmatpush1.bf16.msra.mxu1 %v6718_v14 }
 0x37e   : > { %4031 = vmatprep.subr.bf16.mxu1 %v6360_v63  ;;  %v6982_v63 = vld [vmem:[#allocation8_spill] sm:$0xff] }
 0x380   : > { %3354 = vmatmul.mubr.bf16.vlgmr.msra.gmra.mrb[24].mxu1 %v6592_v21 }
 0x381   : > { %4032 = vmatpush1.bf16.msra.mxu1 %v6357_v10  ;;  %v6981_v10 = vld [vmem:[#allocation6_spill] sm:$0xff] }
 0x382   : > { %4033 = vmatprep.subr.bf16.mxu1 %v6367_v55  ;;  %v5273_v55 = vld [vmem:[%s5566_s14 + $0x120] ss:$24 sps:$4 sm:$0xff]  }
 0x385   : > { %4034 = vmatpush1.bf16.msra.mxu1 %v6377_v1  ;;  %v5275_v1 = vld [vmem:[%s5566_s14 + $0x124] ss:$24 sps:$4 sm:$0xff]  }
 0x386   : > { %4035 = vmatprep.subr.bf16.mxu1 %v6384_v2  ;;  %v6983_v2 = vld [vmem:[#allocation10_spill] sm:$0xff]  ;;  %4002 = vmatprep.subr.bf16.mxu0 %v5275_v1 }
 0x387   : > { %4003 = vmatpush1.bf16.msra.mxu0 %v5273_v55 }
 0x389   : > { %4036 = vmatpush1.bf16.msra.mxu1 %v6393_v47  ;;  %v6984_v47 = vld [vmem:[#allocation12_spill] sm:$0xff] }
 0x38a   : > { %4037 = vmatprep.subr.bf16.mxu1 %v6400_v15  ;;  %v6985_v15 = vld [vmem:[#allocation14_spill] sm:$0xff] }
 0x38d   : > { %4038 = vmatpush1.bf16.msra.mxu1 %v6409_v61  ;;  %v6986_v61 = vld [vmem:[#allocation15_spill] sm:$0xff] }
 0x38e   : > { %4039 = vmatprep.subr.bf16.mxu1 %v6416_v3  ;;  %v5278_v3 = vld [vmem:[%s5566_s14 + $0x154] ss:$24 sps:$4 sm:$0xff]  }
 0x38f   : > { %4004 = vmatprep.subr.bf16.mxu0 %v5278_v3 }
 0x391   : > { %4040 = vmatpush1.bf16.msra.mxu1 %v6425_v9  ;;  %v5276_v9 = vld [vmem:[%s5566_s14 + $0x150] ss:$24 sps:$4 sm:$0xff]  }
 0x392   : > { %4041 = vmatprep.subr.bf16.mxu1 %v6432_v5  ;;  %4005 = vmatpush1.bf16.msra.mxu0 %v5276_v9  ;;  %v5281_v5 = vld [vmem:[%s5566_s14 + $0x184] ss:$24 sps:$4 sm:$0xff]   ;;  %v6994_v9 = vld [vmem:[#allocation24_spill] sm:$0xff] }
 0x393   : > { %4006 = vmatprep.subr.bf16.mxu0 %v5281_v5 }
 0x395   : > { %4042 = vmatpush1.bf16.msra.mxu1 %v6441_v28  ;;  %v5279_v28 = vld [vmem:[%s5566_s14 + $0x180] ss:$24 sps:$4 sm:$0xff]  }
 0x396   : > { %4043 = vmatprep.subr.bf16.mxu1 %v6449_v32  ;;  %4007 = vmatpush1.bf16.msra.mxu0 %v5279_v28  ;;  %v5284_v32 = vld [vmem:[%s5566_s14 + $0x1b4] ss:$24 sps:$4 sm:$0xff]  }
 0x397   : > { %4008 = vmatprep.subr.bf16.mxu0 %v5284_v32 }
 0x399   : > { %4044 = vmatpush1.bf16.msra.mxu1 %v6452_v37  ;;  %v5282_v37 = vld [vmem:[%s5566_s14 + $0x1b0] ss:$24 sps:$4 sm:$0xff]  }
 0x39a   : > { %4045 = vmatprep.subr.bf16.mxu1 %v6459_v7  ;;  %4009 = vmatpush1.bf16.msra.mxu0 %v5282_v37  ;;  %v5287_v7 = vld [vmem:[%s5566_s14 + $0x1e4] ss:$24 sps:$4 sm:$0xff]  }
 0x39b   : > { %4010 = vmatprep.subr.bf16.mxu0 %v5287_v7  ;;  %v6995_v37 = vld [vmem:[#allocation26_spill] sm:$0xff] }
 0x39d   : > { %4046 = vmatpush1.bf16.msra.mxu1 %v6462_v40  ;;  %v5285_v40 = vld [vmem:[%s5566_s14 + $0x1e0] ss:$24 sps:$4 sm:$0xff]  }
 0x39e   : > { %4047 = vmatprep.subr.bf16.mxu1 %v6469_v48  ;;  %4011 = vmatpush1.bf16.msra.mxu0 %v5285_v40  ;;  %v5290_v48 = vld [vmem:[%s5566_s14 + $0x214] ss:$24 sps:$4 sm:$0xff]  }
 0x39f   : > { %4012 = vmatprep.subr.bf16.mxu0 %v5290_v48  ;;  %v6996_v40 = vld [vmem:[#allocation23_spill] sm:$0xff] }
 0x3a1   : > { %4048 = vmatpush1.bf16.msra.mxu1 %v6472_v50  ;;  %v5288_v50 = vld [vmem:[%s5566_s14 + $0x210] ss:$24 sps:$4 sm:$0xff]  }
 0x3a2   : > { %4049 = vmatprep.subr.bf16.mxu1 %v6479_v52  ;;  %4013 = vmatpush1.bf16.msra.mxu0 %v5288_v50  ;;  %v5291_v52 = vld [vmem:[%s5566_s14 + $0x240] ss:$24 sps:$4 sm:$0xff]  }
 0x3a5   : > { %4050 = vmatpush1.bf16.msra.mxu1 %v6482_v53  ;;  %v5293_v53 = vld [vmem:[%s5566_s14 + $0x244] ss:$24 sps:$4 sm:$0xff]  }
 0x3a6   : > { %4051 = vmatprep.subr.bf16.mxu1 %v6489_v58  ;;  %v5296_v58 = vld [vmem:[%s5566_s14 + $0x274] ss:$24 sps:$4 sm:$0xff]   ;;  %4014 = vmatprep.subr.bf16.mxu0 %v5293_v53 }
 0x3a7   : > { %4015 = vmatpush1.bf16.msra.mxu0 %v5291_v52 }
 0x3a8   : > { %4016 = vmatprep.subr.bf16.mxu0 %v5296_v58 }
 0x3a9   : > { %4052 = vmatpush1.bf16.msra.mxu1 %v6492_v0  ;;  %v5294_v0 = vld [vmem:[%s5566_s14 + $0x270] ss:$24 sps:$4 sm:$0xff]  }
 0x3aa   : > { %4053 = vmatprep.subr.bf16.mxu1 %v6499_v6  ;;  %v6987_v6 = vld [vmem:[#allocation7_spill] sm:$0xff] }
 0x3ab   : > { %4017 = vmatpush1.bf16.msra.mxu0 %v5294_v0 }
 0x3ac   : > { %4018 = vmatprep.subr.bf16.mxu0 %v6987_v6 }
 0x3ad   : > { %4054 = vmatpush1.bf16.msra.mxu1 %v6502_v22  ;;  %v6988_v22 = vld [vmem:[#allocation9_spill] sm:$0xff] }
 0x3ae   : > { %4055 = vmatprep.subr.bf16.mxu1 %v6507_v29  ;;  %v6989_v29 = vld [vmem:[#allocation11_spill] sm:$0xff] }
 0x3af   : > { %4019 = vmatpush1.bf16.msra.mxu0 %v6988_v22 }
 0x3b0   : > { %4020 = vmatprep.subr.bf16.mxu0 %v6989_v29 }
 0x3b1   : > { %4056 = vmatpush1.bf16.msra.mxu1 %v6511_v36  ;;  %v6990_v36 = vld [vmem:[#allocation13_spill] sm:$0xff] }
 0x3b2   : > { %4057 = vmatprep.subr.bf16.mxu1 %v6981_v10  ;;  %v6992_v10 = vld [vmem:[#allocation31_spill] sm:$0xff] }
 0x3b3   : > { %4021 = vmatpush1.bf16.msra.mxu0 %v6990_v36 }
 0x3b4   : > { %4072 = vmatprep.subr.bf16.mxu0 %v6991_v24  ;;  %v6997_v24 = vld [vmem:[#allocation25_spill] sm:$0xff] }
 0x3b5   : > { %4058 = vmatpush1.bf16.msra.mxu1 %v6982_v63 }
 0x3b6   : > { %4059 = vmatprep.subr.bf16.mxu1 %v6983_v2  ;;  %v6993_v2 = vld [vmem:[#allocation32_spill] sm:$0xff] }
 0x3b9   : > { %4060 = vmatpush1.bf16.msra.mxu1 %v6984_v47 }
 0x3ba   : > { %4061 = vmatprep.subr.bf16.mxu1 %v6985_v15 }
 0x3bd   : > { %4062 = vmatpush1.bf16.msra.mxu1 %v6986_v61 }
 0x413   : > { %v3273_v51 = vpop.f32.mrb[20].mxu1  ;;  %v3314_v21 = vpop.f32.mrb[28].mxu0 }
 0x414   : > { %v3274_v63 = vadd.f32 %v3273_v51, %v6992_v10  ;;  %v3275_v55 = vpop.f32.mrb[21].mxu1  ;;  %v3316_v1 = vpop.f32.mrb[29].mxu0  ;;  %v3315_v22 = vadd.f32 %v3314_v21, %v6976_v31 }
 0x415   : > { %v3276_v47 = vadd.f32 %v3275_v55, %v6993_v2  ;;  %v3317_v15 = vadd.f32 %v3316_v1, %v6278_v27  ;;  %v3277_v61 = vpop.f32.mrb[22].mxu1  ;;  %v3318_v3 = vpop.f32.mrb[30].mxu0 }
 0x416   : > { %v3368_v5 = vadd.f32 %v3274_v63, %v6994_v9  ;;  %v3278_v28 = vpop.f32.mrb[23].mxu1  ;;  %v3319_v32 = vpop.f32.mrb[31].mxu0 }
 0x417   : > { %v3375_v7 = vadd.f32 %v3276_v47, %v6995_v37  ;;  %v3389_v48 = vadd.f32 %v3317_v15, %v6996_v40 }
 0x418   : > { %v4683_v50 = vmul.f32 -1.442695, %v3368_v5 }
 0x419   : > { %v4684_v52 = vmul.f32 -1.442695, %v3375_v7  ;;  %v4685_v63 = vmul.f32 -1.442695, %v3389_v48  ;;  %v6998_v48 = vld [vmem:[#allocation35_spill] sm:$0xff] }
 0x41a   : > { %5340 = vpow2.f32 %v4683_v50 }
 0x41b   : > { %5342 = vpow2.f32 %v4684_v52 }
 0x424   : > { %v5341_v53 = vpop.eup %5340 }
 0x425   : > { %v3372_v58 = vadd.f32 1.0, %v5341_v53  ;;  %v5343_v0 = vpop.eup %5342 }
 0x426   : > { %v3379_v6 = vadd.f32 1.0, %v5343_v0 }
 0x427   : > { %5344 = vrcp.f32 %v3372_v58  ;;  %v6999_v58 = vld [vmem:[#allocation36_spill] sm:$0xff] }
 0x428   : > { %5346 = vrcp.f32 %v3379_v6 }
 0x431   : > { %v5345_v29 = vpop.eup %5344 }
 0x432   : > { %v3382_v36 = vmul.f32 %v5345_v29, %v3315_v22  ;;  %v5347_v55 = vpop.eup %5346 }
 0x433   : > { %v3385_v1 = vsub.f32 1.0, %v5347_v55  ;;  %v3387_v61 = vmul.f32 %v5347_v55, %v6572_v12 }
 0x434   : > { %v3383_v51 = vadd.f32 %v3382_v36, %v6997_v24 }
 0x436   : > { %5348 = vtanh.f32 %v3383_v51 }
 0x437   : > { %5350 = vpow2.f32 %v4685_v63 }
 0x440   : > { %v5349_v47 = vpop.eup %5348 }
 0x441   : > { %v3386_v15 = vmul.f32 %v5349_v47, %v3385_v1  ;;  %v5351_v9 = vpop.eup %5350 }
 0x442   : > { %v3393_v21 = vadd.f32 1.0, %v5351_v9 }
 0x443   : > { %v6785_v3 = vadd.f32 %v3387_v61, %v3386_v15  ;;  %v5299_v15 = vld [vmem:[%s5566_s14 + $0x44] ss:$24 sps:$4 sm:$0xff]   ;;  %v5297_v61 = vld [vmem:[%s5566_s14 + $0x40] ss:$24 sps:$4 sm:$0xff]  }
 0x444   : > { %5352 = vrcp.f32 %v3393_v21 }
 0x445   : > { %4687 = vst [vmem:[%s6292_s10 + $0x20] sm:$0xff] %v6785_v3  ;;  %v3412_v47 = vpack.c.bf16 %v6785_v3, %v6785_v3 }
 0x44e   : > { %v5353_v40 = vpop.eup %5352 }
 0x453   : > { %v3355_v5 = vpop.f32.mrb[24].mxu1 }
 0x454   : > { %v3356_v28 = vadd.f32 %v3355_v5, %v6978_v20  ;;  %v3357_v32 = vpop.f32.mrb[25].mxu1 }
 0x455   : > { %v3358_v37 = vadd.f32 %v3357_v32, %v6301_v19  ;;  %v3359_v7 = vpop.f32.mrb[26].mxu1 }
 0x456   : > { %v3396_v50 = vadd.f32 %v3356_v28, %v6998_v48  ;;  %v3360_v52 = vpop.f32.mrb[27].mxu1 }
 0x457   : > { %v3403_v12 = vmul.f32 %v5353_v40, %v3358_v37 }
 0x458   : > { %v4686_v53 = vmul.f32 -1.442695, %v3396_v50  ;;  %v7004_v50 = vld [vmem:[#allocation33_spill] sm:$0xff] }
 0x459   : > { %v3404_v0 = vadd.f32 %v3403_v12, %v6999_v58 }
 0x45a   : > { %5354 = vpow2.f32 %v4686_v53 }
 0x464   : > { %v5355_v6 = vpop.eup %5354 }
 0x465   : > { %v3400_v22 = vadd.f32 1.0, %v5355_v6 }
 0x467   : > { %5356 = vrcp.f32 %v3400_v22 }
 0x468   : > { %5358 = vtanh.f32 %v3404_v0 }
 0x471   : > { %v5357_v29 = vpop.eup %5356 }
 0x472   : > { %v3406_v36 = vsub.f32 1.0, %v5357_v29  ;;  %v5359_v24 = vpop.eup %5358  ;;  %v3408_v63 = vmul.f32 %v5357_v29, %v6581_v59 }
 0x474   : > { %v3407_v51 = vmul.f32 %v5359_v24, %v3406_v36 }
 0x476   : > { %v6794_v55 = vadd.f32 %v3408_v63, %v3407_v51 }
 0x478   : > { %4688 = vst [vmem:[%s6292_s10 + $0x18] sm:$0xff] %v6794_v55  ;;  %v3413_v1 = vpack.c.bf16 %v6794_v55, %v6794_v55 }
 0x47a   : > { %4022 = vmatprep.mubr.bf16.mxu0 %v3413_v1  ;;  %4063 = vmatprep.mubr.bf16.mxu1 %v3413_v1 }
 0x47b   : > { %4023 = vmatmul.mubr.bf16.vlgmr.msra.gmra.mrb[32].mxu0 %v3412_v47  ;;  %4064 = vmatmul.mubr.bf16.vlgmr.msra.gmra.mrb[28].mxu1 %v3412_v47 }
 0x47c   : > { %4073 = vmatpush1.bf16.msra.mxu0 %v6588_v49  ;;  %4104 = vmatprep.mubr.bf16.mxu0 %v3413_v1 }
 0x47d   : > { %4074 = vmatprep.subr.bf16.mxu0 %v5299_v15 }
 0x480   : > { %4075 = vmatpush1.bf16.msra.mxu0 %v5297_v61 }
 0x481   : > { %4076 = vmatprep.subr.bf16.mxu0 %v6599_v8 }
 0x484   : > { %4077 = vmatpush1.bf16.msra.mxu0 %v6605_v43 }
 0x485   : > { %4078 = vmatprep.subr.bf16.mxu0 %v6609_v56 }
 0x488   : > { %4079 = vmatpush1.bf16.msra.mxu0 %v6615_v11 }
 0x489   : > { %4080 = vmatprep.subr.bf16.mxu0 %v6619_v26 }
 0x48c   : > { %4081 = vmatpush1.bf16.msra.mxu0 %v6625_v33 }
 0x48d   : > { %4082 = vmatprep.subr.bf16.mxu0 %v6629_v25 }
 0x490   : > { %4083 = vmatpush1.bf16.msra.mxu0 %v6635_v57  ;;  %v7000_v57 = vld [vmem:[#allocation28_spill] sm:$0xff] }
 0x491   : > { %4084 = vmatprep.subr.bf16.mxu0 %v6639_v41 }
 0x494   : > { %4085 = vmatpush1.bf16.msra.mxu0 %v6645_v18 }
 0x495   : > { %4086 = vmatprep.subr.bf16.mxu0 %v6649_v42 }
 0x498   : > { %4087 = vmatpush1.bf16.msra.mxu0 %v6654_v4  ;;  %v7001_v4 = vld [vmem:[#allocation30_spill] sm:$0xff] }
 0x499   : > { %4088 = vmatprep.subr.bf16.mxu0 %v6658_v17 }
 0x49c   : > { %4089 = vmatpush1.bf16.msra.mxu0 %v6662_v13  ;;  %v7002_v13 = vld [vmem:[#allocation21_spill] sm:$0xff] }
 0x49d   : > { %4090 = vmatprep.subr.bf16.mxu0 %v6666_v23 }
 0x4a0   : > { %4091 = vmatpush1.bf16.msra.mxu0 %v6670_v16 }
 0x4a1   : > { %4092 = vmatprep.subr.bf16.mxu0 %v6674_v38 }
 0x4a4   : > { %4093 = vmatpush1.bf16.msra.mxu0 %v6678_v60 }
 0x4a5   : > { %4094 = vmatprep.subr.bf16.mxu0 %v6682_v34 }
 0x4a8   : > { %4095 = vmatpush1.bf16.msra.mxu0 %v6686_v46 }
 0x4a9   : > { %4096 = vmatprep.subr.bf16.mxu0 %v6690_v45 }
 0x4ac   : > { %4097 = vmatpush1.bf16.msra.mxu0 %v6694_v30 }
 0x4ad   : > { %4098 = vmatprep.subr.bf16.mxu0 %v6698_v54 }
 0x4b0   : > { %4099 = vmatpush1.bf16.msra.mxu0 %v6702_v44  ;;  %v7003_v44 = vld [vmem:[#allocation29_spill] sm:$0xff] }
 0x4b1   : > { %4100 = vmatprep.subr.bf16.mxu0 %v6706_v39 }
 0x4b4   : > { %4101 = vmatpush1.bf16.msra.mxu0 %v6710_v62 }
 0x4b5   : > { %4102 = vmatprep.subr.bf16.mxu0 %v6714_v35 }
 0x4b8   : > { %4103 = vmatpush1.bf16.msra.mxu0 %v6718_v14 }
 0x4bb   : > { %4105 = vmatmul.mubr.bf16.vlgmr.msra.gmra.mrb[36].mxu0 %v3412_v47 }
 0x54e   : > { %v4024_v59 = vpop.f32.mrb[32].mxu0  ;;  %v4065_v49 = vpop.f32.mrb[28].mxu1 }
 0x54f   : > { %v4025_v8 = vadd.f32 %v4024_v59, %v6992_v10  ;;  %v4026_v43 = vpop.f32.mrb[33].mxu0  ;;  %v4067_v56 = vpop.f32.mrb[29].mxu1 }
 0x550   : > { %v4027_v11 = vadd.f32 %v4026_v43, %v6993_v2  ;;  %v4068_v26 = vadd.f32 %v4067_v56, %v6278_v27  ;;  %v4028_v33 = vpop.f32.mrb[34].mxu0  ;;  %v4069_v25 = vpop.f32.mrb[30].mxu1  ;;  %v4066_v27 = vadd.f32 %v4065_v49, %v6976_v31 }
 0x551   : > { %v4119_v41 = vadd.f32 %v4025_v8, %v7000_v57  ;;  %v4029_v18 = vpop.f32.mrb[35].mxu0  ;;  %v4070_v42 = vpop.f32.mrb[31].mxu1 }
 0x552   : > { %v4126_v17 = vadd.f32 %v4027_v11, %v7001_v4  ;;  %v4140_v23 = vadd.f32 %v4068_v26, %v7002_v13 }
 0x553   : > { %v4785_v16 = vmul.f32 -1.442695, %v4119_v41 }
 0x554   : > { %v4786_v38 = vmul.f32 -1.442695, %v4126_v17  ;;  %v4787_v62 = vmul.f32 -1.442695, %v4140_v23 }
 0x555   : > { %5360 = vpow2.f32 %v4785_v16 }
 0x556   : > { %5362 = vpow2.f32 %v4786_v38 }
 0x55f   : > { %v5361_v60 = vpop.eup %5360 }
 0x560   : > { %v4123_v34 = vadd.f32 1.0, %v5361_v60  ;;  %v5363_v46 = vpop.eup %5362 }
 0x561   : > { %v4130_v45 = vadd.f32 1.0, %v5363_v46 }
 0x562   : > { %5364 = vrcp.f32 %v4123_v34 }
 0x563   : > { %5366 = vrcp.f32 %v4130_v45 }
 0x56c   : > { %v5365_v30 = vpop.eup %5364 }
 0x56d   : > { %v4133_v54 = vmul.f32 %v5365_v30, %v4066_v27  ;;  %v5367_v35 = vpop.eup %5366 }
 0x56e   : > { %v4136_v14 = vsub.f32 1.0, %v5367_v35  ;;  %v4138_v9 = vmul.f32 %v5367_v35, %v6785_v3  ;;  %v7005_v3 = vld [vmem:[#allocation34_spill] sm:$0xff] }
 0x56f   : > { %v4134_v39 = vadd.f32 %v4133_v54, %v7003_v44 }
 0x571   : > { %5368 = vtanh.f32 %v4134_v39 }
 0x572   : > { %5370 = vpow2.f32 %v4787_v62 }
 0x57b   : > { %v5369_v10 = vpop.eup %5368 }
 0x57c   : > { %v4137_v2 = vmul.f32 %v5369_v10, %v4136_v14  ;;  %v5371_v5 = vpop.eup %5370 }
 0x57d   : > { %v4144_v28 = vadd.f32 1.0, %v5371_v5 }
 0x57e   : > { %v4139_v21 = vadd.f32 %v4138_v9, %v4137_v2 }
 0x57f   : > { %5372 = vrcp.f32 %v4144_v28 }
 0x580   : > { %4789 = vst [vmem:[%s6292_s10 + $0x30] sm:$0xff] %v4139_v21 }
 0x589   : > { %v5373_v48 = vpop.eup %5372 }
 0x58e   : > { %v4106_v31 = vpop.f32.mrb[36].mxu0 }
 0x58f   : > { %v4107_v32 = vadd.f32 %v4106_v31, %v6978_v20  ;;  %v4108_v37 = vpop.f32.mrb[37].mxu0 }
 0x590   : > { %v4109_v7 = vadd.f32 %v4108_v37, %v6301_v19  ;;  %v4110_v40 = vpop.f32.mrb[38].mxu0 }
 0x591   : > { %v4147_v52 = vadd.f32 %v4107_v32, %v7004_v50  ;;  %v4111_v12 = vpop.f32.mrb[39].mxu0 }
 0x592   : > { %v4154_v53 = vmul.f32 %v5373_v48, %v4109_v7 }
 0x593   : > { %v4788_v58 = vmul.f32 -1.442695, %v4147_v52 }
 0x594   : > { %v4155_v0 = vadd.f32 %v4154_v53, %v7005_v3 }
 0x595   : > { %5374 = vpow2.f32 %v4788_v58 }
 0x59f   : > { %v5375_v6 = vpop.eup %5374 }
 0x5a0   : > { %v4151_v22 = vadd.f32 1.0, %v5375_v6 }
 0x5a2   : > { %5376 = vrcp.f32 %v4151_v22 }
 0x5a3   : > { %5378 = vtanh.f32 %v4155_v0 }
 0x5ac   : > { %v5377_v29 = vpop.eup %5376 }
 0x5ad   : > { %v4157_v20 = vsub.f32 1.0, %v5377_v29  ;;  %v5379_v36 = vpop.eup %5378  ;;  %v4159_v19 = vmul.f32 %v5377_v29, %v6794_v55 }
 0x5af   : > { %v4158_v24 = vmul.f32 %v5379_v36, %v4157_v20 }
 0x5b1   : > { %v4160_v51 = vadd.f32 %v4159_v19, %v4158_v24 }
 0x5b3   : > { %4162 = vst [vmem:[%s6292_s10 + $0x8] sm:$0xff] %v4160_v51 }
 0x5b4 PF: > { %p15_p7 = scmp.ge.s32.totalorder %s5502_s23, 4   ;;  %s7006_s18 = smov %s5436_s19 }
 0x5b5   : > { %s7007_s19 = smov %s5440_s20  ;;  %s7008_s20 = smov %s5512_s26 }
 0x5b6   : > { %s7009_s21 = smov %s5502_s23  ;;  %17 = sbr.rel (!%p15_p7) target bundleno = 3 (0x3), region = 98 }
 0x5bd   :  { %4184 = vsyncpa [#allocation4], 1 }
 0x5be   :  { %4186 = vsyncpa [#allocation4 + $0x1], 1 }

// kernel: forward.5
= control target key start
LH: loop header
LB: loop body
LE: loop exit
PB: predicated region body
PF: predicated region fallthrough
CT: control target
= control target key end

     0   :  { %10 = vsyncpa [#allocation4], 0  ;;  %s6377_s0 = inlined_call_operand.vmem [shape: f32[2,4,8,128], index: 0, kind: input, shape index: {}]   ;;  %s6378_s1 = inlined_call_operand.hbm [shape: bf16[2,128,768], index: 1, kind: input, shape index: {}]   ;;  %s6379_s2 = inlined_call_operand.vmem [shape: bf16[2,256,768], index: 2, kind: input, shape index: {}]   ;;  %s6380_s3 = inlined_call_operand.vmem [shape: f32[2,1,768], index: 3, kind: input, shape index: {}]   ;;  %s6381_s4 = inlined_call_operand.vmem [shape: f32[2,1,768], index: 4, kind: input, shape index: {}]   ;;  %s6382_s5 = inlined_call_operand.vmem [shape: f32[2,4,8,256], index: 5, kind: output, shape index: {}]  }
   0x1   :  { %12 = vsyncpa [#allocation4 + $0x1], 0  ;;  %s5039_s18 = smov 0   ;;  %s5041_s19 = smov 0  }
   0x2   :  { %s5043_s20 = smov 0   ;;  %s5045_s21 = smov 0  }
   0x3 LB: > { %s5058_s22 = sadd.s32 4294967295, %s5003_s21   ;;  %s5061_s23 = sadd.s32 1, %s5003_s21   ;;  %s5003_s21 = sphi %s5045_s21, %s6583_s21   ;;  %s4999_s20 = sphi %s5043_s20, %s6582_s20   ;;  %s4995_s19 = sphi %s5041_s19, %s6581_s19   ;;  %s4991_s18 = sphi %s5039_s18, %s6580_s18  }
   0x4   : > { %s48_s24 = ssub.s32 %s5003_s21, %s5061_s23  ;;  %s51_s25 = sadd.s32 1, %s4999_s20 }
   0x5   : > { %p49_p0 = scmp.eq.s32.totalorder %s48_s24, 0  ;;  %p58_p1 = scmp.ne.s32.totalorder %s4999_s20, %s4995_s19 }
   0x6   : > { %p59_p2 = scmp.eq.s32.totalorder %s5003_s21, 0  ;;  %p64_p3 = scmp.ne.s32.totalorder %s4995_s19, %s4991_s18 }
   0x7   : > { %s5071_s26 = scalar_select %p49_p0, %s4999_s20, %s51_s25  }
   0x8   : > { %p60_p4 = por %p59_p2, %p58_p1  ;;  %p65_p5 = scmp.eq.s32.totalorder %s5058_s22, 0 }
   0x9   : > { %p4463_p6 = scmp.lt.s32.totalorder %s5003_s21, 2  ;;  %s200_s28 = sand.u32 1, %s4999_s20  }
   0xa   : > { %p5075_p7 = por %p65_p5, %p64_p3  ;;  %s4452_s29 = smul.u32 384, %s200_s28 }
   0xb   : > { %s4453_s30 = smul.u32 6144, %s5003_s21  ;;  %p5081_p8 = pnand %p4463_p6, %p60_p4 }
   0xc   : > { %s204_s10 = scalar_lea.vmem [#allocation3], %s4452_s29  ;;  %s5093_s12 = scalar_lea.sflag [#allocation4], %s200_s28 }
   0xd   : > { %s5088_s9 = scalar_lea.hbm %s6378_s1, %s4453_s30  ;;  %s211_s11 = sshll.u32 %s204_s10, 4  ;;  %s5090_s11 = int_to_ptr.vmem [resolvable:$true] %s211_s11 }
   0xe   : > { %s4939_s13 = scalar_lea.hbm %s5088_s9, 6144  ;;  %p4941_p11 = pneg %p5081_p8 }
   0xf   : > { %p4940_p10 = scmp.ne.s32.totalorder %s5088_s9, %s4939_s13  ;;  %s4944_s16 = scalar_lea.hbm %s6378_s1, 12288 }
  0x10   : > { %p4945_p0 = scmp.lt.u32.totalorder %s5088_s9, %s6378_s1  ;;  %p4946_p1 = scmp.lt.u32.totalorder %s4944_s16, %s4939_s13 }
  0x11   : > { %p4942_p12 = pnand %p4941_p11, %p4940_p10  ;;  %p4948_p3 = scmp.lt.u32.totalorder %s4939_s13, %s5088_s9 }
  0x12   : > { %p4947_p2 = por %p4946_p1, %p4945_p0 }
  0x13   : > { %p4943_p13 = pneg %p4942_p12 }
  0x14   : > { %p4949_p4 = por %p4948_p3, %p4947_p2 }
  0x16   : > { %p4950_p5 = pnand %p4949_p4, %p4943_p13 }
  0x18   : > { %4953 = shalt.err (!%p4950_p5)
}
  0x19   : > { %s4954_s24 = scalar_lea.vmem %s5090_s11, 6144  ;;  %s5005_s25 = smov [#allocation3]  }
  0x1a   : > { %p4955_p6 = scmp.ne.s32.totalorder %s5090_s11, %s4954_s24  ;;  %s4959_s28 = sshll.u32 %s5005_s25, 4  ;;  %s4960_s28 = int_to_ptr.vmem [resolvable:$false] %s4959_s28 }
  0x1b   : > { %s4961_s29 = scalar_lea.vmem %s4960_s28, 12288  ;;  %p4962_p9 = scmp.lt.s32.totalorder %s5090_s11, %s4960_s28 }
  0x1c   : > { %p4957_p10 = pnand %p4955_p6, %p4941_p11  ;;  %p4963_p0 = scmp.lt.s32.totalorder %s4961_s29, %s4954_s24 }
  0x1e   : > { %p4958_p12 = pneg %p4957_p10  ;;  %p4964_p1 = por %p4963_p0, %p4962_p9 }
  0x20   : > { %p4965_p2 = pnand %p4964_p1, %p4958_p12 }
  0x22   : > { %4968 = shalt.err (!%p4965_p2)
}
  0x23   : > { %s5006_s30 = smov 384   ;;  %s5007_s7 = smov 24  }
  0x24   : > { %4462 = dma.hbm_to_vmem [thread:$0]  (!%p5081_p8), %s5088_s9, 6144, %s5090_s11, %s5093_s12, %s5006_s30, %s5006_s30, %s5007_s7  }
  0x25   : > { %p241_p11 = scmp.lt.s32.totalorder %s5003_s21, 3  ;;  %p6444_p13 = scmp.ge.s32.totalorder %s5003_s21, 1 }
  0x27   : > { %p242_p3 = pnand %p6444_p13, %p241_p11 }
  0x29   : > { %245 = sbr.rel (%p242_p3) target bundleno = 1409 (0x581), region = 40 }
  0x30   : > { %s247_s8 = sand.u32 1, %s4995_s19  }
  0x31   : > { %s4454_s10 = smul.u32 384, %s247_s8  ;;  %s248_s13 = scalar_lea.sflag [#allocation4], %s247_s8 }
  0x33   : > { %s5125_s14 = scalar_lea.vmem [#allocation3], %s4454_s10 }
  0x34   : > { %4986 = dma.done.wait (%p5075_p7), %s248_s13, 6144  }
  0x35   : > { %4988 = vsyncadd (%p5075_p7), %s248_s13, 4294961152  ;;  %v6384_v0 = vmov 0   ;;  %v4499_v1 = vld [vmem:[%s5125_s14 + $0x4] ss:$24 sps:$4 sm:$0xff]   ;;  %v4503_v3 = vld [vmem:[%s5125_s14] ss:$24 sps:$4 sm:$0xff]  }
  0x36   : > { %731 = vmatprep.mubr.bf16.mxu1 %v6384_v0  ;;  %678 = vmatprep.mubr.bf16.mxu0 %v6384_v0  ;;  %v4501_v2 = vld [vmem:[%s5125_s14 + $0xc] ss:$24 sps:$4 sm:$0xff]   ;;  %v4504_v4 = vld [vmem:[%s5125_s14 + $0x8] ss:$24 sps:$4 sm:$0xff]   ;;  %v4507_v6 = vld [vmem:[%s5125_s14 + $0x3c] ss:$24 sps:$4 sm:$0xff]  }
  0x37   : > { %646 = vmatprep.subr.bf16.mxu0 %v4499_v1  ;;  %699 = vmatprep.subr.bf16.mxu1 %v4501_v2  ;;  %v4505_v5 = vld [vmem:[%s5125_s14 + $0x34] ss:$24 sps:$4 sm:$0xff]   ;;  %v4509_v7 = vld [vmem:[%s5125_s14 + $0x30] ss:$24 sps:$4 sm:$0xff]   ;;  %v4511_v9 = vld [vmem:[%s5125_s14 + $0x64] ss:$24 sps:$4 sm:$0xff]  }
  0x38   : > { %647 = vmatpush1.bf16.msra.mxu0 %v4503_v3  ;;  %700 = vmatpush1.bf16.msra.mxu1 %v4504_v4  ;;  %v4510_v8 = vld [vmem:[%s5125_s14 + $0x38] ss:$24 sps:$4 sm:$0xff]   ;;  %v4513_v10 = vld [vmem:[%s5125_s14 + $0x6c] ss:$24 sps:$4 sm:$0xff]   ;;  %v4516_v12 = vld [vmem:[%s5125_s14 + $0x68] ss:$24 sps:$4 sm:$0xff]  }
  0x39   : > { %648 = vmatprep.subr.bf16.mxu0 %v4505_v5  ;;  %701 = vmatprep.subr.bf16.mxu1 %v4507_v6  ;;  %v4515_v11 = vld [vmem:[%s5125_s14 + $0x60] ss:$24 sps:$4 sm:$0xff]   ;;  %v4517_v13 = vld [vmem:[%s5125_s14 + $0x94] ss:$24 sps:$4 sm:$0xff]   ;;  %p296_p7 = scmp.lt.s32.totalorder %s5058_s22, 1 }
  0x3a   : > { %v4519_v14 = vld [vmem:[%s5125_s14 + $0x9c] ss:$24 sps:$4 sm:$0xff]   ;;  %v4521_v15 = vld [vmem:[%s5125_s14 + $0x90] ss:$24 sps:$4 sm:$0xff]   ;;  %v4525_v18 = vld [vmem:[%s5125_s14 + $0xcc] ss:$24 sps:$4 sm:$0xff]  }
  0x3b   : > { %v4522_v16 = vld [vmem:[%s5125_s14 + $0x98] ss:$24 sps:$4 sm:$0xff]   ;;  %v4523_v17 = vld [vmem:[%s5125_s14 + $0xc4] ss:$24 sps:$4 sm:$0xff]   ;;  %s6585_s22 = smov (!%p296_p7, %s5058_s22), 1 }
  0x3c   : > { %649 = vmatpush1.bf16.msra.mxu0 %v4509_v7  ;;  %702 = vmatpush1.bf16.msra.mxu1 %v4510_v8  ;;  %v4527_v19 = vld [vmem:[%s5125_s14 + $0xc0] ss:$24 sps:$4 sm:$0xff]   ;;  %v4529_v21 = vld [vmem:[%s5125_s14 + $0xf4] ss:$24 sps:$4 sm:$0xff]   ;;  %s4455_s21 = smul.u32 768, %s6585_s22  ;;  %s4450_s27 = sshll.u32 %s6585_s22, 5 }
  0x3d   : > { %650 = vmatprep.subr.bf16.mxu0 %v4511_v9  ;;  %703 = vmatprep.subr.bf16.mxu1 %v4513_v10  ;;  %v4528_v20 = vld [vmem:[%s5125_s14 + $0xc8] ss:$24 sps:$4 sm:$0xff]   ;;  %v4531_v22 = vld [vmem:[%s5125_s14 + $0xfc] ss:$24 sps:$4 sm:$0xff]   ;;  %v4534_v24 = vld [vmem:[%s5125_s14 + $0xf8] ss:$24 sps:$4 sm:$0xff]   ;;  %s5177_s16 = scalar_lea.vmem %s6377_s0, %s4450_s27 }
  0x3e   : > { %v4533_v23 = vld [vmem:[%s5125_s14 + $0xf0] ss:$24 sps:$4 sm:$0xff]   ;;  %v4535_v25 = vld [vmem:[%s5125_s14 + $0x124] ss:$24 sps:$4 sm:$0xff]   ;;  %s5168_s11 = scalar_lea.vmem %s6379_s2, %s4455_s21  ;;  %v4539_v27 = vld [vmem:[%s5125_s14 + $0x120] ss:$24 sps:$4 sm:$0xff]  }
  0x3f   : > { %v4537_v26 = vld [vmem:[%s5125_s14 + $0x12c] ss:$24 sps:$4 sm:$0xff]   ;;  %v4540_v28 = vld [vmem:[%s5125_s14 + $0x128] ss:$24 sps:$4 sm:$0xff]   ;;  %v4543_v30 = vld [vmem:[%s5125_s14 + $0x15c] ss:$24 sps:$4 sm:$0xff]  }
  0x40   : > { %651 = vmatpush1.bf16.msra.mxu0 %v4515_v11  ;;  %704 = vmatpush1.bf16.msra.mxu1 %v4516_v12  ;;  %v4541_v29 = vld [vmem:[%s5125_s14 + $0x154] ss:$24 sps:$4 sm:$0xff]   ;;  %v4545_v31 = vld [vmem:[%s5125_s14 + $0x150] ss:$24 sps:$4 sm:$0xff]   ;;  %v320_v33 = vld [vmem:[%s5177_s16] sm:$0xff]  ;;  %s4456_s17 = smul.u32 6, %s6585_s22 }
  0x41   : > { %652 = vmatprep.subr.bf16.mxu0 %v4517_v13  ;;  %705 = vmatprep.subr.bf16.mxu1 %v4519_v14  ;;  %v4546_v32 = vld [vmem:[%s5125_s14 + $0x158] ss:$24 sps:$4 sm:$0xff]   ;;  %v321_v34 = vld [vmem:[%s5177_s16 + $0x8] sm:$0xff]  ;;  %v5185_v36 = vld [vmem:[%s5168_s11 + $0x4] ss:$24 sps:$4 sm:$0xff]   ;;  %s4451_s7 = sshll.u32 %s6585_s22, 6 }
  0x42   : > { %v4549_v35 = vld [vmem:[%s5125_s14 + $0x14] ss:$24 sps:$4 sm:$0xff]   ;;  %v5187_v37 = vpack.c.bf16 %v321_v34, %v320_v33  ;;  %v4547_v38 = vld [vmem:[%s5125_s14 + $0x10] ss:$24 sps:$4 sm:$0xff]   ;;  %v5191_v39 = vld [vmem:[%s5168_s11] ss:$24 sps:$4 sm:$0xff]   ;;  %s309_s25 = scalar_lea.vmem %s6380_s3, %s4456_s17  ;;  %s313_s30 = scalar_lea.vmem %s6381_s4, %s4456_s17 }
  0x43   : > { %v4555_v40 = vld [vmem:[%s5125_s14 + $0x44] ss:$24 sps:$4 sm:$0xff]   ;;  %v5196_v41 = vld [vmem:[%s5168_s11 + $0x34] ss:$24 sps:$4 sm:$0xff]   ;;  %v4553_v42 = vld [vmem:[%s5125_s14 + $0x40] ss:$24 sps:$4 sm:$0xff]   ;;  %s5756_s13 = scalar_lea.vmem %s6382_s5, %s4451_s7 }
  0x44   : > { %653 = vmatpush1.bf16.msra.mxu0 %v4521_v15  ;;  %706 = vmatpush1.bf16.msra.mxu1 %v4522_v16  ;;  %v5203_v43 = vld [vmem:[%s5168_s11 + $0x30] ss:$24 sps:$4 sm:$0xff]   ;;  %v4561_v44 = vld [vmem:[%s5125_s14 + $0x74] ss:$24 sps:$4 sm:$0xff]   ;;  %v5208_v45 = vld [vmem:[%s5168_s11 + $0x64] ss:$24 sps:$4 sm:$0xff]  }
  0x45   : > { %654 = vmatprep.subr.bf16.mxu0 %v4523_v17  ;;  %707 = vmatprep.subr.bf16.mxu1 %v4525_v18  ;;  %v4559_v46 = vld [vmem:[%s5125_s14 + $0x70] ss:$24 sps:$4 sm:$0xff]   ;;  %v5214_v47 = vld [vmem:[%s5168_s11 + $0x60] ss:$24 sps:$4 sm:$0xff]   ;;  %v4567_v48 = vld [vmem:[%s5125_s14 + $0xa4] ss:$24 sps:$4 sm:$0xff]  }
  0x46   : > { %v5219_v49 = vld [vmem:[%s5168_s11 + $0x94] ss:$24 sps:$4 sm:$0xff]   ;;  %v323_v51 = vld [vmem:[%s5177_s16 + $0x18] sm:$0xff]  ;;  %v5228_v54 = vld [vmem:[%s5168_s11 + $0x90] ss:$24 sps:$4 sm:$0xff]  }
  0x47   : > { %v322_v50 = vld [vmem:[%s5177_s16 + $0x10] sm:$0xff]  ;;  %v4565_v53 = vld [vmem:[%s5125_s14 + $0xa0] ss:$24 sps:$4 sm:$0xff]   ;;  %v5234_v56 = vld [vmem:[%s5168_s11 + $0xc4] ss:$24 sps:$4 sm:$0xff]  }
  0x48   : > { %655 = vmatpush1.bf16.msra.mxu0 %v4527_v19  ;;  %708 = vmatpush1.bf16.msra.mxu1 %v4528_v20  ;;  %v5224_v52 = vpack.c.bf16 %v323_v51, %v322_v50  ;;  %v4573_v55 = vld [vmem:[%s5125_s14 + $0xd4] ss:$24 sps:$4 sm:$0xff]   ;;  %v4571_v57 = vld [vmem:[%s5125_s14 + $0xd0] ss:$24 sps:$4 sm:$0xff]   ;;  %v5240_v58 = vld [vmem:[%s5168_s11 + $0xc0] ss:$24 sps:$4 sm:$0xff]  }
  0x49   : > { %656 = vmatprep.subr.bf16.mxu0 %v4529_v21  ;;  %709 = vmatprep.subr.bf16.mxu1 %v4531_v22  ;;  %v4579_v59 = vld [vmem:[%s5125_s14 + $0x104] ss:$24 sps:$4 sm:$0xff]   ;;  %v5248_v60 = vld [vmem:[%s5168_s11 + $0xf4] ss:$24 sps:$4 sm:$0xff]   ;;  %v4577_v61 = vld [vmem:[%s5125_s14 + $0x100] ss:$24 sps:$4 sm:$0xff]  }
  0x4a   : > { %v5252_v62 = vld [vmem:[%s5168_s11 + $0xf0] ss:$24 sps:$4 sm:$0xff]   ;;  %v4585_v63 = vld [vmem:[%s5125_s14 + $0x134] ss:$24 sps:$4 sm:$0xff]   ;;  %v5258_v1 = vld [vmem:[%s5168_s11 + $0x124] ss:$24 sps:$4 sm:$0xff]  }
  0x4b   : > { %v4583_v2 = vld [vmem:[%s5125_s14 + $0x130] ss:$24 sps:$4 sm:$0xff]   ;;  %v5262_v3 = vld [vmem:[%s5168_s11 + $0x120] ss:$24 sps:$4 sm:$0xff]   ;;  %v4591_v4 = vld [vmem:[%s5125_s14 + $0x164] ss:$24 sps:$4 sm:$0xff]  }
  0x4c   : > { %657 = vmatpush1.bf16.msra.mxu0 %v4533_v23  ;;  %710 = vmatpush1.bf16.msra.mxu1 %v4534_v24  ;;  %v5268_v5 = vld [vmem:[%s5168_s11 + $0x154] ss:$24 sps:$4 sm:$0xff]   ;;  %v4589_v6 = vld [vmem:[%s5125_s14 + $0x160] ss:$24 sps:$4 sm:$0xff]   ;;  %v5272_v7 = vld [vmem:[%s5168_s11 + $0x150] ss:$24 sps:$4 sm:$0xff]  }
  0x4d   : > { %658 = vmatprep.subr.bf16.mxu0 %v4535_v25  ;;  %711 = vmatprep.subr.bf16.mxu1 %v4537_v26  ;;  %v5276_v8 = vld [vmem:[%s5168_s11 + $0x184] ss:$24 sps:$4 sm:$0xff]   ;;  %v5283_v10 = vld [vmem:[%s5168_s11 + $0x180] ss:$24 sps:$4 sm:$0xff]   ;;  %v5290_v12 = vld [vmem:[%s5168_s11 + $0x1b4] ss:$24 sps:$4 sm:$0xff]  }
  0x4e   : > { %v5280_v9 = vld [vmem:[%s5168_s11 + $0xc] ss:$24 sps:$4 sm:$0xff]   ;;  %v5286_v11 = vld [vmem:[%s5168_s11 + $0x8] ss:$24 sps:$4 sm:$0xff]   ;;  %v5295_v13 = vld [vmem:[%s5168_s11 + $0x3c] ss:$24 sps:$4 sm:$0xff]  }
  0x4f   : > { %v5299_v14 = vld [vmem:[%s5168_s11 + $0x1b0] ss:$24 sps:$4 sm:$0xff]   ;;  %v5307_v16 = vld [vmem:[%s5168_s11 + $0x1e4] ss:$24 sps:$4 sm:$0xff]   ;;  %v5316_v18 = vld [vmem:[%s5168_s11 + $0x1e0] ss:$24 sps:$4 sm:$0xff]  }
  0x50   : > { %659 = vmatpush1.bf16.msra.mxu0 %v4539_v27  ;;  %712 = vmatpush1.bf16.msra.mxu1 %v4540_v28  ;;  %v5302_v15 = vld [vmem:[%s5168_s11 + $0x38] ss:$24 sps:$4 sm:$0xff]   ;;  %v5312_v17 = vld [vmem:[%s5168_s11 + $0x6c] ss:$24 sps:$4 sm:$0xff]   ;;  %v5319_v19 = vld [vmem:[%s5168_s11 + $0x68] ss:$24 sps:$4 sm:$0xff]  }
  0x51   : > { %660 = vmatprep.subr.bf16.mxu0 %v4541_v29  ;;  %713 = vmatprep.subr.bf16.mxu1 %v4543_v30  ;;  %v5324_v20 = vld [vmem:[%s5168_s11 + $0x214] ss:$24 sps:$4 sm:$0xff]   ;;  %v5332_v22 = vld [vmem:[%s5168_s11 + $0x210] ss:$24 sps:$4 sm:$0xff]   ;;  %v5341_v24 = vld [vmem:[%s5168_s11 + $0x244] ss:$24 sps:$4 sm:$0xff]  }
  0x52   : > { %v5329_v21 = vld [vmem:[%s5168_s11 + $0x9c] ss:$24 sps:$4 sm:$0xff]   ;;  %v5335_v23 = vld [vmem:[%s5168_s11 + $0x98] ss:$24 sps:$4 sm:$0xff]   ;;  %v5346_v25 = vld [vmem:[%s5168_s11 + $0xcc] ss:$24 sps:$4 sm:$0xff]  }
  0x53   : > { %v5350_v26 = vld [vmem:[%s5168_s11 + $0x240] ss:$24 sps:$4 sm:$0xff]   ;;  %v5358_v28 = vld [vmem:[%s5168_s11 + $0x274] ss:$24 sps:$4 sm:$0xff]   ;;  %v5366_v30 = vld [vmem:[%s5168_s11 + $0x270] ss:$24 sps:$4 sm:$0xff]  }
  0x54   : > { %661 = vmatpush1.bf16.msra.mxu0 %v4545_v31  ;;  %714 = vmatpush1.bf16.msra.mxu1 %v4546_v32  ;;  %v5353_v27 = vld [vmem:[%s5168_s11 + $0xc8] ss:$24 sps:$4 sm:$0xff]   ;;  %v5363_v29 = vld [vmem:[%s5168_s11 + $0xfc] ss:$24 sps:$4 sm:$0xff]   ;;  %v5369_v31 = vld [vmem:[%s5168_s11 + $0xf8] ss:$24 sps:$4 sm:$0xff]  }
  0x55   : > { %752 = vmatprep.subr.bf16.mxu0 %v4549_v35  ;;  %1437 = vmatprep.subr.bf16.mxu1 %v5185_v36  ;;  %v5374_v32 = vld [vmem:[%s5168_s11 + $0x2a4] ss:$24 sps:$4 sm:$0xff]   ;;  %v5382_v34 = vld [vmem:[%s5168_s11 + $0x2a0] ss:$24 sps:$4 sm:$0xff]   ;;  %v5419_v50 = vld [vmem:[%s5168_s11 + $0x10] ss:$24 sps:$4 sm:$0xff]  }
  0x56   : > { %v5379_v33 = vld [vmem:[%s5168_s11 + $0x12c] ss:$24 sps:$4 sm:$0xff]   ;;  %v5385_v35 = vld [vmem:[%s5168_s11 + $0x128] ss:$24 sps:$4 sm:$0xff]   ;;  %6445 = vst [vmem:[#allocation6_spill] sm:$0xff] %v5419_v50 }
  0x57   : > { %732 = vmatmul.mubr.bf16.vlgmr.msra.gmra.mrb[0].mxu1 %v5187_v37  ;;  %679 = vmatmul.mubr.bf16.vlgmr.msra.gmra.mrb[0].mxu0 %v5187_v37  ;;  %v5424_v51 = vld [vmem:[%s5168_s11 + $0x1bc] ss:$24 sps:$4 sm:$0xff]  }
  0x58   : > { %753 = vmatpush1.bf16.msra.mxu0 %v4547_v38  ;;  %1438 = vmatpush1.bf16.msra.mxu1 %v5191_v39  ;;  %v5395_v38 = vld [vmem:[%s5168_s11 + $0x15c] ss:$24 sps:$4 sm:$0xff]  }
  0x59   : > { %754 = vmatprep.subr.bf16.mxu0 %v4555_v40  ;;  %1439 = vmatprep.subr.bf16.mxu1 %v5196_v41  ;;  %v5398_v40 = vld [vmem:[%s5168_s11 + $0x2d0] ss:$24 sps:$4 sm:$0xff]  }
  0x5a   : > { %688 = vmatprep.mubr.bf16.mxu0 %v6384_v0  ;;  %741 = vmatprep.mubr.bf16.mxu1 %v6384_v0 }
  0x5c   : > { %755 = vmatpush1.bf16.msra.mxu0 %v4553_v42  ;;  %1440 = vmatpush1.bf16.msra.mxu1 %v5203_v43  ;;  %v5401_v42 = vld [vmem:[%s5168_s11 + $0x158] ss:$24 sps:$4 sm:$0xff]  }
  0x5d   : > { %756 = vmatprep.subr.bf16.mxu0 %v4561_v44  ;;  %1441 = vmatprep.subr.bf16.mxu1 %v5208_v45  ;;  %v5406_v44 = vld [vmem:[%s5168_s11 + $0x18c] ss:$24 sps:$4 sm:$0xff]  }
  0x5f   : > { %689 = vmatmul.mubr.bf16.gmra.mrb[4].mxu0 %v5224_v52  ;;  %742 = vmatmul.mubr.bf16.gmra.mrb[4].mxu1 %v5224_v52 }
  0x60   : > { %757 = vmatpush1.bf16.msra.mxu0 %v4559_v46  ;;  %1442 = vmatpush1.bf16.msra.mxu1 %v5214_v47  ;;  %v5411_v46 = vld [vmem:[%s5168_s11 + $0x14] ss:$24 sps:$4 sm:$0xff]  }
  0x61   : > { %758 = vmatprep.subr.bf16.mxu0 %v4567_v48  ;;  %1443 = vmatprep.subr.bf16.mxu1 %v5219_v49  ;;  %v5414_v48 = vld [vmem:[%s5168_s11 + $0x188] ss:$24 sps:$4 sm:$0xff]  }
  0x62   : > { %784 = vmatprep.mubr.bf16.mxu0 %v6384_v0  ;;  %1469 = vmatprep.mubr.bf16.mxu1 %v6384_v0 }
  0x64   : > { %759 = vmatpush1.bf16.msra.mxu0 %v4565_v53  ;;  %1444 = vmatpush1.bf16.msra.mxu1 %v5228_v54  ;;  %v5430_v53 = vld [vmem:[%s5168_s11 + $0x1b8] ss:$24 sps:$4 sm:$0xff]  }
  0x65   : > { %760 = vmatprep.subr.bf16.mxu0 %v4573_v55  ;;  %1445 = vmatprep.subr.bf16.mxu1 %v5234_v56  ;;  %6447 = vst [vmem:[#allocation8_spill] sm:$0xff] %v5430_v53  ;;  %v5433_v55 = vld [vmem:[%s5168_s11 + $0x40] ss:$24 sps:$4 sm:$0xff]  }
  0x66   : > { %6448 = vst [vmem:[#allocation9_spill] sm:$0xff] %v5433_v55 }
  0x68   : > { %761 = vmatpush1.bf16.msra.mxu0 %v4571_v57  ;;  %1446 = vmatpush1.bf16.msra.mxu1 %v5240_v58  ;;  %v5437_v57 = vld [vmem:[%s5168_s11 + $0x1ec] ss:$24 sps:$4 sm:$0xff]  }
  0x69   : > { %762 = vmatprep.subr.bf16.mxu0 %v4579_v59  ;;  %1447 = vmatprep.subr.bf16.mxu1 %v5248_v60  ;;  %6449 = vst [vmem:[#allocation10_spill] sm:$0xff] %v5437_v57  ;;  %v5440_v59 = vld [vmem:[%s5168_s11 + $0x74] ss:$24 sps:$4 sm:$0xff]  }
  0x6a   : > { %6450 = vst [vmem:[#allocation11_spill] sm:$0xff] %v5440_v59 }
  0x6c   : > { %763 = vmatpush1.bf16.msra.mxu0 %v4577_v61  ;;  %1448 = vmatpush1.bf16.msra.mxu1 %v5252_v62  ;;  %v5447_v61 = vld [vmem:[%s5168_s11 + $0x1e8] ss:$24 sps:$4 sm:$0xff]  }
  0x6d   : > { %764 = vmatprep.subr.bf16.mxu0 %v4585_v63  ;;  %1449 = vmatprep.subr.bf16.mxu1 %v5258_v1  ;;  %6451 = vst [vmem:[#allocation12_spill] sm:$0xff] %v5447_v61  ;;  %v5450_v63 = vld [vmem:[%s5168_s11 + $0x70] ss:$24 sps:$4 sm:$0xff]  }
  0x6e   : > { %6452 = vst [vmem:[#allocation13_spill] sm:$0xff] %v5450_v63 }
  0x70   : > { %765 = vmatpush1.bf16.msra.mxu0 %v4583_v2  ;;  %1450 = vmatpush1.bf16.msra.mxu1 %v5262_v3  ;;  %v5454_v2 = vld [vmem:[%s5168_s11 + $0x21c] ss:$24 sps:$4 sm:$0xff]  }
  0x71   : > { %766 = vmatprep.subr.bf16.mxu0 %v4591_v4  ;;  %1451 = vmatprep.subr.bf16.mxu1 %v5268_v5  ;;  %6453 = vst [vmem:[#allocation14_spill] sm:$0xff] %v5454_v2  ;;  %v5457_v4 = vld [vmem:[%s5168_s11 + $0xa4] ss:$24 sps:$4 sm:$0xff]  }
  0x72   : > { %6454 = vst [vmem:[#allocation15_spill] sm:$0xff] %v5457_v4 }
  0x74   : > { %767 = vmatpush1.bf16.msra.mxu0 %v4589_v6  ;;  %1452 = vmatpush1.bf16.msra.mxu1 %v5272_v7  ;;  %v5464_v6 = vld [vmem:[%s5168_s11 + $0x218] ss:$24 sps:$4 sm:$0xff]  }
  0x75   : > { %1453 = vmatprep.subr.bf16.mxu1 %v5276_v8  ;;  %1478 = vmatprep.subr.bf16.mxu0 %v5280_v9  ;;  %6455 = vst [vmem:[#allocation16_spill] sm:$0xff] %v5464_v6 }
  0x77   : > { %785 = vmatmul.mubr.bf16.vlgmr.msra.gmra.mrb[8].mxu0 %v5187_v37  ;;  %v5390_v37 = vld [vmem:[%s5168_s11 + $0x2d4] ss:$24 sps:$4 sm:$0xff]  }
  0x78   : > { %1454 = vmatpush1.bf16.msra.mxu1 %v5283_v10  ;;  %1479 = vmatpush1.bf16.msra.mxu0 %v5286_v11 }
  0x79   : > { %1455 = vmatprep.subr.bf16.mxu1 %v5290_v12  ;;  %1480 = vmatprep.subr.bf16.mxu0 %v5295_v13 }
  0x7a   : > { %794 = vmatprep.mubr.bf16.mxu0 %v6384_v0 }
  0x7c   : > { %1456 = vmatpush1.bf16.msra.mxu1 %v5299_v14  ;;  %1481 = vmatpush1.bf16.msra.mxu0 %v5302_v15 }
  0x7d   : > { %1457 = vmatprep.subr.bf16.mxu1 %v5307_v16  ;;  %1482 = vmatprep.subr.bf16.mxu0 %v5312_v17 }
  0x7f   : > { %795 = vmatmul.mubr.bf16.gmra.mrb[12].mxu0 %v5224_v52  ;;  %v5427_v52 = vld [vmem:[%s5168_s11 + $0x44] ss:$24 sps:$4 sm:$0xff]  }
  0x80   : > { %1458 = vmatpush1.bf16.msra.mxu1 %v5316_v18  ;;  %1483 = vmatpush1.bf16.msra.mxu0 %v5319_v19  ;;  %6446 = vst [vmem:[#allocation7_spill] sm:$0xff] %v5427_v52 }
  0x81   : > { %1459 = vmatprep.subr.bf16.mxu1 %v5324_v20  ;;  %1484 = vmatprep.subr.bf16.mxu0 %v5329_v21 }
  0x82   : > { %1510 = vmatprep.mubr.bf16.mxu0 %v6384_v0 }
  0x84   : > { %1460 = vmatpush1.bf16.msra.mxu1 %v5332_v22  ;;  %1485 = vmatpush1.bf16.msra.mxu0 %v5335_v23 }
  0x85   : > { %1461 = vmatprep.subr.bf16.mxu1 %v5341_v24  ;;  %1486 = vmatprep.subr.bf16.mxu0 %v5346_v25 }
  0x88   : > { %1462 = vmatpush1.bf16.msra.mxu1 %v5350_v26  ;;  %1487 = vmatpush1.bf16.msra.mxu0 %v5353_v27 }
  0x89   : > { %1463 = vmatprep.subr.bf16.mxu1 %v5358_v28  ;;  %1488 = vmatprep.subr.bf16.mxu0 %v5363_v29 }
  0x8c   : > { %1464 = vmatpush1.bf16.msra.mxu1 %v5366_v30  ;;  %1489 = vmatpush1.bf16.msra.mxu0 %v5369_v31 }
  0x8d   : > { %1465 = vmatprep.subr.bf16.mxu1 %v5374_v32  ;;  %1490 = vmatprep.subr.bf16.mxu0 %v5379_v33 }
  0x90   : > { %1466 = vmatpush1.bf16.msra.mxu1 %v5382_v34  ;;  %1491 = vmatpush1.bf16.msra.mxu0 %v5385_v35 }
  0x91   : > { %1467 = vmatprep.subr.bf16.mxu1 %v5390_v37  ;;  %1492 = vmatprep.subr.bf16.mxu0 %v5395_v38 }
  0x94   : > { %1468 = vmatpush1.bf16.msra.mxu1 %v5398_v40  ;;  %1493 = vmatpush1.bf16.msra.mxu0 %v5401_v42 }
  0x95   : > { %1494 = vmatprep.subr.bf16.mxu0 %v5406_v44  ;;  %1519 = vmatprep.subr.bf16.mxu1 %v5411_v46 }
  0x97   : > { %1470 = vmatmul.mubr.bf16.vlgmr.msra.gmra.mrb[8].mxu1 %v6384_v0 }
  0x98   : > { %1495 = vmatpush1.bf16.msra.mxu0 %v5414_v48  ;;  %1520 = vmatpush1.bf16.msra.mxu1 %v5419_v50  ;;  %v5473_v50 = vld [vmem:[%s5168_s11 + $0xd4] ss:$24 sps:$4 sm:$0xff]  }
  0x99   : > { %1496 = vmatprep.subr.bf16.mxu0 %v5424_v51  ;;  %1521 = vmatprep.subr.bf16.mxu1 %v5427_v52  ;;  %v5467_v52 = vld [vmem:[%s5168_s11 + $0xa0] ss:$24 sps:$4 sm:$0xff]   ;;  %6458 = vst [vmem:[#allocation19_spill] sm:$0xff] %v5473_v50 }
  0x9a   : > { %1551 = vmatprep.mubr.bf16.mxu1 %v6384_v0  ;;  %6456 = vst [vmem:[#allocation17_spill] sm:$0xff] %v5467_v52  ;;  %v5470_v0 = vld [vmem:[%s5168_s11 + $0x24c] ss:$24 sps:$4 sm:$0xff]  }
  0x9b   : > { %6457 = vst [vmem:[#allocation18_spill] sm:$0xff] %v5470_v0 }
  0x9c   : > { %1497 = vmatpush1.bf16.msra.mxu0 %v5430_v53  ;;  %1522 = vmatpush1.bf16.msra.mxu1 %v5433_v55  ;;  %v5483_v55 = vld [vmem:[%s5168_s11 + $0xd0] ss:$24 sps:$4 sm:$0xff]   ;;  %v5489_v53 = vld [vmem:[%s5168_s11 + $0x104] ss:$24 sps:$4 sm:$0xff]  }
  0x9d   : > { %1498 = vmatprep.subr.bf16.mxu0 %v5437_v57  ;;  %1523 = vmatprep.subr.bf16.mxu1 %v5440_v59  ;;  %v5480_v59 = vld [vmem:[%s5168_s11 + $0x248] ss:$24 sps:$4 sm:$0xff]   ;;  %6459 = vst [vmem:[#allocation20_spill] sm:$0xff] %v5483_v55  ;;  %v5486_v57 = vld [vmem:[%s5168_s11 + $0x27c] ss:$24 sps:$4 sm:$0xff]   ;;  %6461 = vst [vmem:[#allocation22_spill] sm:$0xff] %v5489_v53 }
  0x9e   : > { %6460 = vst [vmem:[#allocation21_spill] sm:$0xff] %v5486_v57 }
  0xa0   : > { %1499 = vmatpush1.bf16.msra.mxu0 %v5447_v61  ;;  %1524 = vmatpush1.bf16.msra.mxu1 %v5450_v63  ;;  %v5499_v63 = vld [vmem:[%s5168_s11 + $0x100] ss:$24 sps:$4 sm:$0xff]   ;;  %v5505_v61 = vld [vmem:[%s5168_s11 + $0x134] ss:$24 sps:$4 sm:$0xff]  }
  0xa1   : > { %1500 = vmatprep.subr.bf16.mxu0 %v5454_v2  ;;  %1525 = vmatprep.subr.bf16.mxu1 %v5457_v4  ;;  %v5496_v4 = vld [vmem:[%s5168_s11 + $0x278] ss:$24 sps:$4 sm:$0xff]   ;;  %6462 = vst [vmem:[#allocation23_spill] sm:$0xff] %v5499_v63  ;;  %v5502_v2 = vld [vmem:[%s5168_s11 + $0x2ac] ss:$24 sps:$4 sm:$0xff]   ;;  %6463 = vst [vmem:[#allocation24_spill] sm:$0xff] %v5505_v61 }
  0xa4   : > { %1501 = vmatpush1.bf16.msra.mxu0 %v5464_v6  ;;  %1526 = vmatpush1.bf16.msra.mxu1 %v5467_v52  ;;  %v5515_v52 = vld [vmem:[%s5168_s11 + $0x130] ss:$24 sps:$4 sm:$0xff]   ;;  %v5521_v6 = vld [vmem:[%s5168_s11 + $0x164] ss:$24 sps:$4 sm:$0xff]  }
  0xa5   : > { %1502 = vmatprep.subr.bf16.mxu0 %v5470_v0  ;;  %1527 = vmatprep.subr.bf16.mxu1 %v5473_v50  ;;  %v5512_v50 = vld [vmem:[%s5168_s11 + $0x2a8] ss:$24 sps:$4 sm:$0xff]   ;;  %6464 = vst [vmem:[#allocation25_spill] sm:$0xff] %v5515_v52  ;;  %v5518_v0 = vld [vmem:[%s5168_s11 + $0x2dc] ss:$24 sps:$4 sm:$0xff]   ;;  %6465 = vst [vmem:[#allocation26_spill] sm:$0xff] %v5521_v6 }
  0xa8   : > { %1503 = vmatpush1.bf16.msra.mxu0 %v5480_v59  ;;  %1528 = vmatpush1.bf16.msra.mxu1 %v5483_v55  ;;  %v5531_v55 = vld [vmem:[%s5168_s11 + $0x160] ss:$24 sps:$4 sm:$0xff]  }
  0xa9   : > { %1504 = vmatprep.subr.bf16.mxu0 %v5486_v57  ;;  %1529 = vmatprep.subr.bf16.mxu1 %v5489_v53  ;;  %v5528_v53 = vld [vmem:[%s5168_s11 + $0x2d8] ss:$24 sps:$4 sm:$0xff]   ;;  %6466 = vst [vmem:[#allocation27_spill] sm:$0xff] %v5531_v55  ;;  %v5534_v57 = vld [vmem:[%s5168_s11 + $0x194] ss:$24 sps:$4 sm:$0xff]  }
  0xac   : > { %1505 = vmatpush1.bf16.msra.mxu0 %v5496_v4  ;;  %1530 = vmatpush1.bf16.msra.mxu1 %v5499_v63  ;;  %v5541_v63 = vld [vmem:[%s5168_s11 + $0x190] ss:$24 sps:$4 sm:$0xff]  }
  0xad   : > { %1506 = vmatprep.subr.bf16.mxu0 %v5502_v2  ;;  %1531 = vmatprep.subr.bf16.mxu1 %v5505_v61  ;;  %6467 = vst [vmem:[#allocation28_spill] sm:$0xff] %v5541_v63  ;;  %v5547_v61 = vld [vmem:[%s5168_s11 + $0x1c4] ss:$24 sps:$4 sm:$0xff]  }
  0xb0   : > { %1507 = vmatpush1.bf16.msra.mxu0 %v5512_v50  ;;  %1532 = vmatpush1.bf16.msra.mxu1 %v5515_v52  ;;  %v6468_v52 = vmov 0  }
  0xb1   : > { %1508 = vmatprep.subr.bf16.mxu0 %v5518_v0  ;;  %1533 = vmatprep.subr.bf16.mxu1 %v5521_v6  ;;  %v5553_v6 = vld [vmem:[%s5168_s11 + $0x1c0] ss:$24 sps:$4 sm:$0xff]  }
  0xb4   : > { %1509 = vmatpush1.bf16.msra.mxu0 %v5528_v53  ;;  %1534 = vmatpush1.bf16.msra.mxu1 %v5531_v55  ;;  %v5558_v55 = vld [vmem:[%s5168_s11 + $0x1f4] ss:$24 sps:$4 sm:$0xff]  }
  0xb5   : > { %1535 = vmatprep.subr.bf16.mxu1 %v5534_v57  ;;  %2190 = vmatprep.subr.bf16.mxu0 %v5185_v36  ;;  %v5563_v36 = vld [vmem:[%s5168_s11 + $0x1f0] ss:$24 sps:$4 sm:$0xff]  }
  0xb7   : > { %1511 = vmatmul.mubr.bf16.vlgmr.msra.gmra.mrb[16].mxu0 %v6468_v52 }
  0xb8   : > { %1536 = vmatpush1.bf16.msra.mxu1 %v5541_v63  ;;  %2191 = vmatpush1.bf16.msra.mxu0 %v5191_v39  ;;  %v5568_v63 = vld [vmem:[%s5168_s11 + $0x224] ss:$24 sps:$4 sm:$0xff]   ;;  %v5573_v39 = vld [vmem:[%s5168_s11 + $0x220] ss:$24 sps:$4 sm:$0xff]  }
  0xb9   : > { %1537 = vmatprep.subr.bf16.mxu1 %v5547_v61  ;;  %2192 = vmatprep.subr.bf16.mxu0 %v5196_v41  ;;  %v5578_v41 = vld [vmem:[%s5168_s11 + $0x254] ss:$24 sps:$4 sm:$0xff]  }
  0xbc   : > { %1538 = vmatpush1.bf16.msra.mxu1 %v5553_v6  ;;  %2193 = vmatpush1.bf16.msra.mxu0 %v5203_v43  ;;  %v5583_v43 = vld [vmem:[%s5168_s11 + $0x250] ss:$24 sps:$4 sm:$0xff]  }
  0xbd   : > { %1539 = vmatprep.subr.bf16.mxu1 %v5558_v55  ;;  %2194 = vmatprep.subr.bf16.mxu0 %v5208_v45  ;;  %v5588_v45 = vld [vmem:[%s5168_s11 + $0x284] ss:$24 sps:$4 sm:$0xff]  }
  0xc0   : > { %1540 = vmatpush1.bf16.msra.mxu1 %v5563_v36  ;;  %2195 = vmatpush1.bf16.msra.mxu0 %v5214_v47  ;;  %v5593_v47 = vld [vmem:[%s5168_s11 + $0x280] ss:$24 sps:$4 sm:$0xff]  }
  0xc1   : > { %1541 = vmatprep.subr.bf16.mxu1 %v5568_v63  ;;  %2196 = vmatprep.subr.bf16.mxu0 %v5219_v49  ;;  %v5598_v49 = vld [vmem:[%s5168_s11 + $0x2b4] ss:$24 sps:$4 sm:$0xff]  }
  0xc4   : > { %1542 = vmatpush1.bf16.msra.mxu1 %v5573_v39  ;;  %2197 = vmatpush1.bf16.msra.mxu0 %v5228_v54  ;;  %v5603_v54 = vld [vmem:[%s5168_s11 + $0x2b0] ss:$24 sps:$4 sm:$0xff]  }
  0xc5   : > { %1543 = vmatprep.subr.bf16.mxu1 %v5578_v41  ;;  %2198 = vmatprep.subr.bf16.mxu0 %v5234_v56  ;;  %v5608_v56 = vld [vmem:[%s5168_s11 + $0x2e4] ss:$24 sps:$4 sm:$0xff]  }
  0xc8   : > { %1544 = vmatpush1.bf16.msra.mxu1 %v5583_v43  ;;  %2199 = vmatpush1.bf16.msra.mxu0 %v5240_v58  ;;  %v5613_v58 = vld [vmem:[%s5168_s11 + $0x2e0] ss:$24 sps:$4 sm:$0xff]  }
  0xc9   : > { %1545 = vmatprep.subr.bf16.mxu1 %v5588_v45  ;;  %2200 = vmatprep.subr.bf16.mxu0 %v5248_v60  ;;  %v6469_v60 = vld [vmem:[#allocation8_spill] sm:$0xff] }
  0xcc   : > { %1546 = vmatpush1.bf16.msra.mxu1 %v5593_v47  ;;  %2201 = vmatpush1.bf16.msra.mxu0 %v5252_v62  ;;  %v6470_v62 = vld [vmem:[#allocation10_spill] sm:$0xff] }
  0xcd   : > { %1547 = vmatprep.subr.bf16.mxu1 %v5598_v49  ;;  %2202 = vmatprep.subr.bf16.mxu0 %v5258_v1  ;;  %v6471_v1 = vld [vmem:[#allocation12_spill] sm:$0xff] }
  0xd0   : > { %1548 = vmatpush1.bf16.msra.mxu1 %v5603_v54  ;;  %2203 = vmatpush1.bf16.msra.mxu0 %v5262_v3  ;;  %v6472_v3 = vld [vmem:[#allocation14_spill] sm:$0xff] }
  0xd1   : > { %1549 = vmatprep.subr.bf16.mxu1 %v5608_v56  ;;  %2204 = vmatprep.subr.bf16.mxu0 %v5268_v5  ;;  %v6473_v5 = vld [vmem:[#allocation16_spill] sm:$0xff] }
  0xd4   : > { %1550 = vmatpush1.bf16.msra.mxu1 %v5613_v58  ;;  %2205 = vmatpush1.bf16.msra.mxu0 %v5272_v7  ;;  %v6474_v7 = vld [vmem:[#allocation18_spill] sm:$0xff] }
  0xd5   : > { %2231 = vmatprep.subr.bf16.mxu1 %v5280_v9  ;;  %2206 = vmatprep.subr.bf16.mxu0 %v5276_v8  ;;  %v6475_v8 = vld [vmem:[#allocation21_spill] sm:$0xff]  ;;  %v376_v9 = vlaneseq }
  0xd7   : > { %1552 = vmatmul.mubr.bf16.vlgmr.msra.gmra.mrb[12].mxu1 %v6468_v52 }
  0xd8   : > { %2232 = vmatpush1.bf16.msra.mxu1 %v5286_v11  ;;  %2207 = vmatpush1.bf16.msra.mxu0 %v5283_v10  ;;  %v5671_v10 = vshrl.u32 %v376_v9, 7 }
  0xd9   : > { %2233 = vmatprep.subr.bf16.mxu1 %v5295_v13  ;;  %2208 = vmatprep.subr.bf16.mxu0 %v5290_v12  ;;  %v374_v13 = vld [vmem:[%s309_s25] sm:$0x3f] }
  0xda   : > { %v386_v11 = vsub.s32 2, %v5671_v10  ;;  %v378_v12 = vsub.s32 0, %v5671_v10 }
  0xdc   : > { %2234 = vmatpush1.bf16.msra.mxu1 %v5302_v15  ;;  %2209 = vmatpush1.bf16.msra.mxu0 %v5299_v14  ;;  %v390_v14 = vsub.s32 3, %v5671_v10  ;;  %v387_v15 = vrot.slane %v374_v13, %v386_v11 }
  0xdd   : > { %2235 = vmatprep.subr.bf16.mxu1 %v5312_v17  ;;  %2210 = vmatprep.subr.bf16.mxu0 %v5307_v16  ;;  %v379_v16 = vrot.slane %v374_v13, %v378_v12 }
  0xde   : > { %v391_v17 = vrot.slane %v374_v13, %v390_v14 }
  0xe0   : > { %2236 = vmatpush1.bf16.msra.mxu1 %v5319_v19  ;;  %2211 = vmatpush1.bf16.msra.mxu0 %v5316_v18 }
  0xe1   : > { %2237 = vmatprep.subr.bf16.mxu1 %v5329_v21  ;;  %2212 = vmatprep.subr.bf16.mxu0 %v5324_v20 }
  0xe4   : > { %2238 = vmatpush1.bf16.msra.mxu1 %v5335_v23  ;;  %2213 = vmatpush1.bf16.msra.mxu0 %v5332_v22 }
  0xe5   : > { %2239 = vmatprep.subr.bf16.mxu1 %v5346_v25  ;;  %2214 = vmatprep.subr.bf16.mxu0 %v5341_v24 }
  0xe8   : > { %2240 = vmatpush1.bf16.msra.mxu1 %v5353_v27  ;;  %2215 = vmatpush1.bf16.msra.mxu0 %v5350_v26 }
  0xe9   : > { %2241 = vmatprep.subr.bf16.mxu1 %v5363_v29  ;;  %2216 = vmatprep.subr.bf16.mxu0 %v5358_v28 }
  0xec   : > { %2242 = vmatpush1.bf16.msra.mxu1 %v5369_v31  ;;  %2217 = vmatpush1.bf16.msra.mxu0 %v5366_v30 }
  0xed   : > { %2243 = vmatprep.subr.bf16.mxu1 %v5379_v33  ;;  %2218 = vmatprep.subr.bf16.mxu0 %v5374_v32 }
  0xf0   : > { %2244 = vmatpush1.bf16.msra.mxu1 %v5385_v35  ;;  %2219 = vmatpush1.bf16.msra.mxu0 %v5382_v34 }
  0xf1   : > { %2245 = vmatprep.subr.bf16.mxu1 %v5395_v38  ;;  %2220 = vmatprep.subr.bf16.mxu0 %v5390_v37 }
  0xf4   : > { %2246 = vmatpush1.bf16.msra.mxu1 %v5401_v42  ;;  %2221 = vmatpush1.bf16.msra.mxu0 %v5398_v40 }
  0xf5   : > { %2247 = vmatprep.subr.bf16.mxu1 %v5406_v44  ;;  %2272 = vmatprep.subr.bf16.mxu0 %v5411_v46 }
  0xf8   : > { %2248 = vmatpush1.bf16.msra.mxu1 %v5414_v48 }
  0xf9   : > { %2249 = vmatprep.subr.bf16.mxu1 %v5424_v51 }
  0xfc   : > { %2250 = vmatpush1.bf16.msra.mxu1 %v6469_v60 }
  0xfd   : > { %2251 = vmatprep.subr.bf16.mxu1 %v6470_v62  ;;  %v394_v62 = vsub.s32 4, %v5671_v10 }
 0x100   : > { %2252 = vmatpush1.bf16.msra.mxu1 %v6471_v1  ;;  %v398_v1 = vsub.s32 5, %v5671_v10 }
 0x101   : > { %2253 = vmatprep.subr.bf16.mxu1 %v6472_v3  ;;  %v395_v3 = vrot.slane %v374_v13, %v394_v62 }
 0x104   : > { %2254 = vmatpush1.bf16.msra.mxu1 %v6473_v5  ;;  %v399_v5 = vrot.slane %v374_v13, %v398_v1 }
 0x105   : > { %2255 = vmatprep.subr.bf16.mxu1 %v6474_v7 }
 0x108   : > { %2256 = vmatpush1.bf16.msra.mxu1 %v5480_v59 }
 0x109   : > { %2257 = vmatprep.subr.bf16.mxu1 %v6475_v8 }
 0x10c   : > { %2258 = vmatpush1.bf16.msra.mxu1 %v5496_v4 }
 0x10d   : > { %2259 = vmatprep.subr.bf16.mxu1 %v5502_v2 }
 0x110   : > { %2260 = vmatpush1.bf16.msra.mxu1 %v5512_v50 }
 0x111   : > { %2261 = vmatprep.subr.bf16.mxu1 %v5518_v0  ;;  %v382_v0 = vsub.s32 1, %v5671_v10 }
 0x113   : > { %v383_v18 = vrot.slane %v374_v13, %v382_v0 }
 0x114   : > { %2262 = vmatpush1.bf16.msra.mxu1 %v5528_v53 }
 0x12a   : > { %v733_v19 = vpop.f32.mrb[0].mxu1  ;;  %v680_v20 = vpop.f32.mrb[0].mxu0 }
 0x12b   : > { %v5686_v21 = vadd.f32 %v733_v19, %v387_v15  ;;  %v735_v22 = vpop.f32.mrb[1].mxu1  ;;  %v681_v23 = vadd.f32 %v680_v20, %v379_v16  ;;  %v682_v24 = vpop.f32.mrb[1].mxu0 }
 0x12c   : > { %v5688_v25 = vadd.f32 %v735_v22, %v391_v17  ;;  %v737_v26 = vpop.f32.mrb[2].mxu1  ;;  %v683_v27 = vadd.f32 %v682_v24, %v383_v18  ;;  %v684_v28 = vpop.f32.mrb[2].mxu0 }
 0x12d   : > { %v5690_v29 = vadd.f32 %v737_v26, %v387_v15  ;;  %v739_v30 = vpop.f32.mrb[3].mxu1  ;;  %v5692_v31 = vadd.f32 %v684_v28, %v379_v16  ;;  %v686_v32 = vpop.f32.mrb[3].mxu0 }
 0x12e   : > { %6476 = vst [vmem:[#allocation8_spill] sm:$0xff] %v5688_v25  ;;  %v5694_v33 = vadd.f32 %v739_v30, %v391_v17  ;;  %v5696_v34 = vadd.f32 %v686_v32, %v383_v18  ;;  %v5975_v25 = vld [vmem:[%s5168_s11 + $0x1e0] ss:$24 sps:$4 sm:$0xff]  }
 0x130   : > { %6477 = vst [vmem:[#allocation10_spill] sm:$0xff] %v5694_v33  ;;  %v5998_v33 = vld [vmem:[%s5168_s11 + $0x218] ss:$24 sps:$4 sm:$0xff]  }
 0x131   : > { %6527 = vst [vmem:[#allocation41_spill] sm:$0xff] %v5998_v33 }
 0x132   : > { %v690_v35 = vpop.f32.mrb[4].mxu0  ;;  %v743_v37 = vpop.f32.mrb[4].mxu1 }
 0x133   : > { %v5698_v38 = vadd.f32 %v690_v35, %v379_v16  ;;  %v692_v40 = vpop.f32.mrb[5].mxu0  ;;  %v5700_v42 = vadd.f32 %v743_v37, %v387_v15  ;;  %v745_v44 = vpop.f32.mrb[5].mxu1  ;;  %v829_v35 = vld [vmem:[%s313_s30] sm:$0x3f] }
 0x134   : > { %v5702_v46 = vadd.f32 %v692_v40, %v383_v18  ;;  %v694_v48 = vpop.f32.mrb[6].mxu0  ;;  %v5704_v50 = vadd.f32 %v745_v44, %v391_v17  ;;  %v747_v51 = vpop.f32.mrb[6].mxu1  ;;  %v5735_v37 = vrot.slane %v829_v35, %v378_v12  ;;  %v5737_v40 = vrot.slane %v829_v35, %v382_v0 }
 0x135   : > { %6478 = vst [vmem:[#allocation12_spill] sm:$0xff] %v5698_v38  ;;  %6479 = vst [vmem:[#allocation14_spill] sm:$0xff] %v5700_v42  ;;  %v5706_v52 = vadd.f32 %v694_v48, %v379_v16  ;;  %v696_v53 = vpop.f32.mrb[7].mxu0  ;;  %v5708_v59 = vadd.f32 %v747_v51, %v387_v15  ;;  %v749_v2 = vpop.f32.mrb[7].mxu1  ;;  %v5743_v0 = vrot.slane %v829_v35, %v386_v11  ;;  %v5994_v42 = vld [vmem:[%s5168_s11 + $0x21c] ss:$24 sps:$4 sm:$0xff]  }
 0x136   : > { %6480 = vst [vmem:[#allocation16_spill] sm:$0xff] %v5702_v46  ;;  %v5710_v4 = vadd.f32 %v696_v53, %v383_v18  ;;  %v750_v60 = vadd.f32 %v749_v2, %v391_v17  ;;  %6488 = vst [vmem:[#allocation34_spill] sm:$0xff] %v5735_v37  ;;  %v6003_v46 = vld [vmem:[%s5168_s11 + $0x240] ss:$24 sps:$4 sm:$0xff]   ;;  %v6006_v38 = vld [vmem:[%s5168_s11 + $0x244] ss:$24 sps:$4 sm:$0xff]  }
 0x137   : > { %6481 = vst [vmem:[#allocation18_spill] sm:$0xff] %v5706_v52  ;;  %6482 = vst [vmem:[#allocation21_spill] sm:$0xff] %v5708_v59  ;;  %v5972_v59 = vld [vmem:[%s5168_s11 + $0x1e4] ss:$24 sps:$4 sm:$0xff]   ;;  %v5982_v52 = vld [vmem:[%s5168_s11 + $0x1e8] ss:$24 sps:$4 sm:$0xff]  }
 0x138   : > { %6483 = vst [vmem:[#allocation29_spill] sm:$0xff] %v5710_v4  ;;  %6489 = vst [vmem:[#allocation35_spill] sm:$0xff] %v5737_v40  ;;  %v5978_v4 = vld [vmem:[%s5168_s11 + $0x1ec] ss:$24 sps:$4 sm:$0xff]  }
 0x139   : > { %6524 = vst [vmem:[#allocation38_spill] sm:$0xff] %v5978_v4  ;;  %6525 = vst [vmem:[#allocation39_spill] sm:$0xff] %v5982_v52 }
 0x13a   : > { %6526 = vst [vmem:[#allocation40_spill] sm:$0xff] %v5994_v42 }
 0x14a   : > { %v786_v7 = vpop.f32.mrb[8].mxu0 }
 0x14b   : > { %v5718_v8 = vadd.f32 %v786_v7, %v395_v3  ;;  %v788_v9 = vpop.f32.mrb[9].mxu0 }
 0x14c   : > { %v5720_v15 = vadd.f32 %v788_v9, %v399_v5  ;;  %v790_v16 = vpop.f32.mrb[10].mxu0 }
 0x14d   : > { %6484 = vst [vmem:[#allocation30_spill] sm:$0xff] %v5718_v8  ;;  %v5722_v18 = vadd.f32 %v790_v16, %v395_v3  ;;  %v792_v17 = vpop.f32.mrb[11].mxu0  ;;  %v5966_v8 = vld [vmem:[%s5168_s11 + $0x1b8] ss:$24 sps:$4 sm:$0xff]  }
 0x14e   : > { %6485 = vst [vmem:[#allocation31_spill] sm:$0xff] %v5720_v15  ;;  %v5724_v19 = vadd.f32 %v792_v17, %v399_v5  ;;  %v5962_v15 = vld [vmem:[%s5168_s11 + $0x1bc] ss:$24 sps:$4 sm:$0xff]   ;;  %6523 = vst [vmem:[#allocation37_spill] sm:$0xff] %v5966_v8 }
 0x14f   : > { %6486 = vst [vmem:[#allocation32_spill] sm:$0xff] %v5722_v18  ;;  %6522 = vst [vmem:[#allocation36_spill] sm:$0xff] %v5962_v15  ;;  %v5991_v18 = vld [vmem:[%s5168_s11 + $0x210] ss:$24 sps:$4 sm:$0xff]  }
 0x150   : > { %6487 = vst [vmem:[#allocation33_spill] sm:$0xff] %v5724_v19  ;;  %v5988_v19 = vld [vmem:[%s5168_s11 + $0x214] ss:$24 sps:$4 sm:$0xff]  }
 0x152   : > { %v796_v20 = vpop.f32.mrb[12].mxu0 }
 0x153   : > { %v5726_v22 = vadd.f32 %v796_v20, %v395_v3  ;;  %v798_v24 = vpop.f32.mrb[13].mxu0 }
 0x154   : > { %v5728_v26 = vadd.f32 %v798_v24, %v399_v5  ;;  %v800_v13 = vpop.f32.mrb[14].mxu0  ;;  %v5747_v24 = vrot.slane %v829_v35, %v390_v14 }
 0x155   : > { %v801_v28 = vadd.f32 %v800_v13, %v395_v3  ;;  %v802_v30 = vpop.f32.mrb[15].mxu0 }
 0x156   : > { %v803_v32 = vadd.f32 %v802_v30, %v399_v5 }
 0x16a   : > { %v1471_v44 = vpop.f32.mrb[8].mxu1 }
 0x16b   : > { %v1472_v48 = vadd.f32 %v1471_v44, %v5735_v37  ;;  %v1473_v51 = vpop.f32.mrb[9].mxu1 }
 0x16c   : > { %v1474_v53 = vadd.f32 %v1473_v51, %v5737_v40  ;;  %v1475_v2 = vpop.f32.mrb[10].mxu1 }
 0x16d   : > { %v1567_v3 = vadd.f32 %v1472_v48, %v681_v23  ;;  %v1476_v7 = vpop.f32.mrb[11].mxu1 }
 0x16e   : > { %v1574_v5 = vadd.f32 %v1474_v53, %v683_v27 }
 0x16f   : > { %v4138_v9 = vmul.f32 -1.442695, %v1567_v3 }
 0x170   : > { %v4139_v16 = vmul.f32 -1.442695, %v1574_v5 }
 0x171   : > { %4859 = vpow2.f32 %v4138_v9 }
 0x172   : > { %4861 = vpow2.f32 %v4139_v16 }
 0x17b   : > { %v4860_v17 = vpop.eup %4859 }
 0x17c   : > { %v1571_v20 = vadd.f32 1.0, %v4860_v17  ;;  %v4862_v12 = vpop.eup %4861 }
 0x17d   : > { %v1578_v13 = vadd.f32 1.0, %v4862_v12 }
 0x17e   : > { %4863 = vrcp.f32 %v1571_v20 }
 0x17f   : > { %4865 = vrcp.f32 %v1578_v13  ;;  %v5768_v13 = vrot.slane %v829_v35, %v398_v1 }
 0x188   : > { %v4864_v44 = vpop.eup %4863 }
 0x189   : > { %v4866_v14 = vpop.eup %4865 }
 0x18a   : > { %v1512_v23 = vpop.f32.mrb[16].mxu0  ;;  %v1584_v5 = vsub.f32 1.0, %v4866_v14  ;;  %v1586_v20 = vmul.f32 0.0, %v4866_v14 }
 0x18b   : > { %v1513_v27 = vadd.f32 %v1512_v23, %v5743_v0  ;;  %v1514_v30 = vpop.f32.mrb[17].mxu0 }
 0x18c   : > { %v1515_v48 = vadd.f32 %v1514_v30, %v5747_v24  ;;  %v1516_v51 = vpop.f32.mrb[18].mxu0 }
 0x18d   : > { %v1581_v53 = vmul.f32 %v4864_v44, %v1513_v27  ;;  %v1517_v2 = vpop.f32.mrb[19].mxu0 }
 0x18e   : > { %v1588_v3 = vadd.f32 %v1515_v48, %v750_v60 }
 0x18f   : > { %v1582_v11 = vadd.f32 %v1581_v53, %v5686_v21  ;;  %v5764_v21 = vrot.slane %v829_v35, %v394_v62 }
 0x190   : > { %v4140_v7 = vmul.f32 -1.442695, %v1588_v3 }
 0x191   : > { %4867 = vtanh.f32 %v1582_v11 }
 0x192   : > { %4869 = vpow2.f32 %v4140_v7 }
 0x19b   : > { %v4868_v9 = vpop.eup %4867 }
 0x19c   : > { %v4870_v16 = vpop.eup %4869  ;;  %v1585_v17 = vmul.f32 %v4868_v9, %v1584_v5 }
 0x19d   : > { %v1592_v60 = vadd.f32 1.0, %v4870_v16 }
 0x19e   : > { %v5758_v12 = vadd.f32 %v1586_v20, %v1585_v17  ;;  %v6490_v17 = vld [vmem:[#allocation6_spill] sm:$0xff]  ;;  %v6491_v20 = vld [vmem:[#allocation7_spill] sm:$0xff] }
 0x19f   : > { %4871 = vrcp.f32 %v1592_v60  ;;  %v6492_v60 = vld [vmem:[#allocation9_spill] sm:$0xff] }
 0x1a0   : > { %1609 = vst [vmem:[%s5756_s13] sm:$0xff] %v5758_v12 }
 0x1a9   : > { %v4872_v51 = vpop.eup %4871 }
 0x1aa   : > { %v1553_v23 = vpop.f32.mrb[12].mxu1 }
 0x1ab   : > { %v1554_v27 = vadd.f32 %v1553_v23, %v5764_v21  ;;  %v1555_v30 = vpop.f32.mrb[13].mxu1  ;;  %v6493_v23 = vld [vmem:[#allocation11_spill] sm:$0xff] }
 0x1ac   : > { %v1556_v44 = vadd.f32 %v1555_v30, %v5768_v13  ;;  %v1557_v48 = vpop.f32.mrb[14].mxu1  ;;  %v6495_v30 = vld [vmem:[#allocation15_spill] sm:$0xff] }
 0x1ad   : > { %v1595_v53 = vadd.f32 %v1554_v27, %v801_v28  ;;  %v1558_v2 = vpop.f32.mrb[15].mxu1  ;;  %v6494_v27 = vld [vmem:[#allocation13_spill] sm:$0xff]  ;;  %v6497_v48 = vld [vmem:[#allocation19_spill] sm:$0xff] }
 0x1ae   : > { %v1602_v3 = vmul.f32 %v4872_v51, %v1556_v44  ;;  %v6496_v44 = vld [vmem:[#allocation17_spill] sm:$0xff]  ;;  %v6498_v51 = vld [vmem:[#allocation20_spill] sm:$0xff]  ;;  %v6500_v2 = vld [vmem:[#allocation23_spill] sm:$0xff] }
 0x1af   : > { %v4141_v11 = vmul.f32 -1.442695, %v1595_v53  ;;  %v6499_v53 = vld [vmem:[#allocation22_spill] sm:$0xff] }
 0x1b0   : > { %v1603_v7 = vadd.f32 %v1602_v3, %v803_v32  ;;  %v1612_v32 = vpack.c.bf16 %v5758_v12, %v5758_v12  ;;  %v6501_v3 = vld [vmem:[#allocation24_spill] sm:$0xff] }
 0x1b1   : > { %4873 = vpow2.f32 %v4141_v11  ;;  %v6502_v11 = vld [vmem:[#allocation25_spill] sm:$0xff] }
 0x1bb   : > { %v4874_v62 = vpop.eup %4873 }
 0x1bc   : > { %v1599_v14 = vadd.f32 1.0, %v4874_v62  ;;  %v6504_v62 = vld [vmem:[#allocation27_spill] sm:$0xff] }
 0x1be   : > { %4875 = vrcp.f32 %v1599_v14  ;;  %v6505_v14 = vld [vmem:[#allocation28_spill] sm:$0xff] }
 0x1bf   : > { %4877 = vtanh.f32 %v1603_v7  ;;  %v6503_v7 = vld [vmem:[#allocation26_spill] sm:$0xff] }
 0x1c8   : > { %v4876_v10 = vpop.eup %4875 }
 0x1c9   : > { %v1605_v1 = vsub.f32 1.0, %v4876_v10  ;;  %v4878_v35 = vpop.eup %4877  ;;  %v1607_v9 = vmul.f32 0.0, %v4876_v10  ;;  %v5870_v10 = vld [vmem:[%s5168_s11 + $0x98] ss:$24 sps:$4 sm:$0xff]  }
 0x1ca   : > { %6511 = vst [vmem:[#allocation15_spill] sm:$0xff] %v5870_v10 }
 0x1cb   : > { %v1606_v5 = vmul.f32 %v4878_v35, %v1605_v1  ;;  %v5873_v1 = vld [vmem:[%s5168_s11 + $0xc4] ss:$24 sps:$4 sm:$0xff]  }
 0x1cc   : > { %v5877_v35 = vld [vmem:[%s5168_s11 + $0xcc] ss:$24 sps:$4 sm:$0xff]  }
 0x1cd   : > { %v5772_v16 = vadd.f32 %v1607_v9, %v1606_v5  ;;  %6512 = vst [vmem:[#allocation17_spill] sm:$0xff] %v5877_v35  ;;  %v5881_v5 = vld [vmem:[%s5168_s11 + $0xc0] ss:$24 sps:$4 sm:$0xff]  }
 0x1ce   : > { %v5886_v9 = vld [vmem:[%s5168_s11 + $0xc8] ss:$24 sps:$4 sm:$0xff]  }
 0x1cf   : > { %4142 = vst [vmem:[%s5756_s13 + $0x38] sm:$0xff] %v5772_v16  ;;  %v1613_v28 = vpack.c.bf16 %v5772_v16, %v5772_v16  ;;  %6513 = vst [vmem:[#allocation19_spill] sm:$0xff] %v5886_v9 }
 0x1d1   : > { %2222 = vmatprep.mubr.bf16.mxu0 %v1613_v28  ;;  %2263 = vmatprep.mubr.bf16.mxu1 %v1613_v28 }
 0x1d2   : > { %2223 = vmatmul.mubr.bf16.vlgmr.msra.gmra.mrb[20].mxu0 %v1612_v32  ;;  %2264 = vmatmul.mubr.bf16.vlgmr.msra.gmra.mrb[16].mxu1 %v1612_v32 }
 0x1d3   : > { %2273 = vmatpush1.bf16.msra.mxu0 %v6490_v17  ;;  %2304 = vmatprep.mubr.bf16.mxu0 %v1613_v28  ;;  %v5889_v28 = vld [vmem:[%s5168_s11 + $0xf4] ss:$24 sps:$4 sm:$0xff]   ;;  %v5897_v17 = vld [vmem:[%s5168_s11 + $0xf0] ss:$24 sps:$4 sm:$0xff]  }
 0x1d4   : > { %2274 = vmatprep.subr.bf16.mxu0 %v6491_v20  ;;  %v5902_v20 = vld [vmem:[%s5168_s11 + $0xf8] ss:$24 sps:$4 sm:$0xff]  }
 0x1d5   : > { %6515 = vst [vmem:[#allocation22_spill] sm:$0xff] %v5902_v20 }
 0x1d7   : > { %2275 = vmatpush1.bf16.msra.mxu0 %v6492_v60  ;;  %v5905_v60 = vld [vmem:[%s5168_s11 + $0x124] ss:$24 sps:$4 sm:$0xff]  }
 0x1d8   : > { %2276 = vmatprep.subr.bf16.mxu0 %v6493_v23  ;;  %v5910_v23 = vld [vmem:[%s5168_s11 + $0x120] ss:$24 sps:$4 sm:$0xff]  }
 0x1db   : > { %2277 = vmatpush1.bf16.msra.mxu0 %v6494_v27  ;;  %v5916_v27 = vld [vmem:[%s5168_s11 + $0x12c] ss:$24 sps:$4 sm:$0xff]  }
 0x1dc   : > { %2278 = vmatprep.subr.bf16.mxu0 %v6495_v30  ;;  %6516 = vst [vmem:[#allocation23_spill] sm:$0xff] %v5916_v27  ;;  %v5919_v30 = vld [vmem:[%s5168_s11 + $0x128] ss:$24 sps:$4 sm:$0xff]  }
 0x1dd   : > { %6517 = vst [vmem:[#allocation24_spill] sm:$0xff] %v5919_v30 }
 0x1df   : > { %2279 = vmatpush1.bf16.msra.mxu0 %v6496_v44  ;;  %v5924_v44 = vld [vmem:[%s5168_s11 + $0x154] ss:$24 sps:$4 sm:$0xff]  }
 0x1e0   : > { %2280 = vmatprep.subr.bf16.mxu0 %v6497_v48  ;;  %v5927_v48 = vld [vmem:[%s5168_s11 + $0x150] ss:$24 sps:$4 sm:$0xff]  }
 0x1e3   : > { %2281 = vmatpush1.bf16.msra.mxu0 %v6498_v51  ;;  %v5930_v51 = vld [vmem:[%s5168_s11 + $0x15c] ss:$24 sps:$4 sm:$0xff]  }
 0x1e4   : > { %2282 = vmatprep.subr.bf16.mxu0 %v6499_v53  ;;  %6518 = vst [vmem:[#allocation25_spill] sm:$0xff] %v5930_v51  ;;  %v5934_v53 = vld [vmem:[%s5168_s11 + $0x158] ss:$24 sps:$4 sm:$0xff]  }
 0x1e5   : > { %6519 = vst [vmem:[#allocation26_spill] sm:$0xff] %v5934_v53 }
 0x1e7   : > { %2283 = vmatpush1.bf16.msra.mxu0 %v6500_v2  ;;  %v5940_v2 = vld [vmem:[%s5168_s11 + $0x184] ss:$24 sps:$4 sm:$0xff]  }
 0x1e8   : > { %2284 = vmatprep.subr.bf16.mxu0 %v6501_v3  ;;  %v5943_v3 = vld [vmem:[%s5168_s11 + $0x180] ss:$24 sps:$4 sm:$0xff]  }
 0x1eb   : > { %2285 = vmatpush1.bf16.msra.mxu0 %v6502_v11  ;;  %v5946_v11 = vld [vmem:[%s5168_s11 + $0x18c] ss:$24 sps:$4 sm:$0xff]  }
 0x1ec   : > { %2286 = vmatprep.subr.bf16.mxu0 %v6503_v7  ;;  %6520 = vst [vmem:[#allocation27_spill] sm:$0xff] %v5946_v11  ;;  %v5950_v7 = vld [vmem:[%s5168_s11 + $0x188] ss:$24 sps:$4 sm:$0xff]  }
 0x1ed   : > { %6521 = vst [vmem:[#allocation28_spill] sm:$0xff] %v5950_v7 }
 0x1ef   : > { %2287 = vmatpush1.bf16.msra.mxu0 %v6504_v62  ;;  %v5956_v62 = vld [vmem:[%s5168_s11 + $0x1b4] ss:$24 sps:$4 sm:$0xff]  }
 0x1f0   : > { %2288 = vmatprep.subr.bf16.mxu0 %v5534_v57  ;;  %v5815_v57 = vld [vmem:[%s5168_s11 + $0x4] ss:$24 sps:$4 sm:$0xff]  }
 0x1f1   : > { %2945 = vmatprep.subr.bf16.mxu1 %v5815_v57 }
 0x1f3   : > { %2289 = vmatpush1.bf16.msra.mxu0 %v6505_v14  ;;  %v5959_v14 = vld [vmem:[%s5168_s11 + $0x1b0] ss:$24 sps:$4 sm:$0xff]  }
 0x1f4   : > { %2290 = vmatprep.subr.bf16.mxu0 %v5547_v61  ;;  %v5818_v61 = vld [vmem:[%s5168_s11 + $0x8] ss:$24 sps:$4 sm:$0xff]  }
 0x1f7   : > { %2291 = vmatpush1.bf16.msra.mxu0 %v5553_v6  ;;  %v5824_v6 = vld [vmem:[%s5168_s11 + $0x34] ss:$24 sps:$4 sm:$0xff]  }
 0x1f8   : > { %2292 = vmatprep.subr.bf16.mxu0 %v5558_v55  ;;  %v5812_v55 = vld [vmem:[%s5168_s11] ss:$24 sps:$4 sm:$0xff]  }
 0x1f9   : > { %2946 = vmatpush1.bf16.msra.mxu1 %v5812_v55 }
 0x1fa   : > { %2947 = vmatprep.subr.bf16.mxu1 %v5824_v6 }
 0x1fb   : > { %2293 = vmatpush1.bf16.msra.mxu0 %v5563_v36  ;;  %v5828_v36 = vld [vmem:[%s5168_s11 + $0x3c] ss:$24 sps:$4 sm:$0xff]  }
 0x1fc   : > { %2294 = vmatprep.subr.bf16.mxu0 %v5568_v63  ;;  %v5821_v63 = vld [vmem:[%s5168_s11 + $0xc] ss:$24 sps:$4 sm:$0xff]   ;;  %6506 = vst [vmem:[#allocation6_spill] sm:$0xff] %v5828_v36 }
 0x1ff   : > { %2295 = vmatpush1.bf16.msra.mxu0 %v5573_v39  ;;  %v5833_v39 = vld [vmem:[%s5168_s11 + $0x30] ss:$24 sps:$4 sm:$0xff]  }
 0x200   : > { %2296 = vmatprep.subr.bf16.mxu0 %v5578_v41  ;;  %v5838_v41 = vld [vmem:[%s5168_s11 + $0x38] ss:$24 sps:$4 sm:$0xff]   ;;  %2948 = vmatpush1.bf16.msra.mxu1 %v5833_v39 }
 0x201   : > { %6507 = vst [vmem:[#allocation7_spill] sm:$0xff] %v5838_v41 }
 0x203   : > { %2297 = vmatpush1.bf16.msra.mxu0 %v5583_v43  ;;  %v5841_v43 = vld [vmem:[%s5168_s11 + $0x64] ss:$24 sps:$4 sm:$0xff]  }
 0x204   : > { %2298 = vmatprep.subr.bf16.mxu0 %v5588_v45  ;;  %v5845_v45 = vld [vmem:[%s5168_s11 + $0x6c] ss:$24 sps:$4 sm:$0xff]   ;;  %2949 = vmatprep.subr.bf16.mxu1 %v5841_v43 }
 0x205   : > { %6508 = vst [vmem:[#allocation9_spill] sm:$0xff] %v5845_v45 }
 0x207   : > { %2299 = vmatpush1.bf16.msra.mxu0 %v5593_v47  ;;  %v5849_v47 = vld [vmem:[%s5168_s11 + $0x60] ss:$24 sps:$4 sm:$0xff]  }
 0x208   : > { %2300 = vmatprep.subr.bf16.mxu0 %v5598_v49  ;;  %v5854_v49 = vld [vmem:[%s5168_s11 + $0x68] ss:$24 sps:$4 sm:$0xff]   ;;  %2950 = vmatpush1.bf16.msra.mxu1 %v5849_v47 }
 0x209   : > { %6509 = vst [vmem:[#allocation11_spill] sm:$0xff] %v5854_v49 }
 0x20b   : > { %2301 = vmatpush1.bf16.msra.mxu0 %v5603_v54  ;;  %v5857_v54 = vld [vmem:[%s5168_s11 + $0x94] ss:$24 sps:$4 sm:$0xff]  }
 0x20c   : > { %2302 = vmatprep.subr.bf16.mxu0 %v5608_v56  ;;  %v5861_v56 = vld [vmem:[%s5168_s11 + $0x9c] ss:$24 sps:$4 sm:$0xff]   ;;  %2951 = vmatprep.subr.bf16.mxu1 %v5857_v54 }
 0x20d   : > { %6510 = vst [vmem:[#allocation13_spill] sm:$0xff] %v5861_v56 }
 0x20f   : > { %2303 = vmatpush1.bf16.msra.mxu0 %v5613_v58  ;;  %v5865_v58 = vld [vmem:[%s5168_s11 + $0x90] ss:$24 sps:$4 sm:$0xff]  }
 0x210   : > { %2986 = vmatprep.subr.bf16.mxu0 %v5821_v63  ;;  %2952 = vmatpush1.bf16.msra.mxu1 %v5865_v58 }
 0x211   : > { %2953 = vmatprep.subr.bf16.mxu1 %v5873_v1 }
 0x212   : > { %2305 = vmatmul.mubr.bf16.vlgmr.msra.gmra.mrb[24].mxu0 %v1612_v32  ;;  %v5893_v32 = vld [vmem:[%s5168_s11 + $0xfc] ss:$24 sps:$4 sm:$0xff]  }
 0x213   : > { %2987 = vmatpush1.bf16.msra.mxu0 %v5818_v61  ;;  %6514 = vst [vmem:[#allocation20_spill] sm:$0xff] %v5893_v32 }
 0x214   : > { %2988 = vmatprep.subr.bf16.mxu0 %v5828_v36  ;;  %2954 = vmatpush1.bf16.msra.mxu1 %v5881_v5 }
 0x215   : > { %2955 = vmatprep.subr.bf16.mxu1 %v5889_v28 }
 0x217   : > { %2989 = vmatpush1.bf16.msra.mxu0 %v5838_v41 }
 0x218   : > { %2990 = vmatprep.subr.bf16.mxu0 %v5845_v45  ;;  %2956 = vmatpush1.bf16.msra.mxu1 %v5897_v17 }
 0x219   : > { %2957 = vmatprep.subr.bf16.mxu1 %v5905_v60 }
 0x21b   : > { %2991 = vmatpush1.bf16.msra.mxu0 %v5854_v49 }
 0x21c   : > { %2992 = vmatprep.subr.bf16.mxu0 %v5861_v56  ;;  %2958 = vmatpush1.bf16.msra.mxu1 %v5910_v23 }
 0x21d   : > { %2959 = vmatprep.subr.bf16.mxu1 %v5924_v44 }
 0x21f   : > { %2993 = vmatpush1.bf16.msra.mxu0 %v5870_v10 }
 0x220   : > { %2994 = vmatprep.subr.bf16.mxu0 %v5877_v35  ;;  %2960 = vmatpush1.bf16.msra.mxu1 %v5927_v48 }
 0x221   : > { %2961 = vmatprep.subr.bf16.mxu1 %v5940_v2 }
 0x223   : > { %2995 = vmatpush1.bf16.msra.mxu0 %v5886_v9 }
 0x224   : > { %2996 = vmatprep.subr.bf16.mxu0 %v5893_v32  ;;  %2962 = vmatpush1.bf16.msra.mxu1 %v5943_v3 }
 0x225   : > { %2963 = vmatprep.subr.bf16.mxu1 %v5956_v62 }
 0x227   : > { %2997 = vmatpush1.bf16.msra.mxu0 %v5902_v20 }
 0x228   : > { %2998 = vmatprep.subr.bf16.mxu0 %v5916_v27  ;;  %2964 = vmatpush1.bf16.msra.mxu1 %v5959_v14 }
 0x229   : > { %2965 = vmatprep.subr.bf16.mxu1 %v5972_v59 }
 0x22b   : > { %2999 = vmatpush1.bf16.msra.mxu0 %v5919_v30  ;;  %v6062_v30 = vld [vmem:[%s5168_s11 + $0x2d8] ss:$24 sps:$4 sm:$0xff]  }
 0x22c   : > { %3000 = vmatprep.subr.bf16.mxu0 %v5930_v51  ;;  %2966 = vmatpush1.bf16.msra.mxu1 %v5975_v25  ;;  %v6053_v51 = vld [vmem:[%s5168_s11 + $0x2dc] ss:$24 sps:$4 sm:$0xff]   ;;  %6535 = vst [vmem:[#allocation49_spill] sm:$0xff] %v6062_v30 }
 0x22d   : > { %2967 = vmatprep.subr.bf16.mxu1 %v5988_v19  ;;  %6534 = vst [vmem:[#allocation48_spill] sm:$0xff] %v6053_v51 }
 0x22f   : > { %3001 = vmatpush1.bf16.msra.mxu0 %v5934_v53  ;;  %v6049_v53 = vld [vmem:[%s5168_s11 + $0x2d4] ss:$24 sps:$4 sm:$0xff]  }
 0x230   : > { %3002 = vmatprep.subr.bf16.mxu0 %v5946_v11  ;;  %2968 = vmatpush1.bf16.msra.mxu1 %v5991_v18  ;;  %v6037_v11 = vld [vmem:[%s5168_s11 + $0x2ac] ss:$24 sps:$4 sm:$0xff]  }
 0x231   : > { %2969 = vmatprep.subr.bf16.mxu1 %v6006_v38  ;;  %6532 = vst [vmem:[#allocation46_spill] sm:$0xff] %v6037_v11 }
 0x233   : > { %3003 = vmatpush1.bf16.msra.mxu0 %v5950_v7  ;;  %v6033_v7 = vld [vmem:[%s5168_s11 + $0x2a4] ss:$24 sps:$4 sm:$0xff]  }
 0x234   : > { %3004 = vmatprep.subr.bf16.mxu0 %v5962_v15  ;;  %v6020_v15 = vld [vmem:[%s5168_s11 + $0x27c] ss:$24 sps:$4 sm:$0xff]   ;;  %2970 = vmatpush1.bf16.msra.mxu1 %v6003_v46 }
 0x235   : > { %6530 = vst [vmem:[#allocation44_spill] sm:$0xff] %v6020_v15 }
 0x237   : > { %3005 = vmatpush1.bf16.msra.mxu0 %v5966_v8  ;;  %v6016_v8 = vld [vmem:[%s5168_s11 + $0x274] ss:$24 sps:$4 sm:$0xff]  }
 0x238   : > { %3006 = vmatprep.subr.bf16.mxu0 %v5978_v4  ;;  %v6013_v4 = vld [vmem:[%s5168_s11 + $0x24c] ss:$24 sps:$4 sm:$0xff]   ;;  %2971 = vmatprep.subr.bf16.mxu1 %v6016_v8 }
 0x239   : > { %6529 = vst [vmem:[#allocation43_spill] sm:$0xff] %v6013_v4 }
 0x23b   : > { %3007 = vmatpush1.bf16.msra.mxu0 %v5982_v52  ;;  %v6010_v52 = vld [vmem:[%s5168_s11 + $0x248] ss:$24 sps:$4 sm:$0xff]  }
 0x23c   : > { %3008 = vmatprep.subr.bf16.mxu0 %v5994_v42  ;;  %6528 = vst [vmem:[#allocation42_spill] sm:$0xff] %v6010_v52  ;;  %v6025_v42 = vld [vmem:[%s5168_s11 + $0x270] ss:$24 sps:$4 sm:$0xff]  }
 0x23d   : > { %2972 = vmatpush1.bf16.msra.mxu1 %v6025_v42 }
 0x23e   : > { %2973 = vmatprep.subr.bf16.mxu1 %v6033_v7 }
 0x23f   : > { %3009 = vmatpush1.bf16.msra.mxu0 %v5998_v33  ;;  %v6030_v33 = vld [vmem:[%s5168_s11 + $0x278] ss:$24 sps:$4 sm:$0xff]  }
 0x240   : > { %3010 = vmatprep.subr.bf16.mxu0 %v6013_v4  ;;  %6531 = vst [vmem:[#allocation45_spill] sm:$0xff] %v6030_v33  ;;  %v6041_v4 = vld [vmem:[%s5168_s11 + $0x2a0] ss:$24 sps:$4 sm:$0xff]  }
 0x241   : > { %2974 = vmatpush1.bf16.msra.mxu1 %v6041_v4 }
 0x242   : > { %2975 = vmatprep.subr.bf16.mxu1 %v6049_v53 }
 0x243   : > { %3011 = vmatpush1.bf16.msra.mxu0 %v6010_v52  ;;  %v6046_v52 = vld [vmem:[%s5168_s11 + $0x2a8] ss:$24 sps:$4 sm:$0xff]  }
 0x244   : > { %3012 = vmatprep.subr.bf16.mxu0 %v6020_v15  ;;  %6533 = vst [vmem:[#allocation47_spill] sm:$0xff] %v6046_v52  ;;  %v6057_v15 = vld [vmem:[%s5168_s11 + $0x2d0] ss:$24 sps:$4 sm:$0xff]  }
 0x245   : > { %2976 = vmatpush1.bf16.msra.mxu1 %v6057_v15 }
 0x247   : > { %3013 = vmatpush1.bf16.msra.mxu0 %v6030_v33  ;;  %v6068_v33 = vld [vmem:[%s5168_s11 + $0x14] ss:$24 sps:$4 sm:$0xff]  }
 0x248   : > { %3014 = vmatprep.subr.bf16.mxu0 %v6037_v11  ;;  %3027 = vmatprep.subr.bf16.mxu1 %v6068_v33 }
 0x24b   : > { %3015 = vmatpush1.bf16.msra.mxu0 %v6046_v52 }
 0x24c   : > { %3016 = vmatprep.subr.bf16.mxu0 %v6053_v51 }
 0x24f   : > { %3017 = vmatpush1.bf16.msra.mxu0 %v6062_v30 }
 0x250   : > { %3696 = vmatprep.subr.bf16.mxu0 %v5815_v57 }
 0x2a5   : > { %v2224_v11 = vpop.f32.mrb[20].mxu0  ;;  %v2265_v27 = vpop.f32.mrb[16].mxu1 }
 0x2a6   : > { %v2225_v52 = vadd.f32 %v2224_v11, %v5735_v37  ;;  %v2226_v20 = vpop.f32.mrb[21].mxu0  ;;  %v2267_v32 = vpop.f32.mrb[17].mxu1 }
 0x2a7   : > { %v2227_v9 = vadd.f32 %v2226_v20, %v5737_v40  ;;  %v2268_v51 = vadd.f32 %v2267_v32, %v5747_v24  ;;  %v2228_v35 = vpop.f32.mrb[22].mxu0  ;;  %v2269_v10 = vpop.f32.mrb[18].mxu1 }
 0x2a8   : > { %v2321_v30 = vadd.f32 %v2225_v52, %v5692_v31  ;;  %v2229_v56 = vpop.f32.mrb[23].mxu0  ;;  %v2270_v49 = vpop.f32.mrb[19].mxu1  ;;  %v2266_v10 = vadd.f32 %v2265_v27, %v5743_v0 }
 0x2a9   : > { %v2328_v57 = vadd.f32 %v2227_v9, %v5696_v34  ;;  %v2342_v45 = vadd.f32 %v2268_v51, %v5704_v50 }
 0x2aa   : > { %v4239_v41 = vmul.f32 -1.442695, %v2321_v30 }
 0x2ab   : > { %v4240_v36 = vmul.f32 -1.442695, %v2328_v57  ;;  %v4241_v34 = vmul.f32 -1.442695, %v2342_v45 }
 0x2ac   : > { %4879 = vpow2.f32 %v4239_v41 }
 0x2ad   : > { %4881 = vpow2.f32 %v4240_v36 }
 0x2b6   : > { %v4880_v11 = vpop.eup %4879 }
 0x2b7   : > { %v2325_v37 = vadd.f32 1.0, %v4880_v11  ;;  %v4882_v20 = vpop.eup %4881 }
 0x2b8   : > { %v2332_v40 = vadd.f32 1.0, %v4882_v20 }
 0x2b9   : > { %4883 = vrcp.f32 %v2325_v37 }
 0x2ba   : > { %4885 = vrcp.f32 %v2332_v40 }
 0x2c3   : > { %v4884_v35 = vpop.eup %4883 }
 0x2c4   : > { %v2335_v31 = vmul.f32 %v4884_v35, %v2266_v10  ;;  %v4886_v50 = vpop.eup %4885 }
 0x2c5   : > { %v2338_v41 = vsub.f32 1.0, %v4886_v50  ;;  %v2340_v56 = vmul.f32 %v4886_v50, %v5758_v12 }
 0x2c6   : > { %v2336_v52 = vadd.f32 %v2335_v31, %v5690_v29 }
 0x2c8   : > { %4887 = vtanh.f32 %v2336_v52 }
 0x2c9   : > { %4889 = vpow2.f32 %v4241_v34 }
 0x2d2   : > { %v4888_v49 = vpop.eup %4887 }
 0x2d3   : > { %v2339_v36 = vmul.f32 %v4888_v49, %v2338_v41  ;;  %v4890_v9 = vpop.eup %4889 }
 0x2d4   : > { %v2346_v32 = vadd.f32 1.0, %v4890_v9  ;;  %v6104_v9 = vld [vmem:[%s5168_s11 + $0x44] ss:$24 sps:$4 sm:$0xff]  }
 0x2d5   : > { %v6081_v37 = vadd.f32 %v2340_v56, %v2339_v36  ;;  %v6097_v36 = vld [vmem:[%s5168_s11 + $0x10] ss:$24 sps:$4 sm:$0xff]  }
 0x2d6   : > { %4891 = vrcp.f32 %v2346_v32  ;;  %v6114_v32 = vld [vmem:[%s5168_s11 + $0x74] ss:$24 sps:$4 sm:$0xff]  }
 0x2d7   : > { %4243 = vst [vmem:[%s5756_s13 + $0x10] sm:$0xff] %v6081_v37  ;;  %v6101_v56 = vpack.c.bf16 %v6081_v37, %v6081_v37 }
 0x2e0   : > { %v4892_v51 = vpop.eup %4891 }
 0x2e5   : > { %v2306_v27 = vpop.f32.mrb[24].mxu0 }
 0x2e6   : > { %v2307_v40 = vadd.f32 %v2306_v27, %v5764_v21  ;;  %v2308_v29 = vpop.f32.mrb[25].mxu0  ;;  %v6120_v27 = vld [vmem:[%s5168_s11 + $0x70] ss:$24 sps:$4 sm:$0xff]  }
 0x2e7   : > { %v2309_v45 = vadd.f32 %v2308_v29, %v5768_v13  ;;  %v2310_v30 = vpop.f32.mrb[26].mxu0  ;;  %v6230_v29 = vld [vmem:[%s5168_s11 + $0x280] ss:$24 sps:$4 sm:$0xff]  }
 0x2e8   : > { %v2349_v57 = vadd.f32 %v2307_v40, %v5726_v22  ;;  %v2311_v11 = vpop.f32.mrb[27].mxu0  ;;  %v6124_v40 = vld [vmem:[%s5168_s11 + $0xa4] ss:$24 sps:$4 sm:$0xff]   ;;  %v6547_v30 = vld [vmem:[#allocation24_spill] sm:$0xff] }
 0x2e9   : > { %v2356_v12 = vmul.f32 %v4892_v51, %v2309_v45  ;;  %v6545_v45 = vld [vmem:[#allocation22_spill] sm:$0xff]  ;;  %v6548_v51 = vld [vmem:[#allocation25_spill] sm:$0xff]  ;;  %v6550_v11 = vld [vmem:[#allocation27_spill] sm:$0xff] }
 0x2ea   : > { %v4242_v20 = vmul.f32 -1.442695, %v2349_v57  ;;  %v6549_v57 = vld [vmem:[#allocation26_spill] sm:$0xff] }
 0x2eb   : > { %v2357_v10 = vadd.f32 %v2356_v12, %v5728_v26  ;;  %v6551_v12 = vld [vmem:[#allocation28_spill] sm:$0xff] }
 0x2ec   : > { %4893 = vpow2.f32 %v4242_v20  ;;  %v6552_v20 = vld [vmem:[#allocation36_spill] sm:$0xff] }
 0x2f6   : > { %v4894_v35 = vpop.eup %4893 }
 0x2f7   : > { %v2353_v31 = vadd.f32 1.0, %v4894_v35  ;;  %v6554_v35 = vld [vmem:[#allocation38_spill] sm:$0xff] }
 0x2f9   : > { %4895 = vrcp.f32 %v2353_v31  ;;  %v6555_v31 = vld [vmem:[#allocation39_spill] sm:$0xff] }
 0x2fa   : > { %4897 = vtanh.f32 %v2357_v10  ;;  %v6553_v10 = vld [vmem:[#allocation37_spill] sm:$0xff] }
 0x303   : > { %v4896_v52 = vpop.eup %4895 }
 0x304   : > { %v2359_v34 = vsub.f32 1.0, %v4896_v52  ;;  %v4898_v50 = vpop.eup %4897  ;;  %v2361_v22 = vmul.f32 %v4896_v52, %v5772_v16  ;;  %v6110_v16 = vld [vmem:[%s5168_s11 + $0x40] ss:$24 sps:$4 sm:$0xff]   ;;  %v6556_v52 = vld [vmem:[#allocation40_spill] sm:$0xff] }
 0x306   : > { %v2360_v41 = vmul.f32 %v4898_v50, %v2359_v34  ;;  %v6557_v34 = vld [vmem:[#allocation41_spill] sm:$0xff]  ;;  %v6558_v50 = vld [vmem:[#allocation43_spill] sm:$0xff] }
 0x308   : > { %v6090_v49 = vadd.f32 %v2361_v22, %v2360_v41  ;;  %v6559_v41 = vld [vmem:[#allocation42_spill] sm:$0xff]  ;;  %v6560_v22 = vld [vmem:[#allocation44_spill] sm:$0xff] }
 0x30a   : > { %4244 = vst [vmem:[%s5756_s13 + $0x28] sm:$0xff] %v6090_v49  ;;  %v2368_v26 = vpack.c.bf16 %v6090_v49, %v6090_v49 }
 0x30c   : > { %2977 = vmatprep.mubr.bf16.mxu1 %v2368_v26  ;;  %3018 = vmatprep.mubr.bf16.mxu0 %v2368_v26 }
 0x30d   : > { %2978 = vmatmul.mubr.bf16.vlgmr.msra.gmra.mrb[20].mxu1 %v6101_v56  ;;  %3019 = vmatmul.mubr.bf16.vlgmr.msra.gmra.mrb[28].mxu0 %v6101_v56 }
 0x30e   : > { %3028 = vmatpush1.bf16.msra.mxu1 %v6097_v36  ;;  %3059 = vmatprep.mubr.bf16.mxu1 %v2368_v26  ;;  %v6561_v26 = vld [vmem:[#allocation45_spill] sm:$0xff] }
 0x30f   : > { %3029 = vmatprep.subr.bf16.mxu1 %v6104_v9  ;;  %3697 = vmatpush1.bf16.msra.mxu0 %v5812_v55  ;;  %v6130_v55 = vld [vmem:[%s5168_s11 + $0xa0] ss:$24 sps:$4 sm:$0xff]  }
 0x310   : > { %3698 = vmatprep.subr.bf16.mxu0 %v5824_v6  ;;  %v6134_v6 = vld [vmem:[%s5168_s11 + $0xd4] ss:$24 sps:$4 sm:$0xff]  }
 0x312   : > { %3030 = vmatpush1.bf16.msra.mxu1 %v6110_v16 }
 0x313   : > { %3031 = vmatprep.subr.bf16.mxu1 %v6114_v32  ;;  %3699 = vmatpush1.bf16.msra.mxu0 %v5833_v39  ;;  %v6140_v39 = vld [vmem:[%s5168_s11 + $0xd0] ss:$24 sps:$4 sm:$0xff]  }
 0x314   : > { %3700 = vmatprep.subr.bf16.mxu0 %v5841_v43  ;;  %v6144_v43 = vld [vmem:[%s5168_s11 + $0x104] ss:$24 sps:$4 sm:$0xff]  }
 0x316   : > { %3032 = vmatpush1.bf16.msra.mxu1 %v6120_v27 }
 0x317   : > { %3033 = vmatprep.subr.bf16.mxu1 %v6124_v40  ;;  %3701 = vmatpush1.bf16.msra.mxu0 %v5849_v47  ;;  %v6150_v47 = vld [vmem:[%s5168_s11 + $0x100] ss:$24 sps:$4 sm:$0xff]  }
 0x318   : > { %3702 = vmatprep.subr.bf16.mxu0 %v5857_v54  ;;  %v6154_v54 = vld [vmem:[%s5168_s11 + $0x134] ss:$24 sps:$4 sm:$0xff]  }
 0x31a   : > { %3034 = vmatpush1.bf16.msra.mxu1 %v6130_v55 }
 0x31b   : > { %3035 = vmatprep.subr.bf16.mxu1 %v6134_v6  ;;  %3703 = vmatpush1.bf16.msra.mxu0 %v5865_v58  ;;  %v6160_v58 = vld [vmem:[%s5168_s11 + $0x130] ss:$24 sps:$4 sm:$0xff]  }
 0x31c   : > { %3704 = vmatprep.subr.bf16.mxu0 %v5873_v1  ;;  %v6164_v1 = vld [vmem:[%s5168_s11 + $0x164] ss:$24 sps:$4 sm:$0xff]  }
 0x31e   : > { %3036 = vmatpush1.bf16.msra.mxu1 %v6140_v39 }
 0x31f   : > { %3037 = vmatprep.subr.bf16.mxu1 %v6144_v43  ;;  %3705 = vmatpush1.bf16.msra.mxu0 %v5881_v5  ;;  %v6170_v5 = vld [vmem:[%s5168_s11 + $0x160] ss:$24 sps:$4 sm:$0xff]  }
 0x320   : > { %3706 = vmatprep.subr.bf16.mxu0 %v5889_v28  ;;  %v6174_v28 = vld [vmem:[%s5168_s11 + $0x194] ss:$24 sps:$4 sm:$0xff]  }
 0x322   : > { %3038 = vmatpush1.bf16.msra.mxu1 %v6150_v47 }
 0x323   : > { %3039 = vmatprep.subr.bf16.mxu1 %v6154_v54  ;;  %3707 = vmatpush1.bf16.msra.mxu0 %v5897_v17  ;;  %v6180_v17 = vld [vmem:[%s5168_s11 + $0x190] ss:$24 sps:$4 sm:$0xff]  }
 0x324   : > { %3708 = vmatprep.subr.bf16.mxu0 %v5905_v60  ;;  %v6184_v60 = vld [vmem:[%s5168_s11 + $0x1c4] ss:$24 sps:$4 sm:$0xff]  }
 0x326   : > { %3040 = vmatpush1.bf16.msra.mxu1 %v6160_v58 }
 0x327   : > { %3041 = vmatprep.subr.bf16.mxu1 %v6164_v1  ;;  %3709 = vmatpush1.bf16.msra.mxu0 %v5910_v23  ;;  %v6190_v23 = vld [vmem:[%s5168_s11 + $0x1c0] ss:$24 sps:$4 sm:$0xff]  }
 0x328   : > { %3710 = vmatprep.subr.bf16.mxu0 %v5924_v44  ;;  %v6194_v44 = vld [vmem:[%s5168_s11 + $0x1f4] ss:$24 sps:$4 sm:$0xff]  }
 0x32a   : > { %3042 = vmatpush1.bf16.msra.mxu1 %v6170_v5 }
 0x32b   : > { %3043 = vmatprep.subr.bf16.mxu1 %v6174_v28  ;;  %3711 = vmatpush1.bf16.msra.mxu0 %v5927_v48  ;;  %v6200_v48 = vld [vmem:[%s5168_s11 + $0x1f0] ss:$24 sps:$4 sm:$0xff]  }
 0x32c   : > { %3712 = vmatprep.subr.bf16.mxu0 %v5940_v2  ;;  %v6204_v2 = vld [vmem:[%s5168_s11 + $0x224] ss:$24 sps:$4 sm:$0xff]  }
 0x32e   : > { %3044 = vmatpush1.bf16.msra.mxu1 %v6180_v17 }
 0x32f   : > { %3045 = vmatprep.subr.bf16.mxu1 %v6184_v60  ;;  %3713 = vmatpush1.bf16.msra.mxu0 %v5943_v3  ;;  %v6210_v3 = vld [vmem:[%s5168_s11 + $0x220] ss:$24 sps:$4 sm:$0xff]  }
 0x330   : > { %3714 = vmatprep.subr.bf16.mxu0 %v5956_v62  ;;  %v6214_v62 = vld [vmem:[%s5168_s11 + $0x254] ss:$24 sps:$4 sm:$0xff]  }
 0x332   : > { %3046 = vmatpush1.bf16.msra.mxu1 %v6190_v23 }
 0x333   : > { %3047 = vmatprep.subr.bf16.mxu1 %v6194_v44  ;;  %3715 = vmatpush1.bf16.msra.mxu0 %v5959_v14  ;;  %v6220_v14 = vld [vmem:[%s5168_s11 + $0x250] ss:$24 sps:$4 sm:$0xff]  }
 0x334   : > { %3716 = vmatprep.subr.bf16.mxu0 %v5972_v59  ;;  %v6224_v59 = vld [vmem:[%s5168_s11 + $0x284] ss:$24 sps:$4 sm:$0xff]  }
 0x336   : > { %3048 = vmatpush1.bf16.msra.mxu1 %v6200_v48 }
 0x337   : > { %3049 = vmatprep.subr.bf16.mxu1 %v6204_v2  ;;  %3717 = vmatpush1.bf16.msra.mxu0 %v5975_v25  ;;  %v6234_v25 = vld [vmem:[%s5168_s11 + $0x2b4] ss:$24 sps:$4 sm:$0xff]  }
 0x338   : > { %3718 = vmatprep.subr.bf16.mxu0 %v5988_v19  ;;  %v6240_v19 = vld [vmem:[%s5168_s11 + $0x2b0] ss:$24 sps:$4 sm:$0xff]  }
 0x33a   : > { %3050 = vmatpush1.bf16.msra.mxu1 %v6210_v3 }
 0x33b   : > { %3051 = vmatprep.subr.bf16.mxu1 %v6214_v62  ;;  %3719 = vmatpush1.bf16.msra.mxu0 %v5991_v18  ;;  %v6244_v18 = vld [vmem:[%s5168_s11 + $0x2e4] ss:$24 sps:$4 sm:$0xff]  }
 0x33c   : > { %3720 = vmatprep.subr.bf16.mxu0 %v6006_v38  ;;  %v6250_v38 = vld [vmem:[%s5168_s11 + $0x2e0] ss:$24 sps:$4 sm:$0xff]  }
 0x33e   : > { %3052 = vmatpush1.bf16.msra.mxu1 %v6220_v14 }
 0x33f   : > { %3053 = vmatprep.subr.bf16.mxu1 %v6224_v59  ;;  %3721 = vmatpush1.bf16.msra.mxu0 %v6003_v46  ;;  %v6537_v46 = vld [vmem:[#allocation7_spill] sm:$0xff] }
 0x340   : > { %3722 = vmatprep.subr.bf16.mxu0 %v6016_v8  ;;  %v6538_v8 = vld [vmem:[#allocation9_spill] sm:$0xff] }
 0x342   : > { %3054 = vmatpush1.bf16.msra.mxu1 %v6230_v29 }
 0x343   : > { %3055 = vmatprep.subr.bf16.mxu1 %v6234_v25  ;;  %3723 = vmatpush1.bf16.msra.mxu0 %v6025_v42  ;;  %v6536_v42 = vld [vmem:[#allocation6_spill] sm:$0xff] }
 0x344   : > { %3724 = vmatprep.subr.bf16.mxu0 %v6033_v7  ;;  %v6541_v7 = vld [vmem:[#allocation15_spill] sm:$0xff] }
 0x346   : > { %3056 = vmatpush1.bf16.msra.mxu1 %v6240_v19 }
 0x347   : > { %3057 = vmatprep.subr.bf16.mxu1 %v6244_v18  ;;  %3725 = vmatpush1.bf16.msra.mxu0 %v6041_v4  ;;  %v6539_v4 = vld [vmem:[#allocation11_spill] sm:$0xff] }
 0x348   : > { %3726 = vmatprep.subr.bf16.mxu0 %v6049_v53  ;;  %v6540_v53 = vld [vmem:[#allocation13_spill] sm:$0xff] }
 0x34a   : > { %3058 = vmatpush1.bf16.msra.mxu1 %v6250_v38 }
 0x34b   : > { %3737 = vmatprep.subr.bf16.mxu1 %v5821_v63  ;;  %3727 = vmatpush1.bf16.msra.mxu0 %v6057_v15  ;;  %v6542_v63 = vld [vmem:[#allocation17_spill] sm:$0xff]  ;;  %v6543_v15 = vld [vmem:[#allocation19_spill] sm:$0xff] }
 0x34c   : > { %3778 = vmatprep.subr.bf16.mxu0 %v6068_v33  ;;  %v6544_v33 = vld [vmem:[#allocation20_spill] sm:$0xff] }
 0x34d   : > { %3060 = vmatmul.mubr.bf16.vlgmr.msra.gmra.mrb[24].mxu1 %v6101_v56  ;;  %v6562_v56 = vld [vmem:[#allocation46_spill] sm:$0xff] }
 0x34e   : > { %3738 = vmatpush1.bf16.msra.mxu1 %v5818_v61  ;;  %v6546_v61 = vld [vmem:[#allocation23_spill] sm:$0xff] }
 0x34f   : > { %3739 = vmatprep.subr.bf16.mxu1 %v6536_v42  ;;  %v6563_v42 = vld [vmem:[#allocation47_spill] sm:$0xff] }
 0x352   : > { %3740 = vmatpush1.bf16.msra.mxu1 %v6537_v46  ;;  %v6564_v46 = vld [vmem:[#allocation48_spill] sm:$0xff] }
 0x353   : > { %3741 = vmatprep.subr.bf16.mxu1 %v6538_v8  ;;  %v6565_v8 = vld [vmem:[#allocation49_spill] sm:$0xff] }
 0x356   : > { %3742 = vmatpush1.bf16.msra.mxu1 %v6539_v4 }
 0x357   : > { %3743 = vmatprep.subr.bf16.mxu1 %v6540_v53 }
 0x35a   : > { %3744 = vmatpush1.bf16.msra.mxu1 %v6541_v7  ;;  %v6566_v7 = vld [vmem:[#allocation34_spill] sm:$0xff] }
 0x35b   : > { %3745 = vmatprep.subr.bf16.mxu1 %v6542_v63 }
 0x35e   : > { %3746 = vmatpush1.bf16.msra.mxu1 %v6543_v15 }
 0x35f   : > { %3747 = vmatprep.subr.bf16.mxu1 %v6544_v33 }
 0x362   : > { %3748 = vmatpush1.bf16.msra.mxu1 %v6545_v45  ;;  %v6567_v45 = vld [vmem:[#allocation35_spill] sm:$0xff] }
 0x363   : > { %3749 = vmatprep.subr.bf16.mxu1 %v6546_v61 }
 0x366   : > { %3750 = vmatpush1.bf16.msra.mxu1 %v6547_v30 }
 0x367   : > { %3751 = vmatprep.subr.bf16.mxu1 %v6548_v51 }
 0x36a   : > { %3752 = vmatpush1.bf16.msra.mxu1 %v6549_v57 }
 0x36b   : > { %3753 = vmatprep.subr.bf16.mxu1 %v6550_v11  ;;  %v6568_v11 = vld [vmem:[#allocation12_spill] sm:$0xff] }
 0x36e   : > { %3754 = vmatpush1.bf16.msra.mxu1 %v6551_v12 }
 0x36f   : > { %3755 = vmatprep.subr.bf16.mxu1 %v6552_v20 }
 0x372   : > { %3756 = vmatpush1.bf16.msra.mxu1 %v6553_v10 }
 0x373   : > { %3757 = vmatprep.subr.bf16.mxu1 %v6554_v35  ;;  %v6569_v35 = vld [vmem:[#allocation16_spill] sm:$0xff] }
 0x376   : > { %3758 = vmatpush1.bf16.msra.mxu1 %v6555_v31 }
 0x377   : > { %3759 = vmatprep.subr.bf16.mxu1 %v6556_v52  ;;  %v6570_v52 = vld [vmem:[#allocation10_spill] sm:$0xff] }
 0x37a   : > { %3760 = vmatpush1.bf16.msra.mxu1 %v6557_v34 }
 0x37b   : > { %3761 = vmatprep.subr.bf16.mxu1 %v6558_v50 }
 0x37e   : > { %3762 = vmatpush1.bf16.msra.mxu1 %v6559_v41 }
 0x37f   : > { %3763 = vmatprep.subr.bf16.mxu1 %v6560_v22 }
 0x382   : > { %3764 = vmatpush1.bf16.msra.mxu1 %v6561_v26 }
 0x383   : > { %3765 = vmatprep.subr.bf16.mxu1 %v6562_v56 }
 0x386   : > { %3766 = vmatpush1.bf16.msra.mxu1 %v6563_v42 }
 0x387   : > { %3767 = vmatprep.subr.bf16.mxu1 %v6564_v46 }
 0x38a   : > { %3768 = vmatpush1.bf16.msra.mxu1 %v6565_v8 }
 0x3e0   : > { %v2979_v4 = vpop.f32.mrb[20].mxu1  ;;  %v3020_v53 = vpop.f32.mrb[28].mxu0 }
 0x3e1   : > { %v2980_v63 = vadd.f32 %v2979_v4, %v6566_v7  ;;  %v2981_v15 = vpop.f32.mrb[21].mxu1  ;;  %v3022_v33 = vpop.f32.mrb[29].mxu0  ;;  %v3021_v46 = vadd.f32 %v3020_v53, %v5743_v0 }
 0x3e2   : > { %v2982_v61 = vadd.f32 %v2981_v15, %v6567_v45  ;;  %v3023_v30 = vadd.f32 %v3022_v33, %v5747_v24  ;;  %v2983_v51 = vpop.f32.mrb[22].mxu1  ;;  %v3024_v57 = vpop.f32.mrb[30].mxu0 }
 0x3e3   : > { %v3074_v12 = vadd.f32 %v2980_v63, %v6568_v11  ;;  %v2984_v20 = vpop.f32.mrb[23].mxu1  ;;  %v3025_v10 = vpop.f32.mrb[31].mxu0  ;;  %v6571_v63 = vld [vmem:[#allocation14_spill] sm:$0xff] }
 0x3e4   : > { %v3081_v31 = vadd.f32 %v2982_v61, %v6569_v35  ;;  %v3095_v34 = vadd.f32 %v3023_v30, %v6570_v52 }
 0x3e5   : > { %v4341_v50 = vmul.f32 -1.442695, %v3074_v12 }
 0x3e6   : > { %v4342_v41 = vmul.f32 -1.442695, %v3081_v31  ;;  %v4343_v33 = vmul.f32 -1.442695, %v3095_v34 }
 0x3e7   : > { %4899 = vpow2.f32 %v4341_v50 }
 0x3e8   : > { %4901 = vpow2.f32 %v4342_v41  ;;  %v6572_v41 = vld [vmem:[#allocation32_spill] sm:$0xff] }
 0x3f1   : > { %v4900_v22 = vpop.eup %4899 }
 0x3f2   : > { %v3078_v26 = vadd.f32 1.0, %v4900_v22  ;;  %v4902_v56 = vpop.eup %4901 }
 0x3f3   : > { %v3085_v42 = vadd.f32 1.0, %v4902_v56 }
 0x3f4   : > { %4903 = vrcp.f32 %v3078_v26 }
 0x3f5   : > { %4905 = vrcp.f32 %v3085_v42  ;;  %v6573_v42 = vld [vmem:[#allocation33_spill] sm:$0xff] }
 0x3fe   : > { %v4904_v8 = vpop.eup %4903 }
 0x3ff   : > { %v3088_v4 = vmul.f32 %v4904_v8, %v3021_v46  ;;  %v4906_v61 = vpop.eup %4905 }
 0x400   : > { %v3091_v30 = vsub.f32 1.0, %v4906_v61  ;;  %v3093_v11 = vmul.f32 %v4906_v61, %v6081_v37 }
 0x401   : > { %v3089_v15 = vadd.f32 %v3088_v4, %v6571_v63 }
 0x403   : > { %4907 = vtanh.f32 %v3089_v15 }
 0x404   : > { %4909 = vpow2.f32 %v4343_v33 }
 0x40d   : > { %v4908_v51 = vpop.eup %4907 }
 0x40e   : > { %v3092_v57 = vmul.f32 %v4908_v51, %v3091_v30  ;;  %v4910_v20 = vpop.eup %4909 }
 0x40f   : > { %v3099_v53 = vadd.f32 1.0, %v4910_v20 }
 0x410   : > { %v6300_v12 = vadd.f32 %v3093_v11, %v3092_v57 }
 0x411   : > { %4911 = vrcp.f32 %v3099_v53 }
 0x412   : > { %4345 = vst [vmem:[%s5756_s13 + $0x20] sm:$0xff] %v6300_v12  ;;  %v3118_v11 = vpack.c.bf16 %v6300_v12, %v6300_v12 }
 0x41b   : > { %v4912_v50 = vpop.eup %4911 }
 0x420   : > { %v3061_v10 = vpop.f32.mrb[24].mxu1 }
 0x421   : > { %v3062_v35 = vadd.f32 %v3061_v10, %v5764_v21  ;;  %v3063_v31 = vpop.f32.mrb[25].mxu1 }
 0x422   : > { %v3064_v52 = vadd.f32 %v3063_v31, %v5768_v13  ;;  %v3065_v34 = vpop.f32.mrb[26].mxu1 }
 0x423   : > { %v3102_v22 = vadd.f32 %v3062_v35, %v6572_v41  ;;  %v3066_v26 = vpop.f32.mrb[27].mxu1 }
 0x424   : > { %v3109_v37 = vmul.f32 %v4912_v50, %v3064_v52  ;;  %v6578_v50 = vld [vmem:[#allocation30_spill] sm:$0xff] }
 0x425   : > { %v4344_v56 = vmul.f32 -1.442695, %v3102_v22 }
 0x426   : > { %v3110_v46 = vadd.f32 %v3109_v37, %v6573_v42 }
 0x427   : > { %4913 = vpow2.f32 %v4344_v56 }
 0x431   : > { %v4914_v8 = vpop.eup %4913 }
 0x432   : > { %v3106_v4 = vadd.f32 1.0, %v4914_v8 }
 0x434   : > { %4915 = vrcp.f32 %v3106_v4 }
 0x435   : > { %4917 = vtanh.f32 %v3110_v46 }
 0x43e   : > { %v4916_v63 = vpop.eup %4915 }
 0x43f   : > { %v3112_v15 = vsub.f32 1.0, %v4916_v63  ;;  %v4918_v33 = vpop.eup %4917  ;;  %v3114_v30 = vmul.f32 %v4916_v63, %v6090_v49 }
 0x441   : > { %v3113_v61 = vmul.f32 %v4918_v33, %v3112_v15 }
 0x443   : > { %v6309_v51 = vadd.f32 %v3114_v30, %v3113_v61 }
 0x445   : > { %4346 = vst [vmem:[%s5756_s13 + $0x18] sm:$0xff] %v6309_v51  ;;  %v3119_v57 = vpack.c.bf16 %v6309_v51, %v6309_v51 }
 0x447   : > { %3728 = vmatprep.mubr.bf16.mxu0 %v3119_v57  ;;  %3769 = vmatprep.mubr.bf16.mxu1 %v3119_v57 }
 0x448   : > { %3729 = vmatmul.mubr.bf16.vlgmr.msra.gmra.mrb[32].mxu0 %v3118_v11  ;;  %3770 = vmatmul.mubr.bf16.vlgmr.msra.gmra.mrb[28].mxu1 %v3118_v11 }
 0x449   : > { %3779 = vmatpush1.bf16.msra.mxu0 %v6097_v36  ;;  %3810 = vmatprep.mubr.bf16.mxu0 %v3119_v57 }
 0x44a   : > { %3780 = vmatprep.subr.bf16.mxu0 %v6104_v9 }
 0x44d   : > { %3781 = vmatpush1.bf16.msra.mxu0 %v6110_v16 }
 0x44e   : > { %3782 = vmatprep.subr.bf16.mxu0 %v6114_v32 }
 0x451   : > { %3783 = vmatpush1.bf16.msra.mxu0 %v6120_v27 }
 0x452   : > { %3784 = vmatprep.subr.bf16.mxu0 %v6124_v40 }
 0x455   : > { %3785 = vmatpush1.bf16.msra.mxu0 %v6130_v55 }
 0x456   : > { %3786 = vmatprep.subr.bf16.mxu0 %v6134_v6 }
 0x459   : > { %3787 = vmatpush1.bf16.msra.mxu0 %v6140_v39  ;;  %v6574_v39 = vld [vmem:[#allocation18_spill] sm:$0xff] }
 0x45a   : > { %3788 = vmatprep.subr.bf16.mxu0 %v6144_v43 }
 0x45d   : > { %3789 = vmatpush1.bf16.msra.mxu0 %v6150_v47 }
 0x45e   : > { %3790 = vmatprep.subr.bf16.mxu0 %v6154_v54 }
 0x461   : > { %3791 = vmatpush1.bf16.msra.mxu0 %v6160_v58  ;;  %v6575_v58 = vld [vmem:[#allocation29_spill] sm:$0xff] }
 0x462   : > { %3792 = vmatprep.subr.bf16.mxu0 %v6164_v1 }
 0x465   : > { %3793 = vmatpush1.bf16.msra.mxu0 %v6170_v5  ;;  %v6576_v5 = vld [vmem:[#allocation8_spill] sm:$0xff] }
 0x466   : > { %3794 = vmatprep.subr.bf16.mxu0 %v6174_v28 }
 0x469   : > { %3795 = vmatpush1.bf16.msra.mxu0 %v6180_v17 }
 0x46a   : > { %3796 = vmatprep.subr.bf16.mxu0 %v6184_v60 }
 0x46d   : > { %3797 = vmatpush1.bf16.msra.mxu0 %v6190_v23 }
 0x46e   : > { %3798 = vmatprep.subr.bf16.mxu0 %v6194_v44 }
 0x471   : > { %3799 = vmatpush1.bf16.msra.mxu0 %v6200_v48 }
 0x472   : > { %3800 = vmatprep.subr.bf16.mxu0 %v6204_v2 }
 0x475   : > { %3801 = vmatpush1.bf16.msra.mxu0 %v6210_v3 }
 0x476   : > { %3802 = vmatprep.subr.bf16.mxu0 %v6214_v62 }
 0x479   : > { %3803 = vmatpush1.bf16.msra.mxu0 %v6220_v14  ;;  %v6577_v14 = vld [vmem:[#allocation21_spill] sm:$0xff] }
 0x47a   : > { %3804 = vmatprep.subr.bf16.mxu0 %v6224_v59 }
 0x47d   : > { %3805 = vmatpush1.bf16.msra.mxu0 %v6230_v29 }
 0x47e   : > { %3806 = vmatprep.subr.bf16.mxu0 %v6234_v25 }
 0x481   : > { %3807 = vmatpush1.bf16.msra.mxu0 %v6240_v19 }
 0x482   : > { %3808 = vmatprep.subr.bf16.mxu0 %v6244_v18 }
 0x485   : > { %3809 = vmatpush1.bf16.msra.mxu0 %v6250_v38 }
 0x488   : > { %3811 = vmatmul.mubr.bf16.vlgmr.msra.gmra.mrb[36].mxu0 %v3118_v11 }
 0x51b   : > { %v3730_v49 = vpop.f32.mrb[32].mxu0  ;;  %v3771_v36 = vpop.f32.mrb[28].mxu1 }
 0x51c   : > { %v3731_v9 = vadd.f32 %v3730_v49, %v6566_v7  ;;  %v3732_v16 = vpop.f32.mrb[33].mxu0  ;;  %v3773_v32 = vpop.f32.mrb[29].mxu1 }
 0x51d   : > { %v3733_v27 = vadd.f32 %v3732_v16, %v6567_v45  ;;  %v3774_v40 = vadd.f32 %v3773_v32, %v5747_v24  ;;  %v3734_v55 = vpop.f32.mrb[34].mxu0  ;;  %v3775_v6 = vpop.f32.mrb[30].mxu1  ;;  %v3772_v24 = vadd.f32 %v3771_v36, %v5743_v0 }
 0x51e   : > { %v3825_v43 = vadd.f32 %v3731_v9, %v6574_v39  ;;  %v3735_v47 = vpop.f32.mrb[35].mxu0  ;;  %v3776_v54 = vpop.f32.mrb[31].mxu1 }
 0x51f   : > { %v3832_v1 = vadd.f32 %v3733_v27, %v6575_v58  ;;  %v3846_v28 = vadd.f32 %v3774_v40, %v6576_v5 }
 0x520   : > { %v4443_v17 = vmul.f32 -1.442695, %v3825_v43 }
 0x521   : > { %v4444_v60 = vmul.f32 -1.442695, %v3832_v1  ;;  %v4445_v29 = vmul.f32 -1.442695, %v3846_v28 }
 0x522   : > { %4919 = vpow2.f32 %v4443_v17 }
 0x523   : > { %4921 = vpow2.f32 %v4444_v60 }
 0x52c   : > { %v4920_v23 = vpop.eup %4919 }
 0x52d   : > { %v3829_v44 = vadd.f32 1.0, %v4920_v23  ;;  %v4922_v48 = vpop.eup %4921 }
 0x52e   : > { %v3836_v2 = vadd.f32 1.0, %v4922_v48 }
 0x52f   : > { %4923 = vrcp.f32 %v3829_v44 }
 0x530   : > { %4925 = vrcp.f32 %v3836_v2 }
 0x539   : > { %v4924_v3 = vpop.eup %4923 }
 0x53a   : > { %v3839_v62 = vmul.f32 %v4924_v3, %v3772_v24  ;;  %v4926_v25 = vpop.eup %4925 }
 0x53b   : > { %v3842_v19 = vsub.f32 1.0, %v4926_v25  ;;  %v3844_v7 = vmul.f32 %v4926_v25, %v6300_v12  ;;  %v6579_v12 = vld [vmem:[#allocation31_spill] sm:$0xff] }
 0x53c   : > { %v3840_v59 = vadd.f32 %v3839_v62, %v6577_v14 }
 0x53e   : > { %4927 = vtanh.f32 %v3840_v59 }
 0x53f   : > { %4929 = vpow2.f32 %v4445_v29 }
 0x548   : > { %v4928_v18 = vpop.eup %4927 }
 0x549   : > { %v3843_v38 = vmul.f32 %v4928_v18, %v3842_v19  ;;  %v4930_v20 = vpop.eup %4929 }
 0x54a   : > { %v3850_v53 = vadd.f32 1.0, %v4930_v20 }
 0x54b   : > { %v3845_v45 = vadd.f32 %v3844_v7, %v3843_v38 }
 0x54c   : > { %4931 = vrcp.f32 %v3850_v53 }
 0x54d   : > { %4447 = vst [vmem:[%s5756_s13 + $0x30] sm:$0xff] %v3845_v45 }
 0x556   : > { %v4932_v34 = vpop.eup %4931 }
 0x55b   : > { %v3812_v0 = vpop.f32.mrb[36].mxu0 }
 0x55c   : > { %v3813_v10 = vadd.f32 %v3812_v0, %v5764_v21  ;;  %v3814_v35 = vpop.f32.mrb[37].mxu0 }
 0x55d   : > { %v3815_v31 = vadd.f32 %v3814_v35, %v5768_v13  ;;  %v3816_v52 = vpop.f32.mrb[38].mxu0 }
 0x55e   : > { %v3853_v41 = vadd.f32 %v3813_v10, %v6578_v50  ;;  %v3817_v22 = vpop.f32.mrb[39].mxu0 }
 0x55f   : > { %v3860_v26 = vmul.f32 %v4932_v34, %v3815_v31 }
 0x560   : > { %v4446_v37 = vmul.f32 -1.442695, %v3853_v41 }
 0x561   : > { %v3861_v56 = vadd.f32 %v3860_v26, %v6579_v12 }
 0x562   : > { %4933 = vpow2.f32 %v4446_v37 }
 0x56c   : > { %v4934_v42 = vpop.eup %4933 }
 0x56d   : > { %v3857_v46 = vadd.f32 1.0, %v4934_v42 }
 0x56f   : > { %4935 = vrcp.f32 %v3857_v46 }
 0x570   : > { %4937 = vtanh.f32 %v3861_v56 }
 0x579   : > { %v4936_v8 = vpop.eup %4935 }
 0x57a   : > { %v3863_v21 = vsub.f32 1.0, %v4936_v8  ;;  %v4938_v4 = vpop.eup %4937  ;;  %v3865_v13 = vmul.f32 %v4936_v8, %v6309_v51 }
 0x57c   : > { %v3864_v63 = vmul.f32 %v4938_v4, %v3863_v21 }
 0x57e   : > { %v3866_v15 = vadd.f32 %v3865_v13, %v3864_v63 }
 0x580   : > { %3868 = vst [vmem:[%s5756_s13 + $0x8] sm:$0xff] %v3866_v15 }
 0x581 PF: > { %p15_p8 = scmp.ge.s32.totalorder %s5061_s23, 4   ;;  %s6580_s18 = smov %s4995_s19 }
 0x582   : > { %s6581_s19 = smov %s4999_s20  ;;  %s6582_s20 = smov %s5071_s26 }
 0x583   : > { %s6583_s21 = smov %s5061_s23  ;;  %17 = sbr.rel (!%p15_p8) target bundleno = 3 (0x3), region = 98 }
 0x58a   :  { %3890 = vsyncpa [#allocation4], 1 }
 0x58b   :  { %3892 = vsyncpa [#allocation4 + $0x1], 1 }

</bundles_post_ra>
